<compile_context>
chip_gen: v7x
topology: tpu7x:2x2x1
jax: 0.10.0
libtpu: 0.0.40
codegen_flags: <defaults>
</compile_context>

<pallas_src>
import jax
import jax.numpy as jnp
from jax.experimental import pallas as pl
from jax.experimental.pallas import tpu as pltpu

# Small synthetic dims (real blair-roberta-base: H=768, NH=12, FF=3072, 12 layers).
B, S, H = 16, 16, 128        # batch, sequence length, hidden (H=128 -> lane-dense)
NH, DH = 4, 32               # heads, head dim (NH * DH == H)
FF = 256                     # feed-forward inner dim
LAYERS = 2
VOCAB = 100
EPS = 1e-5                   # RoBERTa layer_norm_eps
BS = B * S

NB = 2                       # batch groups == grid steps ("parallel" -> both v7x TCs)
BG = B // NB                 # sequences per grid step
ROWS = BG * S                # residual rows per grid step (128)


def _layernorm(x, gamma, beta):
    mu = jnp.mean(x, axis=-1, keepdims=True)
    xc = x - mu
    var = jnp.mean(xc * xc, axis=-1, keepdims=True)
    return xc * jax.lax.rsqrt(var + EPS) * gamma + beta


# ---------------------------------------------------------------------------
# Fused forward kernel (grid over batch groups; layers unrolled in-kernel)
# ---------------------------------------------------------------------------
def blair_kernel(x_ref, eg_ref, eb_ref,
                 wqkv_ref, bqkv_ref, wo_ref, bo_ref, g1_ref, be1_ref,
                 w1_ref, b1_ref, w2_ref, b2_ref, g2_ref, be2_ref,
                 out_ref, x_sc):
    # Prologue: embedding LayerNorm (runs once per batch-group grid step).
    x = _layernorm(x_ref[...], eg_ref[...], eb_ref[...])          # (ROWS, H) f32

    # All LAYERS weight stacks are VMEM-resident; static unroll keeps the residual
    # in vregs and lets the scheduler overlap adjacent layers.
    for li in range(LAYERS):
        xb = x.astype(jnp.bfloat16)

        # Fused QKV projection: one (ROWS,H)@(H,3H) matmul, bf16 in / f32 accumulate.
        qkv = jnp.dot(xb, wqkv_ref[li],
                      preferred_element_type=jnp.float32) + bqkv_ref[li]
        qkvb = qkv.astype(jnp.bfloat16)

        # Head-major (NH*BG, S, DH) batches: NH lane slices + free leading-dim
        # reshapes + one leading-dim (major) concat per tensor.
        def heads(off):
            return jnp.concatenate(
                [qkvb[:, off + h * DH: off + (h + 1) * DH].reshape(BG, S, DH)
                 for h in range(NH)], axis=0)

        q, k, v = heads(0), heads(H), heads(2 * H)

        # 1/sqrt(DH) is folded into the Q columns of wqkv/bqkv at init time.
        s = jnp.einsum('nqd,nkd->nqk', q, k, preferred_element_type=jnp.float32)
        # TODO(synk): no attention/padding mask applied (synthetic inputs are unpadded).
        s = s - jnp.max(s, axis=-1, keepdims=True)
        p = jnp.exp(s)
        p = p * pl.reciprocal(jnp.sum(p, axis=-1, keepdims=True), approx=True)
        ctx = jnp.einsum('nqk,nkd->nqd', p.astype(jnp.bfloat16), v,
                         preferred_element_type=jnp.float32)
        # Merge heads: leading-dim slices + free reshapes + ONE lane concat.
        ctx = jnp.concatenate(
            [ctx[h * BG:(h + 1) * BG].reshape(ROWS, DH) for h in range(NH)],
            axis=-1)                                               # (ROWS, H) f32

        attn = jnp.dot(ctx.astype(jnp.bfloat16), wo_ref[li],
                       preferred_element_type=jnp.float32) + bo_ref[li]
        x1 = _layernorm(x + attn, g1_ref[li], be1_ref[li])

        ff = jnp.dot(x1.astype(jnp.bfloat16), w1_ref[li],
                     preferred_element_type=jnp.float32) + b1_ref[li]
        # TODO(synk): RoBERTa uses the exact (erf) GELU; tanh approximation used here.
        ff = jax.nn.gelu(ff, approximate=True)
        ffo = jnp.dot(ff.astype(jnp.bfloat16), w2_ref[li],
                      preferred_element_type=jnp.float32) + b2_ref[li]
        x = _layernorm(x1 + ffo, g2_ref[li], be2_ref[li])

    # Epilogue: CLS pooling via a single strided sublane read + L2 normalization.
    x_sc[...] = x
    cls = x_sc[pl.ds(0, BG, stride=S), :]                          # rows 0, S, 2S, ...
    inv = jax.lax.rsqrt(jnp.sum(cls * cls, axis=-1, keepdims=True) + 1e-12)
    out_ref[...] = cls * inv


# ---------------------------------------------------------------------------
# pallas_call wrapper
# ---------------------------------------------------------------------------
def _blair_call():
    def full(shape):                      # untiled, VMEM-resident, shared by all steps
        nd = len(shape)
        return pl.BlockSpec(shape, lambda i, _nd=nd: (0,) * _nd)

    in_specs = [
        pl.BlockSpec((ROWS, H), lambda i: (i, 0)),            # embedded tokens (flat)
        full((1, H)), full((1, H)),                           # emb LN gamma/beta
        full((LAYERS, H, 3 * H)), full((LAYERS, 1, 3 * H)),   # wqkv, bqkv
        full((LAYERS, H, H)), full((LAYERS, 1, H)),           # wo, bo
        full((LAYERS, 1, H)), full((LAYERS, 1, H)),           # ln1 gamma/beta
        full((LAYERS, H, FF)), full((LAYERS, 1, FF)),         # w1, b1
        full((LAYERS, FF, H)), full((LAYERS, 1, H)),          # w2, b2
        full((LAYERS, 1, H)), full((LAYERS, 1, H)),           # ln2 gamma/beta
    ]
    return pl.pallas_call(
        blair_kernel,
        out_shape=jax.ShapeDtypeStruct((B, H), jnp.float32),
        grid=(NB,),
        in_specs=in_specs,
        out_specs=pl.BlockSpec((BG, H), lambda i: (i, 0)),
        scratch_shapes=[pltpu.VMEM((ROWS, H), jnp.float32)],
        compiler_params=pltpu.CompilerParams(
            dimension_semantics=("parallel",),   # independent batch groups (v7x: 2 TCs)
        ),
    )


# ---------------------------------------------------------------------------
# Parameter init (deterministic, synthetic) and full forward
# ---------------------------------------------------------------------------
def init_params(key):
    std = 0.02
    scale = 1.0 / (DH ** 0.5)            # attention scale, folded into Q projection
    keys = jax.random.split(key, 2 + LAYERS)
    params = {
        "tok_emb": std * jax.random.normal(keys[0], (VOCAB, H), jnp.float32),
        "pos_emb": std * jax.random.normal(keys[1], (S, H), jnp.float32),
        "emb_ln_g": jnp.ones((1, H), jnp.float32),
        "emb_ln_b": jnp.zeros((1, H), jnp.float32),
    }
    stk = {k: [] for k in ("wqkv", "bqkv", "wo", "bo", "g1", "be1",
                           "w1", "b1", "w2", "b2", "g2", "be2")}
    for li in range(LAYERS):
        lk = jax.random.split(keys[2 + li], 6)
        wq = (std * scale) * jax.random.normal(lk[0], (H, H), jnp.float32)  # scale folded
        wk = std * jax.random.normal(lk[1], (H, H), jnp.float32)
        wv = std * jax.random.normal(lk[2], (H, H), jnp.float32)
        stk["wqkv"].append(jnp.concatenate([wq, wk, wv], axis=1).astype(jnp.bfloat16))
        # Q bias would also carry the 1/sqrt(DH) fold; it is zero here so a no-op.
        stk["bqkv"].append(jnp.zeros((1, 3 * H), jnp.float32))
        stk["wo"].append((std * jax.random.normal(lk[3], (H, H))).astype(jnp.bfloat16))
        stk["bo"].append(jnp.zeros((1, H), jnp.float32))
        stk["g1"].append(jnp.ones((1, H), jnp.float32))
        stk["be1"].append(jnp.zeros((1, H), jnp.float32))
        stk["w1"].append((std * jax.random.normal(lk[4], (H, FF))).astype(jnp.bfloat16))
        stk["b1"].append(jnp.zeros((1, FF), jnp.float32))
        stk["w2"].append((std * jax.random.normal(lk[5], (FF, H))).astype(jnp.bfloat16))
        stk["b2"].append(jnp.zeros((1, H), jnp.float32))
        stk["g2"].append(jnp.ones((1, H), jnp.float32))
        stk["be2"].append(jnp.zeros((1, H), jnp.float32))
    for k, v in stk.items():
        params[k] = jnp.stack(v, axis=0)                 # leading LAYERS axis
    return params


def blair_forward(token_ids, params):
    # Glue outside the kernel: token-embedding gather + positional embeddings
    # (the HF tokenizer / pretrained checkpoint are external to this model).
    x = jnp.take(params["tok_emb"], token_ids, axis=0) + params["pos_emb"][None, :, :]
    x = x.reshape(BS, H).astype(jnp.float32)
    return _blair_call()(
        x, params["emb_ln_g"], params["emb_ln_b"],
        params["wqkv"], params["bqkv"], params["wo"], params["bo"],
        params["g1"], params["be1"], params["w1"], params["b1"],
        params["w2"], params["b2"], params["g2"], params["be2"],
    )


if __name__ == "__main__":
    key = jax.random.PRNGKey(0)
    k_params, k_ids = jax.random.split(key)
    params = init_params(k_params)
    # Synthetic token ids stand in for the tokenizer output on padded text.
    token_ids = jax.random.randint(k_ids, (B, S), 0, VOCAB, dtype=jnp.int32)

    out = jax.block_until_ready(blair_forward(token_ids, params))

    assert out.shape == (B, H)
    norms = jnp.linalg.norm(out, axis=1)
    assert bool(jnp.all(jnp.abs(norms - 1.0) < 1e-3))
    print("KERNEL_OK")
</pallas_src>

<mosaic_0001>
module attributes {stable_mosaic.version = 11 : i64} {
  func.func @blair_kernel(%arg0: i32, %arg1: memref<128x128xf32, #tpu.memory_space<vmem>>, %arg2: memref<1x128xf32, #tpu.memory_space<vmem>>, %arg3: memref<1x128xf32, #tpu.memory_space<vmem>>, %arg4: memref<2x128x384xbf16, #tpu.memory_space<vmem>>, %arg5: memref<2x1x384xf32, #tpu.memory_space<vmem>>, %arg6: memref<2x128x128xbf16, #tpu.memory_space<vmem>>, %arg7: memref<2x1x128xf32, #tpu.memory_space<vmem>>, %arg8: memref<2x1x128xf32, #tpu.memory_space<vmem>>, %arg9: memref<2x1x128xf32, #tpu.memory_space<vmem>>, %arg10: memref<2x128x256xbf16, #tpu.memory_space<vmem>>, %arg11: memref<2x1x256xf32, #tpu.memory_space<vmem>>, %arg12: memref<2x256x128xbf16, #tpu.memory_space<vmem>>, %arg13: memref<2x1x128xf32, #tpu.memory_space<vmem>>, %arg14: memref<2x1x128xf32, #tpu.memory_space<vmem>>, %arg15: memref<2x1x128xf32, #tpu.memory_space<vmem>>, %arg16: memref<8x128xf32, #tpu.memory_space<vmem>>, %arg17: memref<128x128xf32, #tpu.memory_space<vmem>>) attributes {dimension_semantics = [#tpu.dimension_semantics<parallel>], iteration_bounds = array<i64: 2>, scalar_prefetch = 0 : i64, scratch_operands = 1 : i64, tpu.core_type = #tpu.core_type<tc>, window_params = [{transform_indices = @transform_0, window_bounds = array<i64: 128, 128>}, {pipeline_mode = #tpu.pipeline_mode<synchronous>, transform_indices = @transform_1, window_bounds = array<i64: 1, 128>}, {pipeline_mode = #tpu.pipeline_mode<synchronous>, transform_indices = @transform_2, window_bounds = array<i64: 1, 128>}, {pipeline_mode = #tpu.pipeline_mode<synchronous>, transform_indices = @transform_3, window_bounds = array<i64: 2, 128, 384>}, {pipeline_mode = #tpu.pipeline_mode<synchronous>, transform_indices = @transform_4, window_bounds = array<i64: 2, 1, 384>}, {pipeline_mode = #tpu.pipeline_mode<synchronous>, transform_indices = @transform_5, window_bounds = array<i64: 2, 128, 128>}, {pipeline_mode = #tpu.pipeline_mode<synchronous>, transform_indices = @transform_6, window_bounds = array<i64: 2, 1, 128>}, {pipeline_mode = #tpu.pipeline_mode<synchronous>, transform_indices = @transform_7, window_bounds = array<i64: 2, 1, 128>}, {pipeline_mode = #tpu.pipeline_mode<synchronous>, transform_indices = @transform_8, window_bounds = array<i64: 2, 1, 128>}, {pipeline_mode = #tpu.pipeline_mode<synchronous>, transform_indices = @transform_9, window_bounds = array<i64: 2, 128, 256>}, {pipeline_mode = #tpu.pipeline_mode<synchronous>, transform_indices = @transform_10, window_bounds = array<i64: 2, 1, 256>}, {pipeline_mode = #tpu.pipeline_mode<synchronous>, transform_indices = @transform_11, window_bounds = array<i64: 2, 256, 128>}, {pipeline_mode = #tpu.pipeline_mode<synchronous>, transform_indices = @transform_12, window_bounds = array<i64: 2, 1, 128>}, {pipeline_mode = #tpu.pipeline_mode<synchronous>, transform_indices = @transform_13, window_bounds = array<i64: 2, 1, 128>}, {pipeline_mode = #tpu.pipeline_mode<synchronous>, transform_indices = @transform_14, window_bounds = array<i64: 2, 1, 128>}, {transform_indices = @transform_15, window_bounds = array<i64: 8, 128>}]} {
    %c0 = arith.constant 0 : index
    %c0_0 = arith.constant 0 : index
    %0 = vector.load %arg1[%c0, %c0_0] : memref<128x128xf32, #tpu.memory_space<vmem>>, vector<128x128xf32>
    %c0_1 = arith.constant 0 : index
    %c0_2 = arith.constant 0 : index
    %1 = vector.load %arg2[%c0_1, %c0_2] : memref<1x128xf32, #tpu.memory_space<vmem>>, vector<1x128xf32>
    %c0_3 = arith.constant 0 : index
    %c0_4 = arith.constant 0 : index
    %2 = vector.load %arg3[%c0_3, %c0_4] : memref<1x128xf32, #tpu.memory_space<vmem>>, vector<1x128xf32>
    %cst = arith.constant dense<0.000000e+00> : vector<128xf32>
    %3 = vector.multi_reduction <add>, %0, %cst [1] : vector<128x128xf32> to vector<128xf32>
    %4 = vector.shape_cast %3 : vector<128xf32> to vector<128x1xf32>
    %cst_5 = arith.constant 1.280000e+02 : f32
    %5 = vector.broadcast %cst_5 : f32 to vector<128x1xf32>
    %6 = arith.divf %4, %5 : vector<128x1xf32>
    %7 = vector.broadcast %6 : vector<128x1xf32> to vector<128x128xf32>
    %8 = arith.subf %0, %7 : vector<128x128xf32>
    %9 = arith.mulf %8, %8 : vector<128x128xf32>
    %cst_6 = arith.constant dense<0.000000e+00> : vector<128xf32>
    %10 = vector.multi_reduction <add>, %9, %cst_6 [1] : vector<128x128xf32> to vector<128xf32>
    %11 = vector.shape_cast %10 : vector<128xf32> to vector<128x1xf32>
    %cst_7 = arith.constant 1.280000e+02 : f32
    %12 = vector.broadcast %cst_7 : f32 to vector<128x1xf32>
    %13 = arith.divf %11, %12 : vector<128x1xf32>
    %cst_8 = arith.constant 9.99999974E-6 : f32
    %14 = vector.broadcast %cst_8 : f32 to vector<128x1xf32>
    %15 = arith.addf %13, %14 : vector<128x1xf32>
    %16 = math.rsqrt %15 : vector<128x1xf32>
    %17 = vector.broadcast %16 : vector<128x1xf32> to vector<128x128xf32>
    %18 = arith.mulf %8, %17 : vector<128x128xf32>
    %19 = vector.broadcast %1 : vector<1x128xf32> to vector<128x128xf32>
    %20 = arith.mulf %18, %19 : vector<128x128xf32>
    %21 = vector.broadcast %2 : vector<1x128xf32> to vector<128x128xf32>
    %22 = arith.addf %20, %21 : vector<128x128xf32>
    %23 = arith.truncf %22 : vector<128x128xf32> to vector<128x128xbf16>
    %c0_9 = arith.constant 0 : index
    %c0_10 = arith.constant 0 : index
    %c0_11 = arith.constant 0 : index
    %24 = vector.load %arg4[%c0_9, %c0_10, %c0_11] : memref<2x128x384xbf16, #tpu.memory_space<vmem>>, vector<1x128x384xbf16>
    %25 = vector.shape_cast %24 : vector<1x128x384xbf16> to vector<128x384xbf16>
    %cst_12 = arith.constant dense<0.000000e+00> : vector<128x384xf32>
    %26 = tpu.matmul %23, %25, %cst_12 {dimension_numbers = #tpu.dot_dimension_numbers<[1], [0], [0], [1], [0, 0, 1, 1], [], []>} : vector<128x128xbf16>, vector<128x384xbf16>, vector<128x384xf32> -> vector<128x384xf32>
    %c0_13 = arith.constant 0 : index
    %c0_14 = arith.constant 0 : index
    %c0_15 = arith.constant 0 : index
    %27 = vector.load %arg5[%c0_13, %c0_14, %c0_15] : memref<2x1x384xf32, #tpu.memory_space<vmem>>, vector<1x1x384xf32>
    %28 = vector.shape_cast %27 : vector<1x1x384xf32> to vector<1x384xf32>
    %29 = vector.broadcast %28 : vector<1x384xf32> to vector<128x384xf32>
    %30 = arith.addf %26, %29 : vector<128x384xf32>
    %31 = arith.truncf %30 : vector<128x384xf32> to vector<128x384xbf16>
    %32 = vector.extract_strided_slice %31 {offsets = [0, 0], sizes = [128, 32], strides = [1, 1]} : vector<128x384xbf16> to vector<128x32xbf16>
    %33 = vector.shape_cast %32 : vector<128x32xbf16> to vector<8x16x32xbf16>
    %34 = vector.extract_strided_slice %31 {offsets = [0, 32], sizes = [128, 32], strides = [1, 1]} : vector<128x384xbf16> to vector<128x32xbf16>
    %35 = vector.shape_cast %34 : vector<128x32xbf16> to vector<8x16x32xbf16>
    %36 = vector.extract_strided_slice %31 {offsets = [0, 64], sizes = [128, 32], strides = [1, 1]} : vector<128x384xbf16> to vector<128x32xbf16>
    %37 = vector.shape_cast %36 : vector<128x32xbf16> to vector<8x16x32xbf16>
    %38 = vector.extract_strided_slice %31 {offsets = [0, 96], sizes = [128, 32], strides = [1, 1]} : vector<128x384xbf16> to vector<128x32xbf16>
    %39 = vector.shape_cast %38 : vector<128x32xbf16> to vector<8x16x32xbf16>
    %40 = tpu.concatenate %33, %35, %37, %39 in 0 : vector<8x16x32xbf16>, vector<8x16x32xbf16>, vector<8x16x32xbf16>, vector<8x16x32xbf16> -> vector<32x16x32xbf16>
    %41 = vector.extract_strided_slice %31 {offsets = [0, 128], sizes = [128, 32], strides = [1, 1]} : vector<128x384xbf16> to vector<128x32xbf16>
    %42 = vector.shape_cast %41 : vector<128x32xbf16> to vector<8x16x32xbf16>
    %43 = vector.extract_strided_slice %31 {offsets = [0, 160], sizes = [128, 32], strides = [1, 1]} : vector<128x384xbf16> to vector<128x32xbf16>
    %44 = vector.shape_cast %43 : vector<128x32xbf16> to vector<8x16x32xbf16>
    %45 = vector.extract_strided_slice %31 {offsets = [0, 192], sizes = [128, 32], strides = [1, 1]} : vector<128x384xbf16> to vector<128x32xbf16>
    %46 = vector.shape_cast %45 : vector<128x32xbf16> to vector<8x16x32xbf16>
    %47 = vector.extract_strided_slice %31 {offsets = [0, 224], sizes = [128, 32], strides = [1, 1]} : vector<128x384xbf16> to vector<128x32xbf16>
    %48 = vector.shape_cast %47 : vector<128x32xbf16> to vector<8x16x32xbf16>
    %49 = tpu.concatenate %42, %44, %46, %48 in 0 : vector<8x16x32xbf16>, vector<8x16x32xbf16>, vector<8x16x32xbf16>, vector<8x16x32xbf16> -> vector<32x16x32xbf16>
    %50 = vector.extract_strided_slice %31 {offsets = [0, 256], sizes = [128, 32], strides = [1, 1]} : vector<128x384xbf16> to vector<128x32xbf16>
    %51 = vector.shape_cast %50 : vector<128x32xbf16> to vector<8x16x32xbf16>
    %52 = vector.extract_strided_slice %31 {offsets = [0, 288], sizes = [128, 32], strides = [1, 1]} : vector<128x384xbf16> to vector<128x32xbf16>
    %53 = vector.shape_cast %52 : vector<128x32xbf16> to vector<8x16x32xbf16>
    %54 = vector.extract_strided_slice %31 {offsets = [0, 320], sizes = [128, 32], strides = [1, 1]} : vector<128x384xbf16> to vector<128x32xbf16>
    %55 = vector.shape_cast %54 : vector<128x32xbf16> to vector<8x16x32xbf16>
    %56 = vector.extract_strided_slice %31 {offsets = [0, 352], sizes = [128, 32], strides = [1, 1]} : vector<128x384xbf16> to vector<128x32xbf16>
    %57 = vector.shape_cast %56 : vector<128x32xbf16> to vector<8x16x32xbf16>
    %58 = tpu.concatenate %51, %53, %55, %57 in 0 : vector<8x16x32xbf16>, vector<8x16x32xbf16>, vector<8x16x32xbf16>, vector<8x16x32xbf16> -> vector<32x16x32xbf16>
    "tpu.trace_start"() <{level = 10 : i32, message = "nqd,nkd->nqk"}> : () -> ()
    %cst_16 = arith.constant dense<0.000000e+00> : vector<32x16x16xf32>
    %59 = tpu.matmul %40, %49, %cst_16 {dimension_numbers = #tpu.dot_dimension_numbers<[2], [2], [1], [1], [0, 0, 0, 1, 1, 1], [0], [0]>} : vector<32x16x32xbf16>, vector<32x16x32xbf16>, vector<32x16x16xf32> -> vector<32x16x16xf32>
    "tpu.trace_stop"() : () -> ()
    %cst_17 = arith.constant dense<0xFF800000> : vector<32x16xf32>
    %60 = vector.multi_reduction <maximumf>, %59, %cst_17 [2] : vector<32x16x16xf32> to vector<32x16xf32>
    %61 = vector.shape_cast %60 : vector<32x16xf32> to vector<32x16x1xf32>
    %62 = vector.broadcast %61 : vector<32x16x1xf32> to vector<32x16x16xf32>
    %63 = arith.subf %59, %62 : vector<32x16x16xf32>
    %64 = math.exp %63 : vector<32x16x16xf32>
    %cst_18 = arith.constant dense<0.000000e+00> : vector<32x16xf32>
    %65 = vector.multi_reduction <add>, %64, %cst_18 [2] : vector<32x16x16xf32> to vector<32x16xf32>
    %66 = vector.shape_cast %65 : vector<32x16xf32> to vector<32x16x1xf32>
    %67 = tpu.reciprocal %66 {approx = true} : vector<32x16x1xf32> -> vector<32x16x1xf32>
    %68 = vector.broadcast %67 : vector<32x16x1xf32> to vector<32x16x16xf32>
    %69 = arith.mulf %64, %68 : vector<32x16x16xf32>
    %70 = arith.truncf %69 : vector<32x16x16xf32> to vector<32x16x16xbf16>
    "tpu.trace_start"() <{level = 10 : i32, message = "nqk,nkd->nqd"}> : () -> ()
    %cst_19 = arith.constant dense<0.000000e+00> : vector<32x16x32xf32>
    %71 = tpu.matmul %70, %58, %cst_19 {dimension_numbers = #tpu.dot_dimension_numbers<[2], [1], [1], [2], [0, 0, 0, 1, 1, 2], [0], [0]>} : vector<32x16x16xbf16>, vector<32x16x32xbf16>, vector<32x16x32xf32> -> vector<32x16x32xf32>
    "tpu.trace_stop"() : () -> ()
    %72 = vector.extract_strided_slice %71 {offsets = [0, 0, 0], sizes = [8, 16, 32], strides = [1, 1, 1]} : vector<32x16x32xf32> to vector<8x16x32xf32>
    %73 = vector.shape_cast %72 : vector<8x16x32xf32> to vector<128x32xf32>
    %74 = vector.extract_strided_slice %71 {offsets = [8, 0, 0], sizes = [8, 16, 32], strides = [1, 1, 1]} : vector<32x16x32xf32> to vector<8x16x32xf32>
    %75 = vector.shape_cast %74 : vector<8x16x32xf32> to vector<128x32xf32>
    %76 = vector.extract_strided_slice %71 {offsets = [16, 0, 0], sizes = [8, 16, 32], strides = [1, 1, 1]} : vector<32x16x32xf32> to vector<8x16x32xf32>
    %77 = vector.shape_cast %76 : vector<8x16x32xf32> to vector<128x32xf32>
    %78 = vector.extract_strided_slice %71 {offsets = [24, 0, 0], sizes = [8, 16, 32], strides = [1, 1, 1]} : vector<32x16x32xf32> to vector<8x16x32xf32>
    %79 = vector.shape_cast %78 : vector<8x16x32xf32> to vector<128x32xf32>
    %80 = tpu.concatenate %73, %75, %77, %79 in 1 : vector<128x32xf32>, vector<128x32xf32>, vector<128x32xf32>, vector<128x32xf32> -> vector<128x128xf32>
    %81 = arith.truncf %80 : vector<128x128xf32> to vector<128x128xbf16>
    %c0_20 = arith.constant 0 : index
    %c0_21 = arith.constant 0 : index
    %c0_22 = arith.constant 0 : index
    %82 = vector.load %arg6[%c0_20, %c0_21, %c0_22] : memref<2x128x128xbf16, #tpu.memory_space<vmem>>, vector<1x128x128xbf16>
    %83 = vector.shape_cast %82 : vector<1x128x128xbf16> to vector<128x128xbf16>
    %cst_23 = arith.constant dense<0.000000e+00> : vector<128x128xf32>
    %84 = tpu.matmul %81, %83, %cst_23 {dimension_numbers = #tpu.dot_dimension_numbers<[1], [0], [0], [1], [0, 0, 1, 1], [], []>} : vector<128x128xbf16>, vector<128x128xbf16>, vector<128x128xf32> -> vector<128x128xf32>
    %c0_24 = arith.constant 0 : index
    %c0_25 = arith.constant 0 : index
    %c0_26 = arith.constant 0 : index
    %85 = vector.load %arg7[%c0_24, %c0_25, %c0_26] : memref<2x1x128xf32, #tpu.memory_space<vmem>>, vector<1x1x128xf32>
    %86 = vector.shape_cast %85 : vector<1x1x128xf32> to vector<1x128xf32>
    %87 = vector.broadcast %86 : vector<1x128xf32> to vector<128x128xf32>
    %88 = arith.addf %84, %87 : vector<128x128xf32>
    %89 = arith.addf %22, %88 : vector<128x128xf32>
    %c0_27 = arith.constant 0 : index
    %c0_28 = arith.constant 0 : index
    %c0_29 = arith.constant 0 : index
    %90 = vector.load %arg8[%c0_27, %c0_28, %c0_29] : memref<2x1x128xf32, #tpu.memory_space<vmem>>, vector<1x1x128xf32>
    %91 = vector.shape_cast %90 : vector<1x1x128xf32> to vector<1x128xf32>
    %c0_30 = arith.constant 0 : index
    %c0_31 = arith.constant 0 : index
    %c0_32 = arith.constant 0 : index
    %92 = vector.load %arg9[%c0_30, %c0_31, %c0_32] : memref<2x1x128xf32, #tpu.memory_space<vmem>>, vector<1x1x128xf32>
    %93 = vector.shape_cast %92 : vector<1x1x128xf32> to vector<1x128xf32>
    %cst_33 = arith.constant dense<0.000000e+00> : vector<128xf32>
    %94 = vector.multi_reduction <add>, %89, %cst_33 [1] : vector<128x128xf32> to vector<128xf32>
    %95 = vector.shape_cast %94 : vector<128xf32> to vector<128x1xf32>
    %cst_34 = arith.constant 1.280000e+02 : f32
    %96 = vector.broadcast %cst_34 : f32 to vector<128x1xf32>
    %97 = arith.divf %95, %96 : vector<128x1xf32>
    %98 = vector.broadcast %97 : vector<128x1xf32> to vector<128x128xf32>
    %99 = arith.subf %89, %98 : vector<128x128xf32>
    %100 = arith.mulf %99, %99 : vector<128x128xf32>
    %cst_35 = arith.constant dense<0.000000e+00> : vector<128xf32>
    %101 = vector.multi_reduction <add>, %100, %cst_35 [1] : vector<128x128xf32> to vector<128xf32>
    %102 = vector.shape_cast %101 : vector<128xf32> to vector<128x1xf32>
    %cst_36 = arith.constant 1.280000e+02 : f32
    %103 = vector.broadcast %cst_36 : f32 to vector<128x1xf32>
    %104 = arith.divf %102, %103 : vector<128x1xf32>
    %cst_37 = arith.constant 9.99999974E-6 : f32
    %105 = vector.broadcast %cst_37 : f32 to vector<128x1xf32>
    %106 = arith.addf %104, %105 : vector<128x1xf32>
    %107 = math.rsqrt %106 : vector<128x1xf32>
    %108 = vector.broadcast %107 : vector<128x1xf32> to vector<128x128xf32>
    %109 = arith.mulf %99, %108 : vector<128x128xf32>
    %110 = vector.broadcast %91 : vector<1x128xf32> to vector<128x128xf32>
    %111 = arith.mulf %109, %110 : vector<128x128xf32>
    %112 = vector.broadcast %93 : vector<1x128xf32> to vector<128x128xf32>
    %113 = arith.addf %111, %112 : vector<128x128xf32>
    %114 = arith.truncf %113 : vector<128x128xf32> to vector<128x128xbf16>
    %c0_38 = arith.constant 0 : index
    %c0_39 = arith.constant 0 : index
    %c0_40 = arith.constant 0 : index
    %115 = vector.load %arg10[%c0_38, %c0_39, %c0_40] : memref<2x128x256xbf16, #tpu.memory_space<vmem>>, vector<1x128x256xbf16>
    %116 = vector.shape_cast %115 : vector<1x128x256xbf16> to vector<128x256xbf16>
    %cst_41 = arith.constant dense<0.000000e+00> : vector<128x256xf32>
    %117 = tpu.matmul %114, %116, %cst_41 {dimension_numbers = #tpu.dot_dimension_numbers<[1], [0], [0], [1], [0, 0, 1, 1], [], []>} : vector<128x128xbf16>, vector<128x256xbf16>, vector<128x256xf32> -> vector<128x256xf32>
    %c0_42 = arith.constant 0 : index
    %c0_43 = arith.constant 0 : index
    %c0_44 = arith.constant 0 : index
    %118 = vector.load %arg11[%c0_42, %c0_43, %c0_44] : memref<2x1x256xf32, #tpu.memory_space<vmem>>, vector<1x1x256xf32>
    %119 = vector.shape_cast %118 : vector<1x1x256xf32> to vector<1x256xf32>
    %120 = vector.broadcast %119 : vector<1x256xf32> to vector<128x256xf32>
    %121 = arith.addf %117, %120 : vector<128x256xf32>
    %122 = arith.mulf %121, %121 : vector<128x256xf32>
    %123 = arith.mulf %121, %122 : vector<128x256xf32>
    %cst_45 = arith.constant 4.471500e-02 : f32
    %124 = vector.broadcast %cst_45 : f32 to vector<128x256xf32>
    %125 = arith.mulf %124, %123 : vector<128x256xf32>
    %126 = arith.addf %121, %125 : vector<128x256xf32>
    %cst_46 = arith.constant 0.797884583 : f32
    %127 = vector.broadcast %cst_46 : f32 to vector<128x256xf32>
    %128 = arith.mulf %127, %126 : vector<128x256xf32>
    %129 = math.tanh %128 : vector<128x256xf32>
    %cst_47 = arith.constant 1.000000e+00 : f32
    %130 = vector.broadcast %cst_47 : f32 to vector<128x256xf32>
    %131 = arith.addf %130, %129 : vector<128x256xf32>
    %cst_48 = arith.constant 5.000000e-01 : f32
    %132 = vector.broadcast %cst_48 : f32 to vector<128x256xf32>
    %133 = arith.mulf %132, %131 : vector<128x256xf32>
    %134 = arith.mulf %121, %133 : vector<128x256xf32>
    %135 = arith.truncf %134 : vector<128x256xf32> to vector<128x256xbf16>
    %c0_49 = arith.constant 0 : index
    %c0_50 = arith.constant 0 : index
    %c0_51 = arith.constant 0 : index
    %136 = vector.load %arg12[%c0_49, %c0_50, %c0_51] : memref<2x256x128xbf16, #tpu.memory_space<vmem>>, vector<1x256x128xbf16>
    %137 = vector.shape_cast %136 : vector<1x256x128xbf16> to vector<256x128xbf16>
    %cst_52 = arith.constant dense<0.000000e+00> : vector<128x128xf32>
    %138 = tpu.matmul %135, %137, %cst_52 {dimension_numbers = #tpu.dot_dimension_numbers<[1], [0], [0], [1], [0, 0, 1, 1], [], []>} : vector<128x256xbf16>, vector<256x128xbf16>, vector<128x128xf32> -> vector<128x128xf32>
    %c0_53 = arith.constant 0 : index
    %c0_54 = arith.constant 0 : index
    %c0_55 = arith.constant 0 : index
    %139 = vector.load %arg13[%c0_53, %c0_54, %c0_55] : memref<2x1x128xf32, #tpu.memory_space<vmem>>, vector<1x1x128xf32>
    %140 = vector.shape_cast %139 : vector<1x1x128xf32> to vector<1x128xf32>
    %141 = vector.broadcast %140 : vector<1x128xf32> to vector<128x128xf32>
    %142 = arith.addf %138, %141 : vector<128x128xf32>
    %143 = arith.addf %113, %142 : vector<128x128xf32>
    %c0_56 = arith.constant 0 : index
    %c0_57 = arith.constant 0 : index
    %c0_58 = arith.constant 0 : index
    %144 = vector.load %arg14[%c0_56, %c0_57, %c0_58] : memref<2x1x128xf32, #tpu.memory_space<vmem>>, vector<1x1x128xf32>
    %145 = vector.shape_cast %144 : vector<1x1x128xf32> to vector<1x128xf32>
    %c0_59 = arith.constant 0 : index
    %c0_60 = arith.constant 0 : index
    %c0_61 = arith.constant 0 : index
    %146 = vector.load %arg15[%c0_59, %c0_60, %c0_61] : memref<2x1x128xf32, #tpu.memory_space<vmem>>, vector<1x1x128xf32>
    %147 = vector.shape_cast %146 : vector<1x1x128xf32> to vector<1x128xf32>
    %cst_62 = arith.constant dense<0.000000e+00> : vector<128xf32>
    %148 = vector.multi_reduction <add>, %143, %cst_62 [1] : vector<128x128xf32> to vector<128xf32>
    %149 = vector.shape_cast %148 : vector<128xf32> to vector<128x1xf32>
    %cst_63 = arith.constant 1.280000e+02 : f32
    %150 = vector.broadcast %cst_63 : f32 to vector<128x1xf32>
    %151 = arith.divf %149, %150 : vector<128x1xf32>
    %152 = vector.broadcast %151 : vector<128x1xf32> to vector<128x128xf32>
    %153 = arith.subf %143, %152 : vector<128x128xf32>
    %154 = arith.mulf %153, %153 : vector<128x128xf32>
    %cst_64 = arith.constant dense<0.000000e+00> : vector<128xf32>
    %155 = vector.multi_reduction <add>, %154, %cst_64 [1] : vector<128x128xf32> to vector<128xf32>
    %156 = vector.shape_cast %155 : vector<128xf32> to vector<128x1xf32>
    %cst_65 = arith.constant 1.280000e+02 : f32
    %157 = vector.broadcast %cst_65 : f32 to vector<128x1xf32>
    %158 = arith.divf %156, %157 : vector<128x1xf32>
    %cst_66 = arith.constant 9.99999974E-6 : f32
    %159 = vector.broadcast %cst_66 : f32 to vector<128x1xf32>
    %160 = arith.addf %158, %159 : vector<128x1xf32>
    %161 = math.rsqrt %160 : vector<128x1xf32>
    %162 = vector.broadcast %161 : vector<128x1xf32> to vector<128x128xf32>
    %163 = arith.mulf %153, %162 : vector<128x128xf32>
    %164 = vector.broadcast %145 : vector<1x128xf32> to vector<128x128xf32>
    %165 = arith.mulf %163, %164 : vector<128x128xf32>
    %166 = vector.broadcast %147 : vector<1x128xf32> to vector<128x128xf32>
    %167 = arith.addf %165, %166 : vector<128x128xf32>
    %168 = arith.truncf %167 : vector<128x128xf32> to vector<128x128xbf16>
    %c1 = arith.constant 1 : index
    %c0_67 = arith.constant 0 : index
    %c0_68 = arith.constant 0 : index
    %169 = vector.load %arg4[%c1, %c0_67, %c0_68] : memref<2x128x384xbf16, #tpu.memory_space<vmem>>, vector<1x128x384xbf16>
    %170 = vector.shape_cast %169 : vector<1x128x384xbf16> to vector<128x384xbf16>
    %cst_69 = arith.constant dense<0.000000e+00> : vector<128x384xf32>
    %171 = tpu.matmul %168, %170, %cst_69 {dimension_numbers = #tpu.dot_dimension_numbers<[1], [0], [0], [1], [0, 0, 1, 1], [], []>} : vector<128x128xbf16>, vector<128x384xbf16>, vector<128x384xf32> -> vector<128x384xf32>
    %c1_70 = arith.constant 1 : index
    %c0_71 = arith.constant 0 : index
    %c0_72 = arith.constant 0 : index
    %172 = vector.load %arg5[%c1_70, %c0_71, %c0_72] : memref<2x1x384xf32, #tpu.memory_space<vmem>>, vector<1x1x384xf32>
    %173 = vector.shape_cast %172 : vector<1x1x384xf32> to vector<1x384xf32>
    %174 = vector.broadcast %173 : vector<1x384xf32> to vector<128x384xf32>
    %175 = arith.addf %171, %174 : vector<128x384xf32>
    %176 = arith.truncf %175 : vector<128x384xf32> to vector<128x384xbf16>
    %177 = vector.extract_strided_slice %176 {offsets = [0, 0], sizes = [128, 32], strides = [1, 1]} : vector<128x384xbf16> to vector<128x32xbf16>
    %178 = vector.shape_cast %177 : vector<128x32xbf16> to vector<8x16x32xbf16>
    %179 = vector.extract_strided_slice %176 {offsets = [0, 32], sizes = [128, 32], strides = [1, 1]} : vector<128x384xbf16> to vector<128x32xbf16>
    %180 = vector.shape_cast %179 : vector<128x32xbf16> to vector<8x16x32xbf16>
    %181 = vector.extract_strided_slice %176 {offsets = [0, 64], sizes = [128, 32], strides = [1, 1]} : vector<128x384xbf16> to vector<128x32xbf16>
    %182 = vector.shape_cast %181 : vector<128x32xbf16> to vector<8x16x32xbf16>
    %183 = vector.extract_strided_slice %176 {offsets = [0, 96], sizes = [128, 32], strides = [1, 1]} : vector<128x384xbf16> to vector<128x32xbf16>
    %184 = vector.shape_cast %183 : vector<128x32xbf16> to vector<8x16x32xbf16>
    %185 = tpu.concatenate %178, %180, %182, %184 in 0 : vector<8x16x32xbf16>, vector<8x16x32xbf16>, vector<8x16x32xbf16>, vector<8x16x32xbf16> -> vector<32x16x32xbf16>
    %186 = vector.extract_strided_slice %176 {offsets = [0, 128], sizes = [128, 32], strides = [1, 1]} : vector<128x384xbf16> to vector<128x32xbf16>
    %187 = vector.shape_cast %186 : vector<128x32xbf16> to vector<8x16x32xbf16>
    %188 = vector.extract_strided_slice %176 {offsets = [0, 160], sizes = [128, 32], strides = [1, 1]} : vector<128x384xbf16> to vector<128x32xbf16>
    %189 = vector.shape_cast %188 : vector<128x32xbf16> to vector<8x16x32xbf16>
    %190 = vector.extract_strided_slice %176 {offsets = [0, 192], sizes = [128, 32], strides = [1, 1]} : vector<128x384xbf16> to vector<128x32xbf16>
    %191 = vector.shape_cast %190 : vector<128x32xbf16> to vector<8x16x32xbf16>
    %192 = vector.extract_strided_slice %176 {offsets = [0, 224], sizes = [128, 32], strides = [1, 1]} : vector<128x384xbf16> to vector<128x32xbf16>
    %193 = vector.shape_cast %192 : vector<128x32xbf16> to vector<8x16x32xbf16>
    %194 = tpu.concatenate %187, %189, %191, %193 in 0 : vector<8x16x32xbf16>, vector<8x16x32xbf16>, vector<8x16x32xbf16>, vector<8x16x32xbf16> -> vector<32x16x32xbf16>
    %195 = vector.extract_strided_slice %176 {offsets = [0, 256], sizes = [128, 32], strides = [1, 1]} : vector<128x384xbf16> to vector<128x32xbf16>
    %196 = vector.shape_cast %195 : vector<128x32xbf16> to vector<8x16x32xbf16>
    %197 = vector.extract_strided_slice %176 {offsets = [0, 288], sizes = [128, 32], strides = [1, 1]} : vector<128x384xbf16> to vector<128x32xbf16>
    %198 = vector.shape_cast %197 : vector<128x32xbf16> to vector<8x16x32xbf16>
    %199 = vector.extract_strided_slice %176 {offsets = [0, 320], sizes = [128, 32], strides = [1, 1]} : vector<128x384xbf16> to vector<128x32xbf16>
    %200 = vector.shape_cast %199 : vector<128x32xbf16> to vector<8x16x32xbf16>
    %201 = vector.extract_strided_slice %176 {offsets = [0, 352], sizes = [128, 32], strides = [1, 1]} : vector<128x384xbf16> to vector<128x32xbf16>
    %202 = vector.shape_cast %201 : vector<128x32xbf16> to vector<8x16x32xbf16>
    %203 = tpu.concatenate %196, %198, %200, %202 in 0 : vector<8x16x32xbf16>, vector<8x16x32xbf16>, vector<8x16x32xbf16>, vector<8x16x32xbf16> -> vector<32x16x32xbf16>
    "tpu.trace_start"() <{level = 10 : i32, message = "nqd,nkd->nqk"}> : () -> ()
    %cst_73 = arith.constant dense<0.000000e+00> : vector<32x16x16xf32>
    %204 = tpu.matmul %185, %194, %cst_73 {dimension_numbers = #tpu.dot_dimension_numbers<[2], [2], [1], [1], [0, 0, 0, 1, 1, 1], [0], [0]>} : vector<32x16x32xbf16>, vector<32x16x32xbf16>, vector<32x16x16xf32> -> vector<32x16x16xf32>
    "tpu.trace_stop"() : () -> ()
    %cst_74 = arith.constant dense<0xFF800000> : vector<32x16xf32>
    %205 = vector.multi_reduction <maximumf>, %204, %cst_74 [2] : vector<32x16x16xf32> to vector<32x16xf32>
    %206 = vector.shape_cast %205 : vector<32x16xf32> to vector<32x16x1xf32>
    %207 = vector.broadcast %206 : vector<32x16x1xf32> to vector<32x16x16xf32>
    %208 = arith.subf %204, %207 : vector<32x16x16xf32>
    %209 = math.exp %208 : vector<32x16x16xf32>
    %cst_75 = arith.constant dense<0.000000e+00> : vector<32x16xf32>
    %210 = vector.multi_reduction <add>, %209, %cst_75 [2] : vector<32x16x16xf32> to vector<32x16xf32>
    %211 = vector.shape_cast %210 : vector<32x16xf32> to vector<32x16x1xf32>
    %212 = tpu.reciprocal %211 {approx = true} : vector<32x16x1xf32> -> vector<32x16x1xf32>
    %213 = vector.broadcast %212 : vector<32x16x1xf32> to vector<32x16x16xf32>
    %214 = arith.mulf %209, %213 : vector<32x16x16xf32>
    %215 = arith.truncf %214 : vector<32x16x16xf32> to vector<32x16x16xbf16>
    "tpu.trace_start"() <{level = 10 : i32, message = "nqk,nkd->nqd"}> : () -> ()
    %cst_76 = arith.constant dense<0.000000e+00> : vector<32x16x32xf32>
    %216 = tpu.matmul %215, %203, %cst_76 {dimension_numbers = #tpu.dot_dimension_numbers<[2], [1], [1], [2], [0, 0, 0, 1, 1, 2], [0], [0]>} : vector<32x16x16xbf16>, vector<32x16x32xbf16>, vector<32x16x32xf32> -> vector<32x16x32xf32>
    "tpu.trace_stop"() : () -> ()
    %217 = vector.extract_strided_slice %216 {offsets = [0, 0, 0], sizes = [8, 16, 32], strides = [1, 1, 1]} : vector<32x16x32xf32> to vector<8x16x32xf32>
    %218 = vector.shape_cast %217 : vector<8x16x32xf32> to vector<128x32xf32>
    %219 = vector.extract_strided_slice %216 {offsets = [8, 0, 0], sizes = [8, 16, 32], strides = [1, 1, 1]} : vector<32x16x32xf32> to vector<8x16x32xf32>
    %220 = vector.shape_cast %219 : vector<8x16x32xf32> to vector<128x32xf32>
    %221 = vector.extract_strided_slice %216 {offsets = [16, 0, 0], sizes = [8, 16, 32], strides = [1, 1, 1]} : vector<32x16x32xf32> to vector<8x16x32xf32>
    %222 = vector.shape_cast %221 : vector<8x16x32xf32> to vector<128x32xf32>
    %223 = vector.extract_strided_slice %216 {offsets = [24, 0, 0], sizes = [8, 16, 32], strides = [1, 1, 1]} : vector<32x16x32xf32> to vector<8x16x32xf32>
    %224 = vector.shape_cast %223 : vector<8x16x32xf32> to vector<128x32xf32>
    %225 = tpu.concatenate %218, %220, %222, %224 in 1 : vector<128x32xf32>, vector<128x32xf32>, vector<128x32xf32>, vector<128x32xf32> -> vector<128x128xf32>
    %226 = arith.truncf %225 : vector<128x128xf32> to vector<128x128xbf16>
    %c1_77 = arith.constant 1 : index
    %c0_78 = arith.constant 0 : index
    %c0_79 = arith.constant 0 : index
    %227 = vector.load %arg6[%c1_77, %c0_78, %c0_79] : memref<2x128x128xbf16, #tpu.memory_space<vmem>>, vector<1x128x128xbf16>
    %228 = vector.shape_cast %227 : vector<1x128x128xbf16> to vector<128x128xbf16>
    %cst_80 = arith.constant dense<0.000000e+00> : vector<128x128xf32>
    %229 = tpu.matmul %226, %228, %cst_80 {dimension_numbers = #tpu.dot_dimension_numbers<[1], [0], [0], [1], [0, 0, 1, 1], [], []>} : vector<128x128xbf16>, vector<128x128xbf16>, vector<128x128xf32> -> vector<128x128xf32>
    %c1_81 = arith.constant 1 : index
    %c0_82 = arith.constant 0 : index
    %c0_83 = arith.constant 0 : index
    %230 = vector.load %arg7[%c1_81, %c0_82, %c0_83] : memref<2x1x128xf32, #tpu.memory_space<vmem>>, vector<1x1x128xf32>
    %231 = vector.shape_cast %230 : vector<1x1x128xf32> to vector<1x128xf32>
    %232 = vector.broadcast %231 : vector<1x128xf32> to vector<128x128xf32>
    %233 = arith.addf %229, %232 : vector<128x128xf32>
    %234 = arith.addf %167, %233 : vector<128x128xf32>
    %c1_84 = arith.constant 1 : index
    %c0_85 = arith.constant 0 : index
    %c0_86 = arith.constant 0 : index
    %235 = vector.load %arg8[%c1_84, %c0_85, %c0_86] : memref<2x1x128xf32, #tpu.memory_space<vmem>>, vector<1x1x128xf32>
    %236 = vector.shape_cast %235 : vector<1x1x128xf32> to vector<1x128xf32>
    %c1_87 = arith.constant 1 : index
    %c0_88 = arith.constant 0 : index
    %c0_89 = arith.constant 0 : index
    %237 = vector.load %arg9[%c1_87, %c0_88, %c0_89] : memref<2x1x128xf32, #tpu.memory_space<vmem>>, vector<1x1x128xf32>
    %238 = vector.shape_cast %237 : vector<1x1x128xf32> to vector<1x128xf32>
    %cst_90 = arith.constant dense<0.000000e+00> : vector<128xf32>
    %239 = vector.multi_reduction <add>, %234, %cst_90 [1] : vector<128x128xf32> to vector<128xf32>
    %240 = vector.shape_cast %239 : vector<128xf32> to vector<128x1xf32>
    %cst_91 = arith.constant 1.280000e+02 : f32
    %241 = vector.broadcast %cst_91 : f32 to vector<128x1xf32>
    %242 = arith.divf %240, %241 : vector<128x1xf32>
    %243 = vector.broadcast %242 : vector<128x1xf32> to vector<128x128xf32>
    %244 = arith.subf %234, %243 : vector<128x128xf32>
    %245 = arith.mulf %244, %244 : vector<128x128xf32>
    %cst_92 = arith.constant dense<0.000000e+00> : vector<128xf32>
    %246 = vector.multi_reduction <add>, %245, %cst_92 [1] : vector<128x128xf32> to vector<128xf32>
    %247 = vector.shape_cast %246 : vector<128xf32> to vector<128x1xf32>
    %cst_93 = arith.constant 1.280000e+02 : f32
    %248 = vector.broadcast %cst_93 : f32 to vector<128x1xf32>
    %249 = arith.divf %247, %248 : vector<128x1xf32>
    %cst_94 = arith.constant 9.99999974E-6 : f32
    %250 = vector.broadcast %cst_94 : f32 to vector<128x1xf32>
    %251 = arith.addf %249, %250 : vector<128x1xf32>
    %252 = math.rsqrt %251 : vector<128x1xf32>
    %253 = vector.broadcast %252 : vector<128x1xf32> to vector<128x128xf32>
    %254 = arith.mulf %244, %253 : vector<128x128xf32>
    %255 = vector.broadcast %236 : vector<1x128xf32> to vector<128x128xf32>
    %256 = arith.mulf %254, %255 : vector<128x128xf32>
    %257 = vector.broadcast %238 : vector<1x128xf32> to vector<128x128xf32>
    %258 = arith.addf %256, %257 : vector<128x128xf32>
    %259 = arith.truncf %258 : vector<128x128xf32> to vector<128x128xbf16>
    %c1_95 = arith.constant 1 : index
    %c0_96 = arith.constant 0 : index
    %c0_97 = arith.constant 0 : index
    %260 = vector.load %arg10[%c1_95, %c0_96, %c0_97] : memref<2x128x256xbf16, #tpu.memory_space<vmem>>, vector<1x128x256xbf16>
    %261 = vector.shape_cast %260 : vector<1x128x256xbf16> to vector<128x256xbf16>
    %cst_98 = arith.constant dense<0.000000e+00> : vector<128x256xf32>
    %262 = tpu.matmul %259, %261, %cst_98 {dimension_numbers = #tpu.dot_dimension_numbers<[1], [0], [0], [1], [0, 0, 1, 1], [], []>} : vector<128x128xbf16>, vector<128x256xbf16>, vector<128x256xf32> -> vector<128x256xf32>
    %c1_99 = arith.constant 1 : index
    %c0_100 = arith.constant 0 : index
    %c0_101 = arith.constant 0 : index
    %263 = vector.load %arg11[%c1_99, %c0_100, %c0_101] : memref<2x1x256xf32, #tpu.memory_space<vmem>>, vector<1x1x256xf32>
    %264 = vector.shape_cast %263 : vector<1x1x256xf32> to vector<1x256xf32>
    %265 = vector.broadcast %264 : vector<1x256xf32> to vector<128x256xf32>
    %266 = arith.addf %262, %265 : vector<128x256xf32>
    %267 = arith.mulf %266, %266 : vector<128x256xf32>
    %268 = arith.mulf %266, %267 : vector<128x256xf32>
    %cst_102 = arith.constant 4.471500e-02 : f32
    %269 = vector.broadcast %cst_102 : f32 to vector<128x256xf32>
    %270 = arith.mulf %269, %268 : vector<128x256xf32>
    %271 = arith.addf %266, %270 : vector<128x256xf32>
    %cst_103 = arith.constant 0.797884583 : f32
    %272 = vector.broadcast %cst_103 : f32 to vector<128x256xf32>
    %273 = arith.mulf %272, %271 : vector<128x256xf32>
    %274 = math.tanh %273 : vector<128x256xf32>
    %cst_104 = arith.constant 1.000000e+00 : f32
    %275 = vector.broadcast %cst_104 : f32 to vector<128x256xf32>
    %276 = arith.addf %275, %274 : vector<128x256xf32>
    %cst_105 = arith.constant 5.000000e-01 : f32
    %277 = vector.broadcast %cst_105 : f32 to vector<128x256xf32>
    %278 = arith.mulf %277, %276 : vector<128x256xf32>
    %279 = arith.mulf %266, %278 : vector<128x256xf32>
    %280 = arith.truncf %279 : vector<128x256xf32> to vector<128x256xbf16>
    %c1_106 = arith.constant 1 : index
    %c0_107 = arith.constant 0 : index
    %c0_108 = arith.constant 0 : index
    %281 = vector.load %arg12[%c1_106, %c0_107, %c0_108] : memref<2x256x128xbf16, #tpu.memory_space<vmem>>, vector<1x256x128xbf16>
    %282 = vector.shape_cast %281 : vector<1x256x128xbf16> to vector<256x128xbf16>
    %cst_109 = arith.constant dense<0.000000e+00> : vector<128x128xf32>
    %283 = tpu.matmul %280, %282, %cst_109 {dimension_numbers = #tpu.dot_dimension_numbers<[1], [0], [0], [1], [0, 0, 1, 1], [], []>} : vector<128x256xbf16>, vector<256x128xbf16>, vector<128x128xf32> -> vector<128x128xf32>
    %c1_110 = arith.constant 1 : index
    %c0_111 = arith.constant 0 : index
    %c0_112 = arith.constant 0 : index
    %284 = vector.load %arg13[%c1_110, %c0_111, %c0_112] : memref<2x1x128xf32, #tpu.memory_space<vmem>>, vector<1x1x128xf32>
    %285 = vector.shape_cast %284 : vector<1x1x128xf32> to vector<1x128xf32>
    %286 = vector.broadcast %285 : vector<1x128xf32> to vector<128x128xf32>
    %287 = arith.addf %283, %286 : vector<128x128xf32>
    %288 = arith.addf %258, %287 : vector<128x128xf32>
    %c1_113 = arith.constant 1 : index
    %c0_114 = arith.constant 0 : index
    %c0_115 = arith.constant 0 : index
    %289 = vector.load %arg14[%c1_113, %c0_114, %c0_115] : memref<2x1x128xf32, #tpu.memory_space<vmem>>, vector<1x1x128xf32>
    %290 = vector.shape_cast %289 : vector<1x1x128xf32> to vector<1x128xf32>
    %c1_116 = arith.constant 1 : index
    %c0_117 = arith.constant 0 : index
    %c0_118 = arith.constant 0 : index
    %291 = vector.load %arg15[%c1_116, %c0_117, %c0_118] : memref<2x1x128xf32, #tpu.memory_space<vmem>>, vector<1x1x128xf32>
    %292 = vector.shape_cast %291 : vector<1x1x128xf32> to vector<1x128xf32>
    %cst_119 = arith.constant dense<0.000000e+00> : vector<128xf32>
    %293 = vector.multi_reduction <add>, %288, %cst_119 [1] : vector<128x128xf32> to vector<128xf32>
    %294 = vector.shape_cast %293 : vector<128xf32> to vector<128x1xf32>
    %cst_120 = arith.constant 1.280000e+02 : f32
    %295 = vector.broadcast %cst_120 : f32 to vector<128x1xf32>
    %296 = arith.divf %294, %295 : vector<128x1xf32>
    %297 = vector.broadcast %296 : vector<128x1xf32> to vector<128x128xf32>
    %298 = arith.subf %288, %297 : vector<128x128xf32>
    %299 = arith.mulf %298, %298 : vector<128x128xf32>
    %cst_121 = arith.constant dense<0.000000e+00> : vector<128xf32>
    %300 = vector.multi_reduction <add>, %299, %cst_121 [1] : vector<128x128xf32> to vector<128xf32>
    %301 = vector.shape_cast %300 : vector<128xf32> to vector<128x1xf32>
    %cst_122 = arith.constant 1.280000e+02 : f32
    %302 = vector.broadcast %cst_122 : f32 to vector<128x1xf32>
    %303 = arith.divf %301, %302 : vector<128x1xf32>
    %cst_123 = arith.constant 9.99999974E-6 : f32
    %304 = vector.broadcast %cst_123 : f32 to vector<128x1xf32>
    %305 = arith.addf %303, %304 : vector<128x1xf32>
    %306 = math.rsqrt %305 : vector<128x1xf32>
    %307 = vector.broadcast %306 : vector<128x1xf32> to vector<128x128xf32>
    %308 = arith.mulf %298, %307 : vector<128x128xf32>
    %309 = vector.broadcast %290 : vector<1x128xf32> to vector<128x128xf32>
    %310 = arith.mulf %308, %309 : vector<128x128xf32>
    %311 = vector.broadcast %292 : vector<1x128xf32> to vector<128x128xf32>
    %312 = arith.addf %310, %311 : vector<128x128xf32>
    %c0_124 = arith.constant 0 : index
    %c0_125 = arith.constant 0 : index
    %313 = vector.load %arg17[%c0_124, %c0_125] : memref<128x128xf32, #tpu.memory_space<vmem>>, vector<128x128xf32>
    tpu.vector_store %arg17[%c0_124, %c0_125], %312 {strides = array<i32>} : memref<128x128xf32, #tpu.memory_space<vmem>>, vector<128x128xf32>,
    %c0_126 = arith.constant 0 : index
    %c0_127 = arith.constant 0 : index
    %314 = tpu.strided_load %arg17[%c0_126, %c0_127] {strides = array<i32: 16, 1>} : memref<128x128xf32, #tpu.memory_space<vmem>>, vector<8x128xf32>
    %315 = arith.mulf %314, %314 : vector<8x128xf32>
    %cst_128 = arith.constant dense<0.000000e+00> : vector<8xf32>
    %316 = vector.multi_reduction <add>, %315, %cst_128 [1] : vector<8x128xf32> to vector<8xf32>
    %317 = vector.shape_cast %316 : vector<8xf32> to vector<8x1xf32>
    %cst_129 = arith.constant 9.99999996E-13 : f32
    %318 = vector.broadcast %cst_129 : f32 to vector<8x1xf32>
    %319 = arith.addf %317, %318 : vector<8x1xf32>
    %320 = math.rsqrt %319 : vector<8x1xf32>
    %321 = vector.broadcast %320 : vector<8x1xf32> to vector<8x128xf32>
    %322 = arith.mulf %314, %321 : vector<8x128xf32>
    %c0_130 = arith.constant 0 : index
    %c0_131 = arith.constant 0 : index
    %323 = vector.load %arg16[%c0_130, %c0_131] : memref<8x128xf32, #tpu.memory_space<vmem>>, vector<8x128xf32>
    tpu.vector_store %arg16[%c0_130, %c0_131], %322 {strides = array<i32>} : memref<8x128xf32, #tpu.memory_space<vmem>>, vector<8x128xf32>,
    return
  }
  func.func @transform_0(%arg0: i32) -> (i32, i32) {
    %c0_i32 = arith.constant 0 : i32
    %c0_i32_0 = arith.constant 0 : i32
    return %arg0, %c0_i32 : i32, i32
  }
  func.func @transform_1(%arg0: i32) -> (i32, i32) {
    %c0_i32 = arith.constant 0 : i32
    %c0_i32_0 = arith.constant 0 : i32
    %c0_i32_1 = arith.constant 0 : i32
    return %c0_i32, %c0_i32_0 : i32, i32
  }
  func.func @transform_2(%arg0: i32) -> (i32, i32) {
    %c0_i32 = arith.constant 0 : i32
    %c0_i32_0 = arith.constant 0 : i32
    %c0_i32_1 = arith.constant 0 : i32
    return %c0_i32, %c0_i32_0 : i32, i32
  }
  func.func @transform_3(%arg0: i32) -> (i32, i32, i32) {
    %c0_i32 = arith.constant 0 : i32
    %c0_i32_0 = arith.constant 0 : i32
    %c0_i32_1 = arith.constant 0 : i32
    %c0_i32_2 = arith.constant 0 : i32
    return %c0_i32, %c0_i32_0, %c0_i32_1 : i32, i32, i32
  }
  func.func @transform_4(%arg0: i32) -> (i32, i32, i32) {
    %c0_i32 = arith.constant 0 : i32
    %c0_i32_0 = arith.constant 0 : i32
    %c0_i32_1 = arith.constant 0 : i32
    %c0_i32_2 = arith.constant 0 : i32
    return %c0_i32, %c0_i32_0, %c0_i32_1 : i32, i32, i32
  }
  func.func @transform_5(%arg0: i32) -> (i32, i32, i32) {
    %c0_i32 = arith.constant 0 : i32
    %c0_i32_0 = arith.constant 0 : i32
    %c0_i32_1 = arith.constant 0 : i32
    %c0_i32_2 = arith.constant 0 : i32
    return %c0_i32, %c0_i32_0, %c0_i32_1 : i32, i32, i32
  }
  func.func @transform_6(%arg0: i32) -> (i32, i32, i32) {
    %c0_i32 = arith.constant 0 : i32
    %c0_i32_0 = arith.constant 0 : i32
    %c0_i32_1 = arith.constant 0 : i32
    %c0_i32_2 = arith.constant 0 : i32
    return %c0_i32, %c0_i32_0, %c0_i32_1 : i32, i32, i32
  }
  func.func @transform_7(%arg0: i32) -> (i32, i32, i32) {
    %c0_i32 = arith.constant 0 : i32
    %c0_i32_0 = arith.constant 0 : i32
    %c0_i32_1 = arith.constant 0 : i32
    %c0_i32_2 = arith.constant 0 : i32
    return %c0_i32, %c0_i32_0, %c0_i32_1 : i32, i32, i32
  }
  func.func @transform_8(%arg0: i32) -> (i32, i32, i32) {
    %c0_i32 = arith.constant 0 : i32
    %c0_i32_0 = arith.constant 0 : i32
    %c0_i32_1 = arith.constant 0 : i32
    %c0_i32_2 = arith.constant 0 : i32
    return %c0_i32, %c0_i32_0, %c0_i32_1 : i32, i32, i32
  }
  func.func @transform_9(%arg0: i32) -> (i32, i32, i32) {
    %c0_i32 = arith.constant 0 : i32
    %c0_i32_0 = arith.constant 0 : i32
    %c0_i32_1 = arith.constant 0 : i32
    %c0_i32_2 = arith.constant 0 : i32
    return %c0_i32, %c0_i32_0, %c0_i32_1 : i32, i32, i32
  }
  func.func @transform_10(%arg0: i32) -> (i32, i32, i32) {
    %c0_i32 = arith.constant 0 : i32
    %c0_i32_0 = arith.constant 0 : i32
    %c0_i32_1 = arith.constant 0 : i32
    %c0_i32_2 = arith.constant 0 : i32
    return %c0_i32, %c0_i32_0, %c0_i32_1 : i32, i32, i32
  }
  func.func @transform_11(%arg0: i32) -> (i32, i32, i32) {
    %c0_i32 = arith.constant 0 : i32
    %c0_i32_0 = arith.constant 0 : i32
    %c0_i32_1 = arith.constant 0 : i32
    %c0_i32_2 = arith.constant 0 : i32
    return %c0_i32, %c0_i32_0, %c0_i32_1 : i32, i32, i32
  }
  func.func @transform_12(%arg0: i32) -> (i32, i32, i32) {
    %c0_i32 = arith.constant 0 : i32
    %c0_i32_0 = arith.constant 0 : i32
    %c0_i32_1 = arith.constant 0 : i32
    %c0_i32_2 = arith.constant 0 : i32
    return %c0_i32, %c0_i32_0, %c0_i32_1 : i32, i32, i32
  }
  func.func @transform_13(%arg0: i32) -> (i32, i32, i32) {
    %c0_i32 = arith.constant 0 : i32
    %c0_i32_0 = arith.constant 0 : i32
    %c0_i32_1 = arith.constant 0 : i32
    %c0_i32_2 = arith.constant 0 : i32
    return %c0_i32, %c0_i32_0, %c0_i32_1 : i32, i32, i32
  }
  func.func @transform_14(%arg0: i32) -> (i32, i32, i32) {
    %c0_i32 = arith.constant 0 : i32
    %c0_i32_0 = arith.constant 0 : i32
    %c0_i32_1 = arith.constant 0 : i32
    %c0_i32_2 = arith.constant 0 : i32
    return %c0_i32, %c0_i32_0, %c0_i32_1 : i32, i32, i32
  }
  func.func @transform_15(%arg0: i32) -> (i32, i32) {
    %c0_i32 = arith.constant 0 : i32
    %c0_i32_0 = arith.constant 0 : i32
    return %arg0, %c0_i32 : i32, i32
  }
}

</mosaic_0001>

<bundles_post_ra>
// kernel: tpu_custom_call.1
= control target key start
LH: loop header
LB: loop body
LE: loop exit
PB: predicated region body
PF: predicated region fallthrough
CT: control target
= control target key end

     0   :  { %s21315_s0 = inlined_call_operand.hbm [shape: f32[256,128], index: 0, kind: input, shape index: {}]   ;;  %s21316_s1 = inlined_call_operand.hbm [shape: f32[1,128], index: 1, kind: input, shape index: {}]   ;;  %s21317_s2 = inlined_call_operand.hbm [shape: f32[1,128], index: 2, kind: input, shape index: {}]   ;;  %s21318_s3 = inlined_call_operand.hbm [shape: bf16[2,128,384], index: 3, kind: input, shape index: {}]   ;;  %s21319_s4 = inlined_call_operand.vmem [shape: f32[2,1,384], index: 4, kind: input, shape index: {}]   ;;  %s21320_s5 = inlined_call_operand.hbm [shape: bf16[2,128,128], index: 5, kind: input, shape index: {}]   ;;  %s21321_s6 = inlined_call_operand.vmem [shape: f32[2,1,128], index: 6, kind: input, shape index: {}]   ;;  %s21322_s7 = inlined_call_operand.vmem [shape: f32[2,1,128], index: 7, kind: input, shape index: {}]   ;;  %s21323_s8 = inlined_call_operand.vmem [shape: f32[2,1,128], index: 8, kind: input, shape index: {}]   ;;  %s21324_s9 = inlined_call_operand.hbm [shape: bf16[2,128,256], index: 9, kind: input, shape index: {}]   ;;  %s21325_s10 = inlined_call_operand.vmem [shape: f32[2,1,256], index: 10, kind: input, shape index: {}]   ;;  %s21326_s11 = inlined_call_operand.hbm [shape: bf16[2,256,128], index: 11, kind: input, shape index: {}]   ;;  %s21327_s12 = inlined_call_operand.vmem [shape: f32[2,1,128], index: 12, kind: input, shape index: {}]   ;;  %s21328_s13 = inlined_call_operand.vmem [shape: f32[2,1,128], index: 13, kind: input, shape index: {}]   ;;  %s21329_s14 = inlined_call_operand.vmem [shape: f32[2,1,128], index: 14, kind: input, shape index: {}]   ;;  %s21330_s15 = inlined_call_operand.hbm [shape: f32[16,128], index: 15, kind: output, shape index: {}]  }
   0x1   :  { %21436 = sst [smem:[#allocation79_spill]] %s21315_s0 }
   0x2   :  { %21437 = sst [smem:[#allocation80_spill]] %s21316_s1 }
   0x3   :  { %21438 = sst [smem:[#allocation81_spill]] %s21317_s2 }
   0x4   :  { %21439 = sst [smem:[#allocation82_spill]] %s21318_s3 }
   0x5   :  { %21440 = sst [smem:[#allocation83_spill]] %s21322_s7 }
   0x6   :  { %21441 = sst [smem:[#allocation84_spill]] %s21323_s8 }
   0x7   :  { %21442 = sst [smem:[#allocation85_spill]] %s21325_s10 }
   0x8   :  { %21443 = sst [smem:[#allocation86_spill]] %s21327_s12 }
   0x9   :  { %21444 = sst [smem:[#allocation87_spill]] %s21328_s13 }
   0xa   :  { %21445 = sst [smem:[#allocation88_spill]] %s21329_s14 }
   0xb   :  { %21446 = sst [smem:[#allocation89_spill]] %s21330_s15 }
   0xc   :  { %20 = vsyncpa [#allocation4], 0 }
   0xd   :  { %22 = vsyncpa [#allocation4 + $0x1], 0 }
   0xe   :  { %23 = vsyncpa [#allocation7], 0 }
   0xf   :  { %24 = vsyncpa [#allocation10], 0 }
  0x10   :  { %25 = vsyncpa [#allocation13], 0 }
  0x11   :  { %26 = vsyncpa [#allocation5], 0 }
  0x12   :  { %28 = vsyncpa [#allocation5 + $0x1], 0  ;;  %s16219_s18 = smov 0   ;;  %s16221_s19 = smov 0  }
  0x13   :  { %s16223_s20 = smov 0   ;;  %s16225_s21 = smov 0  }
  0x14 LB: > { %s16119_s22 = smov [#allocation6]   ;;  %s16240_s24 = sadd.s32 4294967295, %s16117_s21   ;;  %s16117_s21 = sphi %s16225_s21, %s21733_s21   ;;  %s16113_s20 = sphi %s16223_s20, %s21732_s20   ;;  %s16109_s19 = sphi %s16221_s19, %s21731_s19   ;;  %s16105_s18 = sphi %s16219_s18, %s21730_s18  }
  0x15   : > { %s398_s23 = sshll.u32 %s16119_s22, 4  ;;  %p12857_p0 = scmp.ge.s32.totalorder %s16117_s21, 1  ;;  %s16245_s23 = int_to_ptr.vmem [resolvable:$true] %s398_s23 }
  0x16   : > { %p21338_p1 = scmp.eq.s32.totalorder %s16240_s24, 0  ;;  %p385_p2 = scmp.lt.s32.totalorder %s16117_s21, 3 }
  0x17   : > { %s16120_s26 = smov [#allocation9]   ;;  %s16121_s29 = smov [#allocation12]  }
  0x18   : > { %p16247_p3 = pnand %p12857_p0, %p385_p2  ;;  %s419_s27 = sshll.u32 %s16120_s26, 4  ;;  %s16254_s27 = int_to_ptr.vmem [resolvable:$true] %s419_s27 }
  0x19   : > { %s457_s30 = sshll.u32 %s16121_s29, 4  ;;  %s21449_s1 = sld [smem:[#allocation80_spill]]  ;;  %s16262_s30 = int_to_ptr.vmem [resolvable:$true] %s457_s30 }
  0x1a   : > { %s21447_s25 = scalar_select %p16247_p3, 1, 0 }
  0x1b   : > { %p14548_p5 = pneg %p16247_p3 }
  0x1d   : > { %p16258_p6 = pnand %p14548_p5, %p21338_p1 }
  0x1f   : > { %s15841_s22 = scalar_lea.hbm %s21449_s1, 16  ;;  %p16272_p8 = pneg %p16258_p6 }
  0x20   : > { %p15842_p7 = scmp.ne.s32.totalorder %s21449_s1, %s15841_s22  ;;  %p15848_p11 = scmp.lt.u32.totalorder %s15841_s22, %s21449_s1 }
  0x22   : > { %p15844_p9 = pnand %p16272_p8, %p15842_p7 }
  0x24   : > { %p15845_p10 = pneg %p15844_p9 }
  0x26   : > { %p15850_p12 = pnand %p15848_p11, %p15845_p10 }
  0x28   : > { %15853 = shalt.err (!%p15850_p12)
}
  0x29   : > { %s15854_s14 = scalar_lea.vmem %s16245_s23, 16  ;;  %s15861_s15 = scalar_lea.vmem %s16245_s23, 32 }
  0x2a   : > { %p15855_p13 = scmp.ne.s32.totalorder %s16245_s23, %s15854_s14  ;;  %p15862_p5 = scmp.lt.s32.totalorder %s16245_s23, %s16245_s23 }
  0x2b   : > { %p15863_p7 = scmp.lt.s32.totalorder %s15861_s15, %s15854_s14 }
  0x2c   : > { %p15857_p0 = pnand %p15855_p13, %p16272_p8 }
  0x2d   : > { %p15864_p9 = por %p15863_p7, %p15862_p5 }
  0x2e   : > { %p15858_p2 = pneg %p15857_p0 }
  0x30   : > { %p15865_p4 = pnand %p15864_p9, %p15858_p2 }
  0x32   : > { %15868 = shalt.err (!%p15865_p4)
}
  0x33   : > { %14551 = dma.hbm_to_vmem [thread:$0]  (!%p16258_p6), %s21449_s1, 16, %s16245_s23, [#allocation7]  }
  0x34   : > { %s21451_s3 = sld [smem:[#allocation82_spill]] }
  0x3a   : > { %s15869_s29 = scalar_lea.hbm %s21451_s3, 6144 }
  0x3b   : > { %p15870_p10 = scmp.ne.s32.totalorder %s21451_s3, %s15869_s29  ;;  %p15876_p4 = scmp.lt.u32.totalorder %s15869_s29, %s21451_s3 }
  0x3d   : > { %p15872_p11 = pnand %p15870_p10, %p16272_p8 }
  0x3f   : > { %p15873_p12 = pneg %p15872_p11 }
  0x41   : > { %p15878_p13 = pnand %p15876_p4, %p15873_p12 }
  0x43   : > { %15881 = shalt.err (!%p15878_p13)
}
  0x44   : > { %s15882_s23 = scalar_lea.vmem %s16254_s27, 6144  ;;  %p15890_p7 = scmp.lt.s32.totalorder %s16254_s27, %s16254_s27 }
  0x45   : > { %p15883_p0 = scmp.ne.s32.totalorder %s16254_s27, %s15882_s23  ;;  %p15891_p9 = scmp.lt.s32.totalorder %s15882_s23, %s15882_s23 }
  0x47   : > { %p15885_p2 = pnand %p15883_p0, %p16272_p8  ;;  %p15892_p10 = por %p15891_p9, %p15890_p7 }
  0x49   : > { %p15886_p5 = pneg %p15885_p2 }
  0x4b   : > { %p15893_p11 = pnand %p15892_p10, %p15886_p5 }
  0x4d   : > { %15896 = shalt.err (!%p15893_p11)
}
  0x4e   : > { %s16122_s10 = smov 192   ;;  %s16123_s12 = smov 12  }
  0x4f   : > { %14557 = dma.hbm_to_vmem [thread:$0]  (!%p16258_p6), %s21451_s3, 6144, %s16254_s27, [#allocation10], %s16122_s10, %s16122_s10, %s16123_s12  }
  0x50   : > { %s15897_s29 = scalar_lea.hbm %s21324_s9, 4096 }
  0x51   : > { %p15898_p12 = scmp.ne.s32.totalorder %s21324_s9, %s15897_s29  ;;  %p15904_p0 = scmp.lt.u32.totalorder %s15897_s29, %s21324_s9 }
  0x53   : > { %p15900_p4 = pnand %p15898_p12, %p16272_p8 }
  0x55   : > { %p15901_p13 = pneg %p15900_p4 }
  0x57   : > { %p15906_p2 = pnand %p15904_p0, %p15901_p13 }
  0x59   : > { %15909 = shalt.err (!%p15906_p2)
}
  0x5a   : > { %s15910_s27 = scalar_lea.vmem %s16262_s30, 4096  ;;  %p15918_p10 = scmp.lt.s32.totalorder %s16262_s30, %s16262_s30 }
  0x5b   : > { %p15911_p5 = scmp.ne.s32.totalorder %s16262_s30, %s15910_s27  ;;  %p15919_p11 = scmp.lt.s32.totalorder %s15910_s27, %s15910_s27 }
  0x5d   : > { %p15913_p7 = pnand %p15911_p5, %p16272_p8  ;;  %p15920_p12 = por %p15919_p11, %p15918_p10 }
  0x5f   : > { %p15914_p9 = pneg %p15913_p7 }
  0x61   : > { %p15921_p4 = pnand %p15920_p12, %p15914_p9 }
  0x63   : > { %15924 = shalt.err (!%p15921_p4)
}
  0x64   : > { %s16124_s10 = smov 128   ;;  %s16125_s1 = smov 8  }
  0x65   : > { %14563 = dma.hbm_to_vmem [thread:$0]  (!%p16258_p6), %s21324_s9, 4096, %s16262_s30, [#allocation13], %s16124_s10, %s16124_s10, %s16125_s1  }
  0x66   : > { %s16126_s16 = smov [#allocation8]   ;;  %s16127_s22 = smov [#allocation11]  }
  0x67   : > { %s409_s17 = sshll.u32 %s16126_s16, 4  ;;  %s435_s29 = sshll.u32 %s16127_s22, 4  ;;  %s410_s17 = int_to_ptr.vmem [resolvable:$true] %s409_s17  ;;  %s436_s29 = int_to_ptr.vmem [resolvable:$true] %s435_s29 }
  0x68   : > { %s21452_s2 = sld [smem:[#allocation81_spill]] }
  0x6e   : > { %s15925_s23 = scalar_lea.hbm %s21452_s2, 16 }
  0x6f   : > { %p15926_p13 = scmp.ne.s32.totalorder %s21452_s2, %s15925_s23  ;;  %p15932_p5 = scmp.lt.u32.totalorder %s15925_s23, %s21452_s2 }
  0x71   : > { %p15928_p0 = pnand %p15926_p13, %p16272_p8 }
  0x73   : > { %p15929_p2 = pneg %p15928_p0 }
  0x75   : > { %p15934_p7 = pnand %p15932_p5, %p15929_p2 }
  0x77   : > { %15937 = shalt.err (!%p15934_p7)
}
  0x78   : > { %s15938_s30 = scalar_lea.vmem %s410_s17, 16  ;;  %s15945_s12 = scalar_lea.vmem %s410_s17, 32 }
  0x79   : > { %p15939_p9 = scmp.ne.s32.totalorder %s410_s17, %s15938_s30  ;;  %p15946_p12 = scmp.lt.s32.totalorder %s410_s17, %s410_s17 }
  0x7a   : > { %p15947_p4 = scmp.lt.s32.totalorder %s15945_s12, %s15938_s30 }
  0x7b   : > { %p15941_p10 = pnand %p15939_p9, %p16272_p8 }
  0x7c   : > { %p15948_p1 = por %p15947_p4, %p15946_p12 }
  0x7d   : > { %p15942_p11 = pneg %p15941_p10 }
  0x7f   : > { %p15949_p3 = pnand %p15948_p1, %p15942_p11 }
  0x81   : > { %15952 = shalt.err (!%p15949_p3)
}
  0x82   : > { %14554 = dma.hbm_to_vmem [thread:$0]  (!%p16258_p6), %s21452_s2, 16, %s410_s17, [#allocation7]  }
  0x83   : > { %s15953_s16 = scalar_lea.hbm %s21320_s5, 2048 }
  0x84   : > { %p15954_p13 = scmp.ne.s32.totalorder %s21320_s5, %s15953_s16  ;;  %p15960_p3 = scmp.lt.u32.totalorder %s15953_s16, %s21320_s5 }
  0x86   : > { %p15956_p0 = pnand %p15954_p13, %p16272_p8 }
  0x88   : > { %p15957_p1 = pneg %p15956_p0 }
  0x8a   : > { %p15962_p2 = pnand %p15960_p3, %p15957_p1 }
  0x8c   : > { %15965 = shalt.err (!%p15962_p2)
}
  0x8d   : > { %s15966_s27 = scalar_lea.vmem %s436_s29, 2048  ;;  %p15974_p10 = scmp.lt.s32.totalorder %s436_s29, %s436_s29 }
  0x8e   : > { %p15967_p5 = scmp.ne.s32.totalorder %s436_s29, %s15966_s27  ;;  %p15975_p11 = scmp.lt.s32.totalorder %s15966_s27, %s15966_s27 }
  0x90   : > { %p15969_p7 = pnand %p15967_p5, %p16272_p8  ;;  %p15976_p12 = por %p15975_p11, %p15974_p10 }
  0x92   : > { %p15970_p9 = pneg %p15969_p7 }
  0x94   : > { %p15977_p4 = pnand %p15976_p12, %p15970_p9 }
  0x96   : > { %15980 = shalt.err (!%p15977_p4)
}
  0x97   : > { %s16128_s17 = smov 64   ;;  %s16129_s30 = smov 4  }
  0x98   : > { %14560 = dma.hbm_to_vmem [thread:$0]  (!%p16258_p6), %s21320_s5, 2048, %s436_s29, [#allocation10], %s16128_s17, %s16128_s17, %s16129_s30  }
  0x99   : > { %s16130_s13 = smov [#allocation14]   ;;  %s15981_s22 = scalar_lea.hbm %s21326_s11, 4096 }
  0x9a   : > { %s473_s7 = sshll.u32 %s16130_s13, 4  ;;  %p15982_p13 = scmp.ne.s32.totalorder %s21326_s11, %s15981_s22  ;;  %s474_s7 = int_to_ptr.vmem [resolvable:$true] %s473_s7 }
  0x9b   : > { %p15988_p3 = scmp.lt.u32.totalorder %s15981_s22, %s21326_s11 }
  0x9c   : > { %p15984_p0 = pnand %p15982_p13, %p16272_p8 }
  0x9e   : > { %p15985_p1 = pneg %p15984_p0 }
  0xa0   : > { %p15990_p2 = pnand %p15988_p3, %p15985_p1 }
  0xa2   : > { %15993 = shalt.err (!%p15990_p2)
}
  0xa3   : > { %s15994_s29 = scalar_lea.vmem %s474_s7, 4096  ;;  %p16002_p10 = scmp.lt.s32.totalorder %s474_s7, %s474_s7 }
  0xa4   : > { %p15995_p5 = scmp.ne.s32.totalorder %s474_s7, %s15994_s29  ;;  %p16003_p11 = scmp.lt.s32.totalorder %s15994_s29, %s15994_s29 }
  0xa6   : > { %p15997_p7 = pnand %p15995_p5, %p16272_p8  ;;  %p16004_p12 = por %p16003_p11, %p16002_p10 }
  0xa8   : > { %p15998_p9 = pneg %p15997_p7 }
  0xaa   : > { %p16005_p4 = pnand %p16004_p12, %p15998_p9 }
  0xac   : > { %16008 = shalt.err (!%p16005_p4)
}
  0xad   : > { %14566 = dma.hbm_to_vmem [thread:$0]  (!%p16258_p6), %s21326_s11, 4096, %s474_s7, [#allocation13], %s16128_s17, %s16128_s17, %s16129_s30  }
  0xae   : > { %s12856_s26 = sadd.s32 4294967294, %s16117_s21   ;;  %s16399_s28 = sadd.s32 1, %s16117_s21  }
  0xaf   : > { %s38_s13 = ssub.s32 %s16117_s21, %s16399_s28  ;;  %s41_s8 = sadd.s32 1, %s16113_s20 }
  0xb0   : > { %p39_p8 = scmp.eq.s32.totalorder %s38_s13, 0  ;;  %p48_p13 = scmp.ne.s32.totalorder %s16113_s20, %s16109_s19 }
  0xb1   : > { %p49_p0 = scmp.eq.s32.totalorder %s16117_s21, 0  ;;  %p54_p1 = scmp.ne.s32.totalorder %s16109_s19, %s16105_s18 }
  0xb2   : > { %s16410_s16 = scalar_select %p39_p8, %s16113_s20, %s41_s8  }
  0xb3   : > { %p16412_p3 = por %p49_p0, %p48_p13  ;;  %p21454_p2 = scmp.eq.s32.totalorder %s16240_s24, 0 }
  0xb4   : > { %p372_p5 = scmp.eq.s32.totalorder %s16240_s24, 1  ;;  %p378_p7 = scmp.eq.s32.totalorder %s12856_s26, 1 }
  0xb5   : > { %p16418_p6 = por %p21454_p2, %p54_p1  ;;  %p14581_p9 = scmp.lt.s32.totalorder %s16117_s21, 2 }
  0xb6   : > { %s496_s30 = sand.u32 1, %s16113_s20   ;;  %p16425_p10 = por %p372_p5, %p48_p13 }
  0xb7   : > { %p16429_p11 = por %p378_p7, %p54_p1  ;;  %s12865_s15 = sshll.u32 %s496_s30, 7 }
  0xb8   : > { %s21456_s7 = scalar_select %p16425_p10, 1, 0 }
  0xb9   : > { %s21457_s14 = scalar_select %p16429_p11, 1, 0 }
  0xba   : > { %s13159_s23 = sshll.u32 %s16117_s21, 11  ;;  %s21458_s0 = sld [smem:[#allocation79_spill]] }
  0xbb   : > { %s500_s3 = scalar_lea.vmem [#allocation3], %s12865_s15  ;;  %p16443_p12 = pnand %p14581_p9, %p16412_p3 }
  0xbc   : > { %s507_s26 = sshll.u32 %s500_s3, 4  ;;  %s16447_s8 = scalar_lea.sflag [#allocation4], %s496_s30  ;;  %s16439_s26 = int_to_ptr.vmem [resolvable:$true] %s507_s26 }
  0xbd   : > { %p16011_p8 = pneg %p16443_p12 }
  0xc0   : > { %s16437_s12 = scalar_lea.hbm %s21458_s0, %s13159_s23  ;;  %s16014_s22 = scalar_lea.hbm %s21458_s0, 4096 }
  0xc1   : > { %s16009_s27 = scalar_lea.hbm %s16437_s12, 2048  ;;  %p16015_p1 = scmp.lt.u32.totalorder %s16437_s12, %s21458_s0 }
  0xc2   : > { %p16010_p4 = scmp.ne.s32.totalorder %s16437_s12, %s16009_s27  ;;  %p16016_p3 = scmp.lt.u32.totalorder %s16014_s22, %s16009_s27 }
  0xc3   : > { %p16018_p5 = scmp.lt.u32.totalorder %s16009_s27, %s16437_s12 }
  0xc4   : > { %p16012_p13 = pnand %p16011_p8, %p16010_p4  ;;  %p16017_p2 = por %p16016_p3, %p16015_p1 }
  0xc6   : > { %p16013_p0 = pneg %p16012_p13  ;;  %p16019_p7 = por %p16018_p5, %p16017_p2 }
  0xc8   : > { %p16020_p9 = pnand %p16019_p7, %p16013_p0 }
  0xca   : > { %16023 = shalt.err (!%p16020_p9)
}
  0xcb   : > { %s16024_s30 = scalar_lea.vmem %s16439_s26, 2048  ;;  %s16131_s15 = smov [#allocation3]  }
  0xcc   : > { %p16025_p4 = scmp.ne.s32.totalorder %s16439_s26, %s16024_s30  ;;  %s16029_s23 = sshll.u32 %s16131_s15, 4  ;;  %s16030_s23 = int_to_ptr.vmem [resolvable:$false] %s16029_s23 }
  0xcd   : > { %s16031_s29 = scalar_lea.vmem %s16030_s23, 4096  ;;  %p16032_p10 = scmp.lt.s32.totalorder %s16439_s26, %s16030_s23 }
  0xce   : > { %p16027_p13 = pnand %p16025_p4, %p16011_p8  ;;  %p16033_p1 = scmp.lt.s32.totalorder %s16031_s29, %s16024_s30 }
  0xd0   : > { %p16028_p11 = pneg %p16027_p13  ;;  %p16034_p3 = por %p16033_p1, %p16032_p10 }
  0xd2   : > { %p16035_p2 = pnand %p16034_p3, %p16028_p11 }
  0xd4   : > { %16038 = shalt.err (!%p16035_p2)
}
  0xd5   : > { %14570 = dma.hbm_to_vmem [thread:$0]  (!%p16443_p12), %s16437_s12, 2048, %s16439_s26, %s16447_s8, %s16124_s10, %s16124_s10, %s16125_s1  }
  0xd6   : > { %p21460_p8 = scmp.ne.s32.totalorder %s21447_s25, 0 }
  0xd8   : > { %519 = sbr.rel (%p21460_p8) target bundleno = 6126 (0x17ee), region = 80 }
  0xdf   : > { %s16481_s27 = sand.u32 1, %s16109_s19  }
  0xe0   : > { %s12869_s22 = sshll.u32 %s16481_s27, 7  ;;  %s522_s3 = scalar_lea.sflag [#allocation4], %s16481_s27 }
  0xe1   : > { %s16485_s30 = scalar_lea.vmem [#allocation3], %s12869_s22 }
  0xe2   : > { %16084 = dma.done.wait (%p16418_p6), %s522_s3, 2048  }
  0xe3   : > { %16086 = vsyncadd (%p16418_p6), %s522_s3, 4294965248  ;;  %p21461_p10 = scmp.eq.s32.totalorder %s16240_s24, 0 }
  0xe5   : > { %16088 = dma.done.wait (%p21461_p10), [#allocation7], 32   ;;  %p21462_p11 = pmov %p21461_p10 }
  0xe6   : > { %p21463_p12 = pmov %p21461_p10 }
  0xe7   : > { %16090 = vsyncadd (%p21462_p11), [#allocation7], 4294967264 }
  0xe8   : > { %16092 = dma.done.wait (%p21463_p12), [#allocation10], 8192   ;;  %p21464_p0 = pmov %p21461_p10 }
  0xea   : > { %16094 = vsyncadd (%p21464_p0), [#allocation10], 4294959104  ;;  %p21465_p5 = pmov %p21464_p0 }
  0xeb   : > { %p21466_p7 = pmov %p21464_p0 }
  0xec   : > { %16096 = dma.done.wait (%p21465_p5), [#allocation13], 8192  }
  0xed   : > { %16098 = vsyncadd (%p21466_p7), [#allocation13], 4294959104  ;;  %v598_v0 = vld [vmem:[%s16485_s30] sm:$0xff]  ;;  %v600_v1 = vld [vmem:[%s16485_s30 + $0x10] sm:$0xff]  ;;  %vm16134_vm0 = vmmov 0   ;;  %vm1448_vm1 = vcmask 261120  }
  0xee   : > { %616 = vadd.xlane.f32.xlu0 %v598_v0  ;;  %620 = vadd.xlane.f32.xlu1 %v600_v1  ;;  %v599_v2 = vld [vmem:[%s16485_s30 + $0x8] sm:$0xff]  ;;  %v601_v3 = vld [vmem:[%s16485_s30 + $0x18] sm:$0xff]  ;;  %v602_v4 = vld [vmem:[%s16485_s30 + $0x20] sm:$0xff]  ;;  %s16135_s1 = smov 96   ;;  %s16136_s17 = smov 64   ;;  %vm2953_vm2 = vcmask 130048  }
  0xef   : > { %v603_v5 = vld [vmem:[%s16485_s30 + $0x28] sm:$0xff]  ;;  %v16510_v6 = vld [vmem:[%s16485_s30 + $0x30] sm:$0xff]  ;;  %v16513_v7 = vld [vmem:[%s16485_s30 + $0x38] sm:$0xff]  ;;  %s16137_s12 = smov 32   ;;  %vm5306_vm3 = vcmask 523264   ;;  %vm5323_vm4 = vcmask 785408  }
  0xf0   : > { %v16516_v8 = vld [vmem:[%s16485_s30 + $0x40] sm:$0xff]  ;;  %v16519_v9 = vld [vmem:[%s16485_s30 + $0x48] sm:$0xff]  ;;  %v16524_v10 = vld [vmem:[%s16485_s30 + $0x50] sm:$0xff]  ;;  %s21584_s23 = sld [smem:[#allocation83_spill]]  ;;  %s21585_s3 = sld [smem:[#allocation84_spill]] }
  0xf1   : > { %v16527_v11 = vld [vmem:[%s16485_s30 + $0x58] sm:$0xff]  ;;  %v16532_v12 = vld [vmem:[%s16485_s30 + $0x60] sm:$0xff]  ;;  %v16535_v13 = vld [vmem:[%s16485_s30 + $0x68] sm:$0xff]  ;;  %s21589_s10 = sld [smem:[#allocation85_spill]]  ;;  %s21593_s8 = sld [smem:[#allocation86_spill]] }
  0xf2   : > { %618 = vadd.xlane.f32.xlu0 %v599_v2  ;;  %622 = vadd.xlane.f32.xlu1 %v601_v3  ;;  %v16540_v14 = vld [vmem:[%s16485_s30 + $0x70] sm:$0xff]  ;;  %v16543_v15 = vld [vmem:[%s16485_s30 + $0x78] sm:$0xff]  ;;  %v14882_v18 = vld [vmem:[#allocation9 + $0x1c] ss:$12 sps:$4 sm:$0xff]   ;;  %s21598_s22 = sld [smem:[#allocation87_spill]]  ;;  %s21599_s26 = sld [smem:[#allocation88_spill]] }
  0xf3   : > { %v14879_v16 = vld [vmem:[#allocation9 + $0x4] ss:$12 sps:$4 sm:$0xff]   ;;  %v14881_v17 = vld [vmem:[#allocation9] ss:$12 sps:$4 sm:$0xff]   ;;  %v14884_v19 = vld [vmem:[#allocation9 + $0x8] ss:$12 sps:$4 sm:$0xff]  }
  0xf4   : > { %1022 = vmatprep.subr.bf16.mxu0 %v14879_v16  ;;  %13608 = vmatprep.subr.bf16.mxu1 %v14884_v19  ;;  %v14885_v58 = vld [vmem:[#allocation9 + $0x18] ss:$12 sps:$4 sm:$0xff]   ;;  %s12876_s13 = sshll.u32 %s16481_s27, 3  ;;  %s13156_s15 = sshll.u32 %s16240_s24, 7 }
  0xf5   : > { %1023 = vmatpush1.bf16.msra.mxu0 %v14881_v17  ;;  %13609 = vmatpush3.bf16.msra.mxu1 %v14884_v19  ;;  %v14892_v19 = vld [vmem:[#allocation9 + $0x38] ss:$12 sps:$4 sm:$0xff]   ;;  %s21726_s30 = sld [smem:[#allocation89_spill]]  ;;  %s12716_s0 = scalar_lea.sflag [#allocation5], %s16481_s27 }
  0xf6   : > { %624 = vadd.xlane.f32.xlu0 %v602_v4  ;;  %626 = vadd.xlane.f32.xlu1 %v603_v5  ;;  %p21727_p9 = scmp.ne.s32.totalorder %s21456_s7, 0  ;;  %s16138_s24 = smov [#allocation15]  }
  0xf7   : > { %1024 = vmatprep.subr.bf16.mxu0 %v14882_v18  ;;  %v14890_v18 = vld [vmem:[#allocation9 + $0x4c] ss:$12 sps:$4 sm:$0xff]  }
  0xf9   : > { %1025 = vmatpush1.bf16.msra.mxu0 %v14885_v58 }
  0xfa   : > { %628 = vadd.xlane.f32.xlu0 %v16510_v6  ;;  %630 = vadd.xlane.f32.xlu1 %v16513_v7 }
  0xfb   : > { %s21271_s25 = scalar_lea.hbm %s21726_s30, %s13156_s15 }
  0xfe   : > { %632 = vadd.xlane.f32.xlu0 %v16516_v8  ;;  %634 = vadd.xlane.f32.xlu1 %v16519_v9 }
 0x102   : > { %636 = vadd.xlane.f32.xlu0 %v16524_v10  ;;  %638 = vadd.xlane.f32.xlu1 %v16527_v11 }
 0x106   : > { %640 = vadd.xlane.f32.xlu0 %v16532_v12  ;;  %642 = vadd.xlane.f32.xlu1 %v16535_v13 }
 0x10a   : > { %644 = vadd.xlane.f32.xlu0 %v16540_v14  ;;  %646 = vadd.xlane.f32.xlu1 %v16543_v15 }
 0x17b   : > { %v617_v20 = vpop.xlane.xlu0 %616  ;;  %v621_v21 = vpop.xlane.xlu1 %620 }
 0x17c   : > { %v649_v22 = vmul.f32 0.0078125, %v617_v20  ;;  %v651_v23 = vmul.f32 0.0078125, %v621_v21 }
 0x17e   : > { %v16549_v24 = vsub.f32 %v598_v0, %v649_v22  ;;  %v16551_v25 = vsub.f32 %v600_v1, %v651_v23  ;;  %v14886_v0 = vld [vmem:[#allocation9 + $0x34] ss:$12 sps:$4 sm:$0xff]  }
 0x17f   : > { %v619_v26 = vpop.xlane.xlu0 %618  ;;  %v623_v27 = vpop.xlane.xlu1 %622  ;;  %v14888_v1 = vld [vmem:[#allocation9 + $0x20] ss:$12 sps:$4 sm:$0xff]   ;;  %1026 = vmatprep.subr.bf16.mxu0 %v14886_v0  ;;  %v14893_v22 = vld [vmem:[#allocation9 + $0x48] ss:$12 sps:$4 sm:$0xff]  }
 0x180   : > { %v650_v28 = vmul.f32 0.0078125, %v619_v26  ;;  %v681_v29 = vmul.f32 %v16549_v24, %v16549_v24  ;;  %v652_v30 = vmul.f32 0.0078125, %v623_v27  ;;  %v683_v31 = vmul.f32 %v16551_v25, %v16551_v25  ;;  %13610 = vmatprep.subr.bf16.mxu1 %v14888_v1 }
 0x181   : > { %13611 = vmatpush3.bf16.msra.mxu1 %v14888_v1 }
 0x182   : > { %697 = vadd.xlane.f32.xlu0 %v681_v29  ;;  %v16557_v32 = vsub.f32 %v599_v2, %v650_v28  ;;  %v16559_v33 = vsub.f32 %v601_v3, %v652_v30  ;;  %13612 = vmatprep.subr.bf16.mxu1 %v14892_v19  ;;  %v14894_v29 = vld [vmem:[#allocation9 + $0x64] ss:$12 sps:$4 sm:$0xff]  }
 0x183   : > { %v625_v34 = vpop.xlane.xlu0 %624  ;;  %v627_v35 = vpop.xlane.xlu1 %626  ;;  %v14896_v30 = vld [vmem:[#allocation9 + $0x50] ss:$12 sps:$4 sm:$0xff]  }
 0x184   : > { %v653_v36 = vmul.f32 0.0078125, %v625_v34  ;;  %v682_v37 = vmul.f32 %v16557_v32, %v16557_v32  ;;  %v654_v38 = vmul.f32 0.0078125, %v627_v35  ;;  %v684_v39 = vmul.f32 %v16559_v33, %v16559_v33 }
 0x185   : > { %13613 = vmatpush3.bf16.msra.mxu1 %v14892_v19 }
 0x186   : > { %701 = vadd.xlane.f32.xlu0 %v683_v31  ;;  %699 = vadd.xlane.f32.xlu1 %v682_v37  ;;  %v16565_v40 = vsub.f32 %v602_v4, %v653_v36  ;;  %v16567_v41 = vsub.f32 %v603_v5, %v654_v38  ;;  %v14897_v31 = vld [vmem:[#allocation9 + $0x60] ss:$12 sps:$4 sm:$0xff]   ;;  %v14900_v36 = vld [vmem:[#allocation9 + $0x68] ss:$12 sps:$4 sm:$0xff]   ;;  %v14901_v37 = vld [vmem:[#allocation9 + $0x78] ss:$12 sps:$4 sm:$0xff]  }
 0x187   : > { %v629_v42 = vpop.xlane.xlu0 %628  ;;  %v631_v43 = vpop.xlane.xlu1 %630  ;;  %13614 = vmatprep.subr.bf16.mxu1 %v14896_v30  ;;  %v14904_v38 = vld [vmem:[#allocation9 + $0x80] ss:$12 sps:$4 sm:$0xff]  }
 0x188   : > { %v655_v44 = vmul.f32 0.0078125, %v629_v42  ;;  %v685_v45 = vmul.f32 %v16565_v40, %v16565_v40  ;;  %v656_v46 = vmul.f32 0.0078125, %v631_v43  ;;  %v686_v47 = vmul.f32 %v16567_v41, %v16567_v41  ;;  %v14906_v42 = vld [vmem:[#allocation9 + $0xac] ss:$12 sps:$4 sm:$0xff]  }
 0x189   : > { %13615 = vmatpush3.bf16.msra.mxu1 %v14896_v30  ;;  %v14908_v43 = vld [vmem:[#allocation9 + $0x98] ss:$12 sps:$4 sm:$0xff]  }
 0x18a   : > { %703 = vadd.xlane.f32.xlu1 %v684_v39  ;;  %705 = vadd.xlane.f32.xlu0 %v685_v45  ;;  %v16574_v48 = vsub.f32 %v16510_v6, %v655_v44  ;;  %v16577_v49 = vsub.f32 %v16513_v7, %v656_v46  ;;  %v14889_v7 = vld [vmem:[#allocation9 + $0x30] ss:$12 sps:$4 sm:$0xff]   ;;  %v14909_v44 = vld [vmem:[#allocation9 + $0xa8] ss:$12 sps:$4 sm:$0xff]   ;;  %v21342_v46 = vmov 0  }
 0x18b   : > { %v633_v50 = vpop.xlane.xlu0 %632  ;;  %v635_v51 = vpop.xlane.xlu1 %634  ;;  %1027 = vmatpush1.bf16.msra.mxu0 %v14889_v7  ;;  %13616 = vmatprep.subr.bf16.mxu1 %v14900_v36  ;;  %v14905_v39 = vld [vmem:[#allocation9 + $0x90] ss:$12 sps:$4 sm:$0xff]  }
 0x18c   : > { %v657_v52 = vmul.f32 0.0078125, %v633_v50  ;;  %v687_v53 = vmul.f32 %v16574_v48, %v16574_v48  ;;  %v658_v54 = vmul.f32 0.0078125, %v635_v51  ;;  %v688_v55 = vmul.f32 %v16577_v49, %v16577_v49  ;;  %1028 = vmatprep.subr.bf16.mxu0 %v14890_v18  ;;  %v14910_v45 = vld [vmem:[#allocation9 + $0xb0] ss:$12 sps:$4 sm:$0xff]   ;;  %1054 = vmatprep.mubr.bf16.mxu0 %v21342_v46 }
 0x18d   : > { %13617 = vmatpush3.bf16.msra.mxu1 %v14900_v36 }
 0x18e   : > { %707 = vadd.xlane.f32.xlu1 %v686_v47  ;;  %709 = vadd.xlane.f32.xlu0 %v687_v53  ;;  %v16584_v56 = vsub.f32 %v16516_v8, %v657_v52  ;;  %v16587_v57 = vsub.f32 %v16519_v9, %v658_v54 }
 0x18f   : > { %v637_v59 = vpop.xlane.xlu0 %636  ;;  %v639_v60 = vpop.xlane.xlu1 %638  ;;  %1029 = vmatpush1.bf16.msra.mxu0 %v14893_v22  ;;  %13618 = vmatprep.subr.bf16.mxu1 %v14904_v38  ;;  %v16625_v22 = vld [vmem:[#allocation6] ss:$0 sm:$0xff] }
 0x190   : > { %v659_v61 = vmul.f32 0.0078125, %v637_v59  ;;  %v689_v62 = vmul.f32 %v16584_v56, %v16584_v56  ;;  %v660_v63 = vmul.f32 0.0078125, %v639_v60  ;;  %v690_v2 = vmul.f32 %v16587_v57, %v16587_v57  ;;  %1030 = vmatprep.subr.bf16.mxu0 %v14894_v29 }
 0x191   : > { %13619 = vmatpush3.bf16.msra.mxu1 %v14904_v38 }
 0x192   : > { %711 = vadd.xlane.f32.xlu1 %v688_v55  ;;  %713 = vadd.xlane.f32.xlu0 %v689_v62  ;;  %v16594_v3 = vsub.f32 %v16524_v10, %v659_v61  ;;  %v16597_v4 = vsub.f32 %v16527_v11, %v660_v63 }
 0x193   : > { %v641_v5 = vpop.xlane.xlu0 %640  ;;  %v643_v6 = vpop.xlane.xlu1 %642  ;;  %1031 = vmatpush1.bf16.msra.mxu0 %v14897_v31  ;;  %13620 = vmatprep.subr.bf16.mxu1 %v14908_v43 }
 0x194   : > { %v661_v8 = vmul.f32 0.0078125, %v641_v5  ;;  %v691_v9 = vmul.f32 %v16594_v3, %v16594_v3  ;;  %v662_v16 = vmul.f32 0.0078125, %v643_v6  ;;  %v692_v10 = vmul.f32 %v16597_v4, %v16597_v4 }
 0x195   : > { %13621 = vmatpush3.bf16.msra.mxu1 %v14908_v43 }
 0x196   : > { %715 = vadd.xlane.f32.xlu1 %v690_v2  ;;  %717 = vadd.xlane.f32.xlu0 %v691_v9  ;;  %v16604_v11 = vsub.f32 %v16532_v12, %v661_v8  ;;  %v16607_v17 = vsub.f32 %v16535_v13, %v662_v16 }
 0x197   : > { %v645_v20 = vpop.xlane.xlu0 %644  ;;  %v647_v21 = vpop.xlane.xlu1 %646  ;;  %13622 = vmatprep.subr.bf16.mxu1 %v14910_v45 }
 0x198   : > { %v663_v23 = vmul.f32 0.0078125, %v645_v20  ;;  %v693_v26 = vmul.f32 %v16604_v11, %v16604_v11  ;;  %v664_v27 = vmul.f32 0.0078125, %v647_v21  ;;  %v694_v12 = vmul.f32 %v16607_v17, %v16607_v17 }
 0x199   : > { %13623 = vmatpush3.bf16.msra.mxu1 %v14910_v45 }
 0x19a   : > { %719 = vadd.xlane.f32.xlu1 %v692_v10  ;;  %721 = vadd.xlane.f32.xlu0 %v693_v26  ;;  %v16614_v13 = vsub.f32 %v16540_v14, %v663_v23  ;;  %v16617_v28 = vsub.f32 %v16543_v15, %v664_v27  ;;  %v14898_v14 = vld [vmem:[#allocation9 + $0x7c] ss:$12 sps:$4 sm:$0xff]   ;;  %v14902_v15 = vld [vmem:[#allocation9 + $0x94] ss:$12 sps:$4 sm:$0xff]  }
 0x19b   : > { %1032 = vmatprep.subr.bf16.mxu0 %v14898_v14 }
 0x19c   : > { %v695_v34 = vmul.f32 %v16614_v13, %v16614_v13  ;;  %v696_v35 = vmul.f32 %v16617_v28, %v16617_v28  ;;  %1033 = vmatpush1.bf16.msra.mxu0 %v14901_v37 }
 0x19d   : > { %1034 = vmatprep.subr.bf16.mxu0 %v14902_v15 }
 0x19e   : > { %723 = vadd.xlane.f32.xlu1 %v694_v12  ;;  %725 = vadd.xlane.f32.xlu0 %v695_v34 }
 0x1a0   : > { %1035 = vmatpush1.bf16.msra.mxu0 %v14905_v39 }
 0x1a1   : > { %1036 = vmatprep.subr.bf16.mxu0 %v14906_v42 }
 0x1a2   : > { %727 = vadd.xlane.f32.xlu1 %v696_v35 }
 0x1a4   : > { %1037 = vmatpush1.bf16.msra.mxu0 %v14909_v44 }
 0x20f   : > { %v698_v47 = vpop.xlane.xlu0 %697 }
 0x210   : > { %v729_v50 = vmul.f32 0.0078125, %v698_v47 }
 0x212   : > { %v745_v51 = vadd.f32 1e-05, %v729_v50 }
 0x213   : > { %v700_v52 = vpop.xlane.xlu1 %699  ;;  %v702_v53 = vpop.xlane.xlu0 %701 }
 0x214   : > { %15039 = vrsqrt.f32 %v745_v51  ;;  %v730_v54 = vmul.f32 0.0078125, %v700_v52  ;;  %v731_v55 = vmul.f32 0.0078125, %v702_v53 }
 0x216   : > { %v746_v58 = vadd.f32 1e-05, %v730_v54  ;;  %v747_v59 = vadd.f32 1e-05, %v731_v55 }
 0x217   : > { %v704_v60 = vpop.xlane.xlu1 %703  ;;  %v706_v61 = vpop.xlane.xlu0 %705 }
 0x218   : > { %15041 = vrsqrt.f32 %v746_v58  ;;  %v732_v62 = vmul.f32 0.0078125, %v704_v60  ;;  %v733_v63 = vmul.f32 0.0078125, %v706_v61 }
 0x219   : > { %15043 = vrsqrt.f32 %v747_v59 }
 0x21a   : > { %v748_v0 = vadd.f32 1e-05, %v732_v62  ;;  %v749_v1 = vadd.f32 1e-05, %v733_v63 }
 0x21b   : > { %v708_v2 = vpop.xlane.xlu1 %707  ;;  %v710_v5 = vpop.xlane.xlu0 %709 }
 0x21c   : > { %15045 = vrsqrt.f32 %v748_v0  ;;  %v734_v6 = vmul.f32 0.0078125, %v708_v2  ;;  %v735_v7 = vmul.f32 0.0078125, %v710_v5 }
 0x21d   : > { %15047 = vrsqrt.f32 %v749_v1 }
 0x21e   : > { %v15040_v8 = vpop.eup %15039  ;;  %v750_v9 = vadd.f32 1e-05, %v734_v6  ;;  %v751_v16 = vadd.f32 1e-05, %v735_v7 }
 0x21f   : > { %v712_v10 = vpop.xlane.xlu1 %711  ;;  %v714_v18 = vpop.xlane.xlu0 %713  ;;  %v777_v19 = vmul.f32 %v15040_v8, %v16549_v24  ;;  %v16629_v24 = vld [vmem:[#allocation8] ss:$0 sm:$0xff] }
 0x220   : > { %15049 = vrsqrt.f32 %v750_v9  ;;  %v736_v20 = vmul.f32 0.0078125, %v712_v10  ;;  %v737_v21 = vmul.f32 0.0078125, %v714_v18 }
 0x221   : > { %15051 = vrsqrt.f32 %v751_v16  ;;  %v799_v34 = vmul.f32 %v16625_v22, %v777_v19 }
 0x222   : > { %v15042_v23 = vpop.eup %15041  ;;  %v752_v26 = vadd.f32 1e-05, %v736_v20  ;;  %v753_v27 = vadd.f32 1e-05, %v737_v21 }
 0x223   : > { %v15044_v12 = vpop.eup %15043  ;;  %v716_v29 = vpop.xlane.xlu1 %715  ;;  %v778_v31 = vmul.f32 %v15042_v23, %v16557_v32  ;;  %v16635_v45 = vadd.f32 %v16629_v24, %v799_v34 }
 0x224   : > { %v718_v30 = vpop.xlane.xlu0 %717  ;;  %15053 = vrsqrt.f32 %v752_v26  ;;  %v738_v35 = vmul.f32 0.0078125, %v716_v29  ;;  %v779_v36 = vmul.f32 %v15044_v12, %v16551_v25 }
 0x225   : > { %v739_v14 = vmul.f32 0.0078125, %v718_v30  ;;  %15055 = vrsqrt.f32 %v753_v27  ;;  %v800_v37 = vmul.f32 %v16625_v22, %v778_v31  ;;  %21467 = vst [vmem:[#allocation21_spill] sm:$0xff] %v16635_v45 }
 0x226   : > { %v15046_v15 = vpop.eup %15045  ;;  %v754_v38 = vadd.f32 1e-05, %v738_v35  ;;  %v801_v42 = vmul.f32 %v16625_v22, %v779_v36 }
 0x227   : > { %v755_v39 = vadd.f32 1e-05, %v739_v14  ;;  %v15048_v43 = vpop.eup %15047  ;;  %v720_v44 = vpop.xlane.xlu1 %719  ;;  %v16638_v47 = vadd.f32 %v16629_v24, %v800_v37  ;;  %v780_v50 = vmul.f32 %v15046_v15, %v16559_v33 }
 0x228   : > { %v722_v32 = vpop.xlane.xlu0 %721  ;;  %15057 = vrsqrt.f32 %v754_v38  ;;  %v740_v25 = vmul.f32 0.0078125, %v720_v44  ;;  %v781_v54 = vmul.f32 %v15048_v43, %v16565_v40  ;;  %v16646_v60 = vadd.f32 %v16629_v24, %v801_v42 }
 0x229   : > { %21468 = vst [vmem:[#allocation22_spill] sm:$0xff] %v16638_v47  ;;  %v741_v51 = vmul.f32 0.0078125, %v722_v32  ;;  %15059 = vrsqrt.f32 %v755_v39  ;;  %v837_v52 = vpack.c.bf16 %v16638_v47, %v16635_v45  ;;  %v802_v53 = vmul.f32 %v16625_v22, %v780_v50 }
 0x22a   : > { %v15050_v55 = vpop.eup %15049  ;;  %v756_v58 = vadd.f32 1e-05, %v740_v25  ;;  %21469 = vst [vmem:[#allocation23_spill] sm:$0xff] %v16646_v60  ;;  %v803_v1 = vmul.f32 %v16625_v22, %v781_v54 }
 0x22b   : > { %v757_v59 = vadd.f32 1e-05, %v741_v51  ;;  %v15052_v61 = vpop.eup %15051  ;;  %v724_v62 = vpop.xlane.xlu1 %723  ;;  %1055 = vmatmul.mubr.bf16.vlgmr.msra.gmra.mrb[0].mxu0 %v837_v52  ;;  %13624 = vmatprep.mubr.bf16.mxu1 %v837_v52  ;;  %v16649_v63 = vadd.f32 %v16629_v24, %v802_v53  ;;  %v782_v0 = vmul.f32 %v15050_v55, %v16567_v41 }
 0x22c   : > { %v726_v33 = vpop.xlane.xlu0 %725  ;;  %15061 = vrsqrt.f32 %v756_v58  ;;  %v742_v40 = vmul.f32 0.0078125, %v724_v62  ;;  %1064 = vmatprep.mubr.bf16.mxu0 %v21342_v46  ;;  %v783_v5 = vmul.f32 %v15052_v61, %v16574_v48  ;;  %v16660_v19 = vadd.f32 %v16629_v24, %v803_v1 }
 0x22d   : > { %21470 = vst [vmem:[#allocation24_spill] sm:$0xff] %v16649_v63  ;;  %v743_v2 = vmul.f32 0.0078125, %v726_v33  ;;  %15063 = vrsqrt.f32 %v757_v59  ;;  %v838_v6 = vpack.c.bf16 %v16649_v63, %v16646_v60  ;;  %v804_v7 = vmul.f32 %v16625_v22, %v782_v0 }
 0x22e   : > { %v15054_v8 = vpop.eup %15053  ;;  %v758_v9 = vadd.f32 1e-05, %v742_v40  ;;  %v805_v41 = vmul.f32 %v16625_v22, %v783_v5  ;;  %21471 = vst [vmem:[#allocation25_spill] sm:$0xff] %v16660_v19 }
 0x22f   : > { %v759_v16 = vadd.f32 1e-05, %v743_v2  ;;  %v15056_v10 = vpop.eup %15055  ;;  %v728_v18 = vpop.xlane.xlu1 %727  ;;  %13625 = vmatmul.mubr.bf16.vlgmr.msra.gmra.mrb[0].mxu1 %v838_v6  ;;  %v16663_v20 = vadd.f32 %v16629_v24, %v804_v7  ;;  %v784_v48 = vmul.f32 %v15054_v8, %v16577_v49  ;;  %v877_v2 = vld [vmem:[%s21319_s4] sm:$0x7] }
 0x230   : > { %15065 = vrsqrt.f32 %v758_v9  ;;  %v744_v21 = vmul.f32 0.0078125, %v728_v18  ;;  %v785_v23 = vmul.f32 %v15056_v10, %v16584_v56  ;;  %v16671_v30 = vadd.f32 %v16629_v24, %v805_v41 }
 0x231   : > { %21472 = vst [vmem:[#allocation26_spill] sm:$0xff] %v16663_v20  ;;  %15067 = vrsqrt.f32 %v759_v16  ;;  %v839_v26 = vpack.c.bf16 %v16663_v20, %v16660_v19  ;;  %v806_v27 = vmul.f32 %v16625_v22, %v784_v48 }
 0x232   : > { %v15058_v12 = vpop.eup %15057  ;;  %v760_v29 = vadd.f32 1e-05, %v744_v21  ;;  %21473 = vst [vmem:[#allocation27_spill] sm:$0xff] %v16671_v30  ;;  %v807_v56 = vmul.f32 %v16625_v22, %v785_v23 }
 0x233   : > { %v15060_v31 = vpop.eup %15059  ;;  %1065 = vmatmul.mubr.bf16.gmra.mrb[4].mxu0 %v838_v6  ;;  %13628 = vmatprep.mubr.bf16.mxu1 %v839_v26  ;;  %v16674_v49 = vadd.f32 %v16629_v24, %v806_v27  ;;  %v786_v34 = vmul.f32 %v15058_v12, %v16587_v57 }
 0x234   : > { %15069 = vrsqrt.f32 %v760_v29  ;;  %1074 = vmatprep.mubr.bf16.mxu0 %v21342_v46  ;;  %v787_v35 = vmul.f32 %v15060_v31, %v16594_v3  ;;  %v16685_v39 = vadd.f32 %v16629_v24, %v807_v56 }
 0x235   : > { %21474 = vst [vmem:[#allocation28_spill] sm:$0xff] %v16674_v49  ;;  %v840_v14 = vpack.c.bf16 %v16674_v49, %v16671_v30  ;;  %v808_v36 = vmul.f32 %v16625_v22, %v786_v34 }
 0x236   : > { %v15062_v37 = vpop.eup %15061  ;;  %v809_v15 = vmul.f32 %v16625_v22, %v787_v35  ;;  %21475 = vst [vmem:[#allocation29_spill] sm:$0xff] %v16685_v39 }
 0x237   : > { %v15064_v38 = vpop.eup %15063  ;;  %13629 = vmatmul.mubr.bf16.gmra.mrb[4].mxu1 %v840_v14  ;;  %v16688_v57 = vadd.f32 %v16629_v24, %v808_v36  ;;  %v788_v42 = vmul.f32 %v15062_v37, %v16597_v4 }
 0x238   : > { %v789_v3 = vmul.f32 %v15064_v38, %v16604_v11  ;;  %v16696_v50 = vadd.f32 %v16629_v24, %v809_v15 }
 0x239   : > { %21476 = vst [vmem:[#allocation30_spill] sm:$0xff] %v16688_v57  ;;  %v841_v43 = vpack.c.bf16 %v16688_v57, %v16685_v39  ;;  %v810_v44 = vmul.f32 %v16625_v22, %v788_v42 }
 0x23a   : > { %v15066_v32 = vpop.eup %15065  ;;  %21477 = vst [vmem:[#allocation31_spill] sm:$0xff] %v16696_v50  ;;  %v811_v4 = vmul.f32 %v16625_v22, %v789_v3 }
 0x23b   : > { %v15068_v25 = vpop.eup %15067  ;;  %1075 = vmatmul.mubr.bf16.gmra.mrb[8].mxu0 %v839_v26  ;;  %13632 = vmatprep.mubr.bf16.mxu1 %v841_v43  ;;  %v16699_v51 = vadd.f32 %v16629_v24, %v810_v44  ;;  %v790_v52 = vmul.f32 %v15066_v32, %v16607_v17 }
 0x23c   : > { %1084 = vmatprep.mubr.bf16.mxu0 %v21342_v46  ;;  %v791_v11 = vmul.f32 %v15068_v25, %v16614_v13  ;;  %v16709_v58 = vadd.f32 %v16629_v24, %v811_v4 }
 0x23d   : > { %21478 = vst [vmem:[#allocation32_spill] sm:$0xff] %v16699_v51  ;;  %v842_v53 = vpack.c.bf16 %v16699_v51, %v16696_v50  ;;  %v812_v54 = vmul.f32 %v16625_v22, %v790_v52 }
 0x23e   : > { %v15070_v55 = vpop.eup %15069  ;;  %21479 = vst [vmem:[#allocation33_spill] sm:$0xff] %v16709_v58  ;;  %v813_v61 = vmul.f32 %v16625_v22, %v791_v11 }
 0x23f   : > { %13633 = vmatmul.mubr.bf16.gmra.mrb[8].mxu1 %v842_v53  ;;  %v16712_v59 = vadd.f32 %v16629_v24, %v812_v54  ;;  %v792_v17 = vmul.f32 %v15070_v55, %v16617_v28 }
 0x240   : > { %v16720_v33 = vadd.f32 %v16629_v24, %v813_v61 }
 0x241   : > { %21480 = vst [vmem:[#allocation34_spill] sm:$0xff] %v16712_v59  ;;  %v843_v13 = vpack.c.bf16 %v16712_v59, %v16709_v58  ;;  %v814_v62 = vmul.f32 %v16625_v22, %v792_v17  ;;  %v21344_v22 = vmov 0.0  }
 0x242   : > { %21481 = vst [vmem:[#allocation35_spill] sm:$0xff] %v16720_v33  ;;  %13640 = vmatprep.subr.bf16.mxu1 %v21344_v22  ;;  %13664 = vmatprep.subr.bf16.mxu0 %v21344_v22 }
 0x243   : > { %1085 = vmatmul.mubr.bf16.gmra.mrb[12].mxu0 %v840_v14  ;;  %13636 = vmatprep.mubr.bf16.mxu1 %v843_v13  ;;  %v16723_v0 = vadd.f32 %v16629_v24, %v814_v62  ;;  %v879_v24 = vlaneseq }
 0x244   : > { %1094 = vmatprep.mubr.bf16.mxu0 %v21342_v46 }
 0x245   : > { %21482 = vst [vmem:[#allocation36_spill] sm:$0xff] %v16723_v0  ;;  %v844_v28 = vpack.c.bf16 %v16723_v0, %v16720_v33  ;;  %v16737_v1 = vshrl.u32 %v879_v24, 7 }
 0x247   : > { %13637 = vmatmul.mubr.bf16.gmra.mrb[12].mxu1 %v844_v28  ;;  %21483 = vst [vmem:[#allocation37_spill] sm:$0xff] %v16737_v1  ;;  %v16740_v40 = vsub.s32 0, %v16737_v1  ;;  %v16746_v5 = vsub.s32 1, %v16737_v1  ;;  %v21341_v7 = vsub.s32 2, %v16737_v1 }
 0x248   : > { %13642 = vmatprep.mubr.msk.bf16.mxu1 %vm16134_vm0, %v21344_v22 }
 0x249   : > { %21484 = vst [vmem:[#allocation38_spill] sm:$0xff] %v16740_v40  ;;  %21485 = vst [vmem:[#allocation39_spill] sm:$0xff] %v16746_v5  ;;  %v16749_v6 = vrot.slane %v877_v2, %v16740_v40  ;;  %v16753_v9 = vrot.slane %v877_v2, %v16746_v5  ;;  %v16759_v21 = vrot.slane %v877_v2, %v21341_v7 }
 0x24b   : > { %1095 = vmatmul.mubr.bf16.gmra.mrb[16].mxu0 %v841_v43 }
 0x24c   : > { %1104 = vmatprep.mubr.bf16.mxu0 %v21342_v46 }
 0x253   : > { %1105 = vmatmul.mubr.bf16.gmra.mrb[20].mxu0 %v842_v53 }
 0x254   : > { %1114 = vmatprep.mubr.bf16.mxu0 %v21342_v46 }
 0x25b   : > { %1115 = vmatmul.mubr.bf16.gmra.mrb[24].mxu0 %v843_v13 }
 0x25c   : > { %1124 = vmatprep.mubr.bf16.mxu0 %v21342_v46 }
 0x263   : > { %1125 = vmatmul.mubr.bf16.gmra.mrb[28].mxu0 %v844_v28 }
 0x264   : > { %13666 = vmatprep.mubr.msk.bf16.mxu0 %vm16134_vm0, %v21344_v22 }
 0x2fe   : > { %v1056_v8 = vpop.f32.mrb[0].mxu0 }
 0x2ff   : > { %v1058_v16 = vpop.f32.mrb[1].mxu0  ;;  %v1057_v10 = vadd.f32 %v1056_v8, %v16749_v6 }
 0x300   : > { %v1060_v41 = vpop.f32.mrb[2].mxu0  ;;  %v1059_v23 = vadd.f32 %v1058_v16, %v16753_v9 }
 0x301   : > { %v1061_v18 = vadd.f32 %v1060_v41, %v16749_v6  ;;  %v1062_v48 = vpop.f32.mrb[3].mxu0 }
 0x302   : > { %v1063_v26 = vadd.f32 %v1062_v48, %v16753_v9  ;;  %v13626_v27 = vpop.f32.mrb[0].mxu1 }
 0x303   : > { %v16763_v12 = vpack.c.bf16 %v1061_v18, %v1057_v10  ;;  %v1169_v29 = vpop.f32.mrb[1].mxu1  ;;  %v1178_v56 = vadd.f32 %v13626_v27, %v16759_v21 }
 0x304   : > { %v16765_v31 = vpack.c.bf16 %v1063_v26, %v1059_v23  ;;  %v13627_v34 = vpop.f32.mrb[2].mxu1  ;;  %v1170_v36 = vadd.f32 %v1169_v29, %v16759_v21 }
 0x305   : > { %v1181_v35 = vadd.f32 %v13627_v34, %v16759_v21  ;;  %1264 = vrot.lane.b32.xlu1 %v16763_v12, %s16135_s1  ;;  %v1172_v14 = vpop.f32.mrb[3].mxu1 }
 0x306   : > { %v1173_v37 = vadd.f32 %v1172_v14, %v16759_v21  ;;  %1320 = vrot.lane.b32.xlu0 %v16765_v31, %s16135_s1  ;;  %v1066_v15 = vpop.f32.mrb[4].mxu0  ;;  %v1453_v38 = vsel %vm1448_vm1, %v16765_v31, 0 }
 0x307   : > { %v16777_v42 = vpack.c.bf16 %v1181_v35, %v1178_v56  ;;  %v1068_v3 = vpop.f32.mrb[5].mxu0  ;;  %13641 = vmatpush3.bf16.xpose.msra.mxu1 %v1453_v38  ;;  %v1067_v32 = vadd.f32 %v1066_v15, %v16749_v6 }
 0x308   : > { %v16779_v43 = vpack.c.bf16 %v1173_v37, %v1170_v36  ;;  %v1070_v44 = vpop.f32.mrb[6].mxu0  ;;  %13646 = vmatprep.subr.bf16.mxu1 %v21344_v22  ;;  %v1069_v4 = vadd.f32 %v1068_v3, %v16753_v9 }
 0x309   : > { %v1071_v25 = vadd.f32 %v1070_v44, %v16749_v6  ;;  %v1072_v52 = vpop.f32.mrb[7].mxu0 }
 0x30a   : > { %v1073_v11 = vadd.f32 %v1072_v52, %v16753_v9  ;;  %v13630_v53 = vpop.f32.mrb[4].mxu1 }
 0x30b   : > { %v16786_v54 = vpack.c.bf16 %v1071_v25, %v1067_v32  ;;  %v1185_v55 = vpop.f32.mrb[5].mxu1  ;;  %v1194_v13 = vadd.f32 %v13630_v53, %v16759_v21 }
 0x30c   : > { %v16788_v17 = vpack.c.bf16 %v1073_v11, %v1069_v4  ;;  %v13631_v61 = vpop.f32.mrb[6].mxu1  ;;  %v1186_v24 = vadd.f32 %v1185_v55, %v16759_v21 }
 0x30d   : > { %v1197_v62 = vadd.f32 %v13631_v61, %v16759_v21  ;;  %1266 = vrot.lane.b32.xlu0 %v16786_v54, %s16135_s1  ;;  %v1188_v28 = vpop.f32.mrb[7].mxu1 }
 0x30e   : > { %v1189_v2 = vadd.f32 %v1188_v28, %v16759_v21  ;;  %1322 = vrot.lane.b32.xlu1 %v16788_v17, %s16135_s1  ;;  %v1076_v8 = vpop.f32.mrb[8].mxu0  ;;  %13643 = vmatmul.mubr.msk.bf16.vlgmr.msra.gmra.mrb[16].mxu1 %vm1448_vm1, %v16763_v12  ;;  %v1500_v16 = vsel %vm1448_vm1, %v16788_v17, 0 }
 0x30f   : > { %v16802_v41 = vpack.c.bf16 %v1197_v62, %v1194_v13  ;;  %v1078_v10 = vpop.f32.mrb[9].mxu0  ;;  %13647 = vmatpush3.bf16.xpose.msra.mxu1 %v1500_v16  ;;  %13648 = vmatprep.mubr.msk.bf16.mxu1 %vm16134_vm0, %v21344_v22  ;;  %v1077_v23 = vadd.f32 %v1076_v8, %v16749_v6 }
 0x310   : > { %v16806_v18 = vpack.c.bf16 %v1189_v2, %v1186_v24  ;;  %v1080_v48 = vpop.f32.mrb[10].mxu0  ;;  %13652 = vmatprep.subr.bf16.mxu1 %v21344_v22  ;;  %v1079_v29 = vadd.f32 %v1078_v10, %v16753_v9 }
 0x311   : > { %v1081_v26 = vadd.f32 %v1080_v48, %v16749_v6  ;;  %v1082_v27 = vpop.f32.mrb[11].mxu0 }
 0x312   : > { %v1083_v34 = vadd.f32 %v1082_v27, %v16753_v9  ;;  %v13634_v56 = vpop.f32.mrb[8].mxu1 }
 0x313   : > { %v16813_v35 = vpack.c.bf16 %v1081_v26, %v1077_v23  ;;  %v1201_v14 = vpop.f32.mrb[9].mxu1  ;;  %v1210_v15 = vadd.f32 %v13634_v56, %v16759_v21 }
 0x314   : > { %v16815_v36 = vpack.c.bf16 %v1083_v34, %v1079_v29  ;;  %v13635_v37 = vpop.f32.mrb[10].mxu1  ;;  %v1202_v44 = vadd.f32 %v1201_v14, %v16759_v21 }
 0x315   : > { %v1213_v38 = vadd.f32 %v13635_v37, %v16759_v21  ;;  %1268 = vrot.lane.b32.xlu0 %v16813_v35, %s16135_s1  ;;  %v1204_v3 = vpop.f32.mrb[11].mxu1 }
 0x316   : > { %v1205_v32 = vadd.f32 %v1204_v3, %v16759_v21  ;;  %1324 = vrot.lane.b32.xlu1 %v16815_v36, %s16135_s1  ;;  %v1086_v25 = vpop.f32.mrb[12].mxu0  ;;  %13649 = vmatmul.mubr.msk.bf16.vlgmr.msra.gmra.mrb[20].mxu1 %vm1448_vm1, %v16786_v54  ;;  %v1547_v52 = vsel %vm1448_vm1, %v16815_v36, 0 }
 0x317   : > { %v16829_v4 = vpack.c.bf16 %v1213_v38, %v1210_v15  ;;  %v1088_v11 = vpop.f32.mrb[13].mxu0  ;;  %13653 = vmatpush3.bf16.xpose.msra.mxu1 %v1547_v52  ;;  %13654 = vmatprep.mubr.msk.bf16.mxu1 %vm16134_vm0, %v21344_v22  ;;  %v1087_v61 = vadd.f32 %v1086_v25, %v16749_v6 }
 0x318   : > { %v16833_v53 = vpack.c.bf16 %v1205_v32, %v1202_v44  ;;  %v1090_v55 = vpop.f32.mrb[14].mxu0  ;;  %13658 = vmatprep.subr.bf16.mxu1 %v21344_v22  ;;  %v1089_v28 = vadd.f32 %v1088_v11, %v16753_v9 }
 0x319   : > { %v1091_v13 = vadd.f32 %v1090_v55, %v16749_v6  ;;  %v1092_v62 = vpop.f32.mrb[15].mxu0 }
 0x31a   : > { %v1093_v24 = vadd.f32 %v1092_v62, %v16753_v9  ;;  %v13638_v2 = vpop.f32.mrb[12].mxu1 }
 0x31b   : > { %v16840_v8 = vpack.c.bf16 %v1091_v13, %v1087_v61  ;;  %v1217_v16 = vpop.f32.mrb[13].mxu1  ;;  %v1226_v23 = vadd.f32 %v13638_v2, %v16759_v21 }
 0x31c   : > { %v16842_v10 = vpack.c.bf16 %v1093_v24, %v1089_v28  ;;  %v13639_v48 = vpop.f32.mrb[14].mxu1  ;;  %v1218_v29 = vadd.f32 %v1217_v16, %v16759_v21 }
 0x31d   : > { %v1229_v26 = vadd.f32 %v13639_v48, %v16759_v21  ;;  %1270 = vrot.lane.b32.xlu0 %v16840_v8, %s16135_s1  ;;  %v1220_v27 = vpop.f32.mrb[15].mxu1 }
 0x31e   : > { %v1221_v34 = vadd.f32 %v1220_v27, %v16759_v21  ;;  %1326 = vrot.lane.b32.xlu1 %v16842_v10, %s16135_s1  ;;  %v1096_v56 = vpop.f32.mrb[16].mxu0  ;;  %13655 = vmatmul.mubr.msk.bf16.vlgmr.msra.gmra.mrb[24].mxu1 %vm1448_vm1, %v16813_v35  ;;  %v1594_v14 = vsel %vm1448_vm1, %v16842_v10, 0 }
 0x31f   : > { %v16856_v37 = vpack.c.bf16 %v1229_v26, %v1226_v23  ;;  %v1098_v15 = vpop.f32.mrb[17].mxu0  ;;  %13659 = vmatpush3.bf16.xpose.msra.mxu1 %v1594_v14  ;;  %13660 = vmatprep.mubr.msk.bf16.mxu1 %vm16134_vm0, %v21344_v22  ;;  %v1097_v3 = vadd.f32 %v1096_v56, %v16749_v6 }
 0x320   : > { %v16860_v38 = vpack.c.bf16 %v1221_v34, %v1218_v29  ;;  %v1100_v21 = vpop.f32.mrb[18].mxu0  ;;  %13670 = vmatprep.subr.bf16.mxu1 %v21344_v22  ;;  %v1099_v25 = vadd.f32 %v1098_v15, %v16753_v9 }
 0x321   : > { %21486 = vst [vmem:[#allocation40_spill] sm:$0xff] %v16856_v37  ;;  %v1101_v44 = vadd.f32 %v1100_v21, %v16749_v6  ;;  %v1102_v32 = vpop.f32.mrb[19].mxu0 }
 0x322   : > { %21487 = vst [vmem:[#allocation41_spill] sm:$0xff] %v16860_v38  ;;  %v1103_v52 = vadd.f32 %v1102_v32, %v16753_v9 }
 0x323   : > { %v16867_v11 = vpack.c.bf16 %v1101_v44, %v1097_v3 }
 0x324   : > { %v16869_v55 = vpack.c.bf16 %v1103_v52, %v1099_v25 }
 0x325   : > { %1272 = vrot.lane.b32.xlu0 %v16867_v11, %s16135_s1 }
 0x326   : > { %1328 = vrot.lane.b32.xlu1 %v16869_v55, %s16135_s1  ;;  %v1106_v61 = vpop.f32.mrb[20].mxu0  ;;  %13661 = vmatmul.mubr.msk.bf16.vlgmr.msra.gmra.mrb[28].mxu1 %vm1448_vm1, %v16840_v8  ;;  %v1641_v13 = vsel %vm1448_vm1, %v16869_v55, 0 }
 0x327   : > { %v1108_v62 = vpop.f32.mrb[21].mxu0  ;;  %13665 = vmatpush3.bf16.xpose.msra.mxu0 %v1641_v13  ;;  %13672 = vmatprep.mubr.msk.bf16.mxu1 %vm16134_vm0, %v21344_v22  ;;  %v1107_v24 = vadd.f32 %v1106_v61, %v16749_v6 }
 0x328   : > { %v1110_v28 = vpop.f32.mrb[22].mxu0  ;;  %13676 = vmatprep.subr.bf16.mxu0 %v21344_v22  ;;  %v1109_v48 = vadd.f32 %v1108_v62, %v16753_v9 }
 0x329   : > { %v1111_v2 = vadd.f32 %v1110_v28, %v16749_v6  ;;  %v1112_v16 = vpop.f32.mrb[23].mxu0 }
 0x32a   : > { %v1113_v23 = vadd.f32 %v1112_v16, %v16753_v9 }
 0x32b   : > { %v16886_v26 = vpack.c.bf16 %v1111_v2, %v1107_v24 }
 0x32c   : > { %v16888_v27 = vpack.c.bf16 %v1113_v23, %v1109_v48 }
 0x32d   : > { %1274 = vrot.lane.b32.xlu0 %v16886_v26, %s16135_s1 }
 0x32e   : > { %1330 = vrot.lane.b32.xlu1 %v16888_v27, %s16135_s1  ;;  %v1116_v29 = vpop.f32.mrb[24].mxu0  ;;  %13667 = vmatmul.mubr.msk.bf16.vlgmr.msra.gmra.mrb[32].mxu0 %vm1448_vm1, %v16867_v11  ;;  %v1688_v34 = vsel %vm1448_vm1, %v16888_v27, 0 }
 0x32f   : > { %v1118_v56 = vpop.f32.mrb[25].mxu0  ;;  %13671 = vmatpush3.bf16.xpose.msra.mxu1 %v1688_v34  ;;  %13678 = vmatprep.mubr.msk.bf16.mxu0 %vm16134_vm0, %v21344_v22  ;;  %v1117_v15 = vadd.f32 %v1116_v29, %v16749_v6 }
 0x330   : > { %v1120_v14 = vpop.f32.mrb[26].mxu0  ;;  %13682 = vmatprep.subr.bf16.mxu1 %v21344_v22  ;;  %v1119_v44 = vadd.f32 %v1118_v56, %v16753_v9 }
 0x331   : > { %v1121_v21 = vadd.f32 %v1120_v14, %v16749_v6  ;;  %v1122_v3 = vpop.f32.mrb[27].mxu0 }
 0x332   : > { %v1123_v32 = vadd.f32 %v1122_v3, %v16753_v9 }
 0x333   : > { %v1250_v25 = vpack.c.bf16 %v1121_v21, %v1117_v15 }
 0x334   : > { %v1251_v52 = vpack.c.bf16 %v1123_v32, %v1119_v44 }
 0x335   : > { %1276 = vrot.lane.b32.xlu0 %v1250_v25, %s16135_s1 }
 0x336   : > { %1332 = vrot.lane.b32.xlu1 %v1251_v52, %s16135_s1  ;;  %v1126_v61 = vpop.f32.mrb[28].mxu0  ;;  %13673 = vmatmul.mubr.msk.bf16.vlgmr.msra.gmra.mrb[32].mxu1 %vm1448_vm1, %v16886_v26  ;;  %v1735_v13 = vsel %vm1448_vm1, %v1251_v52, 0 }
 0x337   : > { %v1128_v62 = vpop.f32.mrb[29].mxu0  ;;  %13677 = vmatpush3.bf16.xpose.msra.mxu0 %v1735_v13  ;;  %13684 = vmatprep.mubr.msk.bf16.mxu1 %vm16134_vm0, %v21344_v22  ;;  %v1127_v24 = vadd.f32 %v1126_v61, %v16749_v6 }
 0x338   : > { %v1130_v28 = vpop.f32.mrb[30].mxu0  ;;  %13688 = vmatprep.subr.bf16.mxu0 %v21344_v22  ;;  %v1129_v48 = vadd.f32 %v1128_v62, %v16753_v9 }
 0x339   : > { %v1131_v2 = vadd.f32 %v1130_v28, %v16749_v6  ;;  %v1132_v16 = vpop.f32.mrb[31].mxu0 }
 0x33a   : > { %v1133_v23 = vadd.f32 %v1132_v16, %v16753_v9 }
 0x33b   : > { %v1253_v29 = vpack.c.bf16 %v1131_v2, %v1127_v24 }
 0x33c   : > { %v1254_v34 = vpack.c.bf16 %v1133_v23, %v1129_v48 }
 0x33d   : > { %1278 = vrot.lane.b32.xlu0 %v1253_v29, %s16135_s1 }
 0x33e   : > { %13679 = vmatmul.mubr.msk.bf16.vlgmr.msra.gmra.mrb[36].mxu0 %vm1448_vm1, %v1250_v25  ;;  %1334 = vrot.lane.b32.xlu1 %v1254_v34, %s16135_s1  ;;  %v1782_v56 = vsel %vm1448_vm1, %v1254_v34, 0 }
 0x33f   : > { %13683 = vmatpush3.bf16.xpose.msra.mxu1 %v1782_v56  ;;  %13690 = vmatprep.mubr.msk.bf16.mxu0 %vm16134_vm0, %v21344_v22 }
 0x340   : > { %13694 = vmatprep.subr.bf16.mxu1 %v21344_v22 }
 0x341   : > { %1280 = vrot.lane.b32.xlu0 %v16763_v12, %s16136_s17 }
 0x342   : > { %1336 = vrot.lane.b32.xlu1 %v16765_v31, %s16136_s17 }
 0x345   : > { %1282 = vrot.lane.b32.xlu0 %v16786_v54, %s16136_s17 }
 0x346   : > { %1338 = vrot.lane.b32.xlu1 %v16788_v17, %s16136_s17  ;;  %13685 = vmatmul.mubr.msk.bf16.vlgmr.msra.gmra.mrb[36].mxu1 %vm1448_vm1, %v1253_v29 }
 0x347   : > { %13696 = vmatprep.mubr.msk.bf16.mxu1 %vm16134_vm0, %v21344_v22 }
 0x349   : > { %1284 = vrot.lane.b32.xlu0 %v16813_v35, %s16136_s17 }
 0x34a   : > { %1340 = vrot.lane.b32.xlu1 %v16815_v36, %s16136_s17 }
 0x34d   : > { %1286 = vrot.lane.b32.xlu0 %v16840_v8, %s16136_s17 }
 0x34e   : > { %1342 = vrot.lane.b32.xlu1 %v16842_v10, %s16136_s17 }
 0x351   : > { %1288 = vrot.lane.b32.xlu0 %v16867_v11, %s16136_s17 }
 0x352   : > { %1344 = vrot.lane.b32.xlu1 %v16869_v55, %s16136_s17 }
 0x355   : > { %1290 = vrot.lane.b32.xlu0 %v16886_v26, %s16136_s17 }
 0x356   : > { %1346 = vrot.lane.b32.xlu1 %v16888_v27, %s16136_s17 }
 0x359   : > { %1292 = vrot.lane.b32.xlu0 %v1250_v25, %s16136_s17 }
 0x35a   : > { %1348 = vrot.lane.b32.xlu1 %v1251_v52, %s16136_s17 }
 0x35d   : > { %1294 = vrot.lane.b32.xlu0 %v1253_v29, %s16136_s17 }
 0x35e   : > { %1350 = vrot.lane.b32.xlu1 %v1254_v34, %s16136_s17 }
 0x361   : > { %1296 = vrot.lane.b32.xlu0 %v16763_v12, %s16137_s12 }
 0x362   : > { %1352 = vrot.lane.b32.xlu1 %v16765_v31, %s16137_s12 }
 0x365   : > { %1356 = vrot.lane.b32.xlu0 %v16815_v36, %s16137_s12 }
 0x366   : > { %1354 = vrot.lane.b32.xlu1 %v16788_v17, %s16137_s12 }
 0x369   : > { %1300 = vrot.lane.b32.xlu0 %v16813_v35, %s16137_s12 }
 0x36a   : > { %1298 = vrot.lane.b32.xlu1 %v16786_v54, %s16137_s12 }
 0x36d   : > { %1360 = vrot.lane.b32.xlu0 %v16869_v55, %s16137_s12 }
 0x36e   : > { %1358 = vrot.lane.b32.xlu1 %v16842_v10, %s16137_s12 }
 0x371   : > { %1304 = vrot.lane.b32.xlu0 %v16867_v11, %s16137_s12 }
 0x372   : > { %1302 = vrot.lane.b32.xlu1 %v16840_v8, %s16137_s12 }
 0x375   : > { %1364 = vrot.lane.b32.xlu0 %v1251_v52, %s16137_s12 }
 0x376   : > { %1362 = vrot.lane.b32.xlu1 %v16888_v27, %s16137_s12 }
 0x377   : > { %v1265_v12 = vpop.permute.xlu1 %1264 }
 0x378   : > { %v1321_v6 = vpop.permute.xlu0 %1320 }
 0x379   : > { %v1829_v9 = vsel %vm1448_vm1, %v1321_v6, 0  ;;  %1308 = vrot.lane.b32.xlu0 %v1250_v25, %s16137_s12 }
 0x37a   : > { %1306 = vrot.lane.b32.xlu1 %v16886_v26, %s16137_s12  ;;  %13689 = vmatpush3.bf16.xpose.msra.mxu0 %v1829_v9 }
 0x37b   : > { %13700 = vmatprep.subr.bf16.mxu0 %v21344_v22 }
 0x37d   : > { %1376 = vrot.lane.b32.xlu0 %v16779_v43, %s16135_s1 }
 0x37e   : > { %1366 = vrot.lane.b32.xlu1 %v1254_v34, %s16137_s12 }
 0x37f   : > { %v1267_v17 = vpop.permute.xlu0 %1266 }
 0x380   : > { %v1323_v31 = vpop.permute.xlu1 %1322 }
 0x381   : > { %v1876_v54 = vsel %vm1448_vm1, %v1323_v31, 0  ;;  %1380 = vrot.lane.b32.xlu0 %v16806_v18, %s16135_s1  ;;  %13691 = vmatmul.mubr.msk.bf16.vlgmr.msra.gmra.mrb[40].mxu0 %vm1448_vm1, %v1265_v12 }
 0x382   : > { %1310 = vrot.lane.b32.xlu1 %v1253_v29, %s16137_s12  ;;  %13695 = vmatpush3.bf16.xpose.msra.mxu1 %v1876_v54 }
 0x383   : > { %13702 = vmatprep.mubr.msk.bf16.mxu0 %vm16134_vm0, %v21344_v22  ;;  %13706 = vmatprep.subr.bf16.mxu1 %v21344_v22 }
 0x385   : > { %1384 = vrot.lane.b32.xlu0 %v16833_v53, %s16135_s1 }
 0x386   : > { %1378 = vrot.lane.b32.xlu1 %v16777_v42, %s16135_s1 }
 0x387   : > { %v1269_v8 = vpop.permute.xlu0 %1268 }
 0x388   : > { %v1325_v35 = vpop.permute.xlu1 %1324 }
 0x389   : > { %v1923_v36 = vsel %vm1448_vm1, %v1325_v35, 0  ;;  %1388 = vrot.lane.b32.xlu0 %v16860_v38, %s16135_s1  ;;  %13697 = vmatmul.mubr.msk.bf16.vlgmr.msra.gmra.mrb[40].mxu1 %vm1448_vm1, %v1267_v17 }
 0x38a   : > { %1382 = vrot.lane.b32.xlu1 %v16802_v41, %s16135_s1  ;;  %13701 = vmatpush3.bf16.xpose.msra.mxu0 %v1923_v36 }
 0x38b   : > { %13708 = vmatprep.mubr.msk.bf16.mxu1 %vm16134_vm0, %v21344_v22  ;;  %13712 = vmatprep.subr.bf16.mxu0 %v21344_v22 }
 0x38d   : > { %1400 = vrot.lane.b32.xlu0 %v16779_v43, %s16136_s17 }
 0x38e   : > { %1386 = vrot.lane.b32.xlu1 %v16829_v4, %s16135_s1 }
 0x38f   : > { %v1271_v55 = vpop.permute.xlu0 %1270 }
 0x390   : > { %v1327_v10 = vpop.permute.xlu1 %1326 }
 0x391   : > { %v1970_v11 = vsel %vm1448_vm1, %v1327_v10, 0  ;;  %1404 = vrot.lane.b32.xlu0 %v16806_v18, %s16136_s17  ;;  %13703 = vmatmul.mubr.msk.bf16.vlgmr.msra.gmra.mrb[44].mxu0 %vm1448_vm1, %v1269_v8 }
 0x392   : > { %1390 = vrot.lane.b32.xlu1 %v16856_v37, %s16135_s1  ;;  %13707 = vmatpush3.bf16.xpose.msra.mxu1 %v1970_v11 }
 0x393   : > { %13714 = vmatprep.mubr.msk.bf16.mxu0 %vm16134_vm0, %v21344_v22  ;;  %13718 = vmatprep.subr.bf16.mxu1 %v21344_v22 }
 0x395   : > { %1412 = vrot.lane.b32.xlu0 %v16860_v38, %s16136_s17 }
 0x396   : > { %1402 = vrot.lane.b32.xlu1 %v16777_v42, %s16136_s17 }
 0x397   : > { %v1273_v14 = vpop.permute.xlu0 %1272 }
 0x398   : > { %v1329_v26 = vpop.permute.xlu1 %1328 }
 0x399   : > { %v2017_v27 = vsel %vm1448_vm1, %v1329_v26, 0  ;;  %1428 = vrot.lane.b32.xlu0 %v16806_v18, %s16137_s12  ;;  %13709 = vmatmul.mubr.msk.bf16.vlgmr.msra.gmra.mrb[44].mxu1 %vm1448_vm1, %v1271_v55 }
 0x39a   : > { %1406 = vrot.lane.b32.xlu1 %v16802_v41, %s16136_s17  ;;  %13713 = vmatpush3.bf16.xpose.msra.mxu0 %v2017_v27 }
 0x39b   : > { %13720 = vmatprep.mubr.msk.bf16.mxu1 %vm16134_vm0, %v21344_v22  ;;  %13724 = vmatprep.subr.bf16.mxu0 %v21344_v22 }
 0x39e   : > { %1408 = vrot.lane.b32.xlu1 %v16833_v53, %s16136_s17 }
 0x39f   : > { %v1275_v3 = vpop.permute.xlu0 %1274 }
 0x3a0   : > { %v1331_v15 = vpop.permute.xlu1 %1330 }
 0x3a1   : > { %v2064_v21 = vsel %vm1448_vm1, %v1331_v15, 0  ;;  %13715 = vmatmul.mubr.msk.bf16.vlgmr.msra.gmra.mrb[48].mxu0 %vm1448_vm1, %v1273_v14 }
 0x3a2   : > { %1410 = vrot.lane.b32.xlu1 %v16829_v4, %s16136_s17  ;;  %13719 = vmatpush3.bf16.xpose.msra.mxu1 %v2064_v21 }
 0x3a3   : > { %13726 = vmatprep.mubr.msk.bf16.mxu0 %vm16134_vm0, %v21344_v22  ;;  %13730 = vmatprep.subr.bf16.mxu1 %v21344_v22 }
 0x3a6   : > { %1414 = vrot.lane.b32.xlu1 %v16856_v37, %s16136_s17 }
 0x3a7   : > { %v1277_v25 = vpop.permute.xlu0 %1276 }
 0x3a8   : > { %v1333_v44 = vpop.permute.xlu1 %1332 }
 0x3a9   : > { %v2111_v32 = vsel %vm1448_vm1, %v1333_v44, 0  ;;  %13721 = vmatmul.mubr.msk.bf16.vlgmr.msra.gmra.mrb[48].mxu1 %vm1448_vm1, %v1275_v3 }
 0x3aa   : > { %1424 = vrot.lane.b32.xlu1 %v16779_v43, %s16137_s12  ;;  %13725 = vmatpush3.bf16.xpose.msra.mxu0 %v2111_v32 }
 0x3ab   : > { %13736 = vmatprep.subr.bf16.mxu0 %v21344_v22  ;;  %13732 = vmatprep.mubr.msk.bf16.mxu1 %vm16134_vm0, %v21344_v22 }
 0x3ae   : > { %1426 = vrot.lane.b32.xlu1 %v16777_v42, %s16137_s12 }
 0x3af   : > { %v1279_v52 = vpop.permute.xlu0 %1278 }
 0x3b0   : > { %v1335_v61 = vpop.permute.xlu1 %1334 }
 0x3b1   : > { %v2158_v13 = vsel %vm1448_vm1, %v1335_v61, 0  ;;  %13727 = vmatmul.mubr.msk.bf16.vlgmr.msra.gmra.mrb[52].mxu0 %vm1448_vm1, %v1277_v25 }
 0x3b2   : > { %1430 = vrot.lane.b32.xlu1 %v16802_v41, %s16137_s12  ;;  %13731 = vmatpush3.bf16.xpose.msra.mxu1 %v2158_v13 }
 0x3b3   : > { %v1281_v62 = vpop.permute.xlu0 %1280  ;;  %13742 = vmatprep.subr.bf16.mxu1 %v21344_v22  ;;  %13738 = vmatprep.mubr.msk.bf16.mxu0 %vm16134_vm0, %v21344_v22 }
 0x3b4   : > { %v1337_v28 = vpop.permute.xlu1 %1336 }
 0x3b5   : > { %v2205_v24 = vsel %vm1448_vm1, %v1337_v28, 0 }
 0x3b6   : > { %13737 = vmatpush3.bf16.xpose.msra.mxu0 %v2205_v24 }
 0x3b7   : > { %v1283_v2 = vpop.permute.xlu0 %1282  ;;  %13748 = vmatprep.subr.bf16.mxu0 %v21344_v22 }
 0x3b8   : > { %v1339_v16 = vpop.permute.xlu1 %1338 }
 0x3b9   : > { %v2252_v48 = vsel %vm1448_vm1, %v1339_v16, 0  ;;  %13733 = vmatmul.mubr.msk.bf16.vlgmr.msra.gmra.mrb[52].mxu1 %vm1448_vm1, %v1279_v52 }
 0x3ba   : > { %13743 = vmatpush3.bf16.xpose.msra.mxu1 %v2252_v48  ;;  %13744 = vmatprep.mubr.msk.bf16.mxu1 %vm16134_vm0, %v21344_v22 }
 0x3bb   : > { %v1285_v23 = vpop.permute.xlu0 %1284  ;;  %13754 = vmatprep.subr.bf16.mxu1 %v21344_v22 }
 0x3bc   : > { %v1341_v29 = vpop.permute.xlu1 %1340 }
 0x3bd   : > { %v2299_v34 = vsel %vm1448_vm1, %v1341_v29, 0  ;;  %13739 = vmatmul.mubr.msk.bf16.vlgmr.msra.gmra.mrb[56].mxu0 %vm1448_vm1, %v1281_v62 }
 0x3be   : > { %13749 = vmatpush3.bf16.xpose.msra.mxu0 %v2299_v34  ;;  %13750 = vmatprep.mubr.msk.bf16.mxu0 %vm16134_vm0, %v21344_v22 }
 0x3bf   : > { %v1287_v56 = vpop.permute.xlu0 %1286  ;;  %13760 = vmatprep.subr.bf16.mxu0 %v21344_v22 }
 0x3c0   : > { %v1343_v6 = vpop.permute.xlu1 %1342 }
 0x3c1   : > { %v2346_v9 = vsel %vm1448_vm1, %v1343_v6, 0  ;;  %13745 = vmatmul.mubr.msk.bf16.vlgmr.msra.gmra.mrb[56].mxu1 %vm1448_vm1, %v1283_v2 }
 0x3c2   : > { %13755 = vmatpush3.bf16.xpose.msra.mxu1 %v2346_v9  ;;  %13756 = vmatprep.mubr.msk.bf16.mxu1 %vm16134_vm0, %v21344_v22 }
 0x3c3   : > { %v1289_v12 = vpop.permute.xlu0 %1288  ;;  %13766 = vmatprep.subr.bf16.mxu1 %v21344_v22 }
 0x3c4   : > { %v1345_v31 = vpop.permute.xlu1 %1344 }
 0x3c5   : > { %v2393_v54 = vsel %vm1448_vm1, %v1345_v31, 0  ;;  %13751 = vmatmul.mubr.msk.bf16.vlgmr.msra.gmra.mrb[60].mxu0 %vm1448_vm1, %v1285_v23 }
 0x3c6   : > { %13761 = vmatpush3.bf16.xpose.msra.mxu0 %v2393_v54  ;;  %13762 = vmatprep.mubr.msk.bf16.mxu0 %vm16134_vm0, %v21344_v22 }
 0x3c7   : > { %v1291_v17 = vpop.permute.xlu0 %1290  ;;  %13772 = vmatprep.subr.bf16.mxu0 %v21344_v22 }
 0x3c8   : > { %v1347_v35 = vpop.permute.xlu1 %1346 }
 0x3c9   : > { %v2440_v36 = vsel %vm1448_vm1, %v1347_v35, 0  ;;  %13757 = vmatmul.mubr.msk.bf16.vlgmr.msra.gmra.mrb[60].mxu1 %vm1448_vm1, %v1287_v56 }
 0x3ca   : > { %13767 = vmatpush3.bf16.xpose.msra.mxu1 %v2440_v36  ;;  %13768 = vmatprep.mubr.msk.bf16.mxu1 %vm16134_vm0, %v21344_v22 }
 0x3cb   : > { %v1293_v8 = vpop.permute.xlu0 %1292  ;;  %13778 = vmatprep.subr.bf16.mxu1 %v21344_v22 }
 0x3cc   : > { %v1349_v10 = vpop.permute.xlu1 %1348 }
 0x3cd   : > { %v2487_v11 = vsel %vm1448_vm1, %v1349_v10, 0  ;;  %13763 = vmatmul.mubr.msk.bf16.vlgmr.msra.gmra.mrb[64].mxu0 %vm1448_vm1, %v1289_v12 }
 0x3ce   : > { %13773 = vmatpush3.bf16.xpose.msra.mxu0 %v2487_v11  ;;  %13774 = vmatprep.mubr.msk.bf16.mxu0 %vm16134_vm0, %v21344_v22 }
 0x3cf   : > { %v1295_v55 = vpop.permute.xlu0 %1294  ;;  %13784 = vmatprep.subr.bf16.mxu0 %v21344_v22 }
 0x3d0   : > { %v1351_v26 = vpop.permute.xlu1 %1350 }
 0x3d1   : > { %v2534_v27 = vsel %vm1448_vm1, %v1351_v26, 0  ;;  %13769 = vmatmul.mubr.msk.bf16.vlgmr.msra.gmra.mrb[64].mxu1 %vm1448_vm1, %v1291_v17 }
 0x3d2   : > { %13779 = vmatpush3.bf16.xpose.msra.mxu1 %v2534_v27  ;;  %13780 = vmatprep.mubr.msk.bf16.mxu1 %vm16134_vm0, %v21344_v22 }
 0x3d3   : > { %v1297_v14 = vpop.permute.xlu0 %1296  ;;  %13790 = vmatprep.subr.bf16.mxu1 %v21344_v22 }
 0x3d4   : > { %v1353_v15 = vpop.permute.xlu1 %1352 }
 0x3d5   : > { %v2581_v21 = vsel %vm1448_vm1, %v1353_v15, 0  ;;  %13775 = vmatmul.mubr.msk.bf16.vlgmr.msra.gmra.mrb[68].mxu0 %vm1448_vm1, %v1293_v8 }
 0x3d6   : > { %13785 = vmatpush3.bf16.xpose.msra.mxu0 %v2581_v21  ;;  %13786 = vmatprep.mubr.msk.bf16.mxu0 %vm16134_vm0, %v21344_v22 }
 0x3d7   : > { %v1357_v3 = vpop.permute.xlu0 %1356  ;;  %13796 = vmatprep.subr.bf16.mxu0 %v21344_v22 }
 0x3d8   : > { %v1355_v44 = vpop.permute.xlu1 %1354  ;;  %v2675_v61 = vsel %vm1448_vm1, %v1357_v3, 0 }
 0x3d9   : > { %v2628_v32 = vsel %vm1448_vm1, %v1355_v44, 0  ;;  %13781 = vmatmul.mubr.msk.bf16.vlgmr.msra.gmra.mrb[68].mxu1 %vm1448_vm1, %v1295_v55 }
 0x3da   : > { %13791 = vmatpush3.bf16.xpose.msra.mxu1 %v2628_v32  ;;  %13792 = vmatprep.mubr.msk.bf16.mxu1 %vm16134_vm0, %v21344_v22 }
 0x3db   : > { %v1301_v25 = vpop.permute.xlu0 %1300  ;;  %13802 = vmatprep.subr.bf16.mxu1 %v21344_v22 }
 0x3dc   : > { %v1299_v52 = vpop.permute.xlu1 %1298 }
 0x3dd   : > { %13787 = vmatmul.mubr.msk.bf16.vlgmr.msra.gmra.mrb[72].mxu0 %vm1448_vm1, %v1297_v14 }
 0x3de   : > { %13797 = vmatpush3.bf16.xpose.msra.mxu0 %v2675_v61  ;;  %13798 = vmatprep.mubr.msk.bf16.mxu0 %vm16134_vm0, %v21344_v22 }
 0x3df   : > { %v1361_v13 = vpop.permute.xlu0 %1360  ;;  %13808 = vmatprep.subr.bf16.mxu0 %v21344_v22 }
 0x3e0   : > { %v1359_v62 = vpop.permute.xlu1 %1358  ;;  %v2769_v6 = vsel %vm1448_vm1, %v1361_v13, 0 }
 0x3e1   : > { %v2722_v28 = vsel %vm1448_vm1, %v1359_v62, 0  ;;  %v17113_v24 = vpop.f32.mrb[16].mxu1  ;;  %13793 = vmatmul.mubr.msk.bf16.vlgmr.msra.gmra.mrb[72].mxu1 %vm1448_vm1, %v1299_v52 }
 0x3e2   : > { %v13644_v2 = vpop.f32.mrb[17].mxu1  ;;  %13803 = vmatpush3.bf16.xpose.msra.mxu1 %v2722_v28  ;;  %v2954_v16 = vsel %vm2953_vm2, %v17113_v24, -inf  ;;  %13804 = vmatprep.mubr.msk.bf16.mxu1 %vm16134_vm0, %v21344_v22 }
 0x3e3   : > { %v17120_v48 = vpop.f32.mrb[18].mxu1  ;;  %2955 = vmax.xlane.f32.xlu0 %v2954_v16  ;;  %v1305_v23 = vpop.permute.xlu0 %1304  ;;  %13814 = vmatprep.subr.bf16.mxu1 %v21344_v22 }
 0x3e4   : > { %v13645_v29 = vpop.f32.mrb[19].mxu1  ;;  %v1303_v34 = vpop.permute.xlu1 %1302  ;;  %v2957_v56 = vsel %vm2953_vm2, %v17120_v48, -inf }
 0x3e5   : > { %2958 = vmax.xlane.f32.xlu1 %v2957_v56  ;;  %13799 = vmatmul.mubr.msk.bf16.vlgmr.msra.gmra.mrb[76].mxu0 %vm1448_vm1, %v1301_v25 }
 0x3e6   : > { %13809 = vmatpush3.bf16.xpose.msra.mxu0 %v2769_v6  ;;  %13810 = vmatprep.mubr.msk.bf16.mxu0 %vm16134_vm0, %v21344_v22 }
 0x3e7   : > { %13820 = vmatprep.subr.bf16.mxu0 %v21344_v22  ;;  %v1365_v54 = vpop.permute.xlu0 %1364 }
 0x3e8   : > { %v1363_v9 = vpop.permute.xlu1 %1362  ;;  %v2863_v11 = vsel %vm1448_vm1, %v1365_v54, 0 }
 0x3e9   : > { %v2816_v12 = vsel %vm1448_vm1, %v1363_v9, 0  ;;  %v17131_v31 = vpop.f32.mrb[20].mxu1  ;;  %13805 = vmatmul.mubr.msk.bf16.vlgmr.msra.gmra.mrb[76].mxu1 %vm1448_vm1, %v1303_v34 }
 0x3ea   : > { %v13650_v17 = vpop.f32.mrb[21].mxu1  ;;  %13815 = vmatpush3.bf16.xpose.msra.mxu1 %v2816_v12  ;;  %v2960_v35 = vsel %vm2953_vm2, %v17131_v31, -inf  ;;  %13816 = vmatprep.mubr.msk.bf16.mxu1 %vm16134_vm0, %v21344_v22 }
 0x3eb   : > { %v17138_v36 = vpop.f32.mrb[22].mxu1  ;;  %2961 = vmax.xlane.f32.xlu0 %v2960_v35  ;;  %13826 = vmatprep.subr.bf16.mxu1 %v21344_v22  ;;  %v1309_v44 = vpop.permute.xlu0 %1308 }
 0x3ec   : > { %v13651_v8 = vpop.f32.mrb[23].mxu1  ;;  %v1307_v10 = vpop.permute.xlu1 %1306  ;;  %v2963_v55 = vsel %vm2953_vm2, %v17138_v36, -inf }
 0x3ed   : > { %13811 = vmatmul.mubr.msk.bf16.vlgmr.msra.gmra.mrb[80].mxu0 %vm1448_vm1, %v1305_v23 }
 0x3ee   : > { %13821 = vmatpush3.bf16.xpose.msra.mxu0 %v2863_v11  ;;  %13822 = vmatprep.mubr.msk.bf16.mxu0 %vm16134_vm0, %v21344_v22 }
 0x3ef   : > { %2964 = vmax.xlane.f32.xlu0 %v2963_v55  ;;  %13832 = vmatprep.subr.bf16.mxu0 %v21344_v22 }
 0x3f0   : > { %v1367_v26 = vpop.permute.xlu1 %1366 }
 0x3f1   : > { %v2910_v27 = vsel %vm1448_vm1, %v1367_v26, 0  ;;  %v17149_v14 = vpop.f32.mrb[24].mxu1  ;;  %13817 = vmatmul.mubr.msk.bf16.vlgmr.msra.gmra.mrb[80].mxu1 %vm1448_vm1, %v1307_v10 }
 0x3f2   : > { %v13656_v15 = vpop.f32.mrb[25].mxu1  ;;  %13827 = vmatpush3.bf16.xpose.msra.mxu1 %v2910_v27  ;;  %v2966_v21 = vsel %vm2953_vm2, %v17149_v14, -inf  ;;  %13828 = vmatprep.mubr.msk.bf16.mxu1 %vm16134_vm0, %v21344_v22 }
 0x3f3   : > { %v17156_v3 = vpop.f32.mrb[26].mxu1  ;;  %2967 = vmax.xlane.f32.xlu0 %v2966_v21  ;;  %13838 = vmatprep.subr.bf16.mxu1 %v21344_v22 }
 0x3f4   : > { %v13657_v32 = vpop.f32.mrb[27].mxu1  ;;  %v2969_v25 = vsel %vm2953_vm2, %v17156_v3, -inf  ;;  %v1311_v52 = vpop.permute.xlu1 %1310 }
 0x3f5   : > { %2970 = vmax.xlane.f32.xlu1 %v2969_v25  ;;  %13823 = vmatmul.mubr.msk.bf16.vlgmr.msra.gmra.mrb[84].mxu0 %vm1448_vm1, %v1309_v44 }
 0x3f6   : > { %13833 = vmatpush3.bf16.msra.mxu0 %v16779_v43  ;;  %13834 = vmatprep.mubr.msk.bf16.mxu0 %vm16134_vm0, %v21344_v22 }
 0x3f7   : > { %13844 = vmatprep.subr.bf16.mxu0 %v21344_v22 }
 0x3f9   : > { %v17166_v61 = vpop.f32.mrb[28].mxu1  ;;  %13829 = vmatmul.mubr.msk.bf16.vlgmr.msra.gmra.mrb[84].mxu1 %vm1448_vm1, %v1311_v52 }
 0x3fa   : > { %v13662_v13 = vpop.f32.mrb[29].mxu1  ;;  %13839 = vmatpush3.bf16.msra.mxu1 %v16777_v42  ;;  %v2972_v62 = vsel %vm2953_vm2, %v17166_v61, -inf  ;;  %13840 = vmatprep.mubr.msk.bf16.mxu1 %vm16134_vm0, %v21344_v22 }
 0x3fb   : > { %v17174_v43 = vpop.f32.mrb[30].mxu1  ;;  %2973 = vmax.xlane.f32.xlu0 %v2972_v62  ;;  %13850 = vmatprep.subr.bf16.mxu1 %v21344_v22  ;;  %v17211_v13 = vpop.permute.xlu1 %1378 }
 0x3fc   : > { %v13663_v28 = vpop.f32.mrb[31].mxu1  ;;  %v2975_v2 = vsel %vm2953_vm2, %v17174_v43, -inf  ;;  %21488 = vst [vmem:[#allocation42_spill] sm:$0xff] %v17211_v13 }
 0x3fd   : > { %2976 = vmax.xlane.f32.xlu1 %v2975_v2 }
 0x3ff   : > { %v17213_v62 = vpop.permute.xlu1 %1382 }
 0x400   : > { %21489 = vst [vmem:[#allocation43_spill] sm:$0xff] %v17213_v62 }
 0x401   : > { %v17179_v16 = vpop.f32.mrb[32].mxu0 }
 0x402   : > { %v13668_v23 = vpop.f32.mrb[33].mxu0  ;;  %v2978_v42 = vsel %vm2953_vm2, %v17179_v16, -inf }
 0x403   : > { %v17183_v29 = vpop.f32.mrb[34].mxu0  ;;  %2979 = vmax.xlane.f32.xlu0 %v2978_v42  ;;  %v17215_v28 = vpop.permute.xlu1 %1386 }
 0x404   : > { %v13669_v34 = vpop.f32.mrb[35].mxu0  ;;  %v2981_v56 = vsel %vm2953_vm2, %v17183_v29, -inf  ;;  %21490 = vst [vmem:[#allocation44_spill] sm:$0xff] %v17215_v28  ;;  %v17219_v23 = vpop.permute.xlu0 %1376 }
 0x405   : > { %2982 = vmax.xlane.f32.xlu1 %v2981_v56  ;;  %21492 = vst [vmem:[#allocation46_spill] sm:$0xff] %v17219_v23 }
 0x407   : > { %v17217_v2 = vpop.permute.xlu1 %1390 }
 0x408   : > { %21491 = vst [vmem:[#allocation45_spill] sm:$0xff] %v17217_v2  ;;  %v17223_v34 = vpop.permute.xlu0 %1380 }
 0x409   : > { %v17187_v6 = vpop.f32.mrb[32].mxu1  ;;  %21494 = vst [vmem:[#allocation48_spill] sm:$0xff] %v17223_v34 }
 0x40a   : > { %v13674_v9 = vpop.f32.mrb[33].mxu1  ;;  %v2984_v12 = vsel %vm2953_vm2, %v17187_v6, -inf }
 0x40b   : > { %v17191_v54 = vpop.f32.mrb[34].mxu1  ;;  %2985 = vmax.xlane.f32.xlu0 %v2984_v12  ;;  %v17221_v42 = vpop.permute.xlu1 %1402 }
 0x40c   : > { %v13675_v17 = vpop.f32.mrb[35].mxu1  ;;  %v2987_v35 = vsel %vm2953_vm2, %v17191_v54, -inf  ;;  %21493 = vst [vmem:[#allocation47_spill] sm:$0xff] %v17221_v42  ;;  %v17227_v9 = vpop.permute.xlu0 %1384 }
 0x40d   : > { %2988 = vmax.xlane.f32.xlu1 %v2987_v35  ;;  %21496 = vst [vmem:[#allocation50_spill] sm:$0xff] %v17227_v9 }
 0x40f   : > { %v17225_v56 = vpop.permute.xlu1 %1406 }
 0x410   : > { %21495 = vst [vmem:[#allocation49_spill] sm:$0xff] %v17225_v56  ;;  %v17231_v17 = vpop.permute.xlu0 %1388 }
 0x411   : > { %v17195_v8 = vpop.f32.mrb[36].mxu0  ;;  %21498 = vst [vmem:[#allocation52_spill] sm:$0xff] %v17231_v17 }
 0x412   : > { %v13680_v10 = vpop.f32.mrb[37].mxu0  ;;  %v2990_v11 = vsel %vm2953_vm2, %v17195_v8, -inf }
 0x413   : > { %v17199_v55 = vpop.f32.mrb[38].mxu0  ;;  %2991 = vmax.xlane.f32.xlu0 %v2990_v11  ;;  %v17229_v12 = vpop.permute.xlu1 %1408 }
 0x414   : > { %v13681_v26 = vpop.f32.mrb[39].mxu0  ;;  %v2993_v27 = vsel %vm2953_vm2, %v17199_v55, -inf  ;;  %21497 = vst [vmem:[#allocation51_spill] sm:$0xff] %v17229_v12 }
 0x415   : > { %2994 = vmax.xlane.f32.xlu1 %v2993_v27 }
 0x417   : > { %v17237_v26 = vpop.permute.xlu1 %1410 }
 0x418   : > { %21499 = vst [vmem:[#allocation53_spill] sm:$0xff] %v17237_v26 }
 0x419   : > { %v17203_v15 = vpop.f32.mrb[36].mxu1 }
 0x41a   : > { %v13686_v21 = vpop.f32.mrb[37].mxu1  ;;  %v2996_v44 = vsel %vm2953_vm2, %v17203_v15, -inf }
 0x41b   : > { %2997 = vmax.xlane.f32.xlu0 %v2996_v44  ;;  %v17207_v32 = vpop.f32.mrb[38].mxu1 }
 0x41c   : > { %v13687_v25 = vpop.f32.mrb[39].mxu1  ;;  %v2999_v52 = vsel %vm2953_vm2, %v17207_v32, -inf }
 0x41d   : > { %3000 = vmax.xlane.f32.xlu1 %v2999_v52  ;;  %v17243_v25 = vpop.permute.xlu0 %1400  ;;  %v17245_v52 = vpop.permute.xlu1 %1414 }
 0x41e   : > { %21500 = vst [vmem:[#allocation54_spill] sm:$0xff] %v17243_v25  ;;  %21501 = vst [vmem:[#allocation55_spill] sm:$0xff] %v17245_v52 }
 0x421   : > { %v17255_v1 = vpop.permute.xlu0 %1404 }
 0x422   : > { %21502 = vst [vmem:[#allocation56_spill] sm:$0xff] %v17255_v1 }
 0x425   : > { %v17263_v0 = vpop.permute.xlu0 %1412 }
 0x426   : > { %21504 = vst [vmem:[#allocation58_spill] sm:$0xff] %v17263_v0 }
 0x454   : > { %v17233_v35 = vpop.f32.mrb[40].mxu0 }
 0x455   : > { %v13692_v10 = vpop.f32.mrb[41].mxu0  ;;  %v3002_v11 = vsel %vm2953_vm2, %v17233_v35, -inf }
 0x456   : > { %3003 = vmax.xlane.f32.xlu0 %v3002_v11  ;;  %v17239_v27 = vpop.f32.mrb[42].mxu0 }
 0x457   : > { %v13693_v21 = vpop.f32.mrb[43].mxu0  ;;  %v3005_v44 = vsel %vm2953_vm2, %v17239_v27, -inf }
 0x458   : > { %3006 = vmax.xlane.f32.xlu1 %v3005_v44  ;;  %v17257_v44 = vpop.permute.xlu1 %1424 }
 0x459   : > { %21503 = vst [vmem:[#allocation57_spill] sm:$0xff] %v17257_v44 }
 0x45c   : > { %v17247_v7 = vpop.f32.mrb[40].mxu1  ;;  %v17269_v59 = vpop.permute.xlu1 %1426 }
 0x45d   : > { %v13698_v10 = vpop.f32.mrb[41].mxu1  ;;  %v3008_v46 = vsel %vm2953_vm2, %v17247_v7, -inf  ;;  %21505 = vst [vmem:[#allocation59_spill] sm:$0xff] %v17269_v59 }
 0x45e   : > { %3009 = vmax.xlane.f32.xlu0 %v3008_v46  ;;  %v17251_v22 = vpop.f32.mrb[42].mxu1 }
 0x45f   : > { %v13699_v11 = vpop.f32.mrb[43].mxu1  ;;  %v3011_v21 = vsel %vm2953_vm2, %v17251_v22, -inf }
 0x460   : > { %3012 = vmax.xlane.f32.xlu1 %v3011_v21  ;;  %v17271_v21 = vpop.permute.xlu0 %1428  ;;  %v17277_v50 = vpop.permute.xlu1 %1430 }
 0x461   : > { %21506 = vst [vmem:[#allocation60_spill] sm:$0xff] %v17271_v21  ;;  %21507 = vst [vmem:[#allocation61_spill] sm:$0xff] %v17277_v50 }
 0x464   : > { %v17259_v5 = vpop.f32.mrb[44].mxu0 }
 0x465   : > { %v13704_v40 = vpop.f32.mrb[45].mxu0  ;;  %v3014_v10 = vsel %vm2953_vm2, %v17259_v5, -inf }
 0x466   : > { %3015 = vmax.xlane.f32.xlu0 %v3014_v10  ;;  %v17265_v46 = vpop.f32.mrb[46].mxu0 }
 0x467   : > { %v13705_v11 = vpop.f32.mrb[47].mxu0  ;;  %v3017_v33 = vsel %vm2953_vm2, %v17265_v46, -inf }
 0x468   : > { %3018 = vmax.xlane.f32.xlu1 %v3017_v33 }
 0x46c   : > { %v17273_v58 = vpop.f32.mrb[44].mxu1 }
 0x46d   : > { %v13710_v40 = vpop.f32.mrb[45].mxu1  ;;  %v3020_v51 = vsel %vm2953_vm2, %v17273_v58, -inf }
 0x46e   : > { %3021 = vmax.xlane.f32.xlu0 %v3020_v51  ;;  %v17279_v10 = vpop.f32.mrb[46].mxu1 }
 0x46f   : > { %v13711_v11 = vpop.f32.mrb[47].mxu1  ;;  %v3023_v57 = vsel %vm2953_vm2, %v17279_v10, -inf }
 0x470   : > { %3024 = vmax.xlane.f32.xlu1 %v3023_v57  ;;  %v2956_v39 = vpop.xlane.xlu0 %2955 }
 0x471   : > { %v3146_v33 = vsub.f32 %v17113_v24, %v2956_v39 }
 0x472   : > { %v2959_v49 = vpop.xlane.xlu1 %2958 }
 0x473   : > { %v3210_v30 = vmul.f32 1.442695, %v3146_v33  ;;  %v3147_v40 = vsub.f32 %v17120_v48, %v2959_v49 }
 0x474   : > { %v17285_v20 = vpop.f32.mrb[48].mxu0 }
 0x475   : > { %15071 = vpow2.f32 %v3210_v30  ;;  %v3212_v19 = vmul.f32 1.442695, %v3147_v40  ;;  %v13716_v63 = vpop.f32.mrb[49].mxu0  ;;  %v3026_v51 = vsel %vm2953_vm2, %v17285_v20, -inf }
 0x476   : > { %3027 = vmax.xlane.f32.xlu0 %v3026_v51  ;;  %v17289_v11 = vpop.f32.mrb[50].mxu0 }
 0x477   : > { %15073 = vpow2.f32 %v3212_v19  ;;  %v13717_v57 = vpop.f32.mrb[51].mxu0  ;;  %v3029_v39 = vsel %vm2953_vm2, %v17289_v11, -inf }
 0x478   : > { %3030 = vmax.xlane.f32.xlu1 %v3029_v39  ;;  %v2962_v24 = vpop.xlane.xlu0 %2961 }
 0x479   : > { %v3148_v49 = vsub.f32 %v17131_v31, %v2962_v24 }
 0x47b   : > { %v3214_v48 = vmul.f32 1.442695, %v3148_v49 }
 0x47c   : > { %v17294_v33 = vpop.f32.mrb[48].mxu1  ;;  %v2965_v30 = vpop.xlane.xlu0 %2964 }
 0x47d   : > { %15075 = vpow2.f32 %v3214_v48  ;;  %v3149_v63 = vsub.f32 %v17138_v36, %v2965_v30  ;;  %v13722_v40 = vpop.f32.mrb[49].mxu1  ;;  %v3032_v51 = vsel %vm2953_vm2, %v17294_v33, -inf }
 0x47e   : > { %3033 = vmax.xlane.f32.xlu0 %v3032_v51  ;;  %v17299_v19 = vpop.f32.mrb[50].mxu1 }
 0x47f   : > { %v17301_v57 = vpop.eup %15071  ;;  %v3216_v39 = vmul.f32 1.442695, %v3149_v63  ;;  %v13723_v60 = vpop.f32.mrb[51].mxu1  ;;  %v3035_v31 = vsel %vm2953_vm2, %v17299_v19, -inf }
 0x480   : > { %3036 = vmax.xlane.f32.xlu1 %v3035_v31  ;;  %v2968_v24 = vpop.xlane.xlu0 %2967  ;;  %v3338_v49 = vsel %vm2953_vm2, %v17301_v57, 0.0 }
 0x481   : > { %v17307_v36 = vpop.eup %15073  ;;  %15077 = vpow2.f32 %v3216_v39  ;;  %v3150_v48 = vsub.f32 %v17149_v14, %v2968_v24 }
 0x482   : > { %v2971_v30 = vpop.xlane.xlu1 %2970  ;;  %3339 = vadd.xlane.f32.xlu0 %v3338_v49  ;;  %v3341_v40 = vsel %vm2953_vm2, %v17307_v36, 0.0 }
 0x483   : > { %v3151_v60 = vsub.f32 %v17156_v3, %v2971_v30  ;;  %v3218_v63 = vmul.f32 1.442695, %v3150_v48 }
 0x484   : > { %3342 = vadd.xlane.f32.xlu1 %v3341_v40  ;;  %v17313_v51 = vpop.f32.mrb[52].mxu0 }
 0x485   : > { %v13728_v31 = vpop.f32.mrb[53].mxu0  ;;  %v3038_v47 = vsel %vm2953_vm2, %v17313_v51, -inf  ;;  %v3220_v14 = vmul.f32 1.442695, %v3151_v60  ;;  %15079 = vpow2.f32 %v3218_v63 }
 0x486   : > { %v17317_v45 = vpop.f32.mrb[54].mxu0  ;;  %3039 = vmax.xlane.f32.xlu0 %v3038_v47 }
 0x487   : > { %v17319_v39 = vpop.eup %15075  ;;  %v13729_v24 = vpop.f32.mrb[55].mxu0  ;;  %v3041_v49 = vsel %vm2953_vm2, %v17317_v45, -inf  ;;  %15081 = vpow2.f32 %v3220_v14 }
 0x488   : > { %3042 = vmax.xlane.f32.xlu1 %v3041_v49  ;;  %v3344_v3 = vsel %vm2953_vm2, %v17319_v39, 0.0  ;;  %v2974_v48 = vpop.xlane.xlu0 %2973 }
 0x489   : > { %v3152_v40 = vsub.f32 %v17166_v61, %v2974_v48 }
 0x48a   : > { %3345 = vadd.xlane.f32.xlu0 %v3344_v3  ;;  %v2977_v47 = vpop.xlane.xlu1 %2976 }
 0x48b   : > { %v17325_v30 = vpop.eup %15077  ;;  %v3153_v3 = vsub.f32 %v17174_v43, %v2977_v47  ;;  %v3222_v14 = vmul.f32 1.442695, %v3152_v40 }
 0x48c   : > { %v17328_v31 = vpop.f32.mrb[52].mxu1  ;;  %v3347_v60 = vsel %vm2953_vm2, %v17325_v30, 0.0 }
 0x48d   : > { %v13734_v24 = vpop.f32.mrb[53].mxu1  ;;  %3348 = vadd.xlane.f32.xlu1 %v3347_v60  ;;  %v3044_v63 = vsel %vm2953_vm2, %v17328_v31, -inf  ;;  %15083 = vpow2.f32 %v3222_v14 }
 0x48e   : > { %v17334_v49 = vpop.f32.mrb[54].mxu1  ;;  %3045 = vmax.xlane.f32.xlu0 %v3044_v63  ;;  %v3224_v63 = vmul.f32 1.442695, %v3153_v3 }
 0x48f   : > { %v13735_v50 = vpop.f32.mrb[55].mxu1  ;;  %v3047_v61 = vsel %vm2953_vm2, %v17334_v49, -inf  ;;  %v17343_v24 = vpop.eup %15079 }
 0x490   : > { %v17339_v48 = vpop.f32.mrb[56].mxu0  ;;  %15085 = vpow2.f32 %v3224_v63 }
 0x491   : > { %v13740_v59 = vpop.f32.mrb[57].mxu0  ;;  %3048 = vmax.xlane.f32.xlu1 %v3047_v61  ;;  %v3050_v60 = vsel %vm2953_vm2, %v17339_v48, -inf  ;;  %v17351_v40 = vpop.eup %15081  ;;  %v3350_v61 = vsel %vm2953_vm2, %v17343_v24, 0.0 }
 0x492   : > { %v17345_v21 = vpop.f32.mrb[58].mxu0  ;;  %3051 = vmax.xlane.f32.xlu0 %v3050_v60  ;;  %v2980_v59 = vpop.xlane.xlu0 %2979  ;;  %v3353_v14 = vsel %vm2953_vm2, %v17351_v40, 0.0 }
 0x493   : > { %v13741_v52 = vpop.f32.mrb[59].mxu0  ;;  %v3053_v50 = vsel %vm2953_vm2, %v17345_v21, -inf  ;;  %v2983_v60 = vpop.xlane.xlu1 %2982 }
 0x494   : > { %v17349_v43 = vpop.f32.mrb[56].mxu1  ;;  %v3154_v52 = vsub.f32 %v17179_v16, %v2980_v59 }
 0x495   : > { %v13746_v47 = vpop.f32.mrb[57].mxu1  ;;  %3054 = vmax.xlane.f32.xlu1 %v3053_v50  ;;  %v3056_v50 = vsel %vm2953_vm2, %v17349_v43, -inf }
 0x496   : > { %v17355_v44 = vpop.f32.mrb[58].mxu1  ;;  %3351 = vadd.xlane.f32.xlu0 %v3350_v61  ;;  %v3155_v61 = vsub.f32 %v17183_v29, %v2983_v60 }
 0x497   : > { %v13747_v3 = vpop.f32.mrb[59].mxu1  ;;  %v3059_v16 = vsel %vm2953_vm2, %v17355_v44, -inf }
 0x498   : > { %v17358_v26 = vpop.f32.mrb[60].mxu0  ;;  %v3226_v3 = vmul.f32 1.442695, %v3154_v52 }
 0x499   : > { %v13752_v0 = vpop.f32.mrb[61].mxu0  ;;  %3354 = vadd.xlane.f32.xlu1 %v3353_v14  ;;  %v17373_v14 = vpop.eup %15083 }
 0x49a   : > { %v17364_v47 = vpop.f32.mrb[62].mxu0  ;;  %3057 = vmax.xlane.f32.xlu0 %v3056_v50  ;;  %v3062_v0 = vsel %vm2953_vm2, %v17358_v26, -inf  ;;  %v3228_v50 = vmul.f32 1.442695, %v3155_v61  ;;  %15087 = vpow2.f32 %v3226_v3  ;;  %v17381_v60 = vpop.eup %15085 }
 0x49b   : > { %v13753_v63 = vpop.f32.mrb[63].mxu0  ;;  %v3065_v52 = vsel %vm2953_vm2, %v17364_v47, -inf  ;;  %v2989_v3 = vpop.xlane.xlu1 %2988  ;;  %v3359_v25 = vsel %vm2953_vm2, %v17381_v60, 0.0 }
 0x49c   : > { %v17367_v56 = vpop.f32.mrb[60].mxu1  ;;  %v2986_v63 = vpop.xlane.xlu0 %2985  ;;  %15089 = vpow2.f32 %v3228_v50 }
 0x49d   : > { %v13758_v59 = vpop.f32.mrb[61].mxu1  ;;  %3060 = vmax.xlane.f32.xlu1 %v3059_v16 }
 0x49e   : > { %v17375_v12 = vpop.f32.mrb[62].mxu1  ;;  %3063 = vmax.xlane.f32.xlu0 %v3062_v0  ;;  %v3356_v59 = vsel %vm2953_vm2, %v17373_v14, 0.0 }
 0x49f   : > { %v13759_v42 = vpop.f32.mrb[63].mxu1 }
 0x4a0   : > { %v17377_v29 = vpop.f32.mrb[64].mxu0  ;;  %v3156_v42 = vsub.f32 %v17187_v6, %v2986_v63  ;;  %v3071_v6 = vsel %vm2953_vm2, %v17375_v12, -inf }
 0x4a1   : > { %v13764_v16 = vpop.f32.mrb[65].mxu0  ;;  %3066 = vmax.xlane.f32.xlu1 %v3065_v52  ;;  %v3068_v52 = vsel %vm2953_vm2, %v17367_v56, -inf }
 0x4a2   : > { %v17385_v1 = vpop.f32.mrb[66].mxu0  ;;  %3357 = vadd.xlane.f32.xlu0 %v3356_v59  ;;  %v3157_v59 = vsub.f32 %v17191_v54, %v2989_v3 }
 0x4a3   : > { %v13765_v61 = vpop.f32.mrb[67].mxu0 }
 0x4a4   : > { %v17388_v0 = vpop.f32.mrb[64].mxu1  ;;  %v3230_v61 = vmul.f32 1.442695, %v3156_v42  ;;  %v3077_v42 = vsel %vm2953_vm2, %v17385_v1, -inf }
 0x4a5   : > { %v13770_v2 = vpop.f32.mrb[65].mxu1  ;;  %3360 = vadd.xlane.f32.xlu1 %v3359_v25  ;;  %v17403_v25 = vpop.eup %15087 }
 0x4a6   : > { %v17394_v16 = vpop.f32.mrb[66].mxu1  ;;  %3069 = vmax.xlane.f32.xlu0 %v3068_v52  ;;  %v3074_v2 = vsel %vm2953_vm2, %v17377_v29, -inf  ;;  %21508 = vst [vmem:[#allocation62_spill] sm:$0xff] %v17403_v25  ;;  %v3232_v52 = vmul.f32 1.442695, %v3157_v59  ;;  %15091 = vpow2.f32 %v3230_v61  ;;  %v17411_v3 = vpop.eup %15089 }
 0x4a7   : > { %v13771_v50 = vpop.f32.mrb[67].mxu1  ;;  %21511 = vst [vmem:[#allocation65_spill] sm:$0xff] %v17411_v3  ;;  %v2995_v61 = vpop.xlane.xlu1 %2994  ;;  %v3365_v34 = vsel %vm2953_vm2, %v17411_v3, 0.0 }
 0x4a8   : > { %v17397_v17 = vpop.f32.mrb[68].mxu0  ;;  %v2992_v50 = vpop.xlane.xlu0 %2991  ;;  %15093 = vpow2.f32 %v3232_v52 }
 0x4a9   : > { %v13776_v63 = vpop.f32.mrb[69].mxu0  ;;  %3072 = vmax.xlane.f32.xlu1 %v3071_v6 }
 0x4aa   : > { %v17405_v28 = vpop.f32.mrb[70].mxu0  ;;  %3075 = vmax.xlane.f32.xlu0 %v3074_v2  ;;  %v3362_v63 = vsel %vm2953_vm2, %v17403_v25, 0.0 }
 0x4ab   : > { %21509 = vst [vmem:[#allocation63_spill] sm:$0xff] %v17405_v28  ;;  %v13777_v9 = vpop.f32.mrb[71].mxu0 }
 0x4ac   : > { %v17407_v54 = vpop.f32.mrb[68].mxu1  ;;  %v3158_v9 = vsub.f32 %v17195_v8, %v2992_v50  ;;  %v3083_v8 = vsel %vm2953_vm2, %v17394_v16, -inf }
 0x4ad   : > { %21510 = vst [vmem:[#allocation64_spill] sm:$0xff] %v17407_v54  ;;  %v13782_v6 = vpop.f32.mrb[69].mxu1  ;;  %3078 = vmax.xlane.f32.xlu1 %v3077_v42  ;;  %v3080_v42 = vsel %vm2953_vm2, %v17388_v0, -inf }
 0x4ae   : > { %v17415_v62 = vpop.f32.mrb[70].mxu1  ;;  %3363 = vadd.xlane.f32.xlu0 %v3362_v63  ;;  %v3159_v63 = vsub.f32 %v17199_v55, %v2995_v61 }
 0x4af   : > { %v13783_v59 = vpop.f32.mrb[71].mxu1 }
 0x4b0   : > { %v17418_v2 = vpop.f32.mrb[72].mxu0  ;;  %v3234_v59 = vmul.f32 1.442695, %v3158_v9  ;;  %v3089_v9 = vsel %vm2953_vm2, %v17405_v28, -inf }
 0x4b1   : > { %v13788_v13 = vpop.f32.mrb[73].mxu0  ;;  %3366 = vadd.xlane.f32.xlu1 %v3365_v34  ;;  %v17433_v34 = vpop.eup %15091 }
 0x4b2   : > { %v17424_v6 = vpop.f32.mrb[74].mxu0  ;;  %3081 = vmax.xlane.f32.xlu0 %v3080_v42  ;;  %v3086_v13 = vsel %vm2953_vm2, %v17397_v17, -inf  ;;  %21513 = vst [vmem:[#allocation67_spill] sm:$0xff] %v17433_v34  ;;  %v3236_v42 = vmul.f32 1.442695, %v3159_v63  ;;  %15095 = vpow2.f32 %v3234_v59  ;;  %v17441_v61 = vpop.eup %15093 }
 0x4b3   : > { %21512 = vst [vmem:[#allocation66_spill] sm:$0xff] %v17424_v6  ;;  %v13789_v52 = vpop.f32.mrb[75].mxu0  ;;  %21515 = vst [vmem:[#allocation69_spill] sm:$0xff] %v17441_v61  ;;  %v3001_v59 = vpop.xlane.xlu1 %3000  ;;  %v3371_v25 = vsel %vm2953_vm2, %v17441_v61, 0.0 }
 0x4b4   : > { %v17427_v23 = vpop.f32.mrb[72].mxu1  ;;  %v2998_v52 = vpop.xlane.xlu0 %2997  ;;  %15097 = vpow2.f32 %v3236_v42 }
 0x4b5   : > { %v13794_v50 = vpop.f32.mrb[73].mxu1  ;;  %3084 = vmax.xlane.f32.xlu1 %v3083_v8 }
 0x4b6   : > { %v17435_v37 = vpop.f32.mrb[74].mxu1  ;;  %3087 = vmax.xlane.f32.xlu0 %v3086_v13  ;;  %v3368_v50 = vsel %vm2953_vm2, %v17433_v34, 0.0 }
 0x4b7   : > { %21514 = vst [vmem:[#allocation68_spill] sm:$0xff] %v17435_v37  ;;  %v13795_v38 = vpop.f32.mrb[75].mxu1 }
 0x4b8   : > { %v17437_v55 = vpop.f32.mrb[76].mxu0  ;;  %v3160_v38 = vsub.f32 %v17203_v15, %v2998_v52  ;;  %v3095_v15 = vsel %vm2953_vm2, %v17415_v62, -inf }
 0x4b9   : > { %v13800_v8 = vpop.f32.mrb[77].mxu0  ;;  %3090 = vmax.xlane.f32.xlu1 %v3089_v9  ;;  %v3092_v9 = vsel %vm2953_vm2, %v17407_v54, -inf }
 0x4ba   : > { %v17445_v3 = vpop.f32.mrb[78].mxu0  ;;  %3369 = vadd.xlane.f32.xlu0 %v3368_v50  ;;  %v3161_v50 = vsub.f32 %v17207_v32, %v3001_v59 }
 0x4bb   : > { %v13801_v63 = vpop.f32.mrb[79].mxu0 }
 0x4bc   : > { %v17448_v13 = vpop.f32.mrb[76].mxu1  ;;  %v3238_v63 = vmul.f32 1.442695, %v3160_v38  ;;  %v3101_v38 = vsel %vm2953_vm2, %v17424_v6, -inf  ;;  %v3104_v6 = vsel %vm2953_vm2, %v17427_v23, -inf }
 0x4bd   : > { %v13806_v28 = vpop.f32.mrb[77].mxu1  ;;  %3372 = vadd.xlane.f32.xlu1 %v3371_v25  ;;  %v17463_v25 = vpop.eup %15095 }
 0x4be   : > { %v17454_v8 = vpop.f32.mrb[78].mxu1  ;;  %3093 = vmax.xlane.f32.xlu0 %v3092_v9  ;;  %v3098_v28 = vsel %vm2953_vm2, %v17418_v2, -inf  ;;  %21516 = vst [vmem:[#allocation70_spill] sm:$0xff] %v17463_v25  ;;  %v3240_v9 = vmul.f32 1.442695, %v3161_v50  ;;  %15099 = vpow2.f32 %v3238_v63  ;;  %v17471_v59 = vpop.eup %15097 }
 0x4bf   : > { %v13807_v42 = vpop.f32.mrb[79].mxu1  ;;  %21518 = vst [vmem:[#allocation72_spill] sm:$0xff] %v17471_v59 }
 0x4c0   : > { %v17457_v34 = vpop.f32.mrb[80].mxu0  ;;  %15101 = vpow2.f32 %v3240_v9  ;;  %v3107_v9 = vsel %vm2953_vm2, %v17435_v37, -inf }
 0x4c1   : > { %v13812_v52 = vpop.f32.mrb[81].mxu0  ;;  %3096 = vmax.xlane.f32.xlu1 %v3095_v15  ;;  %v3374_v15 = vsel %vm2953_vm2, %v17463_v25, 0.0 }
 0x4c2   : > { %v17465_v61 = vpop.f32.mrb[82].mxu0  ;;  %3099 = vmax.xlane.f32.xlu0 %v3098_v28 }
 0x4c3   : > { %v13813_v54 = vpop.f32.mrb[83].mxu0 }
 0x4c4   : > { %v17467_v32 = vpop.f32.mrb[80].mxu1  ;;  %v3377_v54 = vsel %vm2953_vm2, %v17471_v59, 0.0 }
 0x4c5   : > { %21517 = vst [vmem:[#allocation71_spill] sm:$0xff] %v17467_v32  ;;  %v13818_v42 = vpop.f32.mrb[81].mxu1  ;;  %3102 = vmax.xlane.f32.xlu1 %v3101_v38 }
 0x4c6   : > { %v17475_v52 = vpop.f32.mrb[82].mxu1  ;;  %3375 = vadd.xlane.f32.xlu0 %v3374_v15 }
 0x4c7   : > { %v13819_v28 = vpop.f32.mrb[83].mxu1 }
 0x4c8   : > { %v17477_v50 = vpop.f32.mrb[84].mxu0  ;;  %v3110_v28 = vsel %vm2953_vm2, %v17437_v55, -inf  ;;  %v17491_v59 = vpop.eup %15099 }
 0x4c9   : > { %21519 = vst [vmem:[#allocation73_spill] sm:$0xff] %v17477_v50  ;;  %v13824_v63 = vpop.f32.mrb[85].mxu0  ;;  %3378 = vadd.xlane.f32.xlu1 %v3377_v54  ;;  %21522 = vst [vmem:[#allocation76_spill] sm:$0xff] %v17491_v59  ;;  %v3380_v37 = vsel %vm2953_vm2, %v17491_v59, 0.0 }
 0x4ca   : > { %v17483_v42 = vpop.f32.mrb[86].mxu0  ;;  %3105 = vmax.xlane.f32.xlu0 %v3104_v6  ;;  %v3113_v6 = vsel %vm2953_vm2, %v17445_v3, -inf }
 0x4cb   : > { %21520 = vst [vmem:[#allocation74_spill] sm:$0xff] %v17483_v42  ;;  %v13825_v38 = vpop.f32.mrb[87].mxu0 }
 0x4cc   : > { %v17485_v25 = vpop.f32.mrb[84].mxu1  ;;  %v17497_v38 = vpop.eup %15101 }
 0x4cd   : > { %21521 = vst [vmem:[#allocation75_spill] sm:$0xff] %v17485_v25  ;;  %v13830_v15 = vpop.f32.mrb[85].mxu1  ;;  %3108 = vmax.xlane.f32.xlu1 %v3107_v9  ;;  %21523 = vst [vmem:[#allocation77_spill] sm:$0xff] %v17497_v38  ;;  %v3383_v9 = vsel %vm2953_vm2, %v17497_v38, 0.0 }
 0x4ce   : > { %v17493_v54 = vpop.f32.mrb[86].mxu1  ;;  %3111 = vmax.xlane.f32.xlu0 %v3110_v28  ;;  %v3116_v15 = vsel %vm2953_vm2, %v17448_v13, -inf  ;;  %v3119_v28 = vsel %vm2953_vm2, %v17454_v8, -inf }
 0x4cf   : > { %v13831_v63 = vpop.f32.mrb[87].mxu1 }
 0x4d0   : > { %v3122_v63 = vsel %vm2953_vm2, %v17457_v34, -inf }
 0x4d1   : > { %3114 = vmax.xlane.f32.xlu1 %v3113_v6  ;;  %v3125_v6 = vsel %vm2953_vm2, %v17465_v61, -inf }
 0x4d2   : > { %3381 = vadd.xlane.f32.xlu0 %v3380_v37  ;;  %v3128_v37 = vsel %vm2953_vm2, %v17467_v32, -inf }
 0x4d5   : > { %3384 = vadd.xlane.f32.xlu1 %v3383_v9  ;;  %v3131_v9 = vsel %vm2953_vm2, %v17475_v52, -inf }
 0x4d6   : > { %3117 = vmax.xlane.f32.xlu0 %v3116_v15  ;;  %v3134_v15 = vsel %vm2953_vm2, %v17477_v50, -inf }
 0x4d9   : > { %3120 = vmax.xlane.f32.xlu1 %v3119_v28 }
 0x4da   : > { %3123 = vmax.xlane.f32.xlu0 %v3122_v63  ;;  %v3137_v63 = vsel %vm2953_vm2, %v17483_v42, -inf }
 0x4dd   : > { %3126 = vmax.xlane.f32.xlu1 %v3125_v6  ;;  %v3140_v6 = vsel %vm2953_vm2, %v17485_v25, -inf }
 0x4de   : > { %3129 = vmax.xlane.f32.xlu0 %v3128_v37 }
 0x4e1   : > { %3132 = vmax.xlane.f32.xlu1 %v3131_v9 }
 0x4e2   : > { %3135 = vmax.xlane.f32.xlu0 %v3134_v15  ;;  %v3143_v15 = vsel %vm2953_vm2, %v17493_v54, -inf }
 0x4e3   : > { %v3004_v28 = vpop.xlane.xlu0 %3003 }
 0x4e4   : > { %v3162_v38 = vsub.f32 %v17233_v35, %v3004_v28 }
 0x4e5   : > { %v3007_v59 = vpop.xlane.xlu1 %3006  ;;  %3138 = vmax.xlane.f32.xlu1 %v3137_v63 }
 0x4e6   : > { %v3242_v37 = vmul.f32 1.442695, %v3162_v38  ;;  %v3163_v32 = vsub.f32 %v17239_v27, %v3007_v59  ;;  %3141 = vmax.xlane.f32.xlu0 %v3140_v6 }
 0x4e8   : > { %15103 = vpow2.f32 %v3242_v37  ;;  %v3244_v9 = vmul.f32 1.442695, %v3163_v32 }
 0x4e9   : > { %3144 = vmax.xlane.f32.xlu1 %v3143_v15 }
 0x4ea   : > { %15105 = vpow2.f32 %v3244_v9 }
 0x4eb   : > { %v3010_v35 = vpop.xlane.xlu0 %3009 }
 0x4ec   : > { %v3164_v28 = vsub.f32 %v17247_v7, %v3010_v35 }
 0x4ed   : > { %v3013_v42 = vpop.xlane.xlu1 %3012 }
 0x4ee   : > { %v3246_v50 = vmul.f32 1.442695, %v3164_v28  ;;  %v3165_v63 = vsub.f32 %v17251_v22, %v3013_v42 }
 0x4f0   : > { %15107 = vpow2.f32 %v3246_v50  ;;  %v3248_v25 = vmul.f32 1.442695, %v3165_v63 }
 0x4f2   : > { %v17527_v38 = vpop.eup %15103  ;;  %15109 = vpow2.f32 %v3248_v25 }
 0x4f3   : > { %v3016_v27 = vpop.xlane.xlu0 %3015  ;;  %v3386_v32 = vsel %vm2953_vm2, %v17527_v38, 0.0 }
 0x4f4   : > { %v17531_v59 = vpop.eup %15105  ;;  %v3166_v6 = vsub.f32 %v17259_v5, %v3016_v27  ;;  %3387 = vadd.xlane.f32.xlu0 %v3386_v32 }
 0x4f5   : > { %v3019_v37 = vpop.xlane.xlu1 %3018  ;;  %v3389_v7 = vsel %vm2953_vm2, %v17531_v59, 0.0 }
 0x4f6   : > { %v3250_v9 = vmul.f32 1.442695, %v3166_v6  ;;  %v3167_v22 = vsub.f32 %v17265_v46, %v3019_v37  ;;  %3390 = vadd.xlane.f32.xlu1 %v3389_v7 }
 0x4f8   : > { %15111 = vpow2.f32 %v3250_v9  ;;  %v3252_v50 = vmul.f32 1.442695, %v3167_v22 }
 0x4fa   : > { %v17537_v25 = vpop.eup %15107  ;;  %15113 = vpow2.f32 %v3252_v50 }
 0x4fb   : > { %v3022_v42 = vpop.xlane.xlu0 %3021  ;;  %v3392_v15 = vsel %vm2953_vm2, %v17537_v25, 0.0 }
 0x4fc   : > { %v17541_v35 = vpop.eup %15109  ;;  %v3168_v5 = vsub.f32 %v17273_v58, %v3022_v42  ;;  %3393 = vadd.xlane.f32.xlu0 %v3392_v15 }
 0x4fd   : > { %v3025_v28 = vpop.xlane.xlu1 %3024  ;;  %v3395_v63 = vsel %vm2953_vm2, %v17541_v35, 0.0 }
 0x4fe   : > { %v3254_v46 = vmul.f32 1.442695, %v3168_v5  ;;  %v3169_v27 = vsub.f32 %v17279_v10, %v3025_v28  ;;  %3396 = vadd.xlane.f32.xlu1 %v3395_v63 }
 0x500   : > { %15115 = vpow2.f32 %v3254_v46  ;;  %v3256_v32 = vmul.f32 1.442695, %v3169_v27 }
 0x502   : > { %v17547_v6 = vpop.eup %15111  ;;  %15117 = vpow2.f32 %v3256_v32 }
 0x503   : > { %v3028_v37 = vpop.xlane.xlu0 %3027  ;;  %v3398_v7 = vsel %vm2953_vm2, %v17547_v6, 0.0 }
 0x504   : > { %v17551_v9 = vpop.eup %15113  ;;  %v3170_v58 = vsub.f32 %v17285_v20, %v3028_v37  ;;  %3399 = vadd.xlane.f32.xlu0 %v3398_v7 }
 0x505   : > { %v3031_v22 = vpop.xlane.xlu1 %3030  ;;  %v3401_v50 = vsel %vm2953_vm2, %v17551_v9, 0.0 }
 0x506   : > { %v3258_v10 = vmul.f32 1.442695, %v3170_v58  ;;  %v3171_v42 = vsub.f32 %v17289_v11, %v3031_v22  ;;  %3402 = vadd.xlane.f32.xlu1 %v3401_v50 }
 0x508   : > { %15119 = vpow2.f32 %v3258_v10  ;;  %v3260_v15 = vmul.f32 1.442695, %v3171_v42 }
 0x50a   : > { %v17557_v5 = vpop.eup %15115  ;;  %15121 = vpow2.f32 %v3260_v15 }
 0x50b   : > { %v3034_v28 = vpop.xlane.xlu0 %3033  ;;  %v3404_v63 = vsel %vm2953_vm2, %v17557_v5, 0.0 }
 0x50c   : > { %v17561_v46 = vpop.eup %15117  ;;  %v3172_v20 = vsub.f32 %v17294_v33, %v3034_v28  ;;  %3405 = vadd.xlane.f32.xlu0 %v3404_v63 }
 0x50d   : > { %v3037_v27 = vpop.xlane.xlu1 %3036  ;;  %v3407_v32 = vsel %vm2953_vm2, %v17561_v46, 0.0 }
 0x50e   : > { %v3262_v11 = vmul.f32 1.442695, %v3172_v20  ;;  %v3173_v37 = vsub.f32 %v17299_v19, %v3037_v27  ;;  %3408 = vadd.xlane.f32.xlu1 %v3407_v32 }
 0x50f   : > { %v3340_v7 = vpop.xlane.xlu0 %3339 }
 0x510   : > { %15123 = vpow2.f32 %v3262_v11  ;;  %v3264_v58 = vmul.f32 1.442695, %v3173_v37 }
 0x511   : > { %15125 = vrcp.f32 %v3340_v7  ;;  %v3343_v22 = vpop.xlane.xlu1 %3342 }
 0x512   : > { %v17567_v50 = vpop.eup %15119  ;;  %15127 = vpow2.f32 %v3264_v58 }
 0x513   : > { %15129 = vrcp.f32 %v3343_v22  ;;  %v3040_v10 = vpop.xlane.xlu0 %3039  ;;  %v3410_v33 = vsel %vm2953_vm2, %v17567_v50, 0.0 }
 0x514   : > { %v17571_v42 = vpop.eup %15121  ;;  %v3174_v15 = vsub.f32 %v17313_v51, %v3040_v10  ;;  %3411 = vadd.xlane.f32.xlu0 %v3410_v33 }
 0x515   : > { %v3043_v19 = vpop.xlane.xlu1 %3042  ;;  %v3413_v28 = vsel %vm2953_vm2, %v17571_v42, 0.0 }
 0x516   : > { %v3266_v63 = vmul.f32 1.442695, %v3174_v15  ;;  %v3175_v20 = vsub.f32 %v17317_v45, %v3043_v19  ;;  %3414 = vadd.xlane.f32.xlu1 %v3413_v28 }
 0x517   : > { %v3346_v27 = vpop.xlane.xlu0 %3345 }
 0x518   : > { %15131 = vpow2.f32 %v3266_v63  ;;  %v3268_v32 = vmul.f32 1.442695, %v3175_v20 }
 0x519   : > { %15133 = vrcp.f32 %v3346_v27 }
 0x51a   : > { %v17577_v11 = vpop.eup %15123  ;;  %15135 = vpow2.f32 %v3268_v32  ;;  %v3349_v37 = vpop.xlane.xlu1 %3348 }
 0x51b   : > { %v15126_v7 = vpop.eup %15125  ;;  %15137 = vrcp.f32 %v3349_v37  ;;  %v3046_v51 = vpop.xlane.xlu0 %3045  ;;  %v3416_v58 = vsel %vm2953_vm2, %v17577_v11, 0.0 }
 0x51c   : > { %v17581_v22 = vpop.eup %15127  ;;  %v3176_v10 = vsub.f32 %v17328_v31, %v3046_v51  ;;  %3417 = vadd.xlane.f32.xlu0 %v3416_v58  ;;  %v3594_v15 = vmul.f32 %v15126_v7, %v17301_v57 }
 0x51d   : > { %21524 = vst [vmem:[#allocation78_spill] sm:$0xff] %v17581_v22  ;;  %v15130_v45 = vpop.eup %15129  ;;  %v3419_v33 = vsel %vm2953_vm2, %v17581_v22, 0.0 }
 0x51e   : > { %v3595_v19 = vmul.f32 %v15130_v45, %v17307_v36  ;;  %v3270_v28 = vmul.f32 1.442695, %v3176_v10  ;;  %3420 = vadd.xlane.f32.xlu1 %v3419_v33  ;;  %v3049_v63 = vpop.xlane.xlu1 %3048  ;;  %v21525_v10 = vmov 0.0  }
 0x51f   : > { %v3177_v20 = vsub.f32 %v17334_v49, %v3049_v63  ;;  %v3052_v27 = vpop.xlane.xlu0 %3051 }
 0x520   : > { %15139 = vpow2.f32 %v3270_v28  ;;  %v3178_v32 = vsub.f32 %v17339_v48, %v3052_v27  ;;  %v3658_v37 = vpack.c.bf16 %v3595_v19, %v3594_v15 }
 0x521   : > { %v3272_v31 = vmul.f32 1.442695, %v3177_v20 }
 0x522   : > { %v17590_v51 = vpop.eup %15131  ;;  %v3274_v58 = vmul.f32 1.442695, %v3178_v32  ;;  %13835 = vmatmul.mubr.msk.bf16.vlgmr.msra.gmra.mrb[88].mxu0 %vm2953_vm2, %v3658_v37  ;;  %v3055_v22 = vpop.xlane.xlu1 %3054 }
 0x523   : > { %v15134_v57 = vpop.eup %15133  ;;  %13845 = vmatpush3.bf16.msra.mxu0 %v16806_v18  ;;  %v3179_v36 = vsub.f32 %v17345_v21, %v3055_v22  ;;  %v3352_v7 = vpop.xlane.xlu0 %3351  ;;  %v3422_v49 = vsel %vm2953_vm2, %v17590_v51, 0.0  ;;  %13846 = vmatprep.mubr.msk.bf16.mxu0 %vm16134_vm0, %v21525_v10 }
 0x524   : > { %v17599_v48 = vpop.eup %15135  ;;  %15141 = vpow2.f32 %v3274_v58  ;;  %3423 = vadd.xlane.f32.xlu0 %v3422_v49  ;;  %13856 = vmatprep.subr.bf16.mxu0 %v21525_v10  ;;  %v3596_v21 = vmul.f32 %v15134_v57, %v17319_v39 }
 0x525   : > { %v15138_v45 = vpop.eup %15137  ;;  %15143 = vpow2.f32 %v3272_v31  ;;  %v3276_v33 = vmul.f32 1.442695, %v3179_v36  ;;  %v3425_v18 = vsel %vm2953_vm2, %v17599_v48, 0.0 }
 0x526   : > { %v3597_v22 = vmul.f32 %v15138_v45, %v17325_v30  ;;  %15145 = vrcp.f32 %v3352_v7  ;;  %3426 = vadd.xlane.f32.xlu1 %v3425_v18  ;;  %v3355_v15 = vpop.xlane.xlu1 %3354 }
 0x527   : > { %15147 = vpow2.f32 %v3276_v33  ;;  %v3058_v19 = vpop.xlane.xlu0 %3057 }
 0x528   : > { %15149 = vrcp.f32 %v3355_v15  ;;  %v3180_v28 = vsub.f32 %v17349_v43, %v3058_v19  ;;  %v3659_v63 = vpack.c.bf16 %v3597_v22, %v3596_v21 }
 0x52a   : > { %v17607_v20 = vpop.eup %15139  ;;  %v3278_v27 = vmul.f32 1.442695, %v3180_v28  ;;  %v3061_v32 = vpop.xlane.xlu1 %3060  ;;  %13841 = vmatmul.mubr.msk.bf16.vlgmr.msra.gmra.mrb[88].mxu1 %vm2953_vm2, %v3659_v63 }
 0x52b   : > { %v3181_v37 = vsub.f32 %v17355_v44, %v3061_v32  ;;  %13851 = vmatpush3.bf16.msra.mxu1 %v16802_v41  ;;  %v3064_v39 = vpop.xlane.xlu0 %3063  ;;  %v3428_v30 = vsel %vm2953_vm2, %v17607_v20, 0.0  ;;  %13852 = vmatprep.mubr.msk.bf16.mxu1 %vm16134_vm0, %v21525_v10 }
 0x52c   : > { %15151 = vpow2.f32 %v3278_v27  ;;  %v3182_v43 = vsub.f32 %v17358_v26, %v3064_v39  ;;  %3429 = vadd.xlane.f32.xlu0 %v3428_v30  ;;  %13862 = vmatprep.subr.bf16.mxu1 %v21525_v10 }
 0x52d   : > { %v3280_v31 = vmul.f32 1.442695, %v3181_v37 }
 0x52e   : > { %v17618_v58 = vpop.eup %15141  ;;  %v3282_v57 = vmul.f32 1.442695, %v3182_v43  ;;  %v3067_v44 = vpop.xlane.xlu1 %3066 }
 0x52f   : > { %v17620_v36 = vpop.eup %15143  ;;  %v3183_v41 = vsub.f32 %v17364_v47, %v3067_v44  ;;  %v3358_v7 = vpop.xlane.xlu0 %3357  ;;  %v3434_v49 = vsel %vm2953_vm2, %v17618_v58, 0.0 }
 0x530   : > { %v15146_v45 = vpop.eup %15145  ;;  %15153 = vpow2.f32 %v3282_v57  ;;  %3435 = vadd.xlane.f32.xlu1 %v3434_v49  ;;  %v3431_v28 = vsel %vm2953_vm2, %v17620_v36, 0.0 }
 0x531   : > { %v17625_v26 = vpop.eup %15147  ;;  %15155 = vpow2.f32 %v3280_v31  ;;  %v3284_v33 = vmul.f32 1.442695, %v3183_v41  ;;  %v3598_v15 = vmul.f32 %v15146_v45, %v17343_v24 }
 0x532   : > { %v15150_v18 = vpop.eup %15149  ;;  %15157 = vrcp.f32 %v3358_v7  ;;  %v3361_v21 = vpop.xlane.xlu1 %3360  ;;  %v3437_v22 = vsel %vm2953_vm2, %v17625_v26, 0.0 }
 0x533   : > { %v3599_v47 = vmul.f32 %v15150_v18, %v17351_v40  ;;  %15159 = vpow2.f32 %v3284_v33  ;;  %3438 = vadd.xlane.f32.xlu0 %v3437_v22  ;;  %v3070_v19 = vpop.xlane.xlu0 %3069 }
 0x534   : > { %15161 = vrcp.f32 %v3361_v21  ;;  %v3184_v63 = vsub.f32 %v17367_v56, %v3070_v19  ;;  %3432 = vadd.xlane.f32.xlu1 %v3431_v28 }
 0x535   : > { %v3660_v27 = vpack.c.bf16 %v3599_v47, %v3598_v15 }
 0x536   : > { %v17634_v32 = vpop.eup %15151  ;;  %v3286_v37 = vmul.f32 1.442695, %v3184_v63  ;;  %v3073_v39 = vpop.xlane.xlu1 %3072 }
 0x537   : > { %v3185_v30 = vsub.f32 %v17375_v12, %v3073_v39  ;;  %13847 = vmatmul.mubr.msk.bf16.vlgmr.msra.gmra.mrb[92].mxu0 %vm2953_vm2, %v3660_v27  ;;  %v3076_v24 = vpop.xlane.xlu0 %3075  ;;  %v3440_v40 = vsel %vm2953_vm2, %v17634_v32, 0.0 }
 0x538   : > { %15163 = vpow2.f32 %v3286_v37  ;;  %13857 = vmatpush3.bf16.msra.mxu0 %v16833_v53  ;;  %v3186_v43 = vsub.f32 %v17377_v29, %v3076_v24  ;;  %3441 = vadd.xlane.f32.xlu0 %v3440_v40 }
 0x539   : > { %v3288_v56 = vmul.f32 1.442695, %v3185_v30  ;;  %13858 = vmatprep.mubr.msk.bf16.mxu0 %vm16134_vm0, %v21525_v10  ;;  %13868 = vmatprep.subr.bf16.mxu0 %v21525_v10 }
 0x53a   : > { %v17645_v31 = vpop.eup %15153  ;;  %v3290_v12 = vmul.f32 1.442695, %v3186_v43  ;;  %v3079_v57 = vpop.xlane.xlu1 %3078 }
 0x53b   : > { %v17647_v44 = vpop.eup %15155  ;;  %v3187_v41 = vsub.f32 %v17385_v1, %v3079_v57  ;;  %v3364_v7 = vpop.xlane.xlu0 %3363  ;;  %v3446_v49 = vsel %vm2953_vm2, %v17645_v31, 0.0 }
 0x53c   : > { %v15158_v29 = vpop.eup %15157  ;;  %15165 = vpow2.f32 %v3290_v12  ;;  %3447 = vadd.xlane.f32.xlu1 %v3446_v49  ;;  %v3443_v19 = vsel %vm2953_vm2, %v17647_v44, 0.0  ;;  %v21526_v12 = vld [vmem:[#allocation63_spill] sm:$0xff] }
 0x53d   : > { %v17652_v45 = vpop.eup %15159  ;;  %15167 = vpow2.f32 %v3288_v56  ;;  %v3292_v33 = vmul.f32 1.442695, %v3187_v41  ;;  %v3600_v15 = vmul.f32 %v15158_v29, %v17373_v14 }
 0x53e   : > { %v15162_v18 = vpop.eup %15161  ;;  %15169 = vrcp.f32 %v3364_v7  ;;  %v3367_v21 = vpop.xlane.xlu1 %3366  ;;  %v3449_v22 = vsel %vm2953_vm2, %v17652_v45, 0.0 }
 0x53f   : > { %v3601_v1 = vmul.f32 %v15162_v18, %v17381_v60  ;;  %15171 = vpow2.f32 %v3292_v33  ;;  %3450 = vadd.xlane.f32.xlu0 %v3449_v22  ;;  %v3082_v47 = vpop.xlane.xlu0 %3081  ;;  %v21527_v22 = vld [vmem:[#allocation62_spill] sm:$0xff] }
 0x540   : > { %15173 = vrcp.f32 %v3367_v21  ;;  %v3188_v28 = vsub.f32 %v17388_v0, %v3082_v47  ;;  %3444 = vadd.xlane.f32.xlu1 %v3443_v19 }
 0x541   : > { %v3661_v63 = vpack.c.bf16 %v3601_v1, %v3600_v15  ;;  %v21528_v1 = vld [vmem:[#allocation65_spill] sm:$0xff] }
 0x542   : > { %v17661_v27 = vpop.eup %15163  ;;  %v3294_v37 = vmul.f32 1.442695, %v3188_v28  ;;  %v3085_v39 = vpop.xlane.xlu1 %3084 }
 0x543   : > { %v3189_v30 = vsub.f32 %v17394_v16, %v3085_v39  ;;  %13853 = vmatmul.mubr.msk.bf16.vlgmr.msra.gmra.mrb[92].mxu1 %vm2953_vm2, %v3661_v63  ;;  %v3088_v14 = vpop.xlane.xlu0 %3087  ;;  %v3452_v60 = vsel %vm2953_vm2, %v17661_v27, 0.0  ;;  %v21529_v63 = vld [vmem:[#allocation64_spill] sm:$0xff] }
 0x544   : > { %15175 = vpow2.f32 %v3294_v37  ;;  %13863 = vmatpush3.bf16.msra.mxu1 %v16829_v4  ;;  %v3190_v24 = vsub.f32 %v17397_v17, %v3088_v14  ;;  %3453 = vadd.xlane.f32.xlu0 %v3452_v60 }
 0x545   : > { %v3296_v0 = vmul.f32 1.442695, %v3189_v30  ;;  %13864 = vmatprep.mubr.msk.bf16.mxu1 %vm16134_vm0, %v21525_v10  ;;  %13874 = vmatprep.subr.bf16.mxu1 %v21525_v10 }
 0x546   : > { %v17672_v40 = vpop.eup %15165  ;;  %v3298_v16 = vmul.f32 1.442695, %v3190_v24  ;;  %v3091_v43 = vpop.xlane.xlu1 %3090 }
 0x547   : > { %v17674_v56 = vpop.eup %15167  ;;  %v3191_v57 = vsub.f32 %v21526_v12, %v3091_v43  ;;  %v3370_v41 = vpop.xlane.xlu0 %3369  ;;  %v3458_v7 = vsel %vm2953_vm2, %v17672_v40, 0.0  ;;  %v21530_v43 = vld [vmem:[#allocation41_spill] sm:$0xff] }
 0x548   : > { %v15170_v17 = vpop.eup %15169  ;;  %15177 = vpow2.f32 %v3298_v16  ;;  %3459 = vadd.xlane.f32.xlu1 %v3458_v7  ;;  %v3455_v28 = vsel %vm2953_vm2, %v17674_v56, 0.0 }
 0x549   : > { %v17679_v49 = vpop.eup %15171  ;;  %15179 = vpow2.f32 %v3296_v0  ;;  %v3300_v29 = vmul.f32 1.442695, %v3191_v57  ;;  %v3602_v15 = vmul.f32 %v15170_v17, %v21527_v22 }
 0x54a   : > { %v15174_v33 = vpop.eup %15173  ;;  %15181 = vrcp.f32 %v3370_v41  ;;  %v3373_v18 = vpop.xlane.xlu1 %3372  ;;  %v3461_v21 = vsel %vm2953_vm2, %v17679_v49, 0.0 }
 0x54b   : > { %v3603_v47 = vmul.f32 %v15174_v33, %v21528_v1  ;;  %15183 = vpow2.f32 %v3300_v29  ;;  %3462 = vadd.xlane.f32.xlu0 %v3461_v21  ;;  %v3094_v19 = vpop.xlane.xlu0 %3093  ;;  %v21531_v29 = vld [vmem:[#allocation66_spill] sm:$0xff] }
 0x54c   : > { %15185 = vrcp.f32 %v3373_v18  ;;  %v3192_v37 = vsub.f32 %v21529_v63, %v3094_v19  ;;  %3456 = vadd.xlane.f32.xlu1 %v3455_v28  ;;  %v21532_v28 = vld [vmem:[#allocation67_spill] sm:$0xff] }
 0x54d   : > { %v3662_v39 = vpack.c.bf16 %v3603_v47, %v3602_v15 }
 0x54e   : > { %v17688_v30 = vpop.eup %15175  ;;  %v3302_v14 = vmul.f32 1.442695, %v3192_v37  ;;  %v3097_v60 = vpop.xlane.xlu1 %3096  ;;  %v21533_v37 = vld [vmem:[#allocation69_spill] sm:$0xff] }
 0x54f   : > { %v3193_v24 = vsub.f32 %v17415_v62, %v3097_v60  ;;  %13859 = vmatmul.mubr.msk.bf16.vlgmr.msra.gmra.mrb[96].mxu0 %vm2953_vm2, %v3662_v39  ;;  %v3100_v0 = vpop.xlane.xlu0 %3099  ;;  %v3464_v16 = vsel %vm2953_vm2, %v17688_v30, 0.0 }
 0x550   : > { %15187 = vpow2.f32 %v3302_v14  ;;  %13869 = vmatpush3.bf16.msra.mxu0 %v21530_v43  ;;  %v3194_v12 = vsub.f32 %v17418_v2, %v3100_v0  ;;  %3465 = vadd.xlane.f32.xlu0 %v3464_v16 }
 0x551   : > { %v3304_v57 = vmul.f32 1.442695, %v3193_v24  ;;  %13870 = vmatprep.mubr.msk.bf16.mxu0 %vm16134_vm0, %v21525_v10  ;;  %13880 = vmatprep.subr.bf16.mxu0 %v21525_v10 }
 0x552   : > { %v17699_v41 = vpop.eup %15177  ;;  %v3306_v62 = vmul.f32 1.442695, %v3194_v12  ;;  %v3103_v7 = vpop.xlane.xlu1 %3102 }
 0x553   : > { %v17701_v17 = vpop.eup %15179  ;;  %v3195_v33 = vsub.f32 %v21531_v29, %v3103_v7  ;;  %v3376_v18 = vpop.xlane.xlu0 %3375  ;;  %v3470_v21 = vsel %vm2953_vm2, %v17699_v41, 0.0 }
 0x554   : > { %v15182_v2 = vpop.eup %15181  ;;  %15189 = vpow2.f32 %v3306_v62  ;;  %3471 = vadd.xlane.f32.xlu1 %v3470_v21  ;;  %v3467_v60 = vsel %vm2953_vm2, %v17701_v17, 0.0  ;;  %v21534_v62 = vld [vmem:[#allocation68_spill] sm:$0xff] }
 0x555   : > { %v17706_v22 = vpop.eup %15183  ;;  %15191 = vpow2.f32 %v3304_v57  ;;  %v3308_v15 = vmul.f32 1.442695, %v3195_v33  ;;  %v3604_v63 = vmul.f32 %v15182_v2, %v21532_v28 }
 0x556   : > { %v15186_v1 = vpop.eup %15185  ;;  %15193 = vrcp.f32 %v3376_v18  ;;  %v3379_v47 = vpop.xlane.xlu1 %3378  ;;  %v3473_v19 = vsel %vm2953_vm2, %v17706_v22, 0.0  ;;  %v21535_v18 = vld [vmem:[#allocation40_spill] sm:$0xff] }
 0x557   : > { %v3605_v39 = vmul.f32 %v15186_v1, %v21533_v37  ;;  %15195 = vpow2.f32 %v3308_v15  ;;  %3474 = vadd.xlane.f32.xlu0 %v3473_v19  ;;  %v3106_v14 = vpop.xlane.xlu0 %3105 }
 0x558   : > { %15197 = vrcp.f32 %v3379_v47  ;;  %v3196_v24 = vsub.f32 %v17427_v23, %v3106_v14  ;;  %3468 = vadd.xlane.f32.xlu1 %v3467_v60 }
 0x559   : > { %v3663_v0 = vpack.c.bf16 %v3605_v39, %v3604_v63 }
 0x55a   : > { %v17715_v16 = vpop.eup %15187  ;;  %v3310_v12 = vmul.f32 1.442695, %v3196_v24  ;;  %v3109_v57 = vpop.xlane.xlu1 %3108 }
 0x55b   : > { %v3197_v7 = vsub.f32 %v21534_v62, %v3109_v57  ;;  %13865 = vmatmul.mubr.msk.bf16.vlgmr.msra.gmra.mrb[96].mxu1 %vm2953_vm2, %v3663_v0  ;;  %v3112_v29 = vpop.xlane.xlu0 %3111  ;;  %v3476_v33 = vsel %vm2953_vm2, %v17715_v16, 0.0  ;;  %v21536_v0 = vld [vmem:[#allocation70_spill] sm:$0xff]  ;;  %v21537_v57 = vld [vmem:[#allocation72_spill] sm:$0xff] }
 0x55c   : > { %15199 = vpow2.f32 %v3310_v12  ;;  %13875 = vmatpush3.bf16.msra.mxu1 %v21535_v18  ;;  %v3198_v21 = vsub.f32 %v17437_v55, %v3112_v29  ;;  %3477 = vadd.xlane.f32.xlu0 %v3476_v33 }
 0x55d   : > { %v3312_v23 = vmul.f32 1.442695, %v3197_v7  ;;  %13876 = vmatprep.mubr.msk.bf16.mxu1 %vm16134_vm0, %v21525_v10  ;;  %13886 = vmatprep.subr.bf16.mxu1 %v21525_v10 }
 0x55e   : > { %v17726_v2 = vpop.eup %15189  ;;  %v3314_v15 = vmul.f32 1.442695, %v3198_v21  ;;  %v3115_v1 = vpop.xlane.xlu1 %3114 }
 0x55f   : > { %v17728_v47 = vpop.eup %15191  ;;  %15201 = vpow2.f32 %v3312_v23  ;;  %v3199_v19 = vsub.f32 %v17445_v3, %v3115_v1  ;;  %v3382_v28 = vpop.xlane.xlu0 %3381  ;;  %v3482_v55 = vsel %vm2953_vm2, %v17726_v2, 0.0 }
 0x560   : > { %v15194_v63 = vpop.eup %15193  ;;  %15203 = vpow2.f32 %v3314_v15  ;;  %3483 = vadd.xlane.f32.xlu1 %v3482_v55  ;;  %v3479_v7 = vsel %vm2953_vm2, %v17728_v47, 0.0  ;;  %v21538_v55 = vld [vmem:[#allocation46_spill] sm:$0xff] }
 0x561   : > { %v17733_v37 = vpop.eup %15195  ;;  %v3316_v39 = vmul.f32 1.442695, %v3199_v19  ;;  %15205 = vrcp.f32 %v3382_v28  ;;  %v3606_v12 = vmul.f32 %v15194_v63, %v21536_v0 }
 0x562   : > { %v15198_v14 = vpop.eup %15197  ;;  %v3385_v60 = vpop.xlane.xlu1 %3384  ;;  %v3485_v24 = vsel %vm2953_vm2, %v17733_v37, 0.0 }
 0x563   : > { %v3607_v3 = vmul.f32 %v15198_v14, %v21537_v57  ;;  %15207 = vpow2.f32 %v3316_v39  ;;  %3486 = vadd.xlane.f32.xlu0 %v3485_v24  ;;  %v3118_v62 = vpop.xlane.xlu0 %3117 }
 0x564   : > { %15209 = vrcp.f32 %v3385_v60  ;;  %v3200_v29 = vsub.f32 %v17448_v13, %v3118_v62  ;;  %3480 = vadd.xlane.f32.xlu1 %v3479_v7 }
 0x565   : > { %v3664_v33 = vpack.c.bf16 %v3607_v3, %v3606_v12  ;;  %v21539_v3 = vld [vmem:[#allocation71_spill] sm:$0xff] }
 0x566   : > { %v17742_v21 = vpop.eup %15199  ;;  %v3318_v23 = vmul.f32 1.442695, %v3200_v29  ;;  %v3121_v15 = vpop.xlane.xlu1 %3120 }
 0x567   : > { %v3201_v1 = vsub.f32 %v17454_v8, %v3121_v15  ;;  %13871 = vmatmul.mubr.msk.bf16.vlgmr.msra.gmra.mrb[100].mxu0 %vm2953_vm2, %v3664_v33  ;;  %v3124_v19 = vpop.xlane.xlu0 %3123  ;;  %v3488_v28 = vsel %vm2953_vm2, %v17742_v21, 0.0 }
 0x568   : > { %15211 = vpow2.f32 %v3318_v23  ;;  %13881 = vmatpush3.bf16.msra.mxu0 %v21538_v55  ;;  %v3202_v63 = vsub.f32 %v17457_v34, %v3124_v19  ;;  %3489 = vadd.xlane.f32.xlu0 %v3488_v28  ;;  %v21542_v28 = vld [vmem:[#allocation77_spill] sm:$0xff] }
 0x569   : > { %v17750_v13 = vpop.eup %15201  ;;  %13882 = vmatprep.mubr.msk.bf16.mxu0 %vm16134_vm0, %v21525_v10  ;;  %13892 = vmatprep.subr.bf16.mxu0 %v21525_v10  ;;  %v3320_v39 = vmul.f32 1.442695, %v3201_v1  ;;  %v21541_v1 = vld [vmem:[#allocation76_spill] sm:$0xff] }
 0x56a   : > { %v17755_v8 = vpop.eup %15203  ;;  %v3322_v14 = vmul.f32 1.442695, %v3202_v63  ;;  %v3127_v60 = vpop.xlane.xlu1 %3126  ;;  %v3491_v24 = vsel %vm2953_vm2, %v17750_v13, 0.0 }
 0x56b   : > { %v3203_v0 = vsub.f32 %v17465_v61, %v3127_v60  ;;  %3492 = vadd.xlane.f32.xlu1 %v3491_v24  ;;  %v3130_v34 = vpop.xlane.xlu0 %3129  ;;  %v3494_v12 = vsel %vm2953_vm2, %v17755_v8, 0.0  ;;  %v15206_v57 = vpop.eup %15205  ;;  %v21543_v60 = vld [vmem:[#allocation73_spill] sm:$0xff] }
 0x56c   : > { %15213 = vpow2.f32 %v3322_v14  ;;  %v3204_v62 = vsub.f32 %v21539_v3, %v3130_v34  ;;  %3495 = vadd.xlane.f32.xlu0 %v3494_v12  ;;  %v3608_v19 = vmul.f32 %v15206_v57, %v21541_v1 }
 0x56d   : > { %v17763_v7 = vpop.eup %15207  ;;  %v3324_v29 = vmul.f32 1.442695, %v3203_v0  ;;  %15215 = vpow2.f32 %v3320_v39 }
 0x56e   : > { %21540 = vst [vmem:[#allocation63_spill] sm:$0xff] %v17763_v7  ;;  %v15210_v33 = vpop.eup %15209  ;;  %v3326_v23 = vmul.f32 1.442695, %v3204_v62  ;;  %v3133_v15 = vpop.xlane.xlu1 %3132  ;;  %v3497_v61 = vsel %vm2953_vm2, %v17763_v7, 0.0  ;;  %v21544_v62 = vld [vmem:[#allocation74_spill] sm:$0xff] }
 0x56f   : > { %v3609_v55 = vmul.f32 %v15210_v33, %v21542_v28  ;;  %15217 = vpow2.f32 %v3324_v29  ;;  %v3205_v63 = vsub.f32 %v17475_v52, %v3133_v15  ;;  %3498 = vadd.xlane.f32.xlu1 %v3497_v61  ;;  %v3136_v14 = vpop.xlane.xlu0 %3135  ;;  %v21545_v52 = vld [vmem:[#allocation42_spill] sm:$0xff]  ;;  %v21546_v15 = vld [vmem:[#allocation75_spill] sm:$0xff] }
 0x570   : > { %v3206_v24 = vsub.f32 %v21543_v60, %v3136_v14  ;;  %15219 = vpow2.f32 %v3326_v23 }
 0x571   : > { %v3665_v34 = vpack.c.bf16 %v3609_v55, %v3608_v19  ;;  %v3328_v39 = vmul.f32 1.442695, %v3205_v63 }
 0x572   : > { %v17771_v0 = vpop.eup %15211  ;;  %v3330_v12 = vmul.f32 1.442695, %v3206_v24  ;;  %v3139_v3 = vpop.xlane.xlu1 %3138 }
 0x573   : > { %v3207_v7 = vsub.f32 %v21544_v62, %v3139_v3  ;;  %13877 = vmatmul.mubr.msk.bf16.vlgmr.msra.gmra.mrb[100].mxu1 %vm2953_vm2, %v3665_v34  ;;  %v3142_v57 = vpop.xlane.xlu0 %3141  ;;  %v3500_v29 = vsel %vm2953_vm2, %v17771_v0, 0.0 }
 0x574   : > { %15221 = vpow2.f32 %v3330_v12  ;;  %13887 = vmatpush3.bf16.msra.mxu1 %v21545_v52  ;;  %3501 = vadd.xlane.f32.xlu0 %v3500_v29  ;;  %v3208_v61 = vsub.f32 %v21546_v15, %v3142_v57 }
 0x575   : > { %13888 = vmatprep.mubr.msk.bf16.mxu1 %vm16134_vm0, %v21525_v10  ;;  %13898 = vmatprep.subr.bf16.mxu1 %v21525_v10  ;;  %15223 = vpow2.f32 %v3328_v39  ;;  %v3332_v23 = vmul.f32 1.442695, %v3207_v7 }
 0x576   : > { %v17781_v33 = vpop.eup %15213  ;;  %v3334_v55 = vmul.f32 1.442695, %v3208_v61  ;;  %v17798_v24 = vpop.xlane.xlu1 %3144 }
 0x577   : > { %v3506_v1 = vsel %vm2953_vm2, %v17781_v33, 0.0  ;;  %v17786_v19 = vpop.eup %15215  ;;  %15225 = vpow2.f32 %v3332_v23 }
 0x578   : > { %3507 = vadd.xlane.f32.xlu0 %v3506_v1  ;;  %v3503_v14 = vsel %vm2953_vm2, %v17786_v19, 0.0  ;;  %15227 = vpow2.f32 %v3334_v55 }
 0x579   : > { %v17788_v28 = vpop.eup %15217 }
 0x57a   : > { %v3509_v63 = vsel %vm2953_vm2, %v17788_v28, 0.0  ;;  %v17794_v7 = vpop.eup %15219 }
 0x57b   : > { %3510 = vadd.xlane.f32.xlu1 %v3509_v63  ;;  %v3512_v34 = vsel %vm2953_vm2, %v17794_v7, 0.0 }
 0x57c   : > { %3504 = vadd.xlane.f32.xlu0 %v3503_v14 }
 0x57e   : > { %v17796_v60 = vpop.eup %15221 }
 0x57f   : > { %v3518_v39 = vsel %vm2953_vm2, %v17796_v60, 0.0  ;;  %v17804_v12 = vpop.eup %15223 }
 0x580   : > { %3513 = vadd.xlane.f32.xlu0 %v3512_v34  ;;  %3519 = vadd.xlane.f32.xlu1 %v3518_v39  ;;  %v3515_v57 = vsel %vm2953_vm2, %v17804_v12, 0.0 }
 0x581   : > { %v3388_v3 = vpop.xlane.xlu0 %3387  ;;  %v17808_v29 = vpop.eup %15225 }
 0x582   : > { %15229 = vrcp.f32 %v3388_v3  ;;  %v3521_v52 = vsel %vm2953_vm2, %v17808_v29, 0.0  ;;  %v17812_v23 = vpop.eup %15227 }
 0x583   : > { %v3391_v62 = vpop.xlane.xlu1 %3390  ;;  %v3524_v1 = vsel %vm2953_vm2, %v17812_v23, 0.0 }
 0x584   : > { %15231 = vrcp.f32 %v3391_v62  ;;  %3516 = vadd.xlane.f32.xlu0 %v3515_v57 }
 0x588   : > { %3522 = vadd.xlane.f32.xlu0 %v3521_v52  ;;  %v21547_v52 = vld [vmem:[#allocation48_spill] sm:$0xff] }
 0x589   : > { %v3394_v15 = vpop.xlane.xlu0 %3393 }
 0x58a   : > { %15233 = vrcp.f32 %v3394_v15 }
 0x58b   : > { %v3397_v61 = vpop.xlane.xlu1 %3396 }
 0x58c   : > { %v15230_v55 = vpop.eup %15229  ;;  %15235 = vrcp.f32 %v3397_v61  ;;  %3525 = vadd.xlane.f32.xlu0 %v3524_v1 }
 0x58d   : > { %v3610_v14 = vmul.f32 %v15230_v55, %v17527_v38 }
 0x58e   : > { %v15232_v63 = vpop.eup %15231 }
 0x58f   : > { %v3611_v34 = vmul.f32 %v15232_v63, %v17531_v59  ;;  %v21548_v63 = vld [vmem:[#allocation43_spill] sm:$0xff] }
 0x591   : > { %1434 = vrot.lane.b32.xlu1 %v16829_v4, %s16137_s12  ;;  %v3400_v39 = vpop.xlane.xlu0 %3399  ;;  %v3666_v3 = vpack.c.bf16 %v3611_v34, %v3610_v14 }
 0x592   : > { %15237 = vrcp.f32 %v3400_v39  ;;  %v3209_v39 = vsub.f32 %v17493_v54, %v17798_v24 }
 0x593   : > { %v3403_v62 = vpop.xlane.xlu1 %3402  ;;  %13883 = vmatmul.mubr.msk.bf16.vlgmr.msra.gmra.mrb[104].mxu0 %vm2953_vm2, %v3666_v3 }
 0x594   : > { %v15234_v57 = vpop.eup %15233  ;;  %15239 = vrcp.f32 %v3403_v62  ;;  %13893 = vmatpush3.bf16.msra.mxu0 %v21547_v52  ;;  %13894 = vmatprep.mubr.msk.bf16.mxu0 %vm16134_vm0, %v21525_v10 }
 0x595   : > { %1436 = vrot.lane.b32.xlu1 %v21530_v43, %s16137_s12  ;;  %13904 = vmatprep.subr.bf16.mxu0 %v21525_v10  ;;  %v3612_v4 = vmul.f32 %v15234_v57, %v17537_v25  ;;  %v21549_v57 = vld [vmem:[#allocation50_spill] sm:$0xff] }
 0x596   : > { %v15236_v38 = vpop.eup %15235 }
 0x597   : > { %v3613_v59 = vmul.f32 %v15236_v38, %v17541_v35 }
 0x599   : > { %v3406_v15 = vpop.xlane.xlu0 %3405  ;;  %v3667_v61 = vpack.c.bf16 %v3613_v59, %v3612_v4  ;;  %v21550_v59 = vld [vmem:[#allocation44_spill] sm:$0xff] }
 0x59a   : > { %15241 = vrcp.f32 %v3406_v15 }
 0x59b   : > { %v3409_v1 = vpop.xlane.xlu1 %3408  ;;  %13889 = vmatmul.mubr.msk.bf16.vlgmr.msra.gmra.mrb[104].mxu1 %vm2953_vm2, %v3667_v61 }
 0x59c   : > { %v15238_v55 = vpop.eup %15237  ;;  %15243 = vrcp.f32 %v3409_v1  ;;  %13899 = vmatpush3.bf16.msra.mxu1 %v21548_v63  ;;  %13900 = vmatprep.mubr.msk.bf16.mxu1 %vm16134_vm0, %v21525_v10 }
 0x59d   : > { %13910 = vmatprep.subr.bf16.mxu1 %v21525_v10  ;;  %v3614_v25 = vmul.f32 %v15238_v55, %v17547_v6 }
 0x59e   : > { %v15240_v43 = vpop.eup %15239 }
 0x59f   : > { %v3615_v35 = vmul.f32 %v15240_v43, %v17551_v9  ;;  %v3336_v9 = vmul.f32 1.442695, %v3209_v39  ;;  %v21551_v43 = vld [vmem:[#allocation52_spill] sm:$0xff] }
 0x5a1   : > { %v3412_v14 = vpop.xlane.xlu0 %3411  ;;  %v3668_v34 = vpack.c.bf16 %v3615_v35, %v3614_v25  ;;  %v21552_v35 = vld [vmem:[#allocation78_spill] sm:$0xff] }
 0x5a2   : > { %15245 = vrcp.f32 %v3412_v14  ;;  %1432 = vrot.lane.b32.xlu0 %v16833_v53, %s16137_s12 }
 0x5a3   : > { %v3415_v3 = vpop.xlane.xlu1 %3414  ;;  %13895 = vmatmul.mubr.msk.bf16.vlgmr.msra.gmra.mrb[108].mxu0 %vm2953_vm2, %v3668_v34 }
 0x5a4   : > { %v15242_v62 = vpop.eup %15241  ;;  %15247 = vrcp.f32 %v3415_v3  ;;  %13905 = vmatpush3.bf16.msra.mxu0 %v21549_v57  ;;  %13906 = vmatprep.mubr.msk.bf16.mxu0 %vm16134_vm0, %v21525_v10  ;;  %v21553_v57 = vld [vmem:[#allocation45_spill] sm:$0xff] }
 0x5a5   : > { %13916 = vmatprep.subr.bf16.mxu0 %v21525_v10  ;;  %v3616_v52 = vmul.f32 %v15242_v62, %v17557_v5 }
 0x5a6   : > { %v15244_v6 = vpop.eup %15243 }
 0x5a7   : > { %v3617_v53 = vmul.f32 %v15244_v6, %v17561_v46 }
 0x5a9   : > { %v3418_v38 = vpop.xlane.xlu0 %3417  ;;  %v3669_v54 = vpack.c.bf16 %v3617_v53, %v3616_v52 }
 0x5aa   : > { %15249 = vrcp.f32 %v3418_v38 }
 0x5ab   : > { %15251 = vpow2.f32 %v3336_v9  ;;  %v3421_v24 = vpop.xlane.xlu1 %3420  ;;  %13901 = vmatmul.mubr.msk.bf16.vlgmr.msra.gmra.mrb[108].mxu1 %vm2953_vm2, %v3669_v54 }
 0x5ac   : > { %v15246_v4 = vpop.eup %15245  ;;  %15253 = vrcp.f32 %v3421_v24  ;;  %13911 = vmatpush3.bf16.msra.mxu1 %v21550_v59  ;;  %13912 = vmatprep.mubr.msk.bf16.mxu1 %vm16134_vm0, %v21525_v10  ;;  %v21554_v24 = vld [vmem:[#allocation54_spill] sm:$0xff] }
 0x5ad   : > { %13922 = vmatprep.subr.bf16.mxu1 %v21525_v10  ;;  %v3618_v5 = vmul.f32 %v15246_v4, %v17567_v50 }
 0x5ae   : > { %v15248_v15 = vpop.eup %15247 }
 0x5af   : > { %v3619_v46 = vmul.f32 %v15248_v15, %v17571_v42 }
 0x5b1   : > { %v3424_v61 = vpop.xlane.xlu0 %3423  ;;  %v3670_v1 = vpack.c.bf16 %v3619_v46, %v3618_v5 }
 0x5b2   : > { %15255 = vrcp.f32 %v3424_v61 }
 0x5b3   : > { %v3427_v55 = vpop.xlane.xlu1 %3426  ;;  %13907 = vmatmul.mubr.msk.bf16.vlgmr.msra.gmra.mrb[112].mxu0 %vm2953_vm2, %v3670_v1 }
 0x5b4   : > { %v15250_v63 = vpop.eup %15249  ;;  %15257 = vrcp.f32 %v3427_v55  ;;  %13917 = vmatpush3.bf16.msra.mxu0 %v21551_v43  ;;  %13918 = vmatprep.mubr.msk.bf16.mxu0 %vm16134_vm0, %v21525_v10 }
 0x5b5   : > { %v17858_v25 = vpop.eup %15251  ;;  %13928 = vmatprep.subr.bf16.mxu0 %v21525_v10  ;;  %v3620_v42 = vmul.f32 %v15250_v63, %v17577_v11 }
 0x5b6   : > { %v15254_v50 = vpop.eup %15253  ;;  %v3527_v34 = vsel %vm2953_vm2, %v17858_v25, 0.0 }
 0x5b7   : > { %v3621_v14 = vmul.f32 %v15254_v50, %v21552_v35 }
 0x5b9   : > { %3528 = vadd.xlane.f32.xlu1 %v3527_v34  ;;  %v3671_v39 = vpack.c.bf16 %v3621_v14, %v3620_v42  ;;  %v3430_v62 = vpop.xlane.xlu0 %3429 }
 0x5bb   : > { %13913 = vmatmul.mubr.msk.bf16.vlgmr.msra.gmra.mrb[112].mxu1 %vm2953_vm2, %v3671_v39 }
 0x5bc   : > { %v15256_v3 = vpop.eup %15255  ;;  %13923 = vmatpush3.bf16.msra.mxu1 %v21553_v57  ;;  %13924 = vmatprep.mubr.msk.bf16.mxu1 %vm16134_vm0, %v21525_v10 }
 0x5bd   : > { %v3436_v6 = vpop.xlane.xlu1 %3435  ;;  %13934 = vmatprep.subr.bf16.mxu1 %v21525_v10  ;;  %v3622_v9 = vmul.f32 %v15256_v3, %v17590_v51 }
 0x5be   : > { %v15258_v11 = vpop.eup %15257  ;;  %15259 = vrcp.f32 %v3436_v6 }
 0x5bf   : > { %v3623_v52 = vmul.f32 %v15258_v11, %v17599_v48  ;;  %15261 = vrcp.f32 %v3430_v62 }
 0x5c0   : > { %v3439_v53 = vpop.xlane.xlu0 %3438 }
 0x5c1   : > { %15263 = vrcp.f32 %v3439_v53  ;;  %v3433_v38 = vpop.xlane.xlu1 %3432  ;;  %v3672_v54 = vpack.c.bf16 %v3623_v52, %v3622_v9  ;;  %v21557_v53 = vld [vmem:[#allocation51_spill] sm:$0xff] }
 0x5c2   : > { %15265 = vrcp.f32 %v3433_v38 }
 0x5c3   : > { %13919 = vmatmul.mubr.msk.bf16.vlgmr.msra.gmra.mrb[116].mxu0 %vm2953_vm2, %v3672_v54 }
 0x5c4   : > { %13929 = vmatpush3.bf16.msra.mxu0 %v21554_v24  ;;  %13930 = vmatprep.mubr.msk.bf16.mxu0 %vm16134_vm0, %v21525_v10 }
 0x5c5   : > { %13940 = vmatprep.subr.bf16.mxu0 %v21525_v10  ;;  %v3442_v4 = vpop.xlane.xlu0 %3441 }
 0x5c8   : > { %v15260_v51 = vpop.eup %15259 }
 0x5c9   : > { %v3448_v59 = vpop.xlane.xlu1 %3447  ;;  %v15262_v48 = vpop.eup %15261  ;;  %v3626_v46 = vmul.f32 %v15260_v51, %v17618_v58  ;;  %v21556_v58 = vld [vmem:[#allocation47_spill] sm:$0xff] }
 0x5ca   : > { %1438 = vrot.lane.b32.xlu1 %v21535_v18, %s16137_s12  ;;  %15267 = vrcp.f32 %v3448_v59  ;;  %v3624_v55 = vmul.f32 %v15262_v48, %v17607_v20  ;;  %v21555_v18 = vld [vmem:[#allocation56_spill] sm:$0xff] }
 0x5cb   : > { %v15264_v15 = vpop.eup %15263  ;;  %15269 = vrcp.f32 %v3442_v4 }
 0x5cc   : > { %v15266_v5 = vpop.eup %15265  ;;  %v3627_v61 = vmul.f32 %v15264_v15, %v17625_v26  ;;  %v3451_v1 = vpop.xlane.xlu0 %3450 }
 0x5cd   : > { %v3625_v63 = vmul.f32 %v15266_v5, %v17620_v36  ;;  %15271 = vrcp.f32 %v3451_v1  ;;  %v3445_v43 = vpop.xlane.xlu1 %3444  ;;  %v21559_v1 = vld [vmem:[#allocation58_spill] sm:$0xff] }
 0x5ce   : > { %15273 = vrcp.f32 %v3445_v43  ;;  %v3674_v50 = vpack.c.bf16 %v3627_v61, %v3626_v46 }
 0x5cf   : > { %v3673_v42 = vpack.c.bf16 %v3625_v63, %v3624_v55 }
 0x5d0   : > { %13931 = vmatmul.mubr.msk.bf16.vlgmr.msra.gmra.mrb[120].mxu0 %vm2953_vm2, %v3674_v50 }
 0x5d1   : > { %13941 = vmatpush3.bf16.msra.mxu0 %v21555_v18  ;;  %13925 = vmatmul.mubr.msk.bf16.vlgmr.msra.gmra.mrb[116].mxu1 %vm2953_vm2, %v3673_v42  ;;  %v3454_v20 = vpop.xlane.xlu0 %3453 }
 0x5d2   : > { %13935 = vmatpush3.bf16.msra.mxu1 %v21556_v58  ;;  %13942 = vmatprep.mubr.msk.bf16.mxu0 %vm16134_vm0, %v21525_v10 }
 0x5d3   : > { %13952 = vmatprep.subr.bf16.mxu0 %v21525_v10  ;;  %13936 = vmatprep.mubr.msk.bf16.mxu1 %vm16134_vm0, %v21525_v10 }
 0x5d4   : > { %13946 = vmatprep.subr.bf16.mxu1 %v21525_v10  ;;  %v15268_v36 = vpop.eup %15267 }
 0x5d5   : > { %v3460_v26 = vpop.xlane.xlu1 %3459  ;;  %v15270_v35 = vpop.eup %15269  ;;  %v3630_v39 = vmul.f32 %v15268_v36, %v17645_v31  ;;  %v21558_v31 = vld [vmem:[#allocation49_spill] sm:$0xff] }
 0x5d6   : > { %15275 = vrcp.f32 %v3460_v26  ;;  %v3628_v57 = vmul.f32 %v15270_v35, %v17634_v32 }
 0x5d7   : > { %v15272_v14 = vpop.eup %15271  ;;  %15277 = vrcp.f32 %v3454_v20 }
 0x5d8   : > { %v15274_v34 = vpop.eup %15273  ;;  %v3631_v3 = vmul.f32 %v15272_v14, %v17652_v45  ;;  %v3463_v62 = vpop.xlane.xlu0 %3462 }
 0x5d9   : > { %v3629_v6 = vmul.f32 %v15274_v34, %v17647_v44  ;;  %15279 = vrcp.f32 %v3463_v62  ;;  %v3457_v11 = vpop.xlane.xlu1 %3456  ;;  %v21561_v34 = vld [vmem:[#allocation57_spill] sm:$0xff] }
 0x5da   : > { %15281 = vrcp.f32 %v3457_v11  ;;  %v3676_v9 = vpack.c.bf16 %v3631_v3, %v3630_v39  ;;  %v21562_v39 = vld [vmem:[#allocation55_spill] sm:$0xff] }
 0x5db   : > { %v3675_v52 = vpack.c.bf16 %v3629_v6, %v3628_v57 }
 0x5dc   : > { %13943 = vmatmul.mubr.msk.bf16.vlgmr.msra.gmra.mrb[124].mxu0 %vm2953_vm2, %v3676_v9 }
 0x5dd   : > { %13953 = vmatpush3.bf16.msra.mxu0 %v21557_v53  ;;  %13937 = vmatmul.mubr.msk.bf16.vlgmr.msra.gmra.mrb[120].mxu1 %vm2953_vm2, %v3675_v52  ;;  %v3466_v32 = vpop.xlane.xlu0 %3465 }
 0x5de   : > { %13947 = vmatpush3.bf16.msra.mxu1 %v21558_v31  ;;  %13954 = vmatprep.mubr.msk.bf16.mxu0 %vm16134_vm0, %v21525_v10 }
 0x5df   : > { %13964 = vmatprep.subr.bf16.mxu0 %v21525_v10  ;;  %13948 = vmatprep.mubr.msk.bf16.mxu1 %vm16134_vm0, %v21525_v10 }
 0x5e0   : > { %13958 = vmatprep.subr.bf16.mxu1 %v21525_v10  ;;  %v15276_v44 = vpop.eup %15275 }
 0x5e1   : > { %v3472_v45 = vpop.xlane.xlu1 %3471  ;;  %v15278_v38 = vpop.eup %15277  ;;  %v3634_v4 = vmul.f32 %v15276_v44, %v17672_v40  ;;  %v21560_v40 = vld [vmem:[#allocation53_spill] sm:$0xff] }
 0x5e2   : > { %15283 = vrcp.f32 %v3472_v45  ;;  %v3632_v48 = vmul.f32 %v15278_v38, %v17661_v27 }
 0x5e3   : > { %v15280_v54 = vpop.eup %15279  ;;  %15285 = vrcp.f32 %v3466_v32 }
 0x5e4   : > { %v15282_v24 = vpop.eup %15281  ;;  %v3635_v51 = vmul.f32 %v15280_v54, %v17679_v49  ;;  %v3475_v59 = vpop.xlane.xlu0 %3474 }
 0x5e5   : > { %v3633_v15 = vmul.f32 %v15282_v24, %v17674_v56  ;;  %15287 = vrcp.f32 %v3475_v59  ;;  %v3469_v5 = vpop.xlane.xlu1 %3468 }
 0x5e6   : > { %15289 = vrcp.f32 %v3469_v5  ;;  %v3678_v46 = vpack.c.bf16 %v3635_v51, %v3634_v4 }
 0x5e7   : > { %v3677_v61 = vpack.c.bf16 %v3633_v15, %v3632_v48 }
 0x5e8   : > { %13955 = vmatmul.mubr.msk.bf16.vlgmr.msra.gmra.mrb[128].mxu0 %vm2953_vm2, %v3678_v46 }
 0x5e9   : > { %13965 = vmatpush3.bf16.msra.mxu0 %v21559_v1  ;;  %13949 = vmatmul.mubr.msk.bf16.vlgmr.msra.gmra.mrb[124].mxu1 %vm2953_vm2, %v3677_v61  ;;  %v3478_v27 = vpop.xlane.xlu0 %3477 }
 0x5ea   : > { %13959 = vmatpush3.bf16.msra.mxu1 %v21560_v40  ;;  %13966 = vmatprep.mubr.msk.bf16.mxu0 %vm16134_vm0, %v21525_v10 }
 0x5eb   : > { %13976 = vmatprep.subr.bf16.mxu0 %v21525_v10  ;;  %13960 = vmatprep.mubr.msk.bf16.mxu1 %vm16134_vm0, %v21525_v10 }
 0x5ec   : > { %13970 = vmatprep.subr.bf16.mxu1 %v21525_v10  ;;  %v15284_v56 = vpop.eup %15283 }
 0x5ed   : > { %v3484_v49 = vpop.xlane.xlu1 %3483  ;;  %v15286_v55 = vpop.eup %15285  ;;  %v3638_v50 = vmul.f32 %v15284_v56, %v17699_v41 }
 0x5ee   : > { %15291 = vrcp.f32 %v3484_v49  ;;  %v3636_v58 = vmul.f32 %v15286_v55, %v17688_v30 }
 0x5ef   : > { %v15288_v63 = vpop.eup %15287  ;;  %15293 = vrcp.f32 %v3478_v27  ;;  %v21565_v27 = vld [vmem:[#allocation63_spill] sm:$0xff] }
 0x5f0   : > { %v15290_v43 = vpop.eup %15289  ;;  %v3639_v42 = vmul.f32 %v15288_v63, %v17706_v22  ;;  %v3487_v18 = vpop.xlane.xlu0 %3486  ;;  %v21566_v63 = vld [vmem:[#allocation61_spill] sm:$0xff] }
 0x5f1   : > { %v3637_v20 = vmul.f32 %v15290_v43, %v17701_v17  ;;  %15295 = vrcp.f32 %v3487_v18  ;;  %v3481_v36 = vpop.xlane.xlu1 %3480 }
 0x5f2   : > { %15297 = vrcp.f32 %v3481_v36  ;;  %v3680_v26 = vpack.c.bf16 %v3639_v42, %v3638_v50 }
 0x5f3   : > { %v3679_v35 = vpack.c.bf16 %v3637_v20, %v3636_v58 }
 0x5f4   : > { %13967 = vmatmul.mubr.msk.bf16.vlgmr.msra.gmra.mrb[132].mxu0 %vm2953_vm2, %v3680_v26 }
 0x5f5   : > { %v17926_v14 = vpop.f32.mrb[88].mxu0  ;;  %13977 = vmatpush3.bf16.msra.mxu0 %v21561_v34  ;;  %13961 = vmatmul.mubr.msk.bf16.vlgmr.msra.gmra.mrb[128].mxu1 %vm2953_vm2, %v3679_v35  ;;  %v3490_v41 = vpop.xlane.xlu0 %3489 }
 0x5f6   : > { %v13836_v22 = vpop.f32.mrb[89].mxu0  ;;  %13971 = vmatpush3.bf16.msra.mxu1 %v21562_v39  ;;  %13978 = vmatprep.mubr.msk.bf16.mxu0 %vm16134_vm0, %v21525_v10  ;;  %15299 = vrcp.f32 %v3490_v41 }
 0x5f7   : > { %v17933_v30 = vpop.f32.mrb[90].mxu0  ;;  %13988 = vmatprep.subr.bf16.mxu0 %v21525_v10  ;;  %13972 = vmatprep.mubr.msk.bf16.mxu1 %vm16134_vm0, %v21525_v10 }
 0x5f8   : > { %v13837_v17 = vpop.f32.mrb[91].mxu0  ;;  %v3493_v3 = vpop.xlane.xlu1 %3492  ;;  %13982 = vmatprep.subr.bf16.mxu1 %v21525_v10 }
 0x5f9   : > { %v15292_v62 = vpop.eup %15291  ;;  %15301 = vrcp.f32 %v3493_v3  ;;  %v3496_v57 = vpop.xlane.xlu0 %3495 }
 0x5fa   : > { %v15294_v6 = vpop.eup %15293  ;;  %15303 = vrcp.f32 %v3496_v57  ;;  %v3642_v52 = vmul.f32 %v15292_v62, %v17726_v2  ;;  %v21563_v2 = vld [vmem:[#allocation60_spill] sm:$0xff] }
 0x5fb   : > { %v15296_v11 = vpop.eup %15295  ;;  %v3640_v32 = vmul.f32 %v15294_v6, %v17715_v16  ;;  %v21564_v16 = vld [vmem:[#allocation59_spill] sm:$0xff] }
 0x5fc   : > { %v15298_v9 = vpop.eup %15297  ;;  %v3643_v53 = vmul.f32 %v15296_v11, %v17733_v37  ;;  %v3499_v31 = vpop.xlane.xlu1 %3498 }
 0x5fd   : > { %v3641_v44 = vmul.f32 %v15298_v9, %v17728_v47  ;;  %15305 = vrcp.f32 %v3499_v31  ;;  %v17943_v45 = vpop.f32.mrb[88].mxu1 }
 0x5fe   : > { %v13842_v38 = vpop.f32.mrb[89].mxu1  ;;  %v3682_v54 = vpack.c.bf16 %v3643_v53, %v3642_v52 }
 0x5ff   : > { %v17945_v24 = vpop.f32.mrb[90].mxu1  ;;  %v3681_v4 = vpack.c.bf16 %v3641_v44, %v3640_v32 }
 0x600   : > { %v13843_v51 = vpop.f32.mrb[91].mxu1  ;;  %13979 = vmatmul.mubr.msk.bf16.vlgmr.msra.gmra.mrb[136].mxu0 %vm2953_vm2, %v3682_v54  ;;  %v15300_v59 = vpop.eup %15299 }
 0x601   : > { %13989 = vmatpush3.bf16.msra.mxu0 %v21563_v2  ;;  %13973 = vmatmul.mubr.msk.bf16.vlgmr.msra.gmra.mrb[132].mxu1 %vm2953_vm2, %v3681_v4  ;;  %v3502_v37 = vpop.xlane.xlu0 %3501  ;;  %v3644_v48 = vmul.f32 %v15300_v59, %v17742_v21 }
 0x602   : > { %13983 = vmatpush3.bf16.msra.mxu1 %v21564_v16  ;;  %13984 = vmatprep.mubr.msk.bf16.mxu1 %vm16134_vm0, %v21525_v10  ;;  %15307 = vrcp.f32 %v3502_v37 }
 0x603   : > { %v15302_v47 = vpop.eup %15301  ;;  %13994 = vmatprep.subr.bf16.mxu1 %v21525_v10  ;;  %13990 = vmatprep.mubr.msk.bf16.mxu0 %vm16134_vm0, %v21525_v10 }
 0x604   : > { %v3645_v15 = vmul.f32 %v15302_v47, %v17750_v13  ;;  %14000 = vmatprep.subr.bf16.mxu0 %v21525_v10  ;;  %v15304_v5 = vpop.eup %15303 }
 0x605   : > { %v3508_v46 = vpop.xlane.xlu0 %3507  ;;  %v3646_v40 = vmul.f32 %v15304_v5, %v17755_v8 }
 0x606   : > { %v3683_v61 = vpack.c.bf16 %v3645_v15, %v3644_v48 }
 0x607   : > { %v15306_v1 = vpop.eup %15305 }
 0x608   : > { %v3647_v56 = vmul.f32 %v15306_v1, %v21565_v27  ;;  %v3511_v43 = vpop.xlane.xlu1 %3510 }
 0x609   : > { %13985 = vmatmul.mubr.msk.bf16.vlgmr.msra.gmra.mrb[136].mxu1 %vm2953_vm2, %v3683_v61  ;;  %v3505_v49 = vpop.xlane.xlu0 %3504 }
 0x60a   : > { %v17962_v55 = vpop.f32.mrb[92].mxu0  ;;  %13995 = vmatpush3.bf16.msra.mxu1 %v21566_v63  ;;  %15309 = vrcp.f32 %v3505_v49  ;;  %v3684_v21 = vpack.c.bf16 %v3647_v56, %v3646_v40  ;;  %13996 = vmatprep.mubr.msk.bf16.mxu1 %vm16134_vm0, %v21525_v10 }
 0x60b   : > { %v13848_v13 = vpop.f32.mrb[93].mxu0  ;;  %14006 = vmatprep.subr.bf16.mxu1 %v21525_v10  ;;  %15311 = vrcp.f32 %v3511_v43 }
 0x60c   : > { %v17968_v8 = vpop.f32.mrb[94].mxu0  ;;  %13991 = vmatmul.mubr.msk.bf16.vlgmr.msra.gmra.mrb[140].mxu0 %vm2953_vm2, %v3684_v21  ;;  %15313 = vrcp.f32 %v3508_v46  ;;  %v15308_v18 = vpop.eup %15307 }
 0x60d   : > { %v13849_v50 = vpop.f32.mrb[95].mxu0  ;;  %14002 = vmatprep.mubr.msk.bf16.mxu0 %vm16134_vm0, %v21525_v10  ;;  %v3514_v42 = vpop.xlane.xlu0 %3513  ;;  %v3648_v26 = vmul.f32 %v15308_v18, %v17771_v0 }
 0x60e   : > { %15315 = vrcp.f32 %v3514_v42  ;;  %v3520_v20 = vpop.xlane.xlu1 %3519  ;;  %v21567_v42 = vmov 0  }
 0x611   : > { %v3517_v58 = vpop.xlane.xlu0 %3516 }
 0x612   : > { %15317 = vrcp.f32 %v3517_v58  ;;  %v1435_v62 = vpop.permute.xlu1 %1434 }
 0x614   : > { %v15310_v36 = vpop.eup %15309 }
 0x615   : > { %v3649_v35 = vmul.f32 %v15310_v36, %v17786_v19  ;;  %v3523_v41 = vpop.xlane.xlu0 %3522  ;;  %v15312_v3 = vpop.eup %15311 }
 0x616   : > { %v17975_v34 = vpop.f32.mrb[92].mxu1  ;;  %15319 = vrcp.f32 %v3523_v41  ;;  %v15314_v6 = vpop.eup %15313  ;;  %v3651_v19 = vmul.f32 %v15312_v3, %v17788_v28 }
 0x617   : > { %v13854_v22 = vpop.f32.mrb[93].mxu1  ;;  %v3685_v39 = vpack.c.bf16 %v3649_v35, %v3648_v26  ;;  %15321 = vrcp.f32 %v3520_v20  ;;  %v3650_v52 = vmul.f32 %v15314_v6, %v17781_v33  ;;  %v1437_v4 = vpop.permute.xlu1 %1436 }
 0x618   : > { %v17977_v17 = vpop.f32.mrb[94].mxu1  ;;  %v15316_v0 = vpop.eup %15315 }
 0x619   : > { %v13855_v57 = vpop.f32.mrb[95].mxu1  ;;  %13997 = vmatmul.mubr.msk.bf16.vlgmr.msra.gmra.mrb[140].mxu1 %vm2953_vm2, %v3685_v39  ;;  %v3526_v11 = vpop.xlane.xlu0 %3525  ;;  %v3652_v53 = vmul.f32 %v15316_v0, %v17794_v7  ;;  %v3686_v44 = vpack.c.bf16 %v3651_v19, %v3650_v52 }
 0x61a   : > { %14007 = vmatpush3.bf16.msra.mxu1 %v1435_v62  ;;  %14008 = vmatprep.mubr.msk.bf16.mxu1 %vm16134_vm0, %v21525_v10  ;;  %15323 = vrcp.f32 %v3526_v11 }
 0x61b   : > { %14018 = vmatprep.subr.bf16.mxu1 %v21525_v10 }
 0x61c   : > { %v15318_v9 = vpop.eup %15317 }
 0x61d   : > { %v3653_v31 = vmul.f32 %v15318_v9, %v17804_v12  ;;  %v1433_v32 = vpop.permute.xlu0 %1432 }
 0x61e   : > { %14001 = vmatpush3.bf16.msra.mxu0 %v1433_v32 }
 0x61f   : > { %v3687_v38 = vpack.c.bf16 %v3653_v31, %v3652_v53  ;;  %14012 = vmatprep.subr.bf16.mxu0 %v21525_v10 }
 0x620   : > { %v15320_v54 = vpop.eup %15319 }
 0x621   : > { %14003 = vmatmul.mubr.msk.bf16.vlgmr.msra.gmra.mrb[144].mxu0 %vm2953_vm2, %v3686_v44  ;;  %14009 = vmatmul.mubr.msk.bf16.vlgmr.msra.gmra.mrb[144].mxu1 %vm2953_vm2, %v3687_v38  ;;  %v15322_v28 = vpop.eup %15321  ;;  %v3655_v7 = vmul.f32 %v15320_v54, %v17808_v29 }
 0x622   : > { %v17988_v51 = vpop.f32.mrb[96].mxu0  ;;  %14013 = vmatpush3.bf16.msra.mxu0 %v1437_v4  ;;  %14014 = vmatprep.mubr.msk.bf16.mxu0 %vm16134_vm0, %v21525_v10  ;;  %v3654_v2 = vmul.f32 %v15322_v28, %v17796_v60 }
 0x623   : > { %v13860_v33 = vpop.f32.mrb[97].mxu0  ;;  %14020 = vmatprep.mubr.msk.bf16.mxu1 %vm16134_vm0, %v21525_v10 }
 0x624   : > { %v17995_v12 = vpop.f32.mrb[98].mxu0  ;;  %v3688_v37 = vpack.c.bf16 %v3655_v7, %v3654_v2  ;;  %v15324_v63 = vpop.eup %15323 }
 0x625   : > { %v13861_v59 = vpop.f32.mrb[99].mxu0  ;;  %v3656_v13 = vmul.f32 %v15324_v63, %v17812_v23 }
 0x629   : > { %14015 = vmatmul.mubr.msk.bf16.vlgmr.msra.gmra.mrb[148].mxu0 %vm2953_vm2, %v3688_v37 }
 0x62e   : > { %v18001_v16 = vpop.f32.mrb[96].mxu1 }
 0x62f   : > { %v13866_v47 = vpop.f32.mrb[97].mxu1 }
 0x630   : > { %v18003_v48 = vpop.f32.mrb[98].mxu1 }
 0x631   : > { %v13867_v15 = vpop.f32.mrb[99].mxu1 }
 0x63a   : > { %v18005_v5 = vpop.f32.mrb[100].mxu0 }
 0x63b   : > { %v13872_v29 = vpop.f32.mrb[101].mxu0 }
 0x63c   : > { %v18007_v46 = vpop.f32.mrb[102].mxu0 }
 0x63d   : > { %v13873_v61 = vpop.f32.mrb[103].mxu0 }
 0x646   : > { %v18009_v1 = vpop.f32.mrb[100].mxu1  ;;  %v3529_v40 = vpop.xlane.xlu1 %3528 }
 0x647   : > { %v13878_v60 = vpop.f32.mrb[101].mxu1  ;;  %15325 = vrcp.f32 %v3529_v40 }
 0x648   : > { %v18011_v27 = vpop.f32.mrb[102].mxu1 }
 0x649   : > { %v13879_v56 = vpop.f32.mrb[103].mxu1 }
 0x64a   : > { %v1439_v49 = vpop.permute.xlu1 %1438 }
 0x64b   : > { %14019 = vmatpush3.bf16.msra.mxu1 %v1439_v49 }
 0x651   : > { %v15326_v21 = vpop.eup %15325 }
 0x652   : > { %v3657_v43 = vmul.f32 %v15326_v21, %v17858_v25 }
 0x654   : > { %v3689_v50 = vpack.c.bf16 %v3657_v43, %v3656_v13 }
 0x656   : > { %14021 = vmatmul.mubr.msk.bf16.vlgmr.msra.gmra.mrb[148].mxu1 %vm2953_vm2, %v3689_v50  ;;  %v14911_v50 = vld [vmem:[#allocation11] sm:$0xff]  }
 0x657   : > { %5902 = vmatprep.mubr.bf16.mxu1 %v21567_v42  ;;  %14024 = vmatprep.subr.bf16.mxu0 %v14911_v50 }
 0x658   : > { %14025 = vmatpush3.bf16.msra.mxu0 %v14911_v50 }
 0x666   : > { %v4079_v18 = vpop.f32.mrb[104].mxu0 }
 0x667   : > { %v13884_v58 = vpop.f32.mrb[105].mxu0 }
 0x668   : > { %v4082_v20 = vpop.f32.mrb[106].mxu0 }
 0x669   : > { %v14639_v36 = vpack.i.bf16 %v4082_v20, %v4079_v18  ;;  %v13885_v26 = vpop.f32.mrb[107].mxu0  ;;  %v14912_v18 = vld [vmem:[#allocation11 + $0x8] sm:$0xff]  }
 0x66a   : > { %14026 = vmatprep.subr.bf16.mxu0 %v14912_v18 }
 0x66b   : > { %14640 = vrot.lane.b32.xlu0 %v14639_v36, %s16137_s12  ;;  %14027 = vmatpush3.bf16.msra.mxu0 %v14912_v18 }
 0x66e   : > { %v4123_v35 = vpop.f32.mrb[104].mxu1 }
 0x66f   : > { %v13890_v41 = vpop.f32.mrb[105].mxu1 }
 0x670   : > { %v4126_v22 = vpop.f32.mrb[106].mxu1 }
 0x671   : > { %v14644_v39 = vpack.i.bf16 %v4126_v22, %v4123_v35  ;;  %v13891_v3 = vpop.f32.mrb[107].mxu1 }
 0x672   : > { %v14913_v3 = vld [vmem:[#allocation11 + $0x10] sm:$0xff]  }
 0x673   : > { %14645 = vrot.lane.b32.xlu1 %v14644_v39, %s16137_s12  ;;  %14028 = vmatprep.subr.bf16.mxu0 %v14913_v3 }
 0x674   : > { %14029 = vmatpush3.bf16.msra.mxu0 %v14913_v3  ;;  %v14916_v3 = vld [vmem:[#allocation11 + $0x28] sm:$0xff]  }
 0x676   : > { %v18019_v23 = vpop.f32.mrb[108].mxu0 }
 0x677   : > { %v13896_v25 = vpop.f32.mrb[109].mxu0 }
 0x678   : > { %v18021_v62 = vpop.f32.mrb[110].mxu0 }
 0x679   : > { %v14669_v57 = vpack.i.bf16 %v18021_v62, %v18019_v23  ;;  %v13897_v6 = vpop.f32.mrb[111].mxu0 }
 0x67e   : > { %v18025_v11 = vpop.f32.mrb[108].mxu1 }
 0x67f   : > { %v13902_v0 = vpop.f32.mrb[109].mxu1 }
 0x680   : > { %v18027_v19 = vpop.f32.mrb[110].mxu1  ;;  %v14914_v0 = vld [vmem:[#allocation11 + $0x18] sm:$0xff]  }
 0x681   : > { %v14674_v9 = vpack.i.bf16 %v18027_v19, %v18025_v11  ;;  %v13903_v52 = vpop.f32.mrb[111].mxu1  ;;  %14030 = vmatprep.subr.bf16.mxu0 %v14914_v0 }
 0x682   : > { %v14915_v52 = vld [vmem:[#allocation11 + $0x20] sm:$0xff]   ;;  %14031 = vmatpush3.bf16.msra.mxu0 %v14914_v0 }
 0x683   : > { %14032 = vmatprep.subr.bf16.mxu0 %v14915_v52 }
 0x686   : > { %v18031_v53 = vpop.f32.mrb[112].mxu0  ;;  %14033 = vmatpush3.bf16.msra.mxu0 %v14915_v52 }
 0x687   : > { %v13908_v31 = vpop.f32.mrb[113].mxu0  ;;  %14034 = vmatprep.subr.bf16.mxu0 %v14916_v3 }
 0x688   : > { %v18033_v32 = vpop.f32.mrb[114].mxu0 }
 0x689   : > { %v14699_v44 = vpack.i.bf16 %v18033_v32, %v18031_v53  ;;  %v13909_v38 = vpop.f32.mrb[115].mxu0 }
 0x68a   : > { %14035 = vmatpush3.bf16.msra.mxu0 %v14916_v3 }
 0x68e   : > { %v18037_v54 = vpop.f32.mrb[112].mxu1 }
 0x68f   : > { %v13914_v4 = vpop.f32.mrb[113].mxu1 }
 0x690   : > { %v18039_v28 = vpop.f32.mrb[114].mxu1 }
 0x691   : > { %v14704_v33 = vpack.i.bf16 %v18039_v28, %v18037_v54  ;;  %v13915_v7 = vpop.f32.mrb[115].mxu1 }
 0x696   : > { %v18043_v59 = vpop.f32.mrb[116].mxu0 }
 0x697   : > { %v13920_v2 = vpop.f32.mrb[117].mxu0 }
 0x698   : > { %v18045_v37 = vpop.f32.mrb[118].mxu0 }
 0x699   : > { %v14729_v47 = vpack.i.bf16 %v18045_v37, %v18043_v59  ;;  %v13921_v15 = vpop.f32.mrb[119].mxu0 }
 0x6a3   : > { %v4431_v29 = vpop.f32.mrb[120].mxu0 }
 0x6a4   : > { %v18049_v61 = vpop.f32.mrb[116].mxu1  ;;  %v13932_v40 = vpop.f32.mrb[121].mxu0 }
 0x6a5   : > { %v13926_v60 = vpop.f32.mrb[117].mxu1  ;;  %v4434_v56 = vpop.f32.mrb[122].mxu0 }
 0x6a6   : > { %v14649_v49 = vpack.i.bf16 %v4434_v56, %v4431_v29  ;;  %v18051_v63 = vpop.f32.mrb[118].mxu1  ;;  %v13933_v21 = vpop.f32.mrb[123].mxu0 }
 0x6a7   : > { %v14734_v13 = vpack.i.bf16 %v18051_v63, %v18049_v61  ;;  %v13927_v43 = vpop.f32.mrb[119].mxu1 }
 0x6a8   : > { %14650 = vrot.lane.b32.xlu0 %v14649_v49, %s16136_s17 }
 0x6af   : > { %v18056_v58 = vpop.f32.mrb[124].mxu0 }
 0x6b0   : > { %v4475_v20 = vpop.f32.mrb[120].mxu1  ;;  %v13944_v36 = vpop.f32.mrb[125].mxu0 }
 0x6b1   : > { %v13938_v26 = vpop.f32.mrb[121].mxu1  ;;  %v18058_v35 = vpop.f32.mrb[126].mxu0 }
 0x6b2   : > { %v14679_v41 = vpack.i.bf16 %v18058_v35, %v18056_v58  ;;  %v4478_v22 = vpop.f32.mrb[122].mxu1  ;;  %v13945_v39 = vpop.f32.mrb[127].mxu0 }
 0x6b3   : > { %v14654_v25 = vpack.i.bf16 %v4478_v22, %v4475_v20  ;;  %v13939_v6 = vpop.f32.mrb[123].mxu1 }
 0x6b5   : > { %14655 = vrot.lane.b32.xlu1 %v14654_v25, %s16136_s17  ;;  %v14917_v25 = vld [vmem:[#allocation11 + $0x30] sm:$0xff]  }
 0x6b6   : > { %14036 = vmatprep.subr.bf16.mxu0 %v14917_v25 }
 0x6b7   : > { %14037 = vmatpush3.bf16.msra.mxu0 %v14917_v25 }
 0x6bb   : > { %v4607_v31 = vpop.f32.mrb[128].mxu0 }
 0x6bc   : > { %v4563_v38 = vpop.f32.mrb[124].mxu1  ;;  %v13956_v4 = vpop.f32.mrb[129].mxu0 }
 0x6bd   : > { %v13950_v7 = vpop.f32.mrb[125].mxu1  ;;  %v4610_v2 = vpop.f32.mrb[130].mxu0  ;;  %v14918_v4 = vld [vmem:[#allocation11 + $0x38] sm:$0xff]  }
 0x6be   : > { %v14709_v15 = vpack.i.bf16 %v4610_v2, %v4607_v31  ;;  %v4566_v29 = vpop.f32.mrb[126].mxu1  ;;  %v13957_v40 = vpop.f32.mrb[131].mxu0  ;;  %14038 = vmatprep.subr.bf16.mxu0 %v14918_v4 }
 0x6bf   : > { %v14684_v60 = vpack.i.bf16 %v4566_v29, %v4563_v38  ;;  %v13951_v56 = vpop.f32.mrb[127].mxu1  ;;  %14039 = vmatpush3.bf16.msra.mxu0 %v14918_v4 }
 0x6c7   : > { %v18063_v49 = vpop.f32.mrb[132].mxu0 }
 0x6c8   : > { %v18065_v21 = vpop.f32.mrb[128].mxu1  ;;  %v13968_v43 = vpop.f32.mrb[133].mxu0 }
 0x6c9   : > { %v13962_v50 = vpop.f32.mrb[129].mxu1  ;;  %v18067_v18 = vpop.f32.mrb[134].mxu0 }
 0x6ca   : > { %v14739_v20 = vpack.i.bf16 %v18067_v18, %v18063_v49  ;;  %v4654_v36 = vpop.f32.mrb[130].mxu1  ;;  %v13969_v26 = vpop.f32.mrb[135].mxu0 }
 0x6cb   : > { %v14714_v22 = vpack.i.bf16 %v4654_v36, %v18065_v21  ;;  %v13963_v39 = vpop.f32.mrb[131].mxu1 }
 0x6d3   : > { %v4783_v6 = vpop.f32.mrb[136].mxu0 }
 0x6d4   : > { %v4739_v0 = vpop.f32.mrb[132].mxu1  ;;  %v13980_v52 = vpop.f32.mrb[137].mxu0 }
 0x6d5   : > { %v13974_v31 = vpop.f32.mrb[133].mxu1  ;;  %v4786_v38 = vpop.f32.mrb[138].mxu0 }
 0x6d6   : > { %v14659_v7 = vpack.i.bf16 %v4786_v38, %v4783_v6  ;;  %v4742_v2 = vpop.f32.mrb[134].mxu1  ;;  %v13981_v29 = vpop.f32.mrb[139].mxu0 }
 0x6d7   : > { %v14744_v40 = vpack.i.bf16 %v4742_v2, %v4739_v0  ;;  %v13975_v56 = vpop.f32.mrb[135].mxu1 }
 0x6d8   : > { %14660 = vrot.lane.b32.xlu0 %v14659_v7, %s16135_s1 }
 0x6dc   : > { %14670 = vrot.lane.b32.xlu0 %v14669_v57, %s16137_s12  ;;  %v4827_v21 = vpop.f32.mrb[136].mxu1 }
 0x6dd   : > { %v13986_v43 = vpop.f32.mrb[137].mxu1  ;;  %v14641_v7 = vpop.permute.xlu0 %14640 }
 0x6de   : > { %v4830_v50 = vpop.f32.mrb[138].mxu1  ;;  %v14643_v61 = vunpack.i.h.bf16 %v14641_v7  ;;  %v14642_v63 = vunpack.i.l.bf16 %v14641_v7 }
 0x6df   : > { %v14664_v36 = vpack.i.bf16 %v4830_v50, %v4827_v21  ;;  %v13987_v26 = vpop.f32.mrb[139].mxu1  ;;  %v4871_v39 = vpop.f32.mrb[140].mxu0 }
 0x6e0   : > { %14680 = vrot.lane.b32.xlu0 %v14679_v41, %s16136_s17  ;;  %v13992_v3 = vpop.f32.mrb[141].mxu0 }
 0x6e1   : > { %14665 = vrot.lane.b32.xlu1 %v14664_v36, %s16135_s1  ;;  %v4874_v25 = vpop.f32.mrb[142].mxu0 }
 0x6e2   : > { %v14689_v6 = vpack.i.bf16 %v4874_v25, %v4871_v39  ;;  %v13993_v0 = vpop.f32.mrb[143].mxu0 }
 0x6e4   : > { %14690 = vrot.lane.b32.xlu0 %v14689_v6, %s16135_s1 }
 0x6e5   : > { %14675 = vrot.lane.b32.xlu1 %v14674_v9, %s16137_s12  ;;  %v14646_v49 = vpop.permute.xlu1 %14645 }
 0x6e6   : > { %v14648_v6 = vunpack.i.h.bf16 %v14646_v49  ;;  %v14647_v0 = vunpack.i.l.bf16 %v14646_v49 }
 0x6e8   : > { %14700 = vrot.lane.b32.xlu0 %v14699_v44, %s16137_s12 }
 0x6e9   : > { %14685 = vrot.lane.b32.xlu1 %v14684_v60, %s16136_s17 }
 0x6ec   : > { %14710 = vrot.lane.b32.xlu0 %v14709_v15, %s16136_s17  ;;  %v4915_v23 = vpop.f32.mrb[140].mxu1 }
 0x6ed   : > { %v13998_v62 = vpop.f32.mrb[141].mxu1 }
 0x6ee   : > { %v4918_v57 = vpop.f32.mrb[142].mxu1 }
 0x6ef   : > { %v14694_v58 = vpack.i.bf16 %v4918_v57, %v4915_v23  ;;  %v13999_v35 = vpop.f32.mrb[143].mxu1  ;;  %v5293_v57 = vsel %vm1448_vm1, %v17945_v24, %v14648_v6 }
 0x6f1   : > { %14695 = vrot.lane.b32.xlu1 %v14694_v58, %s16135_s1  ;;  %v5292_v58 = vsel %vm1448_vm1, %v17943_v45, %v14647_v0 }
 0x6f4   : > { %v4959_v41 = vpop.f32.mrb[144].mxu0  ;;  %v5003_v52 = vpop.f32.mrb[144].mxu1 }
 0x6f5   : > { %14705 = vrot.lane.b32.xlu1 %v14704_v33, %s16137_s12  ;;  %v14004_v11 = vpop.f32.mrb[145].mxu0  ;;  %v14010_v19 = vpop.f32.mrb[145].mxu1 }
 0x6f6   : > { %v4962_v9 = vpop.f32.mrb[146].mxu0  ;;  %v5006_v53 = vpop.f32.mrb[146].mxu1 }
 0x6f7   : > { %v14719_v32 = vpack.i.bf16 %v4962_v9, %v4959_v41  ;;  %v14724_v44 = vpack.i.bf16 %v5006_v53, %v5003_v52  ;;  %v14005_v15 = vpop.f32.mrb[147].mxu0  ;;  %v14011_v60 = vpop.f32.mrb[147].mxu1 }
 0x6f9   : > { %14715 = vrot.lane.b32.xlu1 %v14714_v22, %s16136_s17  ;;  %14720 = vrot.lane.b32.xlu0 %v14719_v32, %s16135_s1 }
 0x6fc   : > { %v5047_v31 = vpop.f32.mrb[148].mxu0 }
 0x6fd   : > { %14725 = vrot.lane.b32.xlu1 %v14724_v44, %s16135_s1  ;;  %14730 = vrot.lane.b32.xlu0 %v14729_v47, %s16137_s12  ;;  %v14016_v54 = vpop.f32.mrb[149].mxu0 }
 0x6fe   : > { %v5050_v28 = vpop.f32.mrb[150].mxu0 }
 0x6ff   : > { %v14749_v33 = vpack.i.bf16 %v5050_v28, %v5047_v31  ;;  %v14017_v38 = vpop.f32.mrb[151].mxu0 }
 0x701   : > { %14735 = vrot.lane.b32.xlu1 %v14734_v13, %s16137_s12  ;;  %14740 = vrot.lane.b32.xlu0 %v14739_v20, %s16136_s17  ;;  %v5291_v20 = vsel %vm1448_vm1, %v17933_v30, %v14643_v61 }
 0x705   : > { %14745 = vrot.lane.b32.xlu1 %v14744_v40, %s16136_s17  ;;  %14750 = vrot.lane.b32.xlu0 %v14749_v33, %s16135_s1  ;;  %v5290_v40 = vsel %vm1448_vm1, %v17926_v14, %v14642_v63 }
 0x71a   : > { %v14651_v2 = vpop.permute.xlu0 %14650 }
 0x71b   : > { %v14653_v13 = vunpack.i.h.bf16 %v14651_v2  ;;  %v14652_v29 = vunpack.i.l.bf16 %v14651_v2 }
 0x71d   : > { %v5307_v43 = vsel %vm5306_vm3, %v5290_v40, %v14652_v29  ;;  %v5308_v50 = vsel %vm5306_vm3, %v5291_v20, %v14653_v13 }
 0x727   : > { %v14656_v39 = vpop.permute.xlu1 %14655 }
 0x728   : > { %v14658_v30 = vunpack.i.h.bf16 %v14656_v39  ;;  %v14657_v23 = vunpack.i.l.bf16 %v14656_v39 }
 0x729   : > { %v5091_v59 = vpop.f32.mrb[148].mxu1 }
 0x72a   : > { %v14022_v37 = vpop.f32.mrb[149].mxu1  ;;  %v5310_v53 = vsel %vm5306_vm3, %v5293_v57, %v14658_v30  ;;  %v5309_v32 = vsel %vm5306_vm3, %v5292_v58, %v14657_v23 }
 0x72b   : > { %v5094_v47 = vpop.f32.mrb[150].mxu1 }
 0x72c   : > { %v14754_v22 = vpack.i.bf16 %v5094_v47, %v5091_v59  ;;  %v14023_v4 = vpop.f32.mrb[151].mxu1 }
 0x72e   : > { %14755 = vrot.lane.b32.xlu1 %v14754_v22, %s16135_s1 }
 0x74a   : > { %v14661_v18 = vpop.permute.xlu0 %14660 }
 0x74b   : > { %v14663_v56 = vunpack.i.h.bf16 %v14661_v18  ;;  %v14662_v21 = vunpack.i.l.bf16 %v14661_v18 }
 0x74d   : > { %v5324_v36 = vsel %vm5323_vm4, %v5307_v43, %v14662_v21  ;;  %v5325_v26 = vsel %vm5323_vm4, %v5308_v50, %v14663_v56 }
 0x74e   : > { %v14671_v3 = vpop.permute.xlu0 %14670  ;;  %v5340_v25 = vpack.c.bf16 %v5325_v26, %v5324_v36 }
 0x74f   : > { %v14673_v62 = vunpack.i.h.bf16 %v14671_v3  ;;  %v14672_v35 = vunpack.i.l.bf16 %v14671_v3 }
 0x750   : > { %14040 = vmatprep.mubr.bf16.mxu0 %v5340_v25 }
 0x751   : > { %v5295_v44 = vsel %vm1448_vm1, %v17968_v8, %v14673_v62  ;;  %v5294_v45 = vsel %vm1448_vm1, %v17962_v55, %v14672_v35 }
 0x752   : > { %v14681_v14 = vpop.permute.xlu0 %14680 }
 0x753   : > { %v14666_v41 = vpop.permute.xlu1 %14665  ;;  %v14683_v52 = vunpack.i.h.bf16 %v14681_v14  ;;  %v14682_v11 = vunpack.i.l.bf16 %v14681_v14 }
 0x754   : > { %v14668_v19 = vunpack.i.h.bf16 %v14666_v41  ;;  %v14667_v9 = vunpack.i.l.bf16 %v14666_v41 }
 0x755   : > { %v5311_v38 = vsel %vm5306_vm3, %v5294_v45, %v14682_v11  ;;  %v5312_v59 = vsel %vm5306_vm3, %v5295_v44, %v14683_v52 }
 0x756   : > { %v5327_v15 = vsel %vm5323_vm4, %v5310_v53, %v14668_v19  ;;  %v5326_v24 = vsel %vm5323_vm4, %v5309_v32, %v14667_v9  ;;  %v14691_v60 = vpop.permute.xlu0 %14690 }
 0x757   : > { %v14693_v31 = vunpack.i.h.bf16 %v14691_v60  ;;  %v14692_v54 = vunpack.i.l.bf16 %v14691_v60  ;;  %v5341_v28 = vpack.c.bf16 %v5327_v15, %v5326_v24  ;;  %v14676_v33 = vpop.permute.xlu1 %14675 }
 0x758   : > { %v14678_v4 = vunpack.i.h.bf16 %v14676_v33  ;;  %v14677_v7 = vunpack.i.l.bf16 %v14676_v33 }
 0x759   : > { %14041 = vmatmul.mubr.bf16.vlgmr.msra.gmra.mrb[152].mxu0 %v5341_v28  ;;  %v5328_v37 = vsel %vm5323_vm4, %v5311_v38, %v14692_v54  ;;  %v5329_v8 = vsel %vm5323_vm4, %v5312_v59, %v14693_v31 }
 0x75a   : > { %v5342_v47 = vpack.c.bf16 %v5329_v8, %v5328_v37  ;;  %v14701_v2 = vpop.permute.xlu0 %14700  ;;  %v5297_v13 = vsel %vm1448_vm1, %v17977_v17, %v14678_v4  ;;  %v5296_v29 = vsel %vm1448_vm1, %v17975_v34, %v14677_v7 }
 0x75b   : > { %v14686_v22 = vpop.permute.xlu1 %14685  ;;  %v14703_v26 = vunpack.i.h.bf16 %v14701_v2  ;;  %v14702_v39 = vunpack.i.l.bf16 %v14701_v2 }
 0x75c   : > { %14044 = vmatprep.mubr.bf16.mxu0 %v5342_v47  ;;  %v14688_v55 = vunpack.i.h.bf16 %v14686_v22  ;;  %v14687_v61 = vunpack.i.l.bf16 %v14686_v22 }
 0x75d   : > { %v5299_v6 = vsel %vm1448_vm1, %v17995_v12, %v14703_v26  ;;  %v5298_v0 = vsel %vm1448_vm1, %v17988_v51, %v14702_v39  ;;  %v12967_v39 = vld [vmem:[%s21321_s6] ss:$0 sm:$0xff] }
 0x75e   : > { %v5313_v20 = vsel %vm5306_vm3, %v5296_v29, %v14687_v61  ;;  %v5314_v40 = vsel %vm5306_vm3, %v5297_v13, %v14688_v55  ;;  %v14711_v43 = vpop.permute.xlu0 %14710 }
 0x75f   : > { %v14713_v17 = vunpack.i.h.bf16 %v14711_v43  ;;  %v14712_v3 = vunpack.i.l.bf16 %v14711_v43 }
 0x761   : > { %v5315_v35 = vsel %vm5306_vm3, %v5298_v0, %v14712_v3  ;;  %v5316_v41 = vsel %vm5306_vm3, %v5299_v6, %v14713_v17  ;;  %v21568_v6 = vld [vmem:[#allocation21_spill] sm:$0xff] }
 0x763   : > { %v14696_v63 = vpop.permute.xlu1 %14695 }
 0x764   : > { %v14698_v49 = vunpack.i.h.bf16 %v14696_v63  ;;  %v14697_v18 = vunpack.i.l.bf16 %v14696_v63 }
 0x766   : > { %v5330_v56 = vsel %vm5323_vm4, %v5313_v20, %v14697_v18  ;;  %v5331_v21 = vsel %vm5323_vm4, %v5314_v40, %v14698_v49 }
 0x767   : > { %v14706_v50 = vpop.permute.xlu1 %14705  ;;  %v5343_v36 = vpack.c.bf16 %v5331_v21, %v5330_v56 }
 0x768   : > { %v14708_v25 = vunpack.i.h.bf16 %v14706_v50  ;;  %v14707_v30 = vunpack.i.l.bf16 %v14706_v50 }
 0x769   : > { %14045 = vmatmul.mubr.bf16.gmra.mrb[156].mxu0 %v5343_v36 }
 0x76a   : > { %v5301_v52 = vsel %vm1448_vm1, %v18003_v48, %v14708_v25  ;;  %v5300_v51 = vsel %vm1448_vm1, %v18001_v16, %v14707_v30 }
 0x76b   : > { %v14716_v34 = vpop.permute.xlu1 %14715  ;;  %v14721_v23 = vpop.permute.xlu0 %14720 }
 0x76c   : > { %v14718_v62 = vunpack.i.h.bf16 %v14716_v34  ;;  %v14717_v14 = vunpack.i.l.bf16 %v14716_v34  ;;  %v14723_v57 = vunpack.i.h.bf16 %v14721_v23  ;;  %v14722_v58 = vunpack.i.l.bf16 %v14721_v23  ;;  %v21569_v23 = vld [vmem:[#allocation22_spill] sm:$0xff] }
 0x76e   : > { %v5332_v19 = vsel %vm5323_vm4, %v5315_v35, %v14722_v58  ;;  %v5333_v12 = vsel %vm5323_vm4, %v5316_v41, %v14723_v57  ;;  %v5317_v15 = vsel %vm5306_vm3, %v5300_v51, %v14717_v14  ;;  %v5318_v24 = vsel %vm5306_vm3, %v5301_v52, %v14718_v62  ;;  %v21570_v14 = vld [vmem:[#allocation23_spill] sm:$0xff]  ;;  %v21571_v35 = vld [vmem:[#allocation24_spill] sm:$0xff] }
 0x76f   : > { %v14726_v11 = vpop.permute.xlu1 %14725  ;;  %v14731_v32 = vpop.permute.xlu0 %14730  ;;  %v5344_v44 = vpack.c.bf16 %v5333_v12, %v5332_v19 }
 0x770   : > { %v14728_v9 = vunpack.i.h.bf16 %v14726_v11  ;;  %v14727_v53 = vunpack.i.l.bf16 %v14726_v11  ;;  %v14733_v54 = vunpack.i.h.bf16 %v14731_v32  ;;  %v14732_v28 = vunpack.i.l.bf16 %v14731_v32 }
 0x771   : > { %14048 = vmatprep.mubr.bf16.mxu0 %v5344_v44 }
 0x772   : > { %v5334_v60 = vsel %vm5323_vm4, %v5317_v15, %v14727_v53  ;;  %v5335_v48 = vsel %vm5323_vm4, %v5318_v24, %v14728_v9  ;;  %v5303_v59 = vsel %vm1448_vm1, %v18007_v46, %v14733_v54  ;;  %v5302_v37 = vsel %vm1448_vm1, %v18005_v5, %v14732_v28  ;;  %v21572_v53 = vld [vmem:[#allocation25_spill] sm:$0xff]  ;;  %v21573_v24 = vld [vmem:[#allocation26_spill] sm:$0xff] }
 0x773   : > { %v5345_v45 = vpack.c.bf16 %v5335_v48, %v5334_v60  ;;  %v14741_v31 = vpop.permute.xlu0 %14740  ;;  %v14736_v61 = vpop.permute.xlu1 %14735  ;;  %v21574_v48 = vld [vmem:[#allocation27_spill] sm:$0xff] }
 0x774   : > { %v14743_v33 = vunpack.i.h.bf16 %v14741_v31  ;;  %v14742_v16 = vunpack.i.l.bf16 %v14741_v31  ;;  %v14738_v13 = vunpack.i.h.bf16 %v14736_v61  ;;  %v14737_v29 = vunpack.i.l.bf16 %v14736_v61  ;;  %v21575_v31 = vld [vmem:[#allocation28_spill] sm:$0xff] }
 0x775   : > { %14049 = vmatmul.mubr.bf16.gmra.mrb[160].mxu0 %v5345_v45 }
 0x776   : > { %v5319_v22 = vsel %vm5306_vm3, %v5302_v37, %v14742_v16  ;;  %v5320_v4 = vsel %vm5306_vm3, %v5303_v59, %v14743_v33  ;;  %v5305_v5 = vsel %vm1448_vm1, %v18011_v27, %v14738_v13  ;;  %v5304_v20 = vsel %vm1448_vm1, %v18009_v1, %v14737_v29 }
 0x777   : > { %v14751_v38 = vpop.permute.xlu0 %14750  ;;  %v14746_v63 = vpop.permute.xlu1 %14745 }
 0x778   : > { %v14753_v8 = vunpack.i.h.bf16 %v14751_v38  ;;  %v14752_v47 = vunpack.i.l.bf16 %v14751_v38  ;;  %v14748_v46 = vunpack.i.h.bf16 %v14746_v63  ;;  %v14747_v49 = vunpack.i.l.bf16 %v14746_v63  ;;  %v21579_v63 = vld [vmem:[#allocation32_spill] sm:$0xff] }
 0x77a   : > { %v5336_v7 = vsel %vm5323_vm4, %v5319_v22, %v14752_v47  ;;  %v5337_v2 = vsel %vm5323_vm4, %v5320_v4, %v14753_v8  ;;  %v5321_v21 = vsel %vm5306_vm3, %v5304_v20, %v14747_v49  ;;  %v5322_v43 = vsel %vm5306_vm3, %v5305_v5, %v14748_v46  ;;  %v21576_v8 = vld [vmem:[#allocation29_spill] sm:$0xff] }
 0x77b   : > { %v5346_v55 = vpack.c.bf16 %v5337_v2, %v5336_v7  ;;  %v21577_v7 = vld [vmem:[#allocation30_spill] sm:$0xff] }
 0x77d   : > { %14052 = vmatprep.mubr.bf16.mxu0 %v5346_v55  ;;  %v21578_v55 = vld [vmem:[#allocation31_spill] sm:$0xff] }
 0x7a0   : > { %v14756_v18 = vpop.permute.xlu1 %14755 }
 0x7a1   : > { %v14758_v40 = vunpack.i.h.bf16 %v14756_v18  ;;  %v14757_v56 = vunpack.i.l.bf16 %v14756_v18 }
 0x7a3   : > { %v5338_v50 = vsel %vm5323_vm4, %v5321_v21, %v14757_v56  ;;  %v5339_v36 = vsel %vm5323_vm4, %v5322_v43, %v14758_v40  ;;  %v21580_v40 = vld [vmem:[#allocation33_spill] sm:$0xff] }
 0x7a4   : > { %v5347_v26 = vpack.c.bf16 %v5339_v36, %v5338_v50  ;;  %v21581_v50 = vld [vmem:[#allocation34_spill] sm:$0xff] }
 0x7a6   : > { %14053 = vmatmul.mubr.bf16.gmra.mrb[164].mxu0 %v5347_v26  ;;  %v21582_v26 = vld [vmem:[#allocation35_spill] sm:$0xff] }
 0x82c   : > { %v14042_v27 = vpop.f32.mrb[152].mxu0 }
 0x82d   : > { %v5453_v17 = vpop.f32.mrb[153].mxu0  ;;  %v5462_v34 = vadd.f32 %v14042_v27, %v12967_v39 }
 0x82e   : > { %v5454_v3 = vadd.f32 %v12967_v39, %v5453_v17  ;;  %v14043_v1 = vpop.f32.mrb[154].mxu0  ;;  %v21583_v17 = vld [vmem:[#allocation36_spill] sm:$0xff] }
 0x82f   : > { %v5456_v25 = vpop.f32.mrb[155].mxu0  ;;  %v18191_v57 = vadd.f32 %v5462_v34, %v21570_v14  ;;  %v5465_v58 = vadd.f32 %v14043_v1, %v12967_v39  ;;  %v14919_v1 = vld [vmem:[#allocation12] ss:$8 sps:$4 sm:$0xff]   ;;  %v14922_v34 = vld [vmem:[#allocation12 + $0x10] ss:$8 sps:$4 sm:$0xff]  }
 0x830   : > { %v18184_v0 = vadd.f32 %v5454_v3, %v21568_v6  ;;  %v5457_v30 = vadd.f32 %v12967_v39, %v5456_v25  ;;  %v14921_v25 = vld [vmem:[#allocation12 + $0x4] ss:$8 sps:$4 sm:$0xff]  }
 0x831   : > { %v18196_v41 = vadd.f32 %v5465_v58, %v21571_v35  ;;  %5870 = vmatprep.subr.bf16.mxu1 %v14921_v25 }
 0x832   : > { %v18187_v62 = vadd.f32 %v5457_v30, %v21569_v23  ;;  %5534 = vadd.xlane.f32.xlu0 %v18184_v0  ;;  %5871 = vmatpush1.bf16.msra.mxu1 %v14919_v1 }
 0x834   : > { %5536 = vadd.xlane.f32.xlu1 %v18187_v62 }
 0x836   : > { %5538 = vadd.xlane.f32.xlu0 %v18191_v57 }
 0x83a   : > { %5540 = vadd.xlane.f32.xlu0 %v18196_v41 }
 0x83c   : > { %v14046_v52 = vpop.f32.mrb[156].mxu0 }
 0x83d   : > { %v5469_v11 = vpop.f32.mrb[157].mxu0  ;;  %v5478_v9 = vadd.f32 %v14046_v52, %v12967_v39 }
 0x83e   : > { %v5470_v19 = vadd.f32 %v12967_v39, %v5469_v11  ;;  %v14047_v12 = vpop.f32.mrb[158].mxu0 }
 0x83f   : > { %v5472_v51 = vpop.f32.mrb[159].mxu0  ;;  %v5481_v15 = vadd.f32 %v14047_v12, %v12967_v39  ;;  %v18207_v45 = vadd.f32 %v5478_v9, %v21574_v48 }
 0x840   : > { %v18200_v32 = vadd.f32 %v5470_v19, %v21572_v53  ;;  %v5473_v44 = vadd.f32 %v12967_v39, %v5472_v51 }
 0x841   : > { %v18211_v54 = vadd.f32 %v5481_v15, %v21575_v31 }
 0x842   : > { %v18203_v60 = vadd.f32 %v5473_v44, %v21573_v24  ;;  %5542 = vadd.xlane.f32.xlu0 %v18200_v32 }
 0x844   : > { %5544 = vadd.xlane.f32.xlu1 %v18203_v60 }
 0x846   : > { %5546 = vadd.xlane.f32.xlu0 %v18207_v45 }
 0x848   : > { %v14050_v28 = vpop.f32.mrb[160].mxu0  ;;  %5548 = vadd.xlane.f32.xlu1 %v18211_v54 }
 0x849   : > { %v5485_v33 = vpop.f32.mrb[161].mxu0  ;;  %v5494_v37 = vadd.f32 %v14050_v28, %v12967_v39 }
 0x84a   : > { %v5486_v16 = vadd.f32 %v12967_v39, %v5485_v33  ;;  %v14051_v38 = vpop.f32.mrb[162].mxu0 }
 0x84b   : > { %v5488_v59 = vpop.f32.mrb[163].mxu0  ;;  %v5497_v4 = vadd.f32 %v14051_v38, %v12967_v39  ;;  %v18223_v61 = vadd.f32 %v5494_v37, %v21578_v55  ;;  %v14928_v55 = vld [vmem:[#allocation12 + $0x30] ss:$8 sps:$4 sm:$0xff]  }
 0x84c   : > { %v18216_v47 = vadd.f32 %v5486_v16, %v21576_v8  ;;  %v5489_v22 = vadd.f32 %v12967_v39, %v5488_v59  ;;  %v14927_v59 = vld [vmem:[#allocation12 + $0x24] ss:$8 sps:$4 sm:$0xff]  }
 0x84d   : > { %v18227_v13 = vadd.f32 %v5497_v4, %v21579_v63 }
 0x84e   : > { %v18219_v2 = vadd.f32 %v5489_v22, %v21577_v7  ;;  %5550 = vadd.xlane.f32.xlu0 %v18216_v47  ;;  %v14925_v22 = vld [vmem:[#allocation12 + $0x20] ss:$8 sps:$4 sm:$0xff]   ;;  %v14930_v7 = vld [vmem:[#allocation12 + $0x34] ss:$8 sps:$4 sm:$0xff]  }
 0x850   : > { %5552 = vadd.xlane.f32.xlu1 %v18219_v2 }
 0x852   : > { %5554 = vadd.xlane.f32.xlu0 %v18223_v61 }
 0x854   : > { %5556 = vadd.xlane.f32.xlu1 %v18227_v13 }
 0x879   : > { %v14054_v29 = vpop.f32.mrb[164].mxu0 }
 0x87a   : > { %v5501_v46 = vpop.f32.mrb[165].mxu0  ;;  %v5510_v20 = vadd.f32 %v14054_v29, %v12967_v39 }
 0x87b   : > { %v5502_v49 = vadd.f32 %v12967_v39, %v5501_v46  ;;  %v14055_v18 = vpop.f32.mrb[166].mxu0 }
 0x87c   : > { %v5504_v5 = vpop.f32.mrb[167].mxu0  ;;  %v5513_v43 = vadd.f32 %v14055_v18, %v12967_v39  ;;  %v18239_v27 = vadd.f32 %v5510_v20, %v21582_v26  ;;  %v14936_v26 = vld [vmem:[#allocation12 + $0x54] ss:$8 sps:$4 sm:$0xff]  }
 0x87d   : > { %v18232_v56 = vadd.f32 %v5502_v49, %v21580_v40  ;;  %v5505_v21 = vadd.f32 %v12967_v39, %v5504_v5  ;;  %v14924_v39 = vld [vmem:[#allocation12 + $0x14] ss:$8 sps:$4 sm:$0xff]   ;;  %v14933_v49 = vld [vmem:[#allocation12 + $0x44] ss:$8 sps:$4 sm:$0xff]   ;;  %v14931_v5 = vld [vmem:[#allocation12 + $0x40] ss:$8 sps:$4 sm:$0xff]  }
 0x87e   : > { %v18243_v3 = vadd.f32 %v5513_v43, %v21583_v17  ;;  %5872 = vmatprep.subr.bf16.mxu1 %v14924_v39 }
 0x87f   : > { %v18235_v36 = vadd.f32 %v5505_v21, %v21581_v50  ;;  %5558 = vadd.xlane.f32.xlu0 %v18232_v56  ;;  %5873 = vmatpush1.bf16.msra.mxu1 %v14922_v34  ;;  %v14934_v50 = vld [vmem:[#allocation12 + $0x50] ss:$8 sps:$4 sm:$0xff]   ;;  %v14939_v34 = vld [vmem:[#allocation12 + $0x64] ss:$8 sps:$4 sm:$0xff]  }
 0x880   : > { %5874 = vmatprep.subr.bf16.mxu1 %v14927_v59 }
 0x881   : > { %5560 = vadd.xlane.f32.xlu1 %v18235_v36 }
 0x883   : > { %5562 = vadd.xlane.f32.xlu0 %v18239_v27  ;;  %5875 = vmatpush1.bf16.msra.mxu1 %v14925_v22 }
 0x884   : > { %5876 = vmatprep.subr.bf16.mxu1 %v14930_v7 }
 0x885   : > { %5564 = vadd.xlane.f32.xlu1 %v18243_v3 }
 0x887   : > { %5877 = vmatpush1.bf16.msra.mxu1 %v14928_v55  ;;  %v18330_v55 = vld [vmem:[%s21584_s23] ss:$0 sm:$0xff] }
 0x888   : > { %5878 = vmatprep.subr.bf16.mxu1 %v14933_v49 }
 0x88b   : > { %5879 = vmatpush1.bf16.msra.mxu1 %v14931_v5 }
 0x88c   : > { %5880 = vmatprep.subr.bf16.mxu1 %v14936_v26  ;;  %v18338_v26 = vld [vmem:[%s21585_s3] ss:$0 sm:$0xff] }
 0x88f   : > { %5881 = vmatpush1.bf16.msra.mxu1 %v14934_v50 }
 0x890   : > { %5882 = vmatprep.subr.bf16.mxu1 %v14939_v34 }
 0x8bf   : > { %v5535_v6 = vpop.xlane.xlu0 %5534 }
 0x8c0   : > { %v5566_v30 = vmul.f32 0.0078125, %v5535_v6  ;;  %v14937_v6 = vld [vmem:[#allocation12 + $0x60] ss:$8 sps:$4 sm:$0xff]  }
 0x8c1   : > { %v5537_v23 = vpop.xlane.xlu1 %5536  ;;  %5883 = vmatpush1.bf16.msra.mxu1 %v14937_v6 }
 0x8c2   : > { %v18248_v14 = vsub.f32 %v18184_v0, %v5566_v30  ;;  %v5567_v58 = vmul.f32 0.0078125, %v5537_v23  ;;  %v14942_v30 = vld [vmem:[#allocation12 + $0x74] ss:$8 sps:$4 sm:$0xff]   ;;  %v14940_v23 = vld [vmem:[#allocation12 + $0x70] ss:$8 sps:$4 sm:$0xff]  }
 0x8c3   : > { %v5539_v35 = vpop.xlane.xlu0 %5538  ;;  %5884 = vmatprep.subr.bf16.mxu1 %v14942_v30 }
 0x8c4   : > { %v18251_v52 = vsub.f32 %v18187_v62, %v5567_v58  ;;  %v5568_v11 = vmul.f32 0.0078125, %v5539_v35  ;;  %v5598_v19 = vmul.f32 %v18248_v14, %v18248_v14 }
 0x8c5   : > { %5885 = vmatpush1.bf16.msra.mxu1 %v14940_v23 }
 0x8c6   : > { %v18256_v12 = vsub.f32 %v18191_v57, %v5568_v11  ;;  %5614 = vadd.xlane.f32.xlu0 %v5598_v19  ;;  %v5599_v51 = vmul.f32 %v18251_v52, %v18251_v52 }
 0x8c7   : > { %v5541_v9 = vpop.xlane.xlu0 %5540 }
 0x8c8   : > { %v5569_v53 = vmul.f32 0.0078125, %v5541_v9  ;;  %5616 = vadd.xlane.f32.xlu1 %v5599_v51  ;;  %v5600_v0 = vmul.f32 %v18256_v12, %v18256_v12 }
 0x8ca   : > { %v18263_v62 = vsub.f32 %v18196_v41, %v5569_v53  ;;  %5618 = vadd.xlane.f32.xlu0 %v5600_v0 }
 0x8cc   : > { %v5601_v44 = vmul.f32 %v18263_v62, %v18263_v62 }
 0x8ce   : > { %5620 = vadd.xlane.f32.xlu1 %v5601_v44 }
 0x8cf   : > { %v5543_v57 = vpop.xlane.xlu0 %5542 }
 0x8d0   : > { %v5570_v15 = vmul.f32 0.0078125, %v5543_v57 }
 0x8d1   : > { %v5545_v24 = vpop.xlane.xlu1 %5544 }
 0x8d2   : > { %v18268_v48 = vsub.f32 %v18200_v32, %v5570_v15  ;;  %v5571_v31 = vmul.f32 0.0078125, %v5545_v24 }
 0x8d3   : > { %v5547_v28 = vpop.xlane.xlu0 %5546 }
 0x8d4   : > { %v18271_v33 = vsub.f32 %v18203_v60, %v5571_v31  ;;  %v5572_v16 = vmul.f32 0.0078125, %v5547_v28  ;;  %v5602_v41 = vmul.f32 %v18268_v48, %v18268_v48 }
 0x8d5   : > { %v5549_v38 = vpop.xlane.xlu1 %5548 }
 0x8d6   : > { %v18276_v37 = vsub.f32 %v18207_v45, %v5572_v16  ;;  %v5573_v8 = vmul.f32 0.0078125, %v5549_v38  ;;  %5622 = vadd.xlane.f32.xlu0 %v5602_v41  ;;  %v5603_v32 = vmul.f32 %v18271_v33, %v18271_v33 }
 0x8d8   : > { %v18281_v4 = vsub.f32 %v18211_v54, %v5573_v8  ;;  %5624 = vadd.xlane.f32.xlu1 %v5603_v32  ;;  %v5604_v60 = vmul.f32 %v18276_v37, %v18276_v37 }
 0x8da   : > { %5626 = vadd.xlane.f32.xlu0 %v5604_v60  ;;  %v5605_v45 = vmul.f32 %v18281_v4, %v18281_v4 }
 0x8db   : > { %v5551_v63 = vpop.xlane.xlu0 %5550 }
 0x8dc   : > { %v5574_v29 = vmul.f32 0.0078125, %v5551_v63  ;;  %5628 = vadd.xlane.f32.xlu1 %v5605_v45 }
 0x8dd   : > { %v5553_v46 = vpop.xlane.xlu1 %5552 }
 0x8de   : > { %v18288_v54 = vsub.f32 %v18216_v47, %v5574_v29  ;;  %v5575_v18 = vmul.f32 0.0078125, %v5553_v46 }
 0x8df   : > { %v5555_v20 = vpop.xlane.xlu0 %5554 }
 0x8e0   : > { %v18291_v40 = vsub.f32 %v18219_v2, %v5575_v18  ;;  %v5576_v21 = vmul.f32 0.0078125, %v5555_v20  ;;  %v5606_v43 = vmul.f32 %v18288_v54, %v18288_v54 }
 0x8e1   : > { %v5557_v17 = vpop.xlane.xlu1 %5556 }
 0x8e2   : > { %v18296_v1 = vsub.f32 %v18223_v61, %v5576_v21  ;;  %v5577_v47 = vmul.f32 0.0078125, %v5557_v17  ;;  %5630 = vadd.xlane.f32.xlu0 %v5606_v43  ;;  %v5607_v25 = vmul.f32 %v18291_v40, %v18291_v40 }
 0x8e4   : > { %v18301_v2 = vsub.f32 %v18227_v13, %v5577_v47  ;;  %5632 = vadd.xlane.f32.xlu1 %v5607_v25  ;;  %v5608_v39 = vmul.f32 %v18296_v1, %v18296_v1 }
 0x8e6   : > { %5634 = vadd.xlane.f32.xlu0 %v5608_v39  ;;  %v5609_v61 = vmul.f32 %v18301_v2, %v18301_v2 }
 0x8e8   : > { %5636 = vadd.xlane.f32.xlu1 %v5609_v61 }
 0x90c   : > { %v5559_v13 = vpop.xlane.xlu0 %5558 }
 0x90d   : > { %v5578_v58 = vmul.f32 0.0078125, %v5559_v13 }
 0x90e   : > { %v5561_v35 = vpop.xlane.xlu1 %5560 }
 0x90f   : > { %v18308_v11 = vsub.f32 %v18232_v56, %v5578_v58  ;;  %v5579_v19 = vmul.f32 0.0078125, %v5561_v35 }
 0x910   : > { %v5563_v51 = vpop.xlane.xlu0 %5562 }
 0x911   : > { %v18311_v9 = vsub.f32 %v18235_v36, %v5579_v19  ;;  %v5580_v53 = vmul.f32 0.0078125, %v5563_v51  ;;  %v5610_v0 = vmul.f32 %v18308_v11, %v18308_v11 }
 0x912   : > { %v5565_v44 = vpop.xlane.xlu1 %5564 }
 0x913   : > { %v18316_v57 = vsub.f32 %v18239_v27, %v5580_v53  ;;  %v5581_v15 = vmul.f32 0.0078125, %v5565_v44  ;;  %5638 = vadd.xlane.f32.xlu0 %v5610_v0  ;;  %v5611_v24 = vmul.f32 %v18311_v9, %v18311_v9 }
 0x915   : > { %v18321_v56 = vsub.f32 %v18243_v3, %v5581_v15  ;;  %5640 = vadd.xlane.f32.xlu1 %v5611_v24  ;;  %v5612_v36 = vmul.f32 %v18316_v57, %v18316_v57 }
 0x917   : > { %5642 = vadd.xlane.f32.xlu0 %v5612_v36  ;;  %v5613_v31 = vmul.f32 %v18321_v56, %v18321_v56 }
 0x919   : > { %5644 = vadd.xlane.f32.xlu1 %v5613_v31 }
 0x953   : > { %v5615_v28 = vpop.xlane.xlu0 %5614 }
 0x954   : > { %v5646_v27 = vmul.f32 0.0078125, %v5615_v28 }
 0x955   : > { %v5617_v16 = vpop.xlane.xlu1 %5616 }
 0x956   : > { %v5662_v41 = vadd.f32 1e-05, %v5646_v27  ;;  %v5647_v38 = vmul.f32 0.0078125, %v5617_v16 }
 0x957   : > { %v5619_v59 = vpop.xlane.xlu0 %5618 }
 0x958   : > { %15327 = vrsqrt.f32 %v5662_v41  ;;  %v5663_v8 = vadd.f32 1e-05, %v5647_v38  ;;  %v5648_v32 = vmul.f32 0.0078125, %v5619_v59 }
 0x95a   : > { %15329 = vrsqrt.f32 %v5663_v8  ;;  %v5664_v3 = vadd.f32 1e-05, %v5648_v32 }
 0x95b   : > { %v5621_v22 = vpop.xlane.xlu1 %5620 }
 0x95c   : > { %15331 = vrsqrt.f32 %v5664_v3  ;;  %v5649_v60 = vmul.f32 0.0078125, %v5621_v22 }
 0x95e   : > { %v5665_v7 = vadd.f32 1e-05, %v5649_v60 }
 0x960   : > { %15333 = vrsqrt.f32 %v5665_v7 }
 0x962   : > { %v15328_v45 = vpop.eup %15327 }
 0x963   : > { %v5623_v63 = vpop.xlane.xlu0 %5622  ;;  %v5694_v29 = vmul.f32 %v15328_v45, %v18248_v14 }
 0x964   : > { %v15330_v46 = vpop.eup %15329  ;;  %v5650_v49 = vmul.f32 0.0078125, %v5623_v63 }
 0x965   : > { %v5625_v18 = vpop.xlane.xlu1 %5624  ;;  %v5695_v5 = vmul.f32 %v15330_v46, %v18251_v52  ;;  %v5716_v20 = vmul.f32 %v18330_v55, %v5694_v29 }
 0x966   : > { %v15332_v21 = vpop.eup %15331  ;;  %v5666_v43 = vadd.f32 1e-05, %v5650_v49  ;;  %v5651_v50 = vmul.f32 0.0078125, %v5625_v18 }
 0x967   : > { %v5627_v17 = vpop.xlane.xlu0 %5626  ;;  %v5717_v47 = vmul.f32 %v18330_v55, %v5695_v5  ;;  %v18342_v34 = vadd.f32 %v18338_v26, %v5716_v20  ;;  %v5696_v61 = vmul.f32 %v15332_v21, %v18256_v12 }
 0x968   : > { %15335 = vrsqrt.f32 %v5666_v43  ;;  %v5667_v14 = vadd.f32 1e-05, %v5651_v50  ;;  %v5652_v25 = vmul.f32 0.0078125, %v5627_v17 }
 0x969   : > { %v5629_v39 = vpop.xlane.xlu1 %5628  ;;  %v18345_v52 = vadd.f32 %v18338_v26, %v5717_v47  ;;  %v5718_v19 = vmul.f32 %v18330_v55, %v5696_v61 }
 0x96a   : > { %v15334_v6 = vpop.eup %15333  ;;  %15337 = vrsqrt.f32 %v5667_v14  ;;  %v5668_v30 = vadd.f32 1e-05, %v5652_v25  ;;  %v5653_v23 = vmul.f32 0.0078125, %v5629_v39 }
 0x96b   : > { %v5754_v13 = vpack.c.bf16 %v18345_v52, %v18342_v34  ;;  %v5697_v58 = vmul.f32 %v15334_v6, %v18263_v62  ;;  %v18358_v15 = vadd.f32 %v18338_v26, %v5718_v19 }
 0x96c   : > { %15339 = vrsqrt.f32 %v5668_v30  ;;  %v5669_v35 = vadd.f32 1e-05, %v5653_v23 }
 0x96d   : > { %5903 = vmatmul.mubr.bf16.vlgmr.msra.gmra.mrb[152].mxu1 %v5754_v13  ;;  %v5719_v51 = vmul.f32 %v18330_v55, %v5697_v58 }
 0x96e   : > { %15341 = vrsqrt.f32 %v5669_v35  ;;  %5912 = vmatprep.mubr.bf16.mxu1 %v21567_v42 }
 0x96f   : > { %v5631_v12 = vpop.xlane.xlu0 %5630  ;;  %v18355_v53 = vadd.f32 %v18338_v26, %v5719_v51 }
 0x970   : > { %v5654_v0 = vmul.f32 0.0078125, %v5631_v12 }
 0x971   : > { %v5633_v44 = vpop.xlane.xlu1 %5632  ;;  %v5755_v28 = vpack.c.bf16 %v18355_v53, %v18358_v15 }
 0x972   : > { %v15336_v62 = vpop.eup %15335  ;;  %v5670_v24 = vadd.f32 1e-05, %v5654_v0  ;;  %v5655_v36 = vmul.f32 0.0078125, %v5633_v44 }
 0x973   : > { %v5635_v31 = vpop.xlane.xlu0 %5634  ;;  %v5698_v27 = vmul.f32 %v15336_v62, %v18268_v48 }
 0x974   : > { %v15338_v16 = vpop.eup %15337  ;;  %15343 = vrsqrt.f32 %v5670_v24  ;;  %v5671_v41 = vadd.f32 1e-05, %v5655_v36  ;;  %v5656_v38 = vmul.f32 0.0078125, %v5635_v31 }
 0x975   : > { %v5637_v59 = vpop.xlane.xlu1 %5636  ;;  %5913 = vmatmul.mubr.bf16.gmra.mrb[156].mxu1 %v5755_v28  ;;  %v5699_v8 = vmul.f32 %v15338_v16, %v18271_v33  ;;  %v5720_v32 = vmul.f32 %v18330_v55, %v5698_v27 }
 0x976   : > { %v15340_v3 = vpop.eup %15339  ;;  %15345 = vrsqrt.f32 %v5671_v41  ;;  %v5657_v22 = vmul.f32 0.0078125, %v5637_v59  ;;  %5922 = vmatprep.mubr.bf16.mxu1 %v21567_v42  ;;  %v5672_v45 = vadd.f32 1e-05, %v5656_v38 }
 0x977   : > { %v5721_v60 = vmul.f32 %v18330_v55, %v5699_v8  ;;  %v18368_v63 = vadd.f32 %v18338_v26, %v5720_v32  ;;  %v5700_v33 = vmul.f32 %v15340_v3, %v18276_v37 }
 0x978   : > { %v15342_v7 = vpop.eup %15341  ;;  %v5673_v48 = vadd.f32 1e-05, %v5657_v22 }
 0x979   : > { %v18371_v29 = vadd.f32 %v18338_v26, %v5721_v60  ;;  %v5701_v46 = vmul.f32 %v15342_v7, %v18281_v4  ;;  %v5722_v5 = vmul.f32 %v18330_v55, %v5700_v33 }
 0x97a   : > { %15347 = vrsqrt.f32 %v5673_v48 }
 0x97b   : > { %v5756_v49 = vpack.c.bf16 %v18371_v29, %v18368_v63  ;;  %v5723_v18 = vmul.f32 %v18330_v55, %v5701_v46  ;;  %15349 = vrsqrt.f32 %v5672_v45  ;;  %v18384_v37 = vadd.f32 %v18338_v26, %v5722_v5  ;;  %v14945_v5 = vld [vmem:[#allocation14 + $0x48] sm:$0xff]  }
 0x97d   : > { %5923 = vmatmul.mubr.bf16.gmra.mrb[160].mxu1 %v5756_v49  ;;  %v18381_v21 = vadd.f32 %v18338_v26, %v5723_v18  ;;  %v14944_v18 = vld [vmem:[#allocation14] sm:$0xff]  }
 0x97e   : > { %v15344_v20 = vpop.eup %15343  ;;  %5932 = vmatprep.mubr.bf16.mxu1 %v21567_v42 }
 0x97f   : > { %v5702_v4 = vmul.f32 %v15344_v20, %v18288_v54  ;;  %v5757_v17 = vpack.c.bf16 %v18381_v21, %v18384_v37  ;;  %v14947_v20 = vld [vmem:[#allocation14 + $0x50] sm:$0xff]  }
 0x980   : > { %v15346_v43 = vpop.eup %15345 }
 0x981   : > { %v5703_v50 = vmul.f32 %v15346_v43, %v18291_v40  ;;  %v5724_v25 = vmul.f32 %v18330_v55, %v5702_v4  ;;  %v14948_v43 = vld [vmem:[#allocation14 + $0x10] sm:$0xff]   ;;  %v14950_v4 = vld [vmem:[#allocation14 + $0x18] sm:$0xff]  }
 0x983   : > { %v5725_v47 = vmul.f32 %v18330_v55, %v5703_v50  ;;  %v18398_v54 = vadd.f32 %v18338_v26, %v5724_v25  ;;  %v14951_v50 = vld [vmem:[#allocation14 + $0x60] sm:$0xff]   ;;  %v14955_v25 = vld [vmem:[#allocation14 + $0x70] sm:$0xff]  }
 0x984   : > { %v15348_v14 = vpop.eup %15347 }
 0x985   : > { %5933 = vmatmul.mubr.bf16.gmra.mrb[164].mxu1 %v5757_v17  ;;  %v15350_v39 = vpop.eup %15349  ;;  %v18394_v61 = vadd.f32 %v18338_v26, %v5725_v47  ;;  %v5705_v6 = vmul.f32 %v15348_v14, %v18301_v2  ;;  %v14952_v17 = vld [vmem:[#allocation14 + $0x20] sm:$0xff]   ;;  %v14953_v47 = vld [vmem:[#allocation14 + $0x68] sm:$0xff]  }
 0x986   : > { %5942 = vmatprep.mubr.bf16.mxu1 %v21567_v42  ;;  %v5704_v40 = vmul.f32 %v15350_v39, %v18296_v1  ;;  %v14954_v14 = vld [vmem:[#allocation14 + $0x28] sm:$0xff]   ;;  %v14956_v39 = vld [vmem:[#allocation14 + $0x30] sm:$0xff]  }
 0x987   : > { %v5758_v30 = vpack.c.bf16 %v18394_v61, %v18398_v54  ;;  %v5727_v23 = vmul.f32 %v18330_v55, %v5705_v6  ;;  %v14957_v6 = vld [vmem:[#allocation14 + $0x78] sm:$0xff]  }
 0x988   : > { %v5726_v13 = vmul.f32 %v18330_v55, %v5704_v40  ;;  %v14958_v40 = vld [vmem:[#allocation14 + $0x38] sm:$0xff]  }
 0x989   : > { %v18407_v58 = vadd.f32 %v18338_v26, %v5727_v23  ;;  %v21590_v23 = vld [vmem:[#allocation38_spill] sm:$0xff] }
 0x98a   : > { %v18410_v2 = vadd.f32 %v18338_v26, %v5726_v13 }
 0x98c   : > { %v5759_v35 = vpack.c.bf16 %v18407_v58, %v18410_v2 }
 0x98d   : > { %5943 = vmatmul.mubr.bf16.gmra.mrb[168].mxu1 %v5758_v30  ;;  %v5778_v30 = vld [vmem:[%s21589_s10] sm:$0x3] }
 0x98e   : > { %5952 = vmatprep.mubr.bf16.mxu1 %v21567_v42  ;;  %v18445_v13 = vrot.slane %v5778_v30, %v21590_v23 }
 0x995   : > { %5953 = vmatmul.mubr.bf16.gmra.mrb[172].mxu1 %v5759_v35  ;;  %v21591_v35 = vld [vmem:[#allocation39_spill] sm:$0xff] }
 0x996   : > { %5962 = vmatprep.mubr.bf16.mxu1 %v21567_v42 }
 0x9a0   : > { %v5639_v1 = vpop.xlane.xlu0 %5638 }
 0x9a1   : > { %v5658_v19 = vmul.f32 0.0078125, %v5639_v1  ;;  %v18448_v1 = vrot.slane %v5778_v30, %v21591_v35 }
 0x9a2   : > { %v5641_v51 = vpop.xlane.xlu1 %5640 }
 0x9a3   : > { %v5674_v12 = vadd.f32 1e-05, %v5658_v19  ;;  %v5659_v0 = vmul.f32 0.0078125, %v5641_v51 }
 0x9a4   : > { %v5643_v44 = vpop.xlane.xlu0 %5642 }
 0x9a5   : > { %15351 = vrsqrt.f32 %v5674_v12  ;;  %v5675_v62 = vadd.f32 1e-05, %v5659_v0  ;;  %v5660_v24 = vmul.f32 0.0078125, %v5643_v44 }
 0x9a6   : > { %v5645_v36 = vpop.xlane.xlu1 %5644 }
 0x9a7   : > { %15353 = vrsqrt.f32 %v5675_v62  ;;  %v5676_v31 = vadd.f32 1e-05, %v5660_v24  ;;  %v5661_v28 = vmul.f32 0.0078125, %v5645_v36 }
 0x9a9   : > { %15355 = vrsqrt.f32 %v5676_v31  ;;  %v5677_v27 = vadd.f32 1e-05, %v5661_v28 }
 0x9ab   : > { %15357 = vrsqrt.f32 %v5677_v27 }
 0x9af   : > { %v15352_v16 = vpop.eup %15351 }
 0x9b0   : > { %v5706_v41 = vmul.f32 %v15352_v16, %v18308_v11 }
 0x9b1   : > { %v15354_v38 = vpop.eup %15353 }
 0x9b2   : > { %v5707_v59 = vmul.f32 %v15354_v38, %v18311_v9  ;;  %v5728_v8 = vmul.f32 %v18330_v55, %v5706_v41 }
 0x9b3   : > { %v15356_v32 = vpop.eup %15355 }
 0x9b4   : > { %v5729_v3 = vmul.f32 %v18330_v55, %v5707_v59  ;;  %v18420_v60 = vadd.f32 %v18338_v26, %v5728_v8  ;;  %v5708_v45 = vmul.f32 %v15356_v32, %v18316_v57 }
 0x9b5   : > { %v15358_v22 = vpop.eup %15357 }
 0x9b6   : > { %v18423_v7 = vadd.f32 %v18338_v26, %v5729_v3  ;;  %v5709_v48 = vmul.f32 %v15358_v22, %v18321_v56  ;;  %v5730_v33 = vmul.f32 %v18330_v55, %v5708_v45  ;;  %v14943_v56 = vld [vmem:[#allocation14 + $0x40] sm:$0xff]  }
 0x9b7   : > { %13320 = vmatprep.subr.bf16.mxu0 %v14943_v56 }
 0x9b8   : > { %21586 = vst [vmem:[#allocation62_spill] sm:$0xff] %v18423_v7  ;;  %v5760_v11 = vpack.c.bf16 %v18423_v7, %v18420_v60  ;;  %v5731_v9 = vmul.f32 %v18330_v55, %v5709_v48  ;;  %v18436_v49 = vadd.f32 %v18338_v26, %v5730_v33  ;;  %13321 = vmatpush3.bf16.msra.mxu0 %v14944_v18  ;;  %v14946_v55 = vld [vmem:[#allocation14 + $0x8] sm:$0xff]  }
 0x9b9   : > { %13322 = vmatprep.subr.bf16.mxu0 %v14945_v5 }
 0x9ba   : > { %5963 = vmatmul.mubr.bf16.gmra.mrb[176].mxu1 %v5760_v11  ;;  %v18433_v46 = vadd.f32 %v18338_v26, %v5731_v9  ;;  %21588 = vst [vmem:[#allocation64_spill] sm:$0xff] %v18436_v49  ;;  %v14949_v26 = vld [vmem:[#allocation14 + $0x58] sm:$0xff]  }
 0x9bb   : > { %5972 = vmatprep.mubr.bf16.mxu1 %v21567_v42 }
 0x9bc   : > { %21587 = vst [vmem:[#allocation65_spill] sm:$0xff] %v18433_v46  ;;  %v5761_v57 = vpack.c.bf16 %v18433_v46, %v18436_v49  ;;  %13323 = vmatpush3.bf16.msra.mxu0 %v14946_v55 }
 0x9bd   : > { %13324 = vmatprep.subr.bf16.mxu0 %v14947_v20 }
 0x9c0   : > { %13325 = vmatpush3.bf16.msra.mxu0 %v14948_v43 }
 0x9c1   : > { %13326 = vmatprep.subr.bf16.mxu0 %v14949_v26 }
 0x9c2   : > { %5973 = vmatmul.mubr.bf16.gmra.mrb[180].mxu1 %v5761_v57 }
 0x9c3   : > { %6976 = vmatprep.mubr.bf16.mxu1 %v21567_v42 }
 0x9c4   : > { %13327 = vmatpush3.bf16.msra.mxu0 %v14950_v4 }
 0x9c5   : > { %13328 = vmatprep.subr.bf16.mxu0 %v14951_v50 }
 0x9c8   : > { %13329 = vmatpush3.bf16.msra.mxu0 %v14952_v17 }
 0x9c9   : > { %13330 = vmatprep.subr.bf16.mxu0 %v14953_v47 }
 0x9cc   : > { %13331 = vmatpush3.bf16.msra.mxu0 %v14954_v14 }
 0x9cd   : > { %13332 = vmatprep.subr.bf16.mxu0 %v14955_v25 }
 0x9d0   : > { %13333 = vmatpush3.bf16.msra.mxu0 %v14956_v39 }
 0x9d1   : > { %13334 = vmatprep.subr.bf16.mxu0 %v14957_v6 }
 0x9d4   : > { %13335 = vmatpush3.bf16.msra.mxu0 %v14958_v40 }
 0xa40   : > { %v5904_v19 = vpop.f32.mrb[152].mxu1 }
 0xa41   : > { %v18451_v51 = vadd.f32 %v5904_v19, %v18445_v13  ;;  %v5906_v12 = vpop.f32.mrb[153].mxu1 }
 0xa42   : > { %v18454_v0 = vadd.f32 %v5906_v12, %v18448_v1  ;;  %v5908_v44 = vpop.f32.mrb[154].mxu1 }
 0xa43   : > { %v5983_v62 = vmul.f32 %v18451_v51, %v18451_v51  ;;  %v18459_v24 = vadd.f32 %v5908_v44, %v18445_v13  ;;  %v5910_v36 = vpop.f32.mrb[155].mxu1 }
 0xa44   : > { %v5984_v31 = vmul.f32 %v18454_v0, %v18454_v0  ;;  %v18464_v28 = vadd.f32 %v5910_v36, %v18448_v1 }
 0xa45   : > { %v6015_v27 = vmul.f32 %v5983_v62, %v18451_v51  ;;  %v5985_v16 = vmul.f32 %v18459_v24, %v18459_v24 }
 0xa46   : > { %v6016_v41 = vmul.f32 %v5984_v31, %v18454_v0  ;;  %v5986_v38 = vmul.f32 %v18464_v28, %v18464_v28 }
 0xa47   : > { %v6047_v59 = vmul.f32 0.044715, %v6015_v27  ;;  %v6017_v8 = vmul.f32 %v5985_v16, %v18459_v24 }
 0xa48   : > { %v6048_v32 = vmul.f32 0.044715, %v6016_v41  ;;  %v6018_v3 = vmul.f32 %v5986_v38, %v18464_v28  ;;  %v5914_v22 = vpop.f32.mrb[156].mxu1 }
 0xa49   : > { %v6079_v45 = vadd.f32 %v6047_v59, %v18451_v51  ;;  %v6049_v48 = vmul.f32 0.044715, %v6017_v8  ;;  %v18476_v11 = vadd.f32 %v5914_v22, %v18445_v13  ;;  %v5916_v9 = vpop.f32.mrb[157].mxu1 }
 0xa4a   : > { %v6080_v33 = vadd.f32 %v6048_v32, %v18454_v0  ;;  %v6050_v57 = vmul.f32 0.044715, %v6018_v3  ;;  %v18480_v56 = vadd.f32 %v5916_v9, %v18448_v1  ;;  %v5918_v18 = vpop.f32.mrb[158].mxu1 }
 0xa4b   : > { %v6111_v5 = vmul.f32 0.7978846, %v6079_v45  ;;  %v6081_v55 = vadd.f32 %v6049_v48, %v18459_v24  ;;  %v5987_v20 = vmul.f32 %v18476_v11, %v18476_v11  ;;  %v18486_v43 = vadd.f32 %v5918_v18, %v18445_v13  ;;  %v5920_v26 = vpop.f32.mrb[159].mxu1 }
 0xa4c   : > { %v6112_v4 = vmul.f32 0.7978846, %v6080_v33  ;;  %v6082_v50 = vadd.f32 %v6050_v57, %v18464_v28  ;;  %v5988_v17 = vmul.f32 %v18480_v56, %v18480_v56  ;;  %v18492_v47 = vadd.f32 %v5920_v26, %v18448_v1 }
 0xa4d   : > { %15359 = vtanh.f32 %v6111_v5  ;;  %v6113_v14 = vmul.f32 0.7978846, %v6081_v55  ;;  %v6019_v25 = vmul.f32 %v5987_v20, %v18476_v11  ;;  %v5989_v39 = vmul.f32 %v18486_v43, %v18486_v43 }
 0xa4e   : > { %15361 = vtanh.f32 %v6112_v4  ;;  %v6114_v6 = vmul.f32 0.7978846, %v6082_v50  ;;  %v6020_v40 = vmul.f32 %v5988_v17, %v18480_v56  ;;  %v5990_v30 = vmul.f32 %v18492_v47, %v18492_v47 }
 0xa4f   : > { %15363 = vtanh.f32 %v6113_v14  ;;  %v6051_v19 = vmul.f32 0.044715, %v6019_v25  ;;  %v6021_v12 = vmul.f32 %v5989_v39, %v18486_v43 }
 0xa50   : > { %v6052_v44 = vmul.f32 0.044715, %v6020_v40  ;;  %v6022_v62 = vmul.f32 %v5990_v30, %v18492_v47  ;;  %v5924_v36 = vpop.f32.mrb[160].mxu1  ;;  %15365 = vtanh.f32 %v6114_v6 }
 0xa51   : > { %v6083_v31 = vadd.f32 %v6051_v19, %v18476_v11  ;;  %v6053_v27 = vmul.f32 0.044715, %v6021_v12  ;;  %v18504_v16 = vadd.f32 %v5924_v36, %v18445_v13  ;;  %v5926_v41 = vpop.f32.mrb[161].mxu1 }
 0xa52   : > { %v6084_v38 = vadd.f32 %v6052_v44, %v18480_v56  ;;  %v6054_v59 = vmul.f32 0.044715, %v6022_v62  ;;  %v18508_v8 = vadd.f32 %v5926_v41, %v18448_v1  ;;  %v5928_v32 = vpop.f32.mrb[162].mxu1 }
 0xa53   : > { %v6115_v3 = vmul.f32 0.7978846, %v6083_v31  ;;  %v6085_v22 = vadd.f32 %v6053_v27, %v18486_v43  ;;  %v5991_v45 = vmul.f32 %v18504_v16, %v18504_v16  ;;  %v18514_v48 = vadd.f32 %v5928_v32, %v18445_v13  ;;  %v5930_v9 = vpop.f32.mrb[163].mxu1 }
 0xa54   : > { %v6116_v33 = vmul.f32 0.7978846, %v6084_v38  ;;  %v6086_v57 = vadd.f32 %v6054_v59, %v18492_v47  ;;  %v5992_v18 = vmul.f32 %v18508_v8, %v18508_v8  ;;  %v18520_v5 = vadd.f32 %v5930_v9, %v18448_v1 }
 0xa55   : > { %15367 = vtanh.f32 %v6115_v3  ;;  %v6117_v55 = vmul.f32 0.7978846, %v6085_v22  ;;  %v6023_v20 = vmul.f32 %v5991_v45, %v18504_v16  ;;  %v5993_v26 = vmul.f32 %v18514_v48, %v18514_v48 }
 0xa56   : > { %15369 = vtanh.f32 %v6116_v33  ;;  %v6118_v4 = vmul.f32 0.7978846, %v6086_v57  ;;  %v6024_v50 = vmul.f32 %v5992_v18, %v18508_v8  ;;  %v5994_v17 = vmul.f32 %v18520_v5, %v18520_v5 }
 0xa57   : > { %v15360_v14 = vpop.eup %15359  ;;  %15371 = vtanh.f32 %v6117_v55  ;;  %v6055_v25 = vmul.f32 0.044715, %v6023_v20  ;;  %v6025_v39 = vmul.f32 %v5993_v26, %v18514_v48 }
 0xa58   : > { %v15362_v6 = vpop.eup %15361  ;;  %v6175_v40 = vadd.f32 1.0, %v15360_v14  ;;  %15373 = vtanh.f32 %v6118_v4  ;;  %v6056_v30 = vmul.f32 0.044715, %v6024_v50  ;;  %v6026_v19 = vmul.f32 %v5994_v17, %v18520_v5  ;;  %v5934_v12 = vpop.f32.mrb[164].mxu1 }
 0xa59   : > { %v15364_v44 = vpop.eup %15363  ;;  %v6087_v62 = vadd.f32 %v6055_v25, %v18504_v16  ;;  %v6057_v36 = vmul.f32 0.044715, %v6025_v39  ;;  %v18532_v31 = vadd.f32 %v5934_v12, %v18445_v13  ;;  %v5936_v27 = vpop.f32.mrb[165].mxu1  ;;  %v6176_v41 = vadd.f32 1.0, %v15362_v6 }
 0xa5a   : > { %v6207_v38 = vmul.f32 0.5, %v6175_v40  ;;  %v6177_v59 = vadd.f32 1.0, %v15364_v44  ;;  %v6088_v32 = vadd.f32 %v6056_v30, %v18508_v8  ;;  %v6058_v3 = vmul.f32 0.044715, %v6026_v19  ;;  %v5938_v22 = vpop.f32.mrb[166].mxu1  ;;  %v15366_v55 = vpop.eup %15365 }
 0xa5b   : > { %v6119_v45 = vmul.f32 0.7978846, %v6087_v62  ;;  %v6089_v9 = vadd.f32 %v6057_v36, %v18514_v48  ;;  %v5995_v33 = vmul.f32 %v18532_v31, %v18532_v31  ;;  %v18539_v57 = vadd.f32 %v5936_v27, %v18448_v1  ;;  %v5940_v18 = vpop.f32.mrb[167].mxu1 }
 0xa5c   : > { %v18542_v20 = vmul.f32 %v6207_v38, %v18451_v51  ;;  %v6209_v26 = vmul.f32 0.5, %v6177_v59  ;;  %v6120_v4 = vmul.f32 0.7978846, %v6088_v32  ;;  %v6090_v50 = vadd.f32 %v6058_v3, %v18520_v5 }
 0xa5d   : > { %15375 = vtanh.f32 %v6119_v45  ;;  %v6121_v17 = vmul.f32 0.7978846, %v6089_v9  ;;  %v6027_v14 = vmul.f32 %v5995_v33, %v18532_v31  ;;  %v5996_v25 = vmul.f32 %v18539_v57, %v18539_v57 }
 0xa5e   : > { %v18549_v39 = vmul.f32 %v6209_v26, %v18459_v24  ;;  %15377 = vtanh.f32 %v6120_v4  ;;  %v6122_v6 = vmul.f32 0.7978846, %v6090_v50  ;;  %v18552_v40 = vadd.f32 %v5938_v22, %v18445_v13 }
 0xa5f   : > { %v18554_v51 = vpop.eup %15367  ;;  %15379 = vtanh.f32 %v6121_v17  ;;  %v6059_v30 = vmul.f32 0.044715, %v6027_v14  ;;  %v6028_v19 = vmul.f32 %v5996_v25, %v18539_v57  ;;  %v18558_v12 = vadd.f32 %v5940_v18, %v18448_v1 }
 0xa60   : > { %v18560_v44 = vpop.eup %15369  ;;  %15381 = vtanh.f32 %v6122_v6  ;;  %v5997_v62 = vmul.f32 %v18552_v40, %v18552_v40  ;;  %v5944_v36 = vpop.f32.mrb[168].mxu1  ;;  %v6178_v27 = vadd.f32 1.0, %v15366_v55  ;;  %v6208_v26 = vmul.f32 0.5, %v6176_v41 }
 0xa61   : > { %v18566_v38 = vpop.eup %15371  ;;  %v6091_v59 = vadd.f32 %v6059_v30, %v18532_v31  ;;  %v6060_v32 = vmul.f32 0.044715, %v6028_v19  ;;  %v5998_v3 = vmul.f32 %v18558_v12, %v18558_v12  ;;  %v18572_v22 = vadd.f32 %v5944_v36, %v18445_v13  ;;  %v5946_v45 = vpop.f32.mrb[169].mxu1 }
 0xa62   : > { %v18574_v9 = vpop.eup %15373  ;;  %v6029_v33 = vmul.f32 %v5997_v62, %v18552_v40  ;;  %v18578_v18 = vadd.f32 %v5946_v45, %v18448_v1  ;;  %v5948_v55 = vpop.f32.mrb[170].mxu1  ;;  %v6210_v4 = vmul.f32 0.5, %v6178_v27 }
 0xa63   : > { %v6123_v50 = vmul.f32 0.7978846, %v6091_v59  ;;  %v6092_v17 = vadd.f32 %v6060_v32, %v18539_v57  ;;  %v6030_v14 = vmul.f32 %v5998_v3, %v18558_v12  ;;  %v5999_v25 = vmul.f32 %v18572_v22, %v18572_v22  ;;  %v5950_v6 = vpop.f32.mrb[171].mxu1 }
 0xa64   : > { %v6061_v30 = vmul.f32 0.044715, %v6029_v33  ;;  %v6000_v19 = vmul.f32 %v18578_v18, %v18578_v18  ;;  %v18587_v62 = vadd.f32 %v5948_v55, %v18445_v13  ;;  %v18590_v36 = vadd.f32 %v5950_v6, %v18448_v1 }
 0xa65   : > { %15383 = vtanh.f32 %v6123_v50  ;;  %v6124_v41 = vmul.f32 0.7978846, %v6092_v17  ;;  %v6062_v27 = vmul.f32 0.044715, %v6030_v14  ;;  %v6031_v59 = vmul.f32 %v5999_v25, %v18572_v22 }
 0xa66   : > { %v6093_v32 = vadd.f32 %v6061_v30, %v18552_v40  ;;  %v6032_v3 = vmul.f32 %v6000_v19, %v18578_v18  ;;  %v6001_v45 = vmul.f32 %v18587_v62, %v18587_v62  ;;  %v6002_v33 = vmul.f32 %v18590_v36, %v18590_v36 }
 0xa67   : > { %v18599_v55 = vpop.eup %15375  ;;  %15385 = vtanh.f32 %v6124_v41  ;;  %v6094_v6 = vadd.f32 %v6062_v27, %v18558_v12  ;;  %v6063_v50 = vmul.f32 0.044715, %v6031_v59  ;;  %v6240_v17 = vmul.f32 %v6208_v26, %v18454_v0 }
 0xa68   : > { %v18603_v14 = vpop.eup %15377  ;;  %v6125_v25 = vmul.f32 0.7978846, %v6093_v32  ;;  %v6064_v30 = vmul.f32 0.044715, %v6032_v3  ;;  %v6033_v19 = vmul.f32 %v6001_v45, %v18587_v62  ;;  %v6034_v24 = vmul.f32 %v6002_v33, %v18590_v36  ;;  %v5954_v35 = vpop.f32.mrb[172].mxu1 }
 0xa69   : > { %v18607_v23 = vpop.eup %15379  ;;  %v6126_v42 = vmul.f32 0.7978846, %v6094_v6  ;;  %v6095_v10 = vadd.f32 %v6063_v50, %v18572_v22  ;;  %v6242_v41 = vmul.f32 %v6210_v4, %v18464_v28  ;;  %v18612_v27 = vadd.f32 %v5954_v35, %v18445_v13  ;;  %v5956_v0 = vpop.f32.mrb[173].mxu1 }
 0xa6a   : > { %v18614_v26 = vpop.eup %15381  ;;  %15387 = vtanh.f32 %v6125_v25  ;;  %v6096_v59 = vadd.f32 %v6064_v30, %v18578_v18  ;;  %v6065_v32 = vmul.f32 0.044715, %v6033_v19  ;;  %v6066_v3 = vmul.f32 0.044715, %v6034_v24  ;;  %v5958_v45 = vpop.f32.mrb[174].mxu1 }
 0xa6b   : > { %15389 = vtanh.f32 %v6126_v42  ;;  %v6127_v33 = vmul.f32 0.7978846, %v6095_v10  ;;  %v6272_v46 = vpack.c.bf16 %v6242_v41, %v6240_v17  ;;  %v6003_v6 = vmul.f32 %v18612_v27, %v18612_v27  ;;  %v5960_v50 = vpop.f32.mrb[175].mxu1 }
 0xa6c   : > { %v6128_v28 = vmul.f32 0.7978846, %v6096_v59  ;;  %v6097_v35 = vadd.f32 %v6065_v32, %v18587_v62  ;;  %v6098_v4 = vadd.f32 %v6066_v3, %v18590_v36  ;;  %v18622_v49 = vadd.f32 %v5956_v0, %v18448_v1 }
 0xa6d   : > { %15391 = vtanh.f32 %v6127_v33  ;;  %6454 = vmatprep.mubr.bf16.mxu0 %v6272_v46  ;;  %v6035_v24 = vmul.f32 %v6003_v6, %v18612_v27  ;;  %v18626_v42 = vadd.f32 %v5958_v45, %v18445_v13  ;;  %v18629_v10 = vadd.f32 %v5960_v50, %v18448_v1 }
 0xa6e   : > { %15393 = vtanh.f32 %v6128_v28  ;;  %v6129_v17 = vmul.f32 0.7978846, %v6097_v35  ;;  %v6130_v25 = vmul.f32 0.7978846, %v6098_v4  ;;  %v21592_v30 = vpack.c.bf16 %v18549_v39, %v18542_v20 }
 0xa6f   : > { %v6004_v19 = vmul.f32 %v18622_v49, %v18622_v49  ;;  %v15384_v41 = vpop.eup %15383  ;;  %v6067_v46 = vmul.f32 0.044715, %v6035_v24  ;;  %v6005_v0 = vmul.f32 %v18626_v42, %v18626_v42  ;;  %v6006_v59 = vmul.f32 %v18629_v10, %v18629_v10 }
 0xa70   : > { %6455 = vmatmul.mubr.bf16.vlgmr.msra.gmra.mrb[168].mxu0 %v21592_v30  ;;  %v6180_v32 = vadd.f32 1.0, %v18560_v44  ;;  %15395 = vtanh.f32 %v6129_v17  ;;  %v6182_v45 = vadd.f32 1.0, %v18574_v9  ;;  %v6179_v20 = vadd.f32 1.0, %v18554_v51 }
 0xa71   : > { %v6036_v3 = vmul.f32 %v6004_v19, %v18622_v49  ;;  %v15386_v39 = vpop.eup %15385  ;;  %15397 = vtanh.f32 %v6130_v25  ;;  %v6099_v33 = vadd.f32 %v6067_v46, %v18612_v27  ;;  %v6037_v6 = vmul.f32 %v6005_v0, %v18626_v42 }
 0xa72   : > { %v6038_v50 = vmul.f32 %v6006_v59, %v18629_v10  ;;  %v6212_v35 = vmul.f32 0.5, %v6180_v32  ;;  %v6214_v4 = vmul.f32 0.5, %v6182_v45  ;;  %v6181_v44 = vadd.f32 1.0, %v18566_v38 }
 0xa73   : > { %v6068_v28 = vmul.f32 0.044715, %v6036_v3  ;;  %v6131_v24 = vmul.f32 0.7978846, %v6099_v33  ;;  %v6069_v17 = vmul.f32 0.044715, %v6037_v6 }
 0xa74   : > { %v6070_v30 = vmul.f32 0.044715, %v6038_v50  ;;  %v15388_v19 = vpop.eup %15387  ;;  %v6244_v51 = vmul.f32 %v6212_v35, %v18480_v56  ;;  %v6246_v25 = vmul.f32 %v6214_v4, %v18492_v47  ;;  %v6211_v46 = vmul.f32 0.5, %v6179_v20 }
 0xa75   : > { %v6100_v9 = vadd.f32 %v6068_v28, %v18622_v49  ;;  %v15390_v7 = vpop.eup %15389  ;;  %15399 = vtanh.f32 %v6131_v24  ;;  %v6101_v0 = vadd.f32 %v6069_v17, %v18626_v42  ;;  %v6213_v32 = vmul.f32 0.5, %v6181_v44 }
 0xa76   : > { %v6102_v59 = vadd.f32 %v6070_v30, %v18629_v10  ;;  %v6274_v38 = vpack.c.bf16 %v6246_v25, %v6244_v51  ;;  %v6243_v45 = vmul.f32 %v6211_v46, %v18476_v11  ;;  %v6184_v33 = vadd.f32 1.0, %v18603_v14 }
 0xa77   : > { %v6132_v3 = vmul.f32 0.7978846, %v6100_v9  ;;  %v15392_v6 = vpop.eup %15391  ;;  %v6133_v50 = vmul.f32 0.7978846, %v6101_v0  ;;  %v6245_v56 = vmul.f32 %v6213_v32, %v18486_v43  ;;  %v6186_v47 = vadd.f32 1.0, %v18614_v26 }
 0xa78   : > { %v6134_v28 = vmul.f32 0.7978846, %v6102_v59  ;;  %v15394_v20 = vpop.eup %15393  ;;  %6462 = vmatprep.mubr.bf16.mxu0 %v6274_v38  ;;  %v6216_v35 = vmul.f32 0.5, %v6184_v33  ;;  %v6183_v4 = vadd.f32 1.0, %v18599_v55  ;;  %v6185_v44 = vadd.f32 1.0, %v18607_v23 }
 0xa79   : > { %15401 = vtanh.f32 %v6132_v3  ;;  %v6273_v24 = vpack.c.bf16 %v6245_v56, %v6243_v45  ;;  %v6218_v11 = vmul.f32 0.5, %v6186_v47  ;;  %v6188_v17 = vadd.f32 1.0, %v15386_v39 }
 0xa7a   : > { %15403 = vtanh.f32 %v6133_v50  ;;  %v15396_v14 = vpop.eup %15395  ;;  %v6248_v30 = vmul.f32 %v6216_v35, %v18508_v8  ;;  %v6215_v9 = vmul.f32 0.5, %v6183_v4  ;;  %v6217_v43 = vmul.f32 0.5, %v6185_v44 }
 0xa7b   : > { %15405 = vtanh.f32 %v6134_v28  ;;  %v15398_v51 = vpop.eup %15397  ;;  %6463 = vmatmul.mubr.bf16.gmra.mrb[172].mxu0 %v6273_v24  ;;  %v6250_v26 = vmul.f32 %v6218_v11, %v18520_v5  ;;  %v6190_v25 = vadd.f32 1.0, %v15390_v7  ;;  %v6220_v46 = vmul.f32 0.5, %v6188_v17 }
 0xa7c   : > { %v6187_v0 = vadd.f32 1.0, %v15384_v41  ;;  %v6247_v55 = vmul.f32 %v6215_v9, %v18504_v16  ;;  %v6249_v23 = vmul.f32 %v6217_v43, %v18514_v48  ;;  %v6189_v59 = vadd.f32 1.0, %v15388_v19 }
 0xa7d   : > { %v6192_v32 = vadd.f32 1.0, %v15394_v20  ;;  %v6276_v39 = vpack.c.bf16 %v6250_v26, %v6248_v30  ;;  %v6222_v3 = vmul.f32 0.5, %v6190_v25  ;;  %v6194_v33 = vadd.f32 1.0, %v15398_v51 }
 0xa7e   : > { %v6219_v38 = vmul.f32 0.5, %v6187_v0  ;;  %v6275_v45 = vpack.c.bf16 %v6249_v23, %v6247_v55  ;;  %v6221_v8 = vmul.f32 0.5, %v6189_v59  ;;  %v6252_v5 = vmul.f32 %v6220_v46, %v18539_v57 }
 0xa7f   : > { %v6224_v50 = vmul.f32 0.5, %v6192_v32  ;;  %v15400_v28 = vpop.eup %15399  ;;  %6470 = vmatprep.mubr.bf16.mxu0 %v6276_v39  ;;  %v6254_v7 = vmul.f32 %v6222_v3, %v18558_v12  ;;  %v6191_v41 = vadd.f32 1.0, %v15392_v6  ;;  %v6193_v56 = vadd.f32 1.0, %v15396_v14 }
 0xa80   : > { %v6251_v16 = vmul.f32 %v6219_v38, %v18532_v31  ;;  %v6253_v48 = vmul.f32 %v6221_v8, %v18552_v40  ;;  %v6226_v19 = vmul.f32 0.5, %v6194_v33  ;;  %v6195_v47 = vadd.f32 1.0, %v15400_v28 }
 0xa81   : > { %v6278_v20 = vpack.c.bf16 %v6254_v7, %v6252_v5  ;;  %v6223_v35 = vmul.f32 0.5, %v6191_v41  ;;  %v6225_v4 = vmul.f32 0.5, %v6193_v56  ;;  %v6256_v11 = vmul.f32 %v6224_v50, %v18578_v18 }
 0xa82   : > { %v6277_v24 = vpack.c.bf16 %v6253_v48, %v6251_v16  ;;  %v6258_v17 = vmul.f32 %v6226_v19, %v18590_v36  ;;  %v6227_v9 = vmul.f32 0.5, %v6195_v47 }
 0xa83   : > { %v15402_v44 = vpop.eup %15401  ;;  %6471 = vmatmul.mubr.bf16.gmra.mrb[176].mxu0 %v6275_v45  ;;  %v6255_v12 = vmul.f32 %v6223_v35, %v18572_v22  ;;  %v6257_v6 = vmul.f32 %v6225_v4, %v18587_v62 }
 0xa84   : > { %v15404_v57 = vpop.eup %15403  ;;  %v6196_v31 = vadd.f32 1.0, %v15402_v44  ;;  %6478 = vmatprep.mubr.bf16.mxu0 %v6278_v20  ;;  %v6280_v40 = vpack.c.bf16 %v6258_v17, %v6256_v11  ;;  %v6259_v18 = vmul.f32 %v6227_v9, %v18612_v27 }
 0xa85   : > { %v15406_v14 = vpop.eup %15405  ;;  %v6197_v30 = vadd.f32 1.0, %v15404_v57  ;;  %v6279_v43 = vpack.c.bf16 %v6257_v6, %v6255_v12 }
 0xa86   : > { %v6198_v51 = vadd.f32 1.0, %v15406_v14  ;;  %v6228_v26 = vmul.f32 0.5, %v6196_v31 }
 0xa87   : > { %v6229_v25 = vmul.f32 0.5, %v6197_v30 }
 0xa88   : > { %v6230_v46 = vmul.f32 0.5, %v6198_v51  ;;  %v6260_v0 = vmul.f32 %v6228_v26, %v18622_v49 }
 0xa89   : > { %v6261_v36 = vmul.f32 %v6229_v25, %v18626_v42 }
 0xa8a   : > { %v6262_v22 = vmul.f32 %v6230_v46, %v18629_v10 }
 0xa8b   : > { %v6281_v62 = vpack.c.bf16 %v6261_v36, %v6259_v18  ;;  %6479 = vmatmul.mubr.bf16.gmra.mrb[180].mxu0 %v6277_v24 }
 0xa8c   : > { %v6282_v55 = vpack.c.bf16 %v6262_v22, %v6260_v0  ;;  %6486 = vmatprep.mubr.bf16.mxu0 %v6280_v40 }
 0xa8d   : > { %v5964_v23 = vpop.f32.mrb[176].mxu1 }
 0xa8e   : > { %v18676_v59 = vadd.f32 %v5964_v23, %v18445_v13  ;;  %v5966_v32 = vpop.f32.mrb[177].mxu1 }
 0xa8f   : > { %v18679_v39 = vadd.f32 %v5966_v32, %v18448_v1  ;;  %v5968_v3 = vpop.f32.mrb[178].mxu1 }
 0xa90   : > { %v6007_v27 = vmul.f32 %v18676_v59, %v18676_v59  ;;  %v18684_v49 = vadd.f32 %v5968_v3, %v18445_v13  ;;  %v5970_v42 = vpop.f32.mrb[179].mxu1 }
 0xa91   : > { %v6008_v10 = vmul.f32 %v18679_v39, %v18679_v39  ;;  %v18689_v38 = vadd.f32 %v5970_v42, %v18448_v1 }
 0xa92   : > { %v6039_v45 = vmul.f32 %v6007_v27, %v18676_v59  ;;  %v6009_v8 = vmul.f32 %v18684_v49, %v18684_v49 }
 0xa93   : > { %6487 = vmatmul.mubr.bf16.gmra.mrb[184].mxu0 %v6279_v43  ;;  %v6040_v33 = vmul.f32 %v6008_v10, %v18679_v39  ;;  %v6010_v50 = vmul.f32 %v18689_v38, %v18689_v38 }
 0xa94   : > { %6494 = vmatprep.mubr.bf16.mxu0 %v6282_v55  ;;  %v6071_v28 = vmul.f32 0.044715, %v6039_v45  ;;  %v6041_v5 = vmul.f32 %v6009_v8, %v18684_v49 }
 0xa95   : > { %v6072_v7 = vmul.f32 0.044715, %v6040_v33  ;;  %v6042_v41 = vmul.f32 %v6010_v50, %v18689_v38  ;;  %v5974_v56 = vpop.f32.mrb[180].mxu1 }
 0xa96   : > { %v6103_v16 = vadd.f32 %v6071_v28, %v18676_v59  ;;  %v6073_v48 = vmul.f32 0.044715, %v6041_v5  ;;  %v18701_v19 = vadd.f32 %v5974_v56, %v18445_v13  ;;  %v5976_v47 = vpop.f32.mrb[181].mxu1 }
 0xa97   : > { %v6104_v20 = vadd.f32 %v6072_v7, %v18679_v39  ;;  %v6074_v35 = vmul.f32 0.044715, %v6042_v41  ;;  %v18705_v4 = vadd.f32 %v5976_v47, %v18448_v1  ;;  %v5978_v44 = vpop.f32.mrb[182].mxu1 }
 0xa98   : > { %v6135_v24 = vmul.f32 0.7978846, %v6103_v16  ;;  %v6105_v11 = vadd.f32 %v6073_v48, %v18684_v49  ;;  %v6011_v17 = vmul.f32 %v18701_v19, %v18701_v19  ;;  %v18711_v57 = vadd.f32 %v5978_v44, %v18445_v13  ;;  %v5980_v12 = vpop.f32.mrb[183].mxu1 }
 0xa99   : > { %v6136_v6 = vmul.f32 0.7978846, %v6104_v20  ;;  %v6106_v31 = vadd.f32 %v6074_v35, %v18689_v38  ;;  %v6012_v14 = vmul.f32 %v18705_v4, %v18705_v4  ;;  %v18717_v40 = vadd.f32 %v5980_v12, %v18448_v1 }
 0xa9a   : > { %15407 = vtanh.f32 %v6135_v24  ;;  %v6137_v30 = vmul.f32 0.7978846, %v6105_v11  ;;  %v6043_v9 = vmul.f32 %v6011_v17, %v18701_v19  ;;  %v6013_v43 = vmul.f32 %v18711_v57, %v18711_v57 }
 0xa9b   : > { %6495 = vmatmul.mubr.bf16.gmra.mrb[188].mxu0 %v6281_v62  ;;  %15409 = vtanh.f32 %v6136_v6  ;;  %v6138_v13 = vmul.f32 0.7978846, %v6106_v31  ;;  %v6044_v51 = vmul.f32 %v6012_v14, %v18705_v4  ;;  %v6014_v26 = vmul.f32 %v18717_v40, %v18717_v40 }
 0xa9c   : > { %15411 = vtanh.f32 %v6137_v30  ;;  %v6075_v25 = vmul.f32 0.044715, %v6043_v9  ;;  %v6045_v1 = vmul.f32 %v6013_v43, %v18711_v57 }
 0xa9d   : > { %15413 = vtanh.f32 %v6138_v13  ;;  %v6076_v46 = vmul.f32 0.044715, %v6044_v51  ;;  %v6046_v18 = vmul.f32 %v6014_v26, %v18717_v40 }
 0xa9e   : > { %v6107_v36 = vadd.f32 %v6075_v25, %v18701_v19  ;;  %v6077_v0 = vmul.f32 0.044715, %v6045_v1 }
 0xa9f   : > { %v6108_v22 = vadd.f32 %v6076_v46, %v18705_v4  ;;  %v6078_v62 = vmul.f32 0.044715, %v6046_v18 }
 0xaa0   : > { %v6139_v55 = vmul.f32 0.7978846, %v6107_v36  ;;  %v6109_v23 = vadd.f32 %v6077_v0, %v18711_v57  ;;  %v18742_v36 = vld [vmem:[%s21593_s8] ss:$0 sm:$0xff] }
 0xaa1   : > { %v6140_v32 = vmul.f32 0.7978846, %v6108_v22  ;;  %v6110_v3 = vadd.f32 %v6078_v62, %v18717_v40 }
 0xaa2   : > { %15415 = vtanh.f32 %v6139_v55  ;;  %v6141_v27 = vmul.f32 0.7978846, %v6109_v23 }
 0xaa3   : > { %15417 = vtanh.f32 %v6140_v32  ;;  %v6142_v42 = vmul.f32 0.7978846, %v6110_v3 }
 0xaa4   : > { %v15408_v10 = vpop.eup %15407  ;;  %15419 = vtanh.f32 %v6141_v27 }
 0xaa5   : > { %v15410_v45 = vpop.eup %15409  ;;  %15421 = vtanh.f32 %v6142_v42  ;;  %v6199_v8 = vadd.f32 1.0, %v15408_v10 }
 0xaa6   : > { %v15412_v33 = vpop.eup %15411  ;;  %v6200_v50 = vadd.f32 1.0, %v15410_v45 }
 0xaa7   : > { %v15414_v28 = vpop.eup %15413  ;;  %v6201_v5 = vadd.f32 1.0, %v15412_v33  ;;  %v6231_v7 = vmul.f32 0.5, %v6199_v8 }
 0xaa8   : > { %v6202_v41 = vadd.f32 1.0, %v15414_v28  ;;  %v6232_v56 = vmul.f32 0.5, %v6200_v50 }
 0xaa9   : > { %v6233_v16 = vmul.f32 0.5, %v6201_v5  ;;  %v6263_v47 = vmul.f32 %v6231_v7, %v18676_v59 }
 0xaaa   : > { %v6234_v48 = vmul.f32 0.5, %v6202_v41  ;;  %v6264_v44 = vmul.f32 %v6232_v56, %v18679_v39 }
 0xaab   : > { %v6265_v20 = vmul.f32 %v6233_v16, %v18684_v49 }
 0xaac   : > { %v15416_v35 = vpop.eup %15415  ;;  %v6266_v24 = vmul.f32 %v6234_v48, %v18689_v38 }
 0xaad   : > { %v15418_v11 = vpop.eup %15417  ;;  %v6283_v17 = vpack.c.bf16 %v6265_v20, %v6263_v47  ;;  %v6203_v12 = vadd.f32 1.0, %v15416_v35 }
 0xaae   : > { %v15420_v6 = vpop.eup %15419  ;;  %v6284_v31 = vpack.c.bf16 %v6266_v24, %v6264_v44  ;;  %v6204_v14 = vadd.f32 1.0, %v15418_v11 }
 0xaaf   : > { %v15422_v30 = vpop.eup %15421  ;;  %v6205_v9 = vadd.f32 1.0, %v15420_v6  ;;  %v6235_v43 = vmul.f32 0.5, %v6203_v12 }
 0xab0   : > { %6502 = vmatprep.mubr.bf16.mxu0 %v6284_v31  ;;  %v6206_v13 = vadd.f32 1.0, %v15422_v30  ;;  %v6236_v51 = vmul.f32 0.5, %v6204_v14 }
 0xab1   : > { %6503 = vmatmul.mubr.bf16.gmra.mrb[192].mxu0 %v6283_v17  ;;  %v6237_v59 = vmul.f32 0.5, %v6205_v9  ;;  %v6267_v26 = vmul.f32 %v6235_v43, %v18701_v19 }
 0xab2   : > { %v6238_v49 = vmul.f32 0.5, %v6206_v13  ;;  %v6268_v38 = vmul.f32 %v6236_v51, %v18705_v4 }
 0xab3   : > { %v6269_v39 = vmul.f32 %v6237_v59, %v18711_v57 }
 0xab4   : > { %v6270_v25 = vmul.f32 %v6238_v49, %v18717_v40 }
 0xab5   : > { %v6285_v1 = vpack.c.bf16 %v6269_v39, %v6267_v26 }
 0xab6   : > { %v6286_v46 = vpack.c.bf16 %v6270_v25, %v6268_v38 }
 0xab8   : > { %6510 = vmatprep.mubr.bf16.mxu0 %v6286_v46 }
 0xab9   : > { %6511 = vmatmul.mubr.bf16.gmra.mrb[196].mxu0 %v6285_v1 }
 0xb43   : > { %v13336_v18 = vpop.f32.mrb[168].mxu0 }
 0xb44   : > { %v13337_v0 = vpop.f32.mrb[169].mxu0 }
 0xb45   : > { %v13338_v22 = vadd.f32 %v13337_v0, %v13336_v18  ;;  %v13339_v62 = vpop.f32.mrb[170].mxu0 }
 0xb46   : > { %v13340_v19 = vpop.f32.mrb[171].mxu0 }
 0xb47   : > { %v6457_v57 = vadd.f32 %v13338_v22, %v18742_v36  ;;  %v13341_v55 = vadd.f32 %v13340_v19, %v13339_v62 }
 0xb49   : > { %v6460_v4 = vadd.f32 %v13341_v55, %v18742_v36  ;;  %v18747_v40 = vadd.f32 %v6457_v57, %v18342_v34 }
 0xb4b   : > { %6537 = vadd.xlane.f32.xlu0 %v18747_v40  ;;  %v18751_v23 = vadd.f32 %v6460_v4, %v18345_v52 }
 0xb4d   : > { %6539 = vadd.xlane.f32.xlu1 %v18751_v23 }
 0xb4e   : > { %v13342_v32 = vpop.f32.mrb[172].mxu0 }
 0xb4f   : > { %v13343_v3 = vpop.f32.mrb[173].mxu0 }
 0xb50   : > { %v13344_v27 = vadd.f32 %v13343_v3, %v13342_v32  ;;  %v13345_v42 = vpop.f32.mrb[174].mxu0 }
 0xb51   : > { %v13346_v10 = vpop.f32.mrb[175].mxu0 }
 0xb52   : > { %v6465_v45 = vadd.f32 %v13344_v27, %v18742_v36  ;;  %v13347_v8 = vadd.f32 %v13346_v10, %v13345_v42 }
 0xb54   : > { %v6468_v33 = vadd.f32 %v13347_v8, %v18742_v36  ;;  %v18757_v34 = vadd.f32 %v6465_v45, %v18358_v15 }
 0xb56   : > { %6541 = vadd.xlane.f32.xlu0 %v18757_v34  ;;  %v13348_v50 = vpop.f32.mrb[176].mxu0  ;;  %v18761_v52 = vadd.f32 %v6468_v33, %v18355_v53 }
 0xb57   : > { %v13349_v28 = vpop.f32.mrb[177].mxu0 }
 0xb58   : > { %v13350_v5 = vadd.f32 %v13349_v28, %v13348_v50  ;;  %6543 = vadd.xlane.f32.xlu1 %v18761_v52  ;;  %v13351_v7 = vpop.f32.mrb[178].mxu0  ;;  %v21595_v28 = vld [vmem:[#allocation64_spill] sm:$0xff] }
 0xb59   : > { %v13352_v41 = vpop.f32.mrb[179].mxu0 }
 0xb5a   : > { %v6473_v56 = vadd.f32 %v13350_v5, %v18742_v36  ;;  %v13353_v16 = vadd.f32 %v13352_v41, %v13351_v7  ;;  %v21596_v5 = vld [vmem:[#allocation65_spill] sm:$0xff]  ;;  %v14959_v41 = vld [vmem:[#allocation9 + $0xc0] ss:$12 sps:$4 sm:$0xff]  }
 0xb5c   : > { %v6476_v48 = vadd.f32 %v13353_v16, %v18742_v36  ;;  %v18767_v15 = vadd.f32 %v6473_v56, %v18368_v63  ;;  %v14961_v56 = vld [vmem:[#allocation9 + $0xc4] ss:$12 sps:$4 sm:$0xff]   ;;  %v14964_v16 = vld [vmem:[#allocation9 + $0xdc] ss:$12 sps:$4 sm:$0xff]  }
 0xb5d   : > { %6944 = vmatprep.subr.bf16.mxu1 %v14961_v56 }
 0xb5e   : > { %6545 = vadd.xlane.f32.xlu0 %v18767_v15  ;;  %v13354_v47 = vpop.f32.mrb[180].mxu0  ;;  %v18771_v53 = vadd.f32 %v6476_v48, %v18371_v29  ;;  %6945 = vmatpush1.bf16.msra.mxu1 %v14959_v41  ;;  %v14962_v48 = vld [vmem:[#allocation9 + $0xd8] ss:$12 sps:$4 sm:$0xff]   ;;  %v18890_v41 = vld [vmem:[#allocation9 + $0x128] ss:$12 sps:$4 sm:$0xff]  }
 0xb5f   : > { %v13355_v20 = vpop.f32.mrb[181].mxu0  ;;  %6946 = vmatprep.subr.bf16.mxu1 %v14964_v16  ;;  %v14981_v16 = vld [vmem:[#allocation9 + $0x150] ss:$12 sps:$4 sm:$0xff]  }
 0xb60   : > { %v13356_v35 = vadd.f32 %v13355_v20, %v13354_v47  ;;  %6547 = vadd.xlane.f32.xlu1 %v18771_v53  ;;  %v13357_v44 = vpop.f32.mrb[182].mxu0 }
 0xb61   : > { %v13358_v24 = vpop.f32.mrb[183].mxu0 }
 0xb62   : > { %v6481_v11 = vadd.f32 %v13356_v35, %v18742_v36  ;;  %v13359_v17 = vadd.f32 %v13358_v24, %v13357_v44  ;;  %6947 = vmatpush1.bf16.msra.mxu1 %v14962_v48 }
 0xb64   : > { %v6484_v12 = vadd.f32 %v13359_v17, %v18742_v36  ;;  %v18777_v63 = vadd.f32 %v6481_v11, %v18384_v37 }
 0xb66   : > { %6549 = vadd.xlane.f32.xlu0 %v18777_v63  ;;  %v13360_v6 = vpop.f32.mrb[184].mxu0  ;;  %v18781_v29 = vadd.f32 %v6484_v12, %v18381_v21 }
 0xb67   : > { %v13361_v31 = vpop.f32.mrb[185].mxu0 }
 0xb68   : > { %v13362_v14 = vadd.f32 %v13361_v31, %v13360_v6  ;;  %6551 = vadd.xlane.f32.xlu1 %v18781_v29  ;;  %v13363_v30 = vpop.f32.mrb[186].mxu0 }
 0xb69   : > { %v13364_v9 = vpop.f32.mrb[187].mxu0 }
 0xb6a   : > { %v6489_v43 = vadd.f32 %v13362_v14, %v18742_v36  ;;  %v13365_v13 = vadd.f32 %v13364_v9, %v13363_v30 }
 0xb6c   : > { %v6492_v51 = vadd.f32 %v13365_v13, %v18742_v36  ;;  %v18787_v37 = vadd.f32 %v6489_v43, %v18398_v54 }
 0xb6e   : > { %6553 = vadd.xlane.f32.xlu0 %v18787_v37  ;;  %v13366_v59 = vpop.f32.mrb[188].mxu0  ;;  %v18791_v21 = vadd.f32 %v6492_v51, %v18394_v61 }
 0xb6f   : > { %v13367_v49 = vpop.f32.mrb[189].mxu0 }
 0xb70   : > { %v13368_v26 = vadd.f32 %v13367_v49, %v13366_v59  ;;  %6555 = vadd.xlane.f32.xlu1 %v18791_v21  ;;  %v13369_v39 = vpop.f32.mrb[190].mxu0 }
 0xb71   : > { %v13370_v38 = vpop.f32.mrb[191].mxu0 }
 0xb72   : > { %v6497_v25 = vadd.f32 %v13368_v26, %v18742_v36  ;;  %v13371_v1 = vadd.f32 %v13370_v38, %v13369_v39  ;;  %v14967_v39 = vld [vmem:[#allocation9 + $0xf4] ss:$12 sps:$4 sm:$0xff]  }
 0xb73   : > { %v18854_v38 = vld [vmem:[#allocation9 + $0xc8] ss:$12 sps:$4 sm:$0xff]   ;;  %6948 = vmatprep.subr.bf16.mxu1 %v14967_v39 }
 0xb74   : > { %v6500_v46 = vadd.f32 %v13371_v1, %v18742_v36  ;;  %v18797_v54 = vadd.f32 %v6497_v25, %v18410_v2  ;;  %v14965_v1 = vld [vmem:[#allocation9 + $0xf0] ss:$12 sps:$4 sm:$0xff]   ;;  %14056 = vmatprep.subr.bf16.mxu0 %v18854_v38 }
 0xb75   : > { %6949 = vmatpush1.bf16.msra.mxu1 %v14965_v1  ;;  %14057 = vmatpush3.bf16.msra.mxu0 %v18854_v38 }
 0xb76   : > { %6557 = vadd.xlane.f32.xlu0 %v18797_v54  ;;  %v18801_v18 = vadd.f32 %v6500_v46, %v18407_v58  ;;  %v21594_v58 = vld [vmem:[#allocation62_spill] sm:$0xff] }
 0xb78   : > { %6559 = vadd.xlane.f32.xlu1 %v18801_v18 }
 0xb84   : > { %v13372_v61 = vpop.f32.mrb[192].mxu0 }
 0xb85   : > { %v13373_v0 = vpop.f32.mrb[193].mxu0 }
 0xb86   : > { %v13374_v22 = vadd.f32 %v13373_v0, %v13372_v61  ;;  %v13375_v62 = vpop.f32.mrb[194].mxu0  ;;  %v14971_v0 = vld [vmem:[#allocation9 + $0x10c] ss:$12 sps:$4 sm:$0xff]  }
 0xb87   : > { %v13376_v19 = vpop.f32.mrb[195].mxu0  ;;  %6950 = vmatprep.subr.bf16.mxu1 %v14971_v0 }
 0xb88   : > { %v6505_v57 = vadd.f32 %v13374_v22, %v18742_v36  ;;  %v13377_v55 = vadd.f32 %v13376_v19, %v13375_v62  ;;  %v18861_v22 = vld [vmem:[#allocation9 + $0xe0] ss:$12 sps:$4 sm:$0xff]   ;;  %v14969_v62 = vld [vmem:[#allocation9 + $0x108] ss:$12 sps:$4 sm:$0xff]  }
 0xb89   : > { %14058 = vmatprep.subr.bf16.mxu0 %v18861_v22  ;;  %6951 = vmatpush1.bf16.msra.mxu1 %v14969_v62 }
 0xb8a   : > { %v6508_v4 = vadd.f32 %v13377_v55, %v18742_v36  ;;  %v18807_v2 = vadd.f32 %v6505_v57, %v18420_v60  ;;  %14059 = vmatpush3.bf16.msra.mxu0 %v18861_v22  ;;  %v14975_v55 = vld [vmem:[#allocation9 + $0x124] ss:$12 sps:$4 sm:$0xff]  }
 0xb8b   : > { %6952 = vmatprep.subr.bf16.mxu1 %v14975_v55 }
 0xb8c   : > { %6561 = vadd.xlane.f32.xlu0 %v18807_v2  ;;  %v13378_v32 = vpop.f32.mrb[196].mxu0  ;;  %v18811_v3 = vadd.f32 %v6508_v4, %v21594_v58  ;;  %v18872_v4 = vld [vmem:[#allocation9 + $0xf8] ss:$12 sps:$4 sm:$0xff]   ;;  %v14973_v58 = vld [vmem:[#allocation9 + $0x120] ss:$12 sps:$4 sm:$0xff]  }
 0xb8d   : > { %v13379_v27 = vpop.f32.mrb[197].mxu0  ;;  %14060 = vmatprep.subr.bf16.mxu0 %v18872_v4  ;;  %6953 = vmatpush1.bf16.msra.mxu1 %v14973_v58  ;;  %v18941_v58 = vld [vmem:[%s21598_s22] ss:$0 sm:$0xff] }
 0xb8e   : > { %v13380_v42 = vadd.f32 %v13379_v27, %v13378_v32  ;;  %6563 = vadd.xlane.f32.xlu1 %v18811_v3  ;;  %v13381_v10 = vpop.f32.mrb[198].mxu0  ;;  %14061 = vmatpush3.bf16.msra.mxu0 %v18872_v4 }
 0xb8f   : > { %v13382_v45 = vpop.f32.mrb[199].mxu0 }
 0xb90   : > { %v6513_v8 = vadd.f32 %v13380_v42, %v18742_v36  ;;  %v13383_v33 = vadd.f32 %v13382_v45, %v13381_v10  ;;  %v14977_v45 = vld [vmem:[#allocation9 + $0x138] ss:$12 sps:$4 sm:$0xff]  }
 0xb92   : > { %v6516_v50 = vadd.f32 %v13383_v33, %v18742_v36  ;;  %v18817_v60 = vadd.f32 %v6513_v8, %v21595_v28  ;;  %v14979_v8 = vld [vmem:[#allocation9 + $0x13c] ss:$12 sps:$4 sm:$0xff]  }
 0xb93   : > { %v18879_v33 = vld [vmem:[#allocation9 + $0x110] ss:$12 sps:$4 sm:$0xff]   ;;  %6954 = vmatprep.subr.bf16.mxu1 %v14979_v8 }
 0xb94   : > { %6565 = vadd.xlane.f32.xlu0 %v18817_v60  ;;  %v18821_v7 = vadd.f32 %v6516_v50, %v21596_v5  ;;  %14062 = vmatprep.subr.bf16.mxu0 %v18879_v33  ;;  %v14983_v5 = vld [vmem:[#allocation9 + $0x154] ss:$12 sps:$4 sm:$0xff]  }
 0xb95   : > { %6955 = vmatpush1.bf16.msra.mxu1 %v14977_v45  ;;  %14063 = vmatpush3.bf16.msra.mxu0 %v18879_v33 }
 0xb96   : > { %6567 = vadd.xlane.f32.xlu1 %v18821_v7  ;;  %6956 = vmatprep.subr.bf16.mxu1 %v14983_v5 }
 0xb97   : > { %14064 = vmatprep.subr.bf16.mxu0 %v18890_v41 }
 0xb99   : > { %6957 = vmatpush1.bf16.msra.mxu1 %v14981_v16  ;;  %14065 = vmatpush3.bf16.msra.mxu0 %v18890_v41 }
 0xbd8   : > { %v6538_v47 = vpop.xlane.xlu0 %6537 }
 0xbd9   : > { %v6569_v36 = vmul.f32 0.0078125, %v6538_v47 }
 0xbda   : > { %v6540_v20 = vpop.xlane.xlu1 %6539 }
 0xbdb   : > { %v18825_v35 = vsub.f32 %v18747_v40, %v6569_v36  ;;  %v6570_v44 = vmul.f32 0.0078125, %v6540_v20  ;;  %v14985_v20 = vld [vmem:[#allocation9 + $0x168] ss:$12 sps:$4 sm:$0xff]  }
 0xbdd   : > { %v18828_v24 = vsub.f32 %v18751_v23, %v6570_v44  ;;  %v6601_v11 = vmul.f32 %v18825_v35, %v18825_v35  ;;  %v14987_v44 = vld [vmem:[#allocation9 + $0x16c] ss:$12 sps:$4 sm:$0xff]  }
 0xbde   : > { %6958 = vmatprep.subr.bf16.mxu1 %v14987_v44 }
 0xbdf   : > { %6617 = vadd.xlane.f32.xlu0 %v6601_v11  ;;  %v6602_v17 = vmul.f32 %v18828_v24, %v18828_v24  ;;  %v18897_v11 = vld [vmem:[#allocation9 + $0x140] ss:$12 sps:$4 sm:$0xff]   ;;  %6959 = vmatpush1.bf16.msra.mxu1 %v14985_v20 }
 0xbe0   : > { %14066 = vmatprep.subr.bf16.mxu0 %v18897_v11  ;;  %14504 = vmatprep.subr.bf16.mxu1 %v18854_v38 }
 0xbe1   : > { %6619 = vadd.xlane.f32.xlu1 %v6602_v17  ;;  %14067 = vmatpush3.bf16.msra.mxu0 %v18897_v11 }
 0xbe3   : > { %v6542_v12 = vpop.xlane.xlu0 %6541 }
 0xbe4   : > { %v6571_v6 = vmul.f32 0.0078125, %v6542_v12 }
 0xbe5   : > { %v6544_v31 = vpop.xlane.xlu1 %6543 }
 0xbe6   : > { %v18835_v14 = vsub.f32 %v18757_v34, %v6571_v6  ;;  %v6572_v40 = vmul.f32 0.0078125, %v6544_v31  ;;  %v18908_v6 = vld [vmem:[#allocation9 + $0x158] ss:$12 sps:$4 sm:$0xff]   ;;  %v21597_v31 = vmov 0.0  }
 0xbe7   : > { %14068 = vmatprep.subr.bf16.mxu0 %v18908_v6 }
 0xbe8   : > { %v18838_v30 = vsub.f32 %v18761_v52, %v6572_v40  ;;  %v6603_v23 = vmul.f32 %v18835_v14, %v18835_v14  ;;  %14069 = vmatpush3.bf16.msra.mxu0 %v18908_v6 }
 0xbea   : > { %6621 = vadd.xlane.f32.xlu0 %v6603_v23  ;;  %v6604_v9 = vmul.f32 %v18838_v30, %v18838_v30 }
 0xbeb   : > { %v6546_v43 = vpop.xlane.xlu0 %6545 }
 0xbec   : > { %v6573_v13 = vmul.f32 0.0078125, %v6546_v43  ;;  %6623 = vadd.xlane.f32.xlu1 %v6604_v9 }
 0xbed   : > { %v6548_v51 = vpop.xlane.xlu1 %6547 }
 0xbee   : > { %v18845_v59 = vsub.f32 %v18767_v15, %v6573_v13  ;;  %v6574_v34 = vmul.f32 0.0078125, %v6548_v51 }
 0xbf0   : > { %v18848_v49 = vsub.f32 %v18771_v53, %v6574_v34  ;;  %v6605_v52 = vmul.f32 %v18845_v59, %v18845_v59 }
 0xbf2   : > { %6625 = vadd.xlane.f32.xlu0 %v6605_v52  ;;  %v6606_v26 = vmul.f32 %v18848_v49, %v18848_v49 }
 0xbf3   : > { %v6550_v25 = vpop.xlane.xlu0 %6549 }
 0xbf4   : > { %v6575_v46 = vmul.f32 0.0078125, %v6550_v25  ;;  %6627 = vadd.xlane.f32.xlu1 %v6606_v26 }
 0xbf5   : > { %v6552_v15 = vpop.xlane.xlu1 %6551 }
 0xbf6   : > { %v18858_v53 = vsub.f32 %v18777_v63, %v6575_v46  ;;  %v6576_v61 = vmul.f32 0.0078125, %v6552_v15 }
 0xbf8   : > { %v18864_v19 = vsub.f32 %v18781_v29, %v6576_v61  ;;  %v6607_v57 = vmul.f32 %v18858_v53, %v18858_v53 }
 0xbfa   : > { %6629 = vadd.xlane.f32.xlu0 %v6607_v57  ;;  %v6608_v63 = vmul.f32 %v18864_v19, %v18864_v19 }
 0xbfb   : > { %v6554_v32 = vpop.xlane.xlu0 %6553 }
 0xbfc   : > { %v6577_v29 = vmul.f32 0.0078125, %v6554_v32  ;;  %6631 = vadd.xlane.f32.xlu1 %v6608_v63 }
 0xbfd   : > { %v6556_v27 = vpop.xlane.xlu1 %6555 }
 0xbfe   : > { %v18876_v42 = vsub.f32 %v18787_v37, %v6577_v29  ;;  %v6578_v10 = vmul.f32 0.0078125, %v6556_v27 }
 0xc00   : > { %v18882_v50 = vsub.f32 %v18791_v21, %v6578_v10  ;;  %v6609_v28 = vmul.f32 %v18876_v42, %v18876_v42 }
 0xc02   : > { %6633 = vadd.xlane.f32.xlu0 %v6609_v28  ;;  %v6610_v37 = vmul.f32 %v18882_v50, %v18882_v50 }
 0xc03   : > { %v6558_v56 = vpop.xlane.xlu0 %6557 }
 0xc04   : > { %v6579_v21 = vmul.f32 0.0078125, %v6558_v56  ;;  %6635 = vadd.xlane.f32.xlu1 %v6610_v37  ;;  %v18949_v56 = vld [vmem:[%s21599_s26] ss:$0 sm:$0xff] }
 0xc05   : > { %v6560_v48 = vpop.xlane.xlu1 %6559 }
 0xc06   : > { %v18894_v47 = vsub.f32 %v18797_v54, %v6579_v21  ;;  %v6580_v36 = vmul.f32 0.0078125, %v6560_v48 }
 0xc08   : > { %v18900_v17 = vsub.f32 %v18801_v18, %v6580_v36  ;;  %v6611_v12 = vmul.f32 %v18894_v47, %v18894_v47  ;;  %v18913_v18 = vld [vmem:[#allocation9 + $0x170] ss:$12 sps:$4 sm:$0xff]  }
 0xc09   : > { %14070 = vmatprep.subr.bf16.mxu0 %v18913_v18 }
 0xc0a   : > { %6637 = vadd.xlane.f32.xlu0 %v6611_v12  ;;  %v6612_v54 = vmul.f32 %v18900_v17, %v18900_v17  ;;  %14071 = vmatpush3.bf16.msra.mxu0 %v18913_v18 }
 0xc0b   : > { %14088 = vmatprep.subr.bf16.mxu0 %v21597_v31 }
 0xc0c   : > { %6639 = vadd.xlane.f32.xlu1 %v6612_v54 }
 0xc19   : > { %v6562_v40 = vpop.xlane.xlu0 %6561 }
 0xc1a   : > { %v6581_v23 = vmul.f32 0.0078125, %v6562_v40  ;;  %v21602_v40 = vmov 0  }
 0xc1b   : > { %v6564_v9 = vpop.xlane.xlu1 %6563 }
 0xc1c   : > { %v18919_v43 = vsub.f32 %v18807_v2, %v6581_v23  ;;  %v6582_v13 = vmul.f32 0.0078125, %v6564_v9 }
 0xc1e   : > { %v18922_v51 = vsub.f32 %v18811_v3, %v6582_v13  ;;  %v6613_v34 = vmul.f32 %v18919_v43, %v18919_v43 }
 0xc20   : > { %6641 = vadd.xlane.f32.xlu0 %v6613_v34  ;;  %v6614_v52 = vmul.f32 %v18922_v51, %v18922_v51 }
 0xc21   : > { %v6566_v26 = vpop.xlane.xlu0 %6565 }
 0xc22   : > { %v6583_v39 = vmul.f32 0.0078125, %v6566_v26  ;;  %6643 = vadd.xlane.f32.xlu1 %v6614_v52 }
 0xc23   : > { %v6568_v25 = vpop.xlane.xlu1 %6567 }
 0xc24   : > { %v18929_v1 = vsub.f32 %v18817_v60, %v6583_v39  ;;  %v6584_v2 = vmul.f32 0.0078125, %v6568_v25 }
 0xc26   : > { %v18932_v46 = vsub.f32 %v18821_v7, %v6584_v2  ;;  %v6615_v3 = vmul.f32 %v18929_v1, %v18929_v1 }
 0xc28   : > { %6645 = vadd.xlane.f32.xlu0 %v6615_v3  ;;  %v6616_v15 = vmul.f32 %v18932_v46, %v18932_v46 }
 0xc2a   : > { %6647 = vadd.xlane.f32.xlu1 %v6616_v15 }
 0xc6c   : > { %v6618_v61 = vpop.xlane.xlu0 %6617 }
 0xc6d   : > { %v6649_v0 = vmul.f32 0.0078125, %v6618_v61 }
 0xc6e   : > { %v6620_v62 = vpop.xlane.xlu1 %6619 }
 0xc6f   : > { %v6665_v57 = vadd.f32 1e-05, %v6649_v0  ;;  %v6650_v63 = vmul.f32 0.0078125, %v6620_v62 }
 0xc71   : > { %15423 = vrsqrt.f32 %v6665_v57  ;;  %v6666_v60 = vadd.f32 1e-05, %v6650_v63 }
 0xc73   : > { %15425 = vrsqrt.f32 %v6666_v60 }
 0xc77   : > { %v6622_v55 = vpop.xlane.xlu0 %6621 }
 0xc78   : > { %v6651_v32 = vmul.f32 0.0078125, %v6622_v55 }
 0xc79   : > { %v6624_v29 = vpop.xlane.xlu1 %6623 }
 0xc7a   : > { %v6667_v10 = vadd.f32 1e-05, %v6651_v32  ;;  %v6652_v45 = vmul.f32 0.0078125, %v6624_v29 }
 0xc7b   : > { %v15424_v7 = vpop.eup %15423 }
 0xc7c   : > { %v6697_v27 = vmul.f32 %v15424_v7, %v18825_v35  ;;  %15427 = vrsqrt.f32 %v6667_v10  ;;  %v6668_v5 = vadd.f32 1e-05, %v6652_v45 }
 0xc7d   : > { %v15426_v8 = vpop.eup %15425 }
 0xc7e   : > { %v6719_v28 = vmul.f32 %v18941_v58, %v6697_v27  ;;  %v6698_v37 = vmul.f32 %v15426_v8, %v18828_v24  ;;  %15429 = vrsqrt.f32 %v6668_v5 }
 0xc7f   : > { %v6626_v21 = vpop.xlane.xlu0 %6625 }
 0xc80   : > { %v6720_v16 = vmul.f32 %v18941_v58, %v6698_v37  ;;  %v6653_v48 = vmul.f32 0.0078125, %v6626_v21  ;;  %v18953_v35 = vadd.f32 %v18949_v56, %v6719_v28 }
 0xc81   : > { %v6628_v20 = vpop.xlane.xlu1 %6627 }
 0xc82   : > { %21600 = vst [vmem:[#allocation41_spill] sm:$0xff] %v18953_v35  ;;  %v18956_v36 = vadd.f32 %v18949_v56, %v6720_v16  ;;  %v6669_v24 = vadd.f32 1e-05, %v6653_v48  ;;  %v6654_v44 = vmul.f32 0.0078125, %v6628_v20 }
 0xc84   : > { %21601 = vst [vmem:[#allocation66_spill] sm:$0xff] %v18956_v36  ;;  %v6757_v12 = vpack.c.bf16 %v18956_v36, %v18953_v35  ;;  %15431 = vrsqrt.f32 %v6669_v24  ;;  %v6670_v54 = vadd.f32 1e-05, %v6654_v44 }
 0xc86   : > { %6977 = vmatmul.mubr.bf16.vlgmr.msra.gmra.mrb[184].mxu1 %v6757_v12  ;;  %14072 = vmatprep.mubr.bf16.mxu0 %v6757_v12  ;;  %v15428_v23 = vpop.eup %15427  ;;  %15433 = vrsqrt.f32 %v6670_v54 }
 0xc87   : > { %6986 = vmatprep.mubr.bf16.mxu1 %v21602_v40  ;;  %14512 = vmatpush3.bf16.msra.mxu1 %v18854_v38  ;;  %v6630_v9 = vpop.xlane.xlu0 %6629  ;;  %v6699_v13 = vmul.f32 %v15428_v23, %v18835_v14 }
 0xc88   : > { %14505 = vmatprep.subr.bf16.mxu1 %v18861_v22  ;;  %v15430_v34 = vpop.eup %15429  ;;  %v6655_v52 = vmul.f32 0.0078125, %v6630_v9 }
 0xc89   : > { %v6632_v26 = vpop.xlane.xlu1 %6631  ;;  %v6700_v39 = vmul.f32 %v15430_v34, %v18838_v30  ;;  %v6721_v25 = vmul.f32 %v18941_v58, %v6699_v13 }
 0xc8a   : > { %v6671_v2 = vadd.f32 1e-05, %v6655_v52  ;;  %v6656_v3 = vmul.f32 0.0078125, %v6632_v26 }
 0xc8b   : > { %14513 = vmatpush3.bf16.msra.mxu1 %v18861_v22  ;;  %v6722_v38 = vmul.f32 %v18941_v58, %v6700_v39  ;;  %v18970_v61 = vadd.f32 %v18949_v56, %v6721_v25 }
 0xc8c   : > { %14506 = vmatprep.subr.bf16.mxu1 %v18872_v4  ;;  %15435 = vrsqrt.f32 %v6671_v2  ;;  %v6672_v15 = vadd.f32 1e-05, %v6656_v3 }
 0xc8d   : > { %21603 = vst [vmem:[#allocation67_spill] sm:$0xff] %v18970_v61  ;;  %v18973_v14 = vadd.f32 %v18949_v56, %v6722_v38 }
 0xc8e   : > { %v15432_v30 = vpop.eup %15431  ;;  %15437 = vrsqrt.f32 %v6672_v15 }
 0xc8f   : > { %21604 = vst [vmem:[#allocation69_spill] sm:$0xff] %v18973_v14  ;;  %14514 = vmatpush3.bf16.msra.mxu1 %v18872_v4  ;;  %v6634_v22 = vpop.xlane.xlu0 %6633  ;;  %v6758_v0 = vpack.c.bf16 %v18973_v14, %v18970_v61  ;;  %v6701_v62 = vmul.f32 %v15432_v30, %v18845_v59 }
 0xc90   : > { %14507 = vmatprep.subr.bf16.mxu1 %v18879_v33  ;;  %v15434_v57 = vpop.eup %15433  ;;  %v6657_v63 = vmul.f32 0.0078125, %v6634_v22 }
 0xc91   : > { %v6636_v60 = vpop.xlane.xlu1 %6635  ;;  %6987 = vmatmul.mubr.bf16.gmra.mrb[188].mxu1 %v6758_v0  ;;  %14073 = vmatmul.mubr.bf16.vlgmr.msra.gmra.mrb[200].mxu0 %v6758_v0  ;;  %v6702_v55 = vmul.f32 %v15434_v57, %v18848_v49  ;;  %v6723_v32 = vmul.f32 %v18941_v58, %v6701_v62 }
 0xc92   : > { %v6673_v4 = vadd.f32 1e-05, %v6657_v63  ;;  %v6658_v7 = vmul.f32 0.0078125, %v6636_v60  ;;  %6996 = vmatprep.mubr.bf16.mxu1 %v21602_v40 }
 0xc93   : > { %14515 = vmatpush3.bf16.msra.mxu1 %v18879_v33  ;;  %v6724_v29 = vmul.f32 %v18941_v58, %v6702_v55  ;;  %v18987_v27 = vadd.f32 %v18949_v56, %v6723_v32 }
 0xc94   : > { %14508 = vmatprep.subr.bf16.mxu1 %v18890_v41  ;;  %15439 = vrsqrt.f32 %v6673_v4  ;;  %v6674_v59 = vadd.f32 1e-05, %v6658_v7 }
 0xc95   : > { %21605 = vst [vmem:[#allocation68_spill] sm:$0xff] %v18987_v27  ;;  %v18990_v10 = vadd.f32 %v18949_v56, %v6724_v29 }
 0xc96   : > { %v15436_v49 = vpop.eup %15435  ;;  %15441 = vrsqrt.f32 %v6674_v59 }
 0xc97   : > { %21606 = vst [vmem:[#allocation40_spill] sm:$0xff] %v18990_v10  ;;  %14516 = vmatpush3.bf16.msra.mxu1 %v18890_v41  ;;  %v6638_v45 = vpop.xlane.xlu0 %6637  ;;  %v6759_v33 = vpack.c.bf16 %v18990_v10, %v18987_v27  ;;  %v6703_v8 = vmul.f32 %v15436_v49, %v18858_v53 }
 0xc98   : > { %14509 = vmatprep.subr.bf16.mxu1 %v18897_v11  ;;  %v15438_v28 = vpop.eup %15437  ;;  %v6659_v37 = vmul.f32 0.0078125, %v6638_v45 }
 0xc99   : > { %v6640_v5 = vpop.xlane.xlu1 %6639  ;;  %6997 = vmatmul.mubr.bf16.gmra.mrb[192].mxu1 %v6759_v33  ;;  %14076 = vmatprep.mubr.bf16.mxu0 %v6759_v33  ;;  %v6704_v16 = vmul.f32 %v15438_v28, %v18864_v19  ;;  %v6725_v21 = vmul.f32 %v18941_v58, %v6703_v8 }
 0xc9a   : > { %v6675_v48 = vadd.f32 1e-05, %v6659_v37  ;;  %v6660_v20 = vmul.f32 0.0078125, %v6640_v5  ;;  %7006 = vmatprep.mubr.bf16.mxu1 %v21602_v40 }
 0xc9b   : > { %14517 = vmatpush3.bf16.msra.mxu1 %v18897_v11  ;;  %v6726_v41 = vmul.f32 %v18941_v58, %v6704_v16  ;;  %v19004_v24 = vadd.f32 %v18949_v56, %v6725_v21 }
 0xc9c   : > { %14510 = vmatprep.subr.bf16.mxu1 %v18908_v6  ;;  %15443 = vrsqrt.f32 %v6675_v48  ;;  %v6676_v53 = vadd.f32 1e-05, %v6660_v20 }
 0xc9d   : > { %21607 = vst [vmem:[#allocation70_spill] sm:$0xff] %v19004_v24  ;;  %v19007_v44 = vadd.f32 %v18949_v56, %v6726_v41 }
 0xc9e   : > { %v15440_v19 = vpop.eup %15439  ;;  %15445 = vrsqrt.f32 %v6676_v53  ;;  %v21618_v53 = vld [vmem:[#allocation39_spill] sm:$0xff] }
 0xc9f   : > { %21608 = vst [vmem:[#allocation72_spill] sm:$0xff] %v19007_v44  ;;  %14518 = vmatpush3.bf16.msra.mxu1 %v18908_v6  ;;  %v6760_v12 = vpack.c.bf16 %v19007_v44, %v19004_v24  ;;  %v6705_v11 = vmul.f32 %v15440_v19, %v18876_v42 }
 0xca0   : > { %14511 = vmatprep.subr.bf16.mxu1 %v18913_v18  ;;  %v15442_v54 = vpop.eup %15441 }
 0xca1   : > { %7007 = vmatmul.mubr.bf16.gmra.mrb[196].mxu1 %v6760_v12  ;;  %14077 = vmatmul.mubr.bf16.gmra.mrb[204].mxu0 %v6760_v12  ;;  %v6706_v23 = vmul.f32 %v15442_v54, %v18882_v50  ;;  %v6727_v9 = vmul.f32 %v18941_v58, %v6705_v11 }
 0xca2   : > { %7016 = vmatprep.mubr.bf16.mxu1 %v21602_v40  ;;  %14090 = vmatprep.mubr.msk.bf16.mxu0 %vm16134_vm0, %v21597_v31 }
 0xca3   : > { %14519 = vmatpush3.bf16.msra.mxu1 %v18913_v18  ;;  %v6728_v6 = vmul.f32 %v18941_v58, %v6706_v23  ;;  %v19023_v42 = vadd.f32 %v18949_v56, %v6727_v9 }
 0xca4   : > { %14094 = vmatprep.subr.bf16.mxu1 %v21597_v31 }
 0xca5   : > { %21609 = vst [vmem:[#allocation46_spill] sm:$0xff] %v19023_v42  ;;  %v19026_v13 = vadd.f32 %v18949_v56, %v6728_v6 }
 0xca6   : > { %v15444_v50 = vpop.eup %15443 }
 0xca7   : > { %21610 = vst [vmem:[#allocation71_spill] sm:$0xff] %v19026_v13  ;;  %v6761_v34 = vpack.c.bf16 %v19026_v13, %v19023_v42  ;;  %v6707_v52 = vmul.f32 %v15444_v50, %v18894_v47 }
 0xca8   : > { %v15446_v18 = vpop.eup %15445 }
 0xca9   : > { %7017 = vmatmul.mubr.bf16.gmra.mrb[200].mxu1 %v6761_v34  ;;  %v6708_v26 = vmul.f32 %v15446_v18, %v18900_v17  ;;  %v6729_v39 = vmul.f32 %v18941_v58, %v6707_v52 }
 0xcaa   : > { %7026 = vmatprep.mubr.bf16.mxu1 %v21602_v40 }
 0xcab   : > { %v6730_v25 = vmul.f32 %v18941_v58, %v6708_v26  ;;  %v19036_v2 = vadd.f32 %v18949_v56, %v6729_v39  ;;  %v21619_v26 = vld [vmem:[#allocation37_spill] sm:$0xff] }
 0xcac   : > { %v21620_v39 = vsub.s32 2, %v21619_v26 }
 0xcad   : > { %21611 = vst [vmem:[#allocation76_spill] sm:$0xff] %v19036_v2  ;;  %v19039_v3 = vadd.f32 %v18949_v56, %v6730_v25  ;;  %v6642_v38 = vpop.xlane.xlu0 %6641 }
 0xcae   : > { %v6661_v15 = vmul.f32 0.0078125, %v6642_v38 }
 0xcaf   : > { %21612 = vst [vmem:[#allocation77_spill] sm:$0xff] %v19039_v3  ;;  %v6762_v47 = vpack.c.bf16 %v19039_v3, %v19036_v2  ;;  %v6644_v30 = vpop.xlane.xlu1 %6643 }
 0xcb0   : > { %v6677_v22 = vadd.f32 1e-05, %v6661_v15  ;;  %v6662_v17 = vmul.f32 0.0078125, %v6644_v30 }
 0xcb1   : > { %7027 = vmatmul.mubr.bf16.gmra.mrb[204].mxu1 %v6762_v47 }
 0xcb2   : > { %15447 = vrsqrt.f32 %v6677_v22  ;;  %v6678_v0 = vadd.f32 1e-05, %v6662_v17  ;;  %7036 = vmatprep.mubr.bf16.mxu1 %v21602_v40 }
 0xcb4   : > { %15449 = vrsqrt.f32 %v6678_v0 }
 0xcb5   : > { %v6646_v62 = vpop.xlane.xlu0 %6645 }
 0xcb6   : > { %v6663_v57 = vmul.f32 0.0078125, %v6646_v62 }
 0xcb7   : > { %v6648_v63 = vpop.xlane.xlu1 %6647 }
 0xcb8   : > { %v6679_v60 = vadd.f32 1e-05, %v6663_v57  ;;  %v6664_v55 = vmul.f32 0.0078125, %v6648_v63 }
 0xcba   : > { %15451 = vrsqrt.f32 %v6679_v60  ;;  %v6680_v32 = vadd.f32 1e-05, %v6664_v55 }
 0xcbc   : > { %v15448_v4 = vpop.eup %15447  ;;  %15453 = vrsqrt.f32 %v6680_v32 }
 0xcbd   : > { %v6709_v7 = vmul.f32 %v15448_v4, %v18919_v43 }
 0xcbe   : > { %v15450_v29 = vpop.eup %15449 }
 0xcbf   : > { %v6710_v59 = vmul.f32 %v15450_v29, %v18922_v51  ;;  %v6731_v49 = vmul.f32 %v18941_v58, %v6709_v7 }
 0xcc1   : > { %v6732_v45 = vmul.f32 %v18941_v58, %v6710_v59  ;;  %v19049_v33 = vadd.f32 %v18949_v56, %v6731_v49 }
 0xcc3   : > { %21613 = vst [vmem:[#allocation73_spill] sm:$0xff] %v19049_v33  ;;  %v19052_v8 = vadd.f32 %v18949_v56, %v6732_v45 }
 0xcc4   : > { %v15452_v28 = vpop.eup %15451 }
 0xcc5   : > { %21614 = vst [vmem:[#allocation74_spill] sm:$0xff] %v19052_v8  ;;  %v6763_v37 = vpack.c.bf16 %v19052_v8, %v19049_v33  ;;  %v6711_v5 = vmul.f32 %v15452_v28, %v18929_v1  ;;  %v13013_v1 = vld [vmem:[%s21319_s4 + $0x3] sm:$0x7] }
 0xcc6   : > { %v15454_v43 = vpop.eup %15453  ;;  %v19078_v19 = vrot.slane %v13013_v1, %v21618_v53  ;;  %v19097_v25 = vrot.slane %v13013_v1, %v21620_v39 }
 0xcc7   : > { %7037 = vmatmul.mubr.bf16.gmra.mrb[208].mxu1 %v6763_v37  ;;  %v6712_v51 = vmul.f32 %v15454_v43, %v18932_v46  ;;  %v6733_v16 = vmul.f32 %v18941_v58, %v6711_v5  ;;  %v21617_v46 = vld [vmem:[#allocation38_spill] sm:$0xff] }
 0xcc8   : > { %7046 = vmatprep.mubr.bf16.mxu1 %v21602_v40 }
 0xcc9   : > { %v6734_v21 = vmul.f32 %v18941_v58, %v6712_v51  ;;  %v19062_v48 = vadd.f32 %v18949_v56, %v6733_v16  ;;  %v19075_v58 = vrot.slane %v13013_v1, %v21617_v46 }
 0xccb   : > { %21615 = vst [vmem:[#allocation42_spill] sm:$0xff] %v19062_v48  ;;  %v19065_v20 = vadd.f32 %v18949_v56, %v6734_v21 }
 0xccd   : > { %21616 = vst [vmem:[#allocation75_spill] sm:$0xff] %v19065_v20  ;;  %v6764_v41 = vpack.c.bf16 %v19065_v20, %v19062_v48 }
 0xccf   : > { %7047 = vmatmul.mubr.bf16.gmra.mrb[212].mxu1 %v6764_v41 }
 0xcd0   : > { %14080 = vmatprep.mubr.bf16.mxu1 %v6761_v34 }
 0xcd7   : > { %14081 = vmatmul.mubr.bf16.vlgmr.msra.gmra.mrb[216].mxu1 %v6762_v47 }
 0xcd8   : > { %14084 = vmatprep.mubr.bf16.mxu1 %v6763_v37 }
 0xcdf   : > { %14085 = vmatmul.mubr.bf16.gmra.mrb[220].mxu1 %v6764_v41 }
 0xce0   : > { %14096 = vmatprep.mubr.msk.bf16.mxu1 %vm16134_vm0, %v21597_v31 }
 0xd59   : > { %v6978_v56 = vpop.f32.mrb[184].mxu1 }
 0xd5a   : > { %v6980_v12 = vpop.f32.mrb[185].mxu1  ;;  %v6979_v54 = vadd.f32 %v6978_v56, %v19075_v58 }
 0xd5b   : > { %v6982_v11 = vpop.f32.mrb[186].mxu1  ;;  %v6981_v6 = vadd.f32 %v6980_v12, %v19078_v19 }
 0xd5c   : > { %v6983_v23 = vadd.f32 %v6982_v11, %v19075_v58  ;;  %v6984_v9 = vpop.f32.mrb[187].mxu1 }
 0xd5d   : > { %v6985_v50 = vadd.f32 %v6984_v9, %v19078_v19 }
 0xd5e   : > { %v19084_v34 = vpack.c.bf16 %v6983_v23, %v6979_v54 }
 0xd5f   : > { %v19086_v52 = vpack.c.bf16 %v6985_v50, %v6981_v6 }
 0xd60   : > { %7186 = vrot.lane.b32.xlu1 %v19084_v34, %s16135_s1 }
 0xd61   : > { %7242 = vrot.lane.b32.xlu0 %v19086_v52, %s16135_s1  ;;  %v7374_v18 = vsel %vm1448_vm1, %v19086_v52, 0 }
 0xd62   : > { %14089 = vmatpush3.bf16.xpose.msra.mxu0 %v7374_v18 }
 0xd63   : > { %14100 = vmatprep.subr.bf16.mxu0 %v21597_v31 }
 0xd64   : > { %v6988_v38 = vpop.f32.mrb[188].mxu1  ;;  %v14074_v15 = vpop.f32.mrb[200].mxu0 }
 0xd65   : > { %v6990_v47 = vpop.f32.mrb[189].mxu1  ;;  %v7091_v30 = vpop.f32.mrb[201].mxu0  ;;  %v6989_v0 = vadd.f32 %v6988_v38, %v19075_v58  ;;  %v7100_v62 = vadd.f32 %v14074_v15, %v19097_v25 }
 0xd66   : > { %v6992_v22 = vpop.f32.mrb[190].mxu1  ;;  %v14075_v17 = vpop.f32.mrb[202].mxu0  ;;  %v6991_v32 = vadd.f32 %v6990_v47, %v19078_v19  ;;  %v7092_v4 = vadd.f32 %v7091_v30, %v19097_v25 }
 0xd67   : > { %v6993_v57 = vadd.f32 %v6992_v22, %v19075_v58  ;;  %v7103_v63 = vadd.f32 %v14075_v17, %v19097_v25  ;;  %v6994_v60 = vpop.f32.mrb[191].mxu1  ;;  %v7094_v55 = vpop.f32.mrb[203].mxu0 }
 0xd68   : > { %v6995_v7 = vadd.f32 %v6994_v60, %v19078_v19  ;;  %v7095_v29 = vadd.f32 %v7094_v55, %v19097_v25 }
 0xd69   : > { %14091 = vmatmul.mubr.msk.bf16.vlgmr.msra.gmra.mrb[208].mxu0 %vm1448_vm1, %v19084_v34  ;;  %v19111_v59 = vpack.c.bf16 %v6993_v57, %v6989_v0  ;;  %v19113_v49 = vpack.c.bf16 %v7103_v63, %v7100_v62 }
 0xd6a   : > { %14102 = vmatprep.mubr.msk.bf16.mxu0 %vm16134_vm0, %v21597_v31  ;;  %v19115_v45 = vpack.c.bf16 %v6995_v7, %v6991_v32  ;;  %v19117_v28 = vpack.c.bf16 %v7095_v29, %v7092_v4 }
 0xd6b   : > { %7188 = vrot.lane.b32.xlu0 %v19111_v59, %s16135_s1 }
 0xd6c   : > { %7244 = vrot.lane.b32.xlu1 %v19115_v45, %s16135_s1  ;;  %v6998_v37 = vpop.f32.mrb[192].mxu1  ;;  %v7421_v5 = vsel %vm1448_vm1, %v19115_v45, 0 }
 0xd6d   : > { %v7000_v43 = vpop.f32.mrb[193].mxu1  ;;  %14095 = vmatpush3.bf16.xpose.msra.mxu1 %v7421_v5  ;;  %v6999_v16 = vadd.f32 %v6998_v37, %v19075_v58 }
 0xd6e   : > { %v7002_v51 = vpop.f32.mrb[194].mxu1  ;;  %14106 = vmatprep.subr.bf16.mxu1 %v21597_v31  ;;  %v7001_v1 = vadd.f32 %v7000_v43, %v19078_v19 }
 0xd6f   : > { %v7003_v21 = vadd.f32 %v7002_v51, %v19075_v58  ;;  %v7004_v41 = vpop.f32.mrb[195].mxu1 }
 0xd70   : > { %v7005_v56 = vadd.f32 %v7004_v41, %v19078_v19 }
 0xd71   : > { %v19130_v12 = vpack.c.bf16 %v7003_v21, %v6999_v16 }
 0xd72   : > { %v19132_v11 = vpack.c.bf16 %v7005_v56, %v7001_v1 }
 0xd73   : > { %7190 = vrot.lane.b32.xlu0 %v19130_v12, %s16135_s1 }
 0xd74   : > { %7246 = vrot.lane.b32.xlu1 %v19132_v11, %s16135_s1  ;;  %v7008_v54 = vpop.f32.mrb[196].mxu1  ;;  %v14078_v23 = vpop.f32.mrb[204].mxu0  ;;  %14097 = vmatmul.mubr.msk.bf16.vlgmr.msra.gmra.mrb[224].mxu1 %vm1448_vm1, %v19111_v59  ;;  %v7468_v9 = vsel %vm1448_vm1, %v19132_v11, 0 }
 0xd75   : > { %v7010_v6 = vpop.f32.mrb[197].mxu1  ;;  %v7107_v50 = vpop.f32.mrb[205].mxu0  ;;  %14101 = vmatpush3.bf16.xpose.msra.mxu0 %v7468_v9  ;;  %14108 = vmatprep.mubr.msk.bf16.mxu1 %vm16134_vm0, %v21597_v31  ;;  %v7009_v39 = vadd.f32 %v7008_v54, %v19075_v58  ;;  %v7116_v38 = vadd.f32 %v14078_v23, %v19097_v25 }
 0xd76   : > { %v7012_v18 = vpop.f32.mrb[198].mxu1  ;;  %v14079_v26 = vpop.f32.mrb[206].mxu0  ;;  %14112 = vmatprep.subr.bf16.mxu0 %v21597_v31  ;;  %v7011_v17 = vadd.f32 %v7010_v6, %v19078_v19  ;;  %v7108_v0 = vadd.f32 %v7107_v50, %v19097_v25 }
 0xd77   : > { %v7013_v15 = vadd.f32 %v7012_v18, %v19075_v58  ;;  %v7119_v47 = vadd.f32 %v14079_v26, %v19097_v25  ;;  %v7014_v30 = vpop.f32.mrb[199].mxu1  ;;  %v7110_v22 = vpop.f32.mrb[207].mxu0 }
 0xd78   : > { %v7015_v62 = vadd.f32 %v7014_v30, %v19078_v19  ;;  %v7111_v57 = vadd.f32 %v7110_v22, %v19097_v25 }
 0xd79   : > { %v19153_v63 = vpack.c.bf16 %v7013_v15, %v7009_v39  ;;  %v19155_v60 = vpack.c.bf16 %v7119_v47, %v7116_v38 }
 0xd7a   : > { %v19157_v55 = vpack.c.bf16 %v7015_v62, %v7011_v17  ;;  %v19159_v32 = vpack.c.bf16 %v7111_v57, %v7108_v0 }
 0xd7b   : > { %7192 = vrot.lane.b32.xlu0 %v19153_v63, %s16135_s1 }
 0xd7c   : > { %14103 = vmatmul.mubr.msk.bf16.vlgmr.msra.gmra.mrb[212].mxu0 %vm1448_vm1, %v19130_v12  ;;  %7248 = vrot.lane.b32.xlu1 %v19157_v55, %s16135_s1  ;;  %v7018_v4 = vpop.f32.mrb[200].mxu1  ;;  %v7515_v7 = vsel %vm1448_vm1, %v19157_v55, 0 }
 0xd7d   : > { %v7020_v29 = vpop.f32.mrb[201].mxu1  ;;  %14107 = vmatpush3.bf16.xpose.msra.mxu1 %v7515_v7  ;;  %14114 = vmatprep.mubr.msk.bf16.mxu0 %vm16134_vm0, %v21597_v31  ;;  %v7019_v5 = vadd.f32 %v7018_v4, %v19075_v58 }
 0xd7e   : > { %v7022_v37 = vpop.f32.mrb[202].mxu1  ;;  %14118 = vmatprep.subr.bf16.mxu1 %v21597_v31  ;;  %v7021_v16 = vadd.f32 %v7020_v29, %v19078_v19 }
 0xd7f   : > { %v7023_v43 = vadd.f32 %v7022_v37, %v19075_v58  ;;  %v7024_v51 = vpop.f32.mrb[203].mxu1 }
 0xd80   : > { %v7025_v21 = vadd.f32 %v7024_v51, %v19078_v19 }
 0xd81   : > { %v19176_v41 = vpack.c.bf16 %v7023_v43, %v7019_v5 }
 0xd82   : > { %v19178_v1 = vpack.c.bf16 %v7025_v21, %v7021_v16 }
 0xd83   : > { %7194 = vrot.lane.b32.xlu0 %v19176_v41, %s16135_s1 }
 0xd84   : > { %7250 = vrot.lane.b32.xlu1 %v19178_v1, %s16135_s1  ;;  %v7028_v56 = vpop.f32.mrb[204].mxu1  ;;  %14109 = vmatmul.mubr.msk.bf16.vlgmr.msra.gmra.mrb[228].mxu1 %vm1448_vm1, %v19153_v63  ;;  %v7562_v54 = vsel %vm1448_vm1, %v19178_v1, 0 }
 0xd85   : > { %v7030_v23 = vpop.f32.mrb[205].mxu1  ;;  %14113 = vmatpush3.bf16.xpose.msra.mxu0 %v7562_v54  ;;  %14120 = vmatprep.mubr.msk.bf16.mxu1 %vm16134_vm0, %v21597_v31  ;;  %v7029_v6 = vadd.f32 %v7028_v56, %v19075_v58 }
 0xd86   : > { %v7032_v9 = vpop.f32.mrb[206].mxu1  ;;  %14124 = vmatprep.subr.bf16.mxu0 %v21597_v31  ;;  %v7031_v26 = vadd.f32 %v7030_v23, %v19078_v19 }
 0xd87   : > { %v7033_v50 = vadd.f32 %v7032_v9, %v19075_v58  ;;  %v7034_v18 = vpop.f32.mrb[207].mxu1 }
 0xd88   : > { %v7035_v39 = vadd.f32 %v7034_v18, %v19078_v19 }
 0xd89   : > { %v19195_v38 = vpack.c.bf16 %v7033_v50, %v7029_v6 }
 0xd8a   : > { %v19197_v15 = vpack.c.bf16 %v7035_v39, %v7031_v26 }
 0xd8b   : > { %7196 = vrot.lane.b32.xlu0 %v19195_v38, %s16135_s1 }
 0xd8c   : > { %14115 = vmatmul.mubr.msk.bf16.vlgmr.msra.gmra.mrb[216].mxu0 %vm1448_vm1, %v19176_v41  ;;  %7252 = vrot.lane.b32.xlu1 %v19197_v15, %s16135_s1  ;;  %v7609_v47 = vsel %vm1448_vm1, %v19197_v15, 0 }
 0xd8d   : > { %14119 = vmatpush3.bf16.xpose.msra.mxu1 %v7609_v47  ;;  %14126 = vmatprep.mubr.msk.bf16.mxu0 %vm16134_vm0, %v21597_v31 }
 0xd8e   : > { %14130 = vmatprep.subr.bf16.mxu1 %v21597_v31 }
 0xd94   : > { %14121 = vmatmul.mubr.msk.bf16.vlgmr.msra.gmra.mrb[232].mxu1 %vm1448_vm1, %v19195_v38 }
 0xd95   : > { %14132 = vmatprep.mubr.msk.bf16.mxu1 %vm16134_vm0, %v21597_v31 }
 0xd9a   : > { %v7038_v30 = vpop.f32.mrb[208].mxu1 }
 0xd9b   : > { %v7040_v22 = vpop.f32.mrb[209].mxu1  ;;  %v7039_v0 = vadd.f32 %v7038_v30, %v19075_v58 }
 0xd9c   : > { %v7042_v17 = vpop.f32.mrb[210].mxu1  ;;  %v7041_v4 = vadd.f32 %v7040_v22, %v19078_v19 }
 0xd9d   : > { %v7043_v62 = vadd.f32 %v7042_v17, %v19075_v58  ;;  %v7044_v57 = vpop.f32.mrb[211].mxu1 }
 0xd9e   : > { %v7045_v7 = vadd.f32 %v7044_v57, %v19078_v19 }
 0xd9f   : > { %v19218_v29 = vpack.c.bf16 %v7043_v62, %v7039_v0 }
 0xda0   : > { %v19220_v37 = vpack.c.bf16 %v7045_v7, %v7041_v4 }
 0xda1   : > { %7198 = vrot.lane.b32.xlu0 %v19218_v29, %s16135_s1 }
 0xda2   : > { %7254 = vrot.lane.b32.xlu1 %v19220_v37, %s16135_s1  ;;  %v7048_v5 = vpop.f32.mrb[212].mxu1  ;;  %v7656_v43 = vsel %vm1448_vm1, %v19220_v37, 0 }
 0xda3   : > { %v7050_v51 = vpop.f32.mrb[213].mxu1  ;;  %14125 = vmatpush3.bf16.xpose.msra.mxu0 %v7656_v43  ;;  %v7049_v21 = vadd.f32 %v7048_v5, %v19075_v58 }
 0xda4   : > { %v7052_v16 = vpop.f32.mrb[214].mxu1  ;;  %14136 = vmatprep.subr.bf16.mxu0 %v21597_v31  ;;  %v7051_v23 = vadd.f32 %v7050_v51, %v19078_v19 }
 0xda5   : > { %v7053_v56 = vadd.f32 %v7052_v16, %v19075_v58  ;;  %v7054_v54 = vpop.f32.mrb[215].mxu1 }
 0xda6   : > { %v7055_v9 = vadd.f32 %v7054_v54, %v19078_v19 }
 0xda7   : > { %v19233_v6 = vpack.c.bf16 %v7053_v56, %v7049_v21 }
 0xda8   : > { %v19235_v50 = vpack.c.bf16 %v7055_v9, %v7051_v23 }
 0xda9   : > { %7200 = vrot.lane.b32.xlu0 %v19233_v6, %s16135_s1 }
 0xdaa   : > { %v14082_v18 = vpop.f32.mrb[216].mxu1  ;;  %14127 = vmatmul.mubr.msk.bf16.vlgmr.msra.gmra.mrb[220].mxu0 %vm1448_vm1, %v19218_v29  ;;  %7256 = vrot.lane.b32.xlu1 %v19235_v50, %s16135_s1  ;;  %v7703_v58 = vsel %vm1448_vm1, %v19235_v50, 0 }
 0xdab   : > { %v7123_v26 = vpop.f32.mrb[217].mxu1  ;;  %14131 = vmatpush3.bf16.xpose.msra.mxu1 %v7703_v58  ;;  %14138 = vmatprep.mubr.msk.bf16.mxu0 %vm16134_vm0, %v21597_v31  ;;  %v7132_v39 = vadd.f32 %v14082_v18, %v19097_v25 }
 0xdac   : > { %v14083_v19 = vpop.f32.mrb[218].mxu1  ;;  %14142 = vmatprep.subr.bf16.mxu1 %v21597_v31  ;;  %v7124_v22 = vadd.f32 %v7123_v26, %v19097_v25 }
 0xdad   : > { %v7135_v47 = vadd.f32 %v14083_v19, %v19097_v25  ;;  %v7126_v30 = vpop.f32.mrb[219].mxu1  ;;  %7202 = vrot.lane.b32.xlu0 %v19084_v34, %s16136_s17 }
 0xdae   : > { %v7127_v17 = vadd.f32 %v7126_v30, %v19097_v25  ;;  %7258 = vrot.lane.b32.xlu1 %v19086_v52, %s16136_s17 }
 0xdaf   : > { %v19256_v0 = vpack.c.bf16 %v7135_v47, %v7132_v39 }
 0xdb0   : > { %v19258_v62 = vpack.c.bf16 %v7127_v17, %v7124_v22 }
 0xdb1   : > { %7204 = vrot.lane.b32.xlu0 %v19111_v59, %s16136_s17 }
 0xdb2   : > { %v14086_v57 = vpop.f32.mrb[220].mxu1  ;;  %7260 = vrot.lane.b32.xlu1 %v19115_v45, %s16136_s17  ;;  %14133 = vmatmul.mubr.msk.bf16.vlgmr.msra.gmra.mrb[236].mxu1 %vm1448_vm1, %v19233_v6 }
 0xdb3   : > { %v7139_v4 = vpop.f32.mrb[221].mxu1  ;;  %14144 = vmatprep.mubr.msk.bf16.mxu1 %vm16134_vm0, %v21597_v31  ;;  %v7148_v5 = vadd.f32 %v14086_v57, %v19097_v25 }
 0xdb4   : > { %v14087_v7 = vpop.f32.mrb[222].mxu1  ;;  %v7140_v16 = vadd.f32 %v7139_v4, %v19097_v25 }
 0xdb5   : > { %v7151_v43 = vadd.f32 %v14087_v7, %v19097_v25  ;;  %v7142_v51 = vpop.f32.mrb[223].mxu1  ;;  %7206 = vrot.lane.b32.xlu0 %v19130_v12, %s16136_s17 }
 0xdb6   : > { %v7143_v21 = vadd.f32 %v7142_v51, %v19097_v25  ;;  %7262 = vrot.lane.b32.xlu1 %v19132_v11, %s16136_s17 }
 0xdb7   : > { %v19276_v56 = vpack.c.bf16 %v7151_v43, %v7148_v5 }
 0xdb8   : > { %v19278_v54 = vpack.c.bf16 %v7143_v21, %v7140_v16 }
 0xdb9   : > { %21621 = vst [vmem:[#allocation48_spill] sm:$0xff] %v19276_v56  ;;  %7208 = vrot.lane.b32.xlu0 %v19153_v63, %s16136_s17 }
 0xdba   : > { %21622 = vst [vmem:[#allocation43_spill] sm:$0xff] %v19278_v54  ;;  %7264 = vrot.lane.b32.xlu1 %v19157_v55, %s16136_s17 }
 0xdbd   : > { %7210 = vrot.lane.b32.xlu0 %v19176_v41, %s16136_s17 }
 0xdbe   : > { %7266 = vrot.lane.b32.xlu1 %v19178_v1, %s16136_s17 }
 0xdc1   : > { %7212 = vrot.lane.b32.xlu0 %v19195_v38, %s16136_s17 }
 0xdc2   : > { %7268 = vrot.lane.b32.xlu1 %v19197_v15, %s16136_s17 }
 0xdc5   : > { %7214 = vrot.lane.b32.xlu0 %v19218_v29, %s16136_s17 }
 0xdc6   : > { %7270 = vrot.lane.b32.xlu1 %v19220_v37, %s16136_s17 }
 0xdc9   : > { %7216 = vrot.lane.b32.xlu0 %v19233_v6, %s16136_s17 }
 0xdca   : > { %7272 = vrot.lane.b32.xlu1 %v19235_v50, %s16136_s17 }
 0xdcd   : > { %7218 = vrot.lane.b32.xlu0 %v19084_v34, %s16137_s12 }
 0xdce   : > { %7274 = vrot.lane.b32.xlu1 %v19086_v52, %s16137_s12 }
 0xdd1   : > { %7278 = vrot.lane.b32.xlu0 %v19132_v11, %s16137_s12 }
 0xdd2   : > { %7276 = vrot.lane.b32.xlu1 %v19115_v45, %s16137_s12  ;;  %v7187_v34 = vpop.permute.xlu1 %7186 }
 0xdd3   : > { %v7243_v25 = vpop.permute.xlu0 %7242 }
 0xdd4   : > { %v7750_v23 = vsel %vm1448_vm1, %v7243_v25, 0 }
 0xdd5   : > { %14137 = vmatpush3.bf16.xpose.msra.mxu0 %v7750_v23  ;;  %7222 = vrot.lane.b32.xlu0 %v19130_v12, %s16137_s12 }
 0xdd6   : > { %14148 = vmatprep.subr.bf16.mxu0 %v21597_v31  ;;  %7220 = vrot.lane.b32.xlu1 %v19111_v59, %s16137_s12 }
 0xdd9   : > { %7282 = vrot.lane.b32.xlu0 %v19178_v1, %s16137_s12 }
 0xdda   : > { %7280 = vrot.lane.b32.xlu1 %v19157_v55, %s16137_s12 }
 0xddc   : > { %14139 = vmatmul.mubr.msk.bf16.vlgmr.msra.gmra.mrb[224].mxu0 %vm1448_vm1, %v7187_v34 }
 0xddd   : > { %14150 = vmatprep.mubr.msk.bf16.mxu0 %vm16134_vm0, %v21597_v31  ;;  %7226 = vrot.lane.b32.xlu0 %v19176_v41, %s16137_s12  ;;  %v7189_v45 = vpop.permute.xlu0 %7188 }
 0xdde   : > { %v7245_v52 = vpop.permute.xlu1 %7244  ;;  %7224 = vrot.lane.b32.xlu1 %v19153_v63, %s16137_s12 }
 0xddf   : > { %v7797_v59 = vsel %vm1448_vm1, %v7245_v52, 0 }
 0xde0   : > { %14143 = vmatpush3.bf16.xpose.msra.mxu1 %v7797_v59 }
 0xde1   : > { %14154 = vmatprep.subr.bf16.mxu1 %v21597_v31  ;;  %7286 = vrot.lane.b32.xlu0 %v19220_v37, %s16137_s12 }
 0xde2   : > { %7284 = vrot.lane.b32.xlu1 %v19197_v15, %s16137_s12 }
 0xde5   : > { %7230 = vrot.lane.b32.xlu0 %v19218_v29, %s16137_s12  ;;  %v7191_v63 = vpop.permute.xlu0 %7190 }
 0xde6   : > { %v7247_v12 = vpop.permute.xlu1 %7246  ;;  %7228 = vrot.lane.b32.xlu1 %v19195_v38, %s16137_s12 }
 0xde7   : > { %v7844_v11 = vsel %vm1448_vm1, %v7247_v12, 0  ;;  %14145 = vmatmul.mubr.msk.bf16.vlgmr.msra.gmra.mrb[240].mxu1 %vm1448_vm1, %v7189_v45 }
 0xde8   : > { %14149 = vmatpush3.bf16.xpose.msra.mxu0 %v7844_v11  ;;  %14156 = vmatprep.mubr.msk.bf16.mxu1 %vm16134_vm0, %v21597_v31 }
 0xde9   : > { %14160 = vmatprep.subr.bf16.mxu0 %v21597_v31  ;;  %7298 = vrot.lane.b32.xlu0 %v19117_v28, %s16135_s1 }
 0xdea   : > { %7288 = vrot.lane.b32.xlu1 %v19235_v50, %s16137_s12 }
 0xded   : > { %7302 = vrot.lane.b32.xlu0 %v19159_v32, %s16135_s1  ;;  %v7193_v1 = vpop.permute.xlu0 %7192 }
 0xdee   : > { %v7249_v55 = vpop.permute.xlu1 %7248  ;;  %7232 = vrot.lane.b32.xlu1 %v19233_v6, %s16137_s12 }
 0xdef   : > { %v7891_v41 = vsel %vm1448_vm1, %v7249_v55, 0  ;;  %14151 = vmatmul.mubr.msk.bf16.vlgmr.msra.gmra.mrb[228].mxu0 %vm1448_vm1, %v7191_v63 }
 0xdf0   : > { %14155 = vmatpush3.bf16.xpose.msra.mxu1 %v7891_v41  ;;  %14162 = vmatprep.mubr.msk.bf16.mxu0 %vm16134_vm0, %v21597_v31 }
 0xdf1   : > { %14166 = vmatprep.subr.bf16.mxu1 %v21597_v31  ;;  %7322 = vrot.lane.b32.xlu0 %v19117_v28, %s16136_s17 }
 0xdf2   : > { %7300 = vrot.lane.b32.xlu1 %v19113_v49, %s16135_s1 }
 0xdf5   : > { %7326 = vrot.lane.b32.xlu0 %v19159_v32, %s16136_s17  ;;  %v7195_v29 = vpop.permute.xlu0 %7194 }
 0xdf6   : > { %v7251_v38 = vpop.permute.xlu1 %7250  ;;  %7304 = vrot.lane.b32.xlu1 %v19155_v60, %s16135_s1 }
 0xdf7   : > { %v7938_v15 = vsel %vm1448_vm1, %v7251_v38, 0  ;;  %14157 = vmatmul.mubr.msk.bf16.vlgmr.msra.gmra.mrb[244].mxu1 %vm1448_vm1, %v7193_v1 }
 0xdf8   : > { %14161 = vmatpush3.bf16.xpose.msra.mxu0 %v7938_v15  ;;  %14168 = vmatprep.mubr.msk.bf16.mxu1 %vm16134_vm0, %v21597_v31 }
 0xdf9   : > { %7350 = vrot.lane.b32.xlu0 %v19159_v32, %s16137_s12  ;;  %14172 = vmatprep.subr.bf16.mxu0 %v21597_v31 }
 0xdfa   : > { %7324 = vrot.lane.b32.xlu1 %v19113_v49, %s16136_s17 }
 0xdfd   : > { %7306 = vrot.lane.b32.xlu0 %v19258_v62, %s16135_s1  ;;  %v7197_v6 = vpop.permute.xlu0 %7196 }
 0xdfe   : > { %v7253_v37 = vpop.permute.xlu1 %7252  ;;  %7328 = vrot.lane.b32.xlu1 %v19155_v60, %s16136_s17 }
 0xdff   : > { %v7985_v9 = vsel %vm1448_vm1, %v7253_v37, 0  ;;  %14163 = vmatmul.mubr.msk.bf16.vlgmr.msra.gmra.mrb[232].mxu0 %vm1448_vm1, %v7195_v29 }
 0xe00   : > { %14167 = vmatpush3.bf16.xpose.msra.mxu1 %v7985_v9  ;;  %14174 = vmatprep.mubr.msk.bf16.mxu0 %vm16134_vm0, %v21597_v31 }
 0xe01   : > { %7310 = vrot.lane.b32.xlu0 %v19278_v54, %s16135_s1  ;;  %14178 = vmatprep.subr.bf16.mxu1 %v21597_v31 }
 0xe02   : > { %7346 = vrot.lane.b32.xlu1 %v19117_v28, %s16137_s12 }
 0xe05   : > { %7334 = vrot.lane.b32.xlu0 %v19278_v54, %s16136_s17 }
 0xe06   : > { %7348 = vrot.lane.b32.xlu1 %v19113_v49, %s16137_s12 }
 0xe07   : > { %14169 = vmatmul.mubr.msk.bf16.vlgmr.msra.gmra.mrb[248].mxu1 %vm1448_vm1, %v7197_v6 }
 0xe08   : > { %14180 = vmatprep.mubr.msk.bf16.mxu1 %vm16134_vm0, %v21597_v31 }
 0xe0a   : > { %7352 = vrot.lane.b32.xlu1 %v19155_v60, %s16137_s12 }
 0xe0e   : > { %7308 = vrot.lane.b32.xlu1 %v19256_v0, %s16135_s1 }
 0xe12   : > { %7332 = vrot.lane.b32.xlu1 %v19256_v0, %s16136_s17 }
 0xe13   : > { %v7199_v58 = vpop.permute.xlu0 %7198 }
 0xe14   : > { %v7255_v50 = vpop.permute.xlu1 %7254 }
 0xe15   : > { %v8032_v18 = vsel %vm1448_vm1, %v7255_v50, 0 }
 0xe16   : > { %7330 = vrot.lane.b32.xlu1 %v19258_v62, %s16136_s17  ;;  %14173 = vmatpush3.bf16.xpose.msra.mxu0 %v8032_v18 }
 0xe17   : > { %14184 = vmatprep.subr.bf16.mxu0 %v21597_v31 }
 0xe1a   : > { %7312 = vrot.lane.b32.xlu1 %v19276_v56, %s16135_s1 }
 0xe1b   : > { %v7201_v26 = vpop.permute.xlu0 %7200 }
 0xe1c   : > { %v7257_v19 = vpop.permute.xlu1 %7256 }
 0xe1d   : > { %v8079_v39 = vsel %vm1448_vm1, %v7257_v19, 0  ;;  %14175 = vmatmul.mubr.msk.bf16.vlgmr.msra.gmra.mrb[236].mxu0 %vm1448_vm1, %v7199_v58 }
 0xe1e   : > { %7336 = vrot.lane.b32.xlu1 %v19276_v56, %s16136_s17  ;;  %14179 = vmatpush3.bf16.xpose.msra.mxu1 %v8079_v39 }
 0xe1f   : > { %v7203_v47 = vpop.permute.xlu0 %7202  ;;  %14190 = vmatprep.subr.bf16.mxu1 %v21597_v31  ;;  %14186 = vmatprep.mubr.msk.bf16.mxu0 %vm16134_vm0, %v21597_v31 }
 0xe20   : > { %v7259_v30 = vpop.permute.xlu1 %7258 }
 0xe21   : > { %v8126_v22 = vsel %vm1448_vm1, %v7259_v30, 0 }
 0xe22   : > { %14185 = vmatpush3.bf16.xpose.msra.mxu0 %v8126_v22 }
 0xe23   : > { %v7205_v17 = vpop.permute.xlu0 %7204  ;;  %14196 = vmatprep.subr.bf16.mxu0 %v21597_v31 }
 0xe24   : > { %v7261_v57 = vpop.permute.xlu1 %7260 }
 0xe25   : > { %v8173_v4 = vsel %vm1448_vm1, %v7261_v57, 0  ;;  %14181 = vmatmul.mubr.msk.bf16.vlgmr.msra.gmra.mrb[252].mxu1 %vm1448_vm1, %v7201_v26 }
 0xe26   : > { %14191 = vmatpush3.bf16.xpose.msra.mxu1 %v8173_v4  ;;  %14192 = vmatprep.mubr.msk.bf16.mxu1 %vm16134_vm0, %v21597_v31 }
 0xe27   : > { %v7207_v7 = vpop.permute.xlu0 %7206  ;;  %14202 = vmatprep.subr.bf16.mxu1 %v21597_v31 }
 0xe28   : > { %v7263_v5 = vpop.permute.xlu1 %7262 }
 0xe29   : > { %v8220_v43 = vsel %vm1448_vm1, %v7263_v5, 0  ;;  %14187 = vmatmul.mubr.msk.bf16.vlgmr.msra.gmra.mrb[240].mxu0 %vm1448_vm1, %v7203_v47 }
 0xe2a   : > { %14197 = vmatpush3.bf16.xpose.msra.mxu0 %v8220_v43  ;;  %14198 = vmatprep.mubr.msk.bf16.mxu0 %vm16134_vm0, %v21597_v31 }
 0xe2b   : > { %v7209_v51 = vpop.permute.xlu0 %7208  ;;  %14208 = vmatprep.subr.bf16.mxu0 %v21597_v31 }
 0xe2c   : > { %v7265_v16 = vpop.permute.xlu1 %7264 }
 0xe2d   : > { %v8267_v21 = vsel %vm1448_vm1, %v7265_v16, 0  ;;  %14193 = vmatmul.mubr.msk.bf16.vlgmr.msra.gmra.mrb[0].mxu1 %vm1448_vm1, %v7205_v17 }
 0xe2e   : > { %14203 = vmatpush3.bf16.xpose.msra.mxu1 %v8267_v21  ;;  %14204 = vmatprep.mubr.msk.bf16.mxu1 %vm16134_vm0, %v21597_v31 }
 0xe2f   : > { %v7211_v25 = vpop.permute.xlu0 %7210  ;;  %14214 = vmatprep.subr.bf16.mxu1 %v21597_v31 }
 0xe30   : > { %v7267_v23 = vpop.permute.xlu1 %7266 }
 0xe31   : > { %v8314_v34 = vsel %vm1448_vm1, %v7267_v23, 0  ;;  %14199 = vmatmul.mubr.msk.bf16.vlgmr.msra.gmra.mrb[244].mxu0 %vm1448_vm1, %v7207_v7 }
 0xe32   : > { %14209 = vmatpush3.bf16.xpose.msra.mxu0 %v8314_v34  ;;  %14210 = vmatprep.mubr.msk.bf16.mxu0 %vm16134_vm0, %v21597_v31 }
 0xe33   : > { %v7213_v52 = vpop.permute.xlu0 %7212  ;;  %14220 = vmatprep.subr.bf16.mxu0 %v21597_v31 }
 0xe34   : > { %v7269_v59 = vpop.permute.xlu1 %7268 }
 0xe35   : > { %v8361_v45 = vsel %vm1448_vm1, %v7269_v59, 0  ;;  %14205 = vmatmul.mubr.msk.bf16.vlgmr.msra.gmra.mrb[4].mxu1 %vm1448_vm1, %v7209_v51 }
 0xe36   : > { %14215 = vmatpush3.bf16.xpose.msra.mxu1 %v8361_v45  ;;  %14216 = vmatprep.mubr.msk.bf16.mxu1 %vm16134_vm0, %v21597_v31 }
 0xe37   : > { %v7215_v12 = vpop.permute.xlu0 %7214  ;;  %14226 = vmatprep.subr.bf16.mxu1 %v21597_v31 }
 0xe38   : > { %v7271_v11 = vpop.permute.xlu1 %7270 }
 0xe39   : > { %v8408_v63 = vsel %vm1448_vm1, %v7271_v11, 0  ;;  %14211 = vmatmul.mubr.msk.bf16.vlgmr.msra.gmra.mrb[248].mxu0 %vm1448_vm1, %v7211_v25 }
 0xe3a   : > { %14221 = vmatpush3.bf16.xpose.msra.mxu0 %v8408_v63  ;;  %14222 = vmatprep.mubr.msk.bf16.mxu0 %vm16134_vm0, %v21597_v31 }
 0xe3b   : > { %v7217_v38 = vpop.permute.xlu0 %7216  ;;  %14232 = vmatprep.subr.bf16.mxu0 %v21597_v31 }
 0xe3c   : > { %v19438_v55 = vpop.f32.mrb[208].mxu0  ;;  %v7273_v29 = vpop.permute.xlu1 %7272 }
 0xe3d   : > { %v14092_v41 = vpop.f32.mrb[209].mxu0  ;;  %v8874_v1 = vsel %vm2953_vm2, %v19438_v55, -inf  ;;  %v8455_v9 = vsel %vm1448_vm1, %v7273_v29, 0  ;;  %14217 = vmatmul.mubr.msk.bf16.vlgmr.msra.gmra.mrb[8].mxu1 %vm1448_vm1, %v7213_v52 }
 0xe3e   : > { %v19445_v15 = vpop.f32.mrb[210].mxu0  ;;  %8875 = vmax.xlane.f32.xlu0 %v8874_v1  ;;  %14227 = vmatpush3.bf16.xpose.msra.mxu1 %v8455_v9 }
 0xe3f   : > { %v14093_v37 = vpop.f32.mrb[211].mxu0  ;;  %14228 = vmatprep.mubr.msk.bf16.mxu1 %vm16134_vm0, %v21597_v31  ;;  %v7219_v6 = vpop.permute.xlu0 %7218  ;;  %14238 = vmatprep.subr.bf16.mxu1 %v21597_v31  ;;  %v8877_v58 = vsel %vm2953_vm2, %v19445_v15, -inf }
 0xe40   : > { %v7275_v50 = vpop.permute.xlu1 %7274 }
 0xe41   : > { %v8502_v18 = vsel %vm1448_vm1, %v7275_v50, 0  ;;  %14223 = vmatmul.mubr.msk.bf16.vlgmr.msra.gmra.mrb[252].mxu0 %vm1448_vm1, %v7215_v12 }
 0xe42   : > { %8878 = vmax.xlane.f32.xlu1 %v8877_v58  ;;  %14233 = vmatpush3.bf16.xpose.msra.mxu0 %v8502_v18 }
 0xe43   : > { %v7279_v26 = vpop.permute.xlu0 %7278  ;;  %14234 = vmatprep.mubr.msk.bf16.mxu0 %vm16134_vm0, %v21597_v31  ;;  %14244 = vmatprep.subr.bf16.mxu0 %v21597_v31 }
 0xe44   : > { %v7277_v19 = vpop.permute.xlu1 %7276  ;;  %v8596_v7 = vsel %vm1448_vm1, %v7279_v26, 0 }
 0xe45   : > { %v8549_v39 = vsel %vm1448_vm1, %v7277_v19, 0  ;;  %14229 = vmatmul.mubr.msk.bf16.vlgmr.msra.gmra.mrb[12].mxu1 %vm1448_vm1, %v7217_v38 }
 0xe46   : > { %14239 = vmatpush3.bf16.xpose.msra.mxu1 %v8549_v39  ;;  %14240 = vmatprep.mubr.msk.bf16.mxu1 %vm16134_vm0, %v21597_v31 }
 0xe47   : > { %v19463_v47 = vpop.f32.mrb[224].mxu1  ;;  %v7223_v30 = vpop.permute.xlu0 %7222  ;;  %14250 = vmatprep.subr.bf16.mxu1 %v21597_v31 }
 0xe48   : > { %v14098_v22 = vpop.f32.mrb[225].mxu1  ;;  %v8880_v17 = vsel %vm2953_vm2, %v19463_v47, -inf  ;;  %v7221_v57 = vpop.permute.xlu1 %7220 }
 0xe49   : > { %v19468_v4 = vpop.f32.mrb[226].mxu1  ;;  %8881 = vmax.xlane.f32.xlu0 %v8880_v17  ;;  %14235 = vmatmul.mubr.msk.bf16.vlgmr.msra.gmra.mrb[0].mxu0 %vm1448_vm1, %v7219_v6 }
 0xe4a   : > { %v14099_v5 = vpop.f32.mrb[227].mxu1  ;;  %14245 = vmatpush3.bf16.xpose.msra.mxu0 %v8596_v7  ;;  %14246 = vmatprep.mubr.msk.bf16.mxu0 %vm16134_vm0, %v21597_v31  ;;  %v8883_v51 = vsel %vm2953_vm2, %v19468_v4, -inf }
 0xe4b   : > { %v7283_v43 = vpop.permute.xlu0 %7282  ;;  %14256 = vmatprep.subr.bf16.mxu0 %v21597_v31 }
 0xe4c   : > { %v7281_v16 = vpop.permute.xlu1 %7280  ;;  %v8690_v12 = vsel %vm1448_vm1, %v7283_v43, 0 }
 0xe4d   : > { %8884 = vmax.xlane.f32.xlu0 %v8883_v51  ;;  %v8643_v21 = vsel %vm1448_vm1, %v7281_v16, 0  ;;  %14241 = vmatmul.mubr.msk.bf16.vlgmr.msra.gmra.mrb[16].mxu1 %vm1448_vm1, %v7221_v57 }
 0xe4e   : > { %14251 = vmatpush3.bf16.xpose.msra.mxu1 %v8643_v21  ;;  %14252 = vmatprep.mubr.msk.bf16.mxu1 %vm16134_vm0, %v21597_v31 }
 0xe4f   : > { %v19481_v25 = vpop.f32.mrb[212].mxu0  ;;  %v7227_v23 = vpop.permute.xlu0 %7226  ;;  %14262 = vmatprep.subr.bf16.mxu1 %v21597_v31 }
 0xe50   : > { %v14104_v34 = vpop.f32.mrb[213].mxu0  ;;  %v8886_v52 = vsel %vm2953_vm2, %v19481_v25, -inf  ;;  %v7225_v59 = vpop.permute.xlu1 %7224 }
 0xe51   : > { %v19486_v45 = vpop.f32.mrb[214].mxu0  ;;  %8887 = vmax.xlane.f32.xlu0 %v8886_v52  ;;  %14247 = vmatmul.mubr.msk.bf16.vlgmr.msra.gmra.mrb[4].mxu0 %vm1448_vm1, %v7223_v30 }
 0xe52   : > { %v14105_v11 = vpop.f32.mrb[215].mxu0  ;;  %v8889_v63 = vsel %vm2953_vm2, %v19486_v45, -inf  ;;  %14257 = vmatpush3.bf16.xpose.msra.mxu0 %v8690_v12  ;;  %14258 = vmatprep.mubr.msk.bf16.mxu0 %vm16134_vm0, %v21597_v31 }
 0xe53   : > { %8890 = vmax.xlane.f32.xlu1 %v8889_v63  ;;  %14268 = vmatprep.subr.bf16.mxu0 %v21597_v31  ;;  %v7287_v38 = vpop.permute.xlu0 %7286 }
 0xe54   : > { %v7285_v41 = vpop.permute.xlu1 %7284  ;;  %v8784_v18 = vsel %vm1448_vm1, %v7287_v38, 0 }
 0xe55   : > { %v8737_v1 = vsel %vm1448_vm1, %v7285_v41, 0  ;;  %14253 = vmatmul.mubr.msk.bf16.vlgmr.msra.gmra.mrb[20].mxu1 %vm1448_vm1, %v7225_v59 }
 0xe56   : > { %14263 = vmatpush3.bf16.xpose.msra.mxu1 %v8737_v1  ;;  %14264 = vmatprep.mubr.msk.bf16.mxu1 %vm16134_vm0, %v21597_v31 }
 0xe57   : > { %v19499_v29 = vpop.f32.mrb[228].mxu1  ;;  %14274 = vmatprep.subr.bf16.mxu1 %v21597_v31  ;;  %v7231_v57 = vpop.permute.xlu0 %7230 }
 0xe58   : > { %v14110_v37 = vpop.f32.mrb[229].mxu1  ;;  %v8892_v9 = vsel %vm2953_vm2, %v19499_v29, -inf  ;;  %v7229_v6 = vpop.permute.xlu1 %7228 }
 0xe59   : > { %v19504_v50 = vpop.f32.mrb[230].mxu1  ;;  %8893 = vmax.xlane.f32.xlu0 %v8892_v9  ;;  %14259 = vmatmul.mubr.msk.bf16.vlgmr.msra.gmra.mrb[8].mxu0 %vm1448_vm1, %v7227_v23 }
 0xe5a   : > { %v14111_v58 = vpop.f32.mrb[231].mxu1  ;;  %v8895_v26 = vsel %vm2953_vm2, %v19504_v50, -inf  ;;  %14269 = vmatpush3.bf16.xpose.msra.mxu0 %v8784_v18  ;;  %14270 = vmatprep.mubr.msk.bf16.mxu0 %vm16134_vm0, %v21597_v31 }
 0xe5b   : > { %8896 = vmax.xlane.f32.xlu1 %v8895_v26  ;;  %14280 = vmatprep.subr.bf16.mxu0 %v21597_v31 }
 0xe5c   : > { %v7289_v19 = vpop.permute.xlu1 %7288 }
 0xe5d   : > { %v8831_v39 = vsel %vm1448_vm1, %v7289_v19, 0  ;;  %14265 = vmatmul.mubr.msk.bf16.vlgmr.msra.gmra.mrb[24].mxu1 %vm1448_vm1, %v7229_v6 }
 0xe5e   : > { %14275 = vmatpush3.bf16.xpose.msra.mxu1 %v8831_v39  ;;  %14276 = vmatprep.mubr.msk.bf16.mxu1 %vm16134_vm0, %v21597_v31  ;;  %v19566_v39 = vpop.permute.xlu0 %7298 }
 0xe5f   : > { %v19517_v30 = vpop.f32.mrb[216].mxu0  ;;  %14286 = vmatprep.subr.bf16.mxu1 %v21597_v31  ;;  %21626 = vst [vmem:[#allocation78_spill] sm:$0xff] %v19566_v39 }
 0xe60   : > { %v14116_v22 = vpop.f32.mrb[217].mxu0  ;;  %v8898_v17 = vsel %vm2953_vm2, %v19517_v30, -inf  ;;  %v7233_v51 = vpop.permute.xlu1 %7232 }
 0xe61   : > { %v19522_v7 = vpop.f32.mrb[218].mxu0  ;;  %8899 = vmax.xlane.f32.xlu0 %v8898_v17  ;;  %14271 = vmatmul.mubr.msk.bf16.vlgmr.msra.gmra.mrb[12].mxu0 %vm1448_vm1, %v7231_v57 }
 0xe62   : > { %v14117_v5 = vpop.f32.mrb[219].mxu0  ;;  %v8901_v43 = vsel %vm2953_vm2, %v19522_v7, -inf  ;;  %14281 = vmatpush3.bf16.msra.mxu0 %v19117_v28  ;;  %14282 = vmatprep.mubr.msk.bf16.mxu0 %vm16134_vm0, %v21597_v31  ;;  %v19570_v17 = vpop.permute.xlu0 %7302 }
 0xe63   : > { %8902 = vmax.xlane.f32.xlu1 %v8901_v43  ;;  %14292 = vmatprep.subr.bf16.mxu0 %v21597_v31  ;;  %21628 = vst [vmem:[#allocation54_spill] sm:$0xff] %v19570_v17 }
 0xe64   : > { %v19560_v58 = vpop.permute.xlu1 %7300 }
 0xe65   : > { %14277 = vmatmul.mubr.msk.bf16.vlgmr.msra.gmra.mrb[28].mxu1 %vm1448_vm1, %v7233_v51  ;;  %21623 = vst [vmem:[#allocation50_spill] sm:$0xff] %v19560_v58 }
 0xe66   : > { %14287 = vmatpush3.bf16.msra.mxu1 %v19113_v49  ;;  %14288 = vmatprep.mubr.msk.bf16.mxu1 %vm16134_vm0, %v21597_v31  ;;  %v19574_v5 = vpop.permute.xlu0 %7322 }
 0xe67   : > { %v19535_v16 = vpop.f32.mrb[232].mxu1  ;;  %14298 = vmatprep.subr.bf16.mxu1 %v21597_v31  ;;  %21630 = vst [vmem:[#allocation47_spill] sm:$0xff] %v19574_v5 }
 0xe68   : > { %v14122_v21 = vpop.f32.mrb[233].mxu1  ;;  %v8904_v28 = vsel %vm2953_vm2, %v19535_v16, -inf  ;;  %v19562_v26 = vpop.permute.xlu1 %7304 }
 0xe69   : > { %v19540_v23 = vpop.f32.mrb[234].mxu1  ;;  %8905 = vmax.xlane.f32.xlu0 %v8904_v28  ;;  %21624 = vst [vmem:[#allocation44_spill] sm:$0xff] %v19562_v26 }
 0xe6a   : > { %v14123_v34 = vpop.f32.mrb[235].mxu1  ;;  %v8907_v52 = vsel %vm2953_vm2, %v19540_v23, -inf  ;;  %v19578_v51 = vpop.permute.xlu0 %7326 }
 0xe6b   : > { %8908 = vmax.xlane.f32.xlu1 %v8907_v52  ;;  %21632 = vst [vmem:[#allocation49_spill] sm:$0xff] %v19578_v51 }
 0xe6c   : > { %v19564_v19 = vpop.permute.xlu1 %7324 }
 0xe6d   : > { %21625 = vst [vmem:[#allocation52_spill] sm:$0xff] %v19564_v19 }
 0xe70   : > { %v19568_v22 = vpop.permute.xlu1 %7328 }
 0xe71   : > { %21627 = vst [vmem:[#allocation45_spill] sm:$0xff] %v19568_v22 }
 0xe74   : > { %v19572_v57 = vpop.permute.xlu1 %7346 }
 0xe75   : > { %21629 = vst [vmem:[#allocation56_spill] sm:$0xff] %v19572_v57 }
 0xe78   : > { %v19576_v43 = vpop.permute.xlu1 %7348 }
 0xe79   : > { %21631 = vst [vmem:[#allocation51_spill] sm:$0xff] %v19576_v43 }
 0xe7c   : > { %v19580_v21 = vpop.permute.xlu1 %7352 }
 0xe7d   : > { %v19544_v49 = vpop.f32.mrb[220].mxu0  ;;  %21633 = vst [vmem:[#allocation58_spill] sm:$0xff] %v19580_v21 }
 0xe7e   : > { %v14128_v59 = vpop.f32.mrb[221].mxu0  ;;  %v8910_v12 = vsel %vm2953_vm2, %v19544_v49, -inf }
 0xe7f   : > { %v19548_v11 = vpop.f32.mrb[222].mxu0  ;;  %8911 = vmax.xlane.f32.xlu0 %v8910_v12 }
 0xe80   : > { %v14129_v63 = vpop.f32.mrb[223].mxu0  ;;  %v8913_v41 = vsel %vm2953_vm2, %v19548_v11, -inf }
 0xe81   : > { %8914 = vmax.xlane.f32.xlu1 %v8913_v41  ;;  %v19590_v41 = vpop.permute.xlu0 %7350 }
 0xe82   : > { %21634 = vst [vmem:[#allocation53_spill] sm:$0xff] %v19590_v41 }
 0xe85   : > { %v19552_v1 = vpop.f32.mrb[236].mxu1 }
 0xe86   : > { %v14134_v38 = vpop.f32.mrb[237].mxu1  ;;  %v8916_v37 = vsel %vm2953_vm2, %v19552_v1, -inf }
 0xe87   : > { %8917 = vmax.xlane.f32.xlu0 %v8916_v37  ;;  %v19556_v9 = vpop.f32.mrb[238].mxu1  ;;  %v19592_v38 = vpop.permute.xlu1 %7308 }
 0xe88   : > { %v14135_v6 = vpop.f32.mrb[239].mxu1  ;;  %v8919_v18 = vsel %vm2953_vm2, %v19556_v9, -inf  ;;  %21635 = vst [vmem:[#allocation57_spill] sm:$0xff] %v19592_v38  ;;  %v19594_v37 = vpop.permute.xlu0 %7306 }
 0xe89   : > { %8920 = vmax.xlane.f32.xlu1 %v8919_v18  ;;  %21636 = vst [vmem:[#allocation55_spill] sm:$0xff] %v19594_v37 }
 0xe8b   : > { %v19596_v6 = vpop.permute.xlu1 %7332 }
 0xe8c   : > { %21637 = vst [vmem:[#allocation60_spill] sm:$0xff] %v19596_v6  ;;  %v19606_v46 = vpop.permute.xlu0 %7310 }
 0xe8d   : > { %21638 = vst [vmem:[#allocation59_spill] sm:$0xff] %v19606_v46 }
 0xe8f   : > { %v19608_v20 = vpop.permute.xlu1 %7330 }
 0xe90   : > { %21639 = vst [vmem:[#allocation63_spill] sm:$0xff] %v19608_v20  ;;  %v19614_v33 = vpop.permute.xlu0 %7334 }
 0xe91   : > { %21640 = vst [vmem:[#allocation61_spill] sm:$0xff] %v19614_v33 }
 0xeaf   : > { %v19582_v28 = vpop.f32.mrb[224].mxu0 }
 0xeb0   : > { %v14140_v34 = vpop.f32.mrb[225].mxu0  ;;  %v8922_v52 = vsel %vm2953_vm2, %v19582_v28, -inf }
 0xeb1   : > { %8923 = vmax.xlane.f32.xlu0 %v8922_v52  ;;  %v19586_v59 = vpop.f32.mrb[226].mxu0 }
 0xeb2   : > { %v14141_v12 = vpop.f32.mrb[227].mxu0  ;;  %v8925_v63 = vsel %vm2953_vm2, %v19586_v59, -inf }
 0xeb3   : > { %8926 = vmax.xlane.f32.xlu1 %v8925_v63 }
 0xeba   : > { %v19598_v18 = vpop.f32.mrb[240].mxu1 }
 0xebb   : > { %v14146_v34 = vpop.f32.mrb[241].mxu1  ;;  %v8928_v52 = vsel %vm2953_vm2, %v19598_v18, -inf }
 0xebc   : > { %8929 = vmax.xlane.f32.xlu0 %v8928_v52  ;;  %v19602_v12 = vpop.f32.mrb[242].mxu1 }
 0xebd   : > { %v14147_v53 = vpop.f32.mrb[243].mxu1  ;;  %v8931_v63 = vsel %vm2953_vm2, %v19602_v12, -inf }
 0xebe   : > { %8932 = vmax.xlane.f32.xlu1 %v8931_v63  ;;  %v19618_v53 = vpop.permute.xlu1 %7312 }
 0xebf   : > { %21641 = vst [vmem:[#allocation21_spill] sm:$0xff] %v19618_v53 }
 0xec2   : > { %v19610_v48 = vpop.f32.mrb[228].mxu0  ;;  %v19625_v42 = vpop.permute.xlu1 %7336 }
 0xec3   : > { %v14152_v8 = vpop.f32.mrb[229].mxu0  ;;  %v8934_v34 = vsel %vm2953_vm2, %v19610_v48, -inf  ;;  %21642 = vst [vmem:[#allocation22_spill] sm:$0xff] %v19625_v42 }
 0xec4   : > { %8935 = vmax.xlane.f32.xlu0 %v8934_v34  ;;  %v19616_v52 = vpop.f32.mrb[230].mxu0 }
 0xec5   : > { %v14153_v3 = vpop.f32.mrb[231].mxu0  ;;  %v8937_v2 = vsel %vm2953_vm2, %v19616_v52, -inf }
 0xec6   : > { %8938 = vmax.xlane.f32.xlu1 %v8937_v2 }
 0xeca   : > { %v19622_v13 = vpop.f32.mrb[244].mxu1 }
 0xecb   : > { %v8876_v63 = vpop.xlane.xlu0 %8875  ;;  %v14158_v44 = vpop.f32.mrb[245].mxu1  ;;  %v8940_v34 = vsel %vm2953_vm2, %v19622_v13, -inf }
 0xecc   : > { %v9066_v8 = vsub.f32 %v19438_v55, %v8876_v63  ;;  %8941 = vmax.xlane.f32.xlu0 %v8940_v34  ;;  %v19629_v24 = vpop.f32.mrb[246].mxu1 }
 0xecd   : > { %v14159_v3 = vpop.f32.mrb[247].mxu1  ;;  %v8943_v27 = vsel %vm2953_vm2, %v19629_v24, -inf }
 0xece   : > { %v9130_v10 = vmul.f32 1.442695, %v9066_v8  ;;  %8944 = vmax.xlane.f32.xlu1 %v8943_v27 }
 0xecf   : > { %v8879_v2 = vpop.xlane.xlu1 %8878 }
 0xed0   : > { %15455 = vpow2.f32 %v9130_v10  ;;  %v9067_v14 = vsub.f32 %v19445_v15, %v8879_v2 }
 0xed2   : > { %v19634_v55 = vpop.f32.mrb[232].mxu0  ;;  %v9132_v63 = vmul.f32 1.442695, %v9067_v14 }
 0xed3   : > { %v14164_v44 = vpop.f32.mrb[233].mxu0  ;;  %v8946_v61 = vsel %vm2953_vm2, %v19634_v55, -inf }
 0xed4   : > { %8947 = vmax.xlane.f32.xlu0 %v8946_v61  ;;  %v19638_v34 = vpop.f32.mrb[234].mxu0  ;;  %15457 = vpow2.f32 %v9132_v63 }
 0xed5   : > { %v14165_v8 = vpop.f32.mrb[235].mxu0  ;;  %v8949_v3 = vsel %vm2953_vm2, %v19638_v34, -inf }
 0xed6   : > { %8950 = vmax.xlane.f32.xlu1 %v8949_v3  ;;  %v8882_v27 = vpop.xlane.xlu0 %8881 }
 0xed7   : > { %v9068_v35 = vsub.f32 %v19463_v47, %v8882_v27 }
 0xeda   : > { %v19642_v10 = vpop.eup %15455  ;;  %v19644_v15 = vpop.f32.mrb[248].mxu1 }
 0xedb   : > { %v14170_v2 = vpop.f32.mrb[249].mxu1  ;;  %v8952_v14 = vsel %vm2953_vm2, %v19644_v15, -inf  ;;  %v9258_v8 = vsel %vm2953_vm2, %v19642_v10, 0.0  ;;  %v8885_v36 = vpop.xlane.xlu0 %8884 }
 0xedc   : > { %8953 = vmax.xlane.f32.xlu0 %v8952_v14  ;;  %v19648_v44 = vpop.f32.mrb[250].mxu1  ;;  %v9069_v14 = vsub.f32 %v19468_v4, %v8885_v36 }
 0xedd   : > { %v14171_v61 = vpop.f32.mrb[251].mxu1  ;;  %v8955_v63 = vsel %vm2953_vm2, %v19648_v44, -inf }
 0xede   : > { %v19654_v3 = vpop.eup %15457  ;;  %8956 = vmax.xlane.f32.xlu1 %v8955_v63  ;;  %v9134_v61 = vmul.f32 1.442695, %v9068_v35  ;;  %v9136_v40 = vmul.f32 1.442695, %v9069_v14 }
 0xedf   : > { %v9261_v2 = vsel %vm2953_vm2, %v19654_v3, 0.0  ;;  %v8888_v21 = vpop.xlane.xlu0 %8887 }
 0xee0   : > { %9259 = vadd.xlane.f32.xlu0 %v9258_v8  ;;  %15459 = vpow2.f32 %v9134_v61  ;;  %v8891_v43 = vpop.xlane.xlu1 %8890  ;;  %v9070_v41 = vsub.f32 %v19481_v25, %v8888_v21 }
 0xee1   : > { %15461 = vpow2.f32 %v9136_v40  ;;  %v9071_v63 = vsub.f32 %v19486_v45, %v8891_v43 }
 0xee2   : > { %9262 = vadd.xlane.f32.xlu1 %v9261_v2  ;;  %v9138_v42 = vmul.f32 1.442695, %v9070_v41 }
 0xee3   : > { %v9140_v36 = vmul.f32 1.442695, %v9071_v63 }
 0xee4   : > { %15463 = vpow2.f32 %v9138_v42 }
 0xee5   : > { %15465 = vpow2.f32 %v9140_v36 }
 0xee6   : > { %v8894_v45 = vpop.xlane.xlu0 %8893 }
 0xee8   : > { %v8897_v21 = vpop.xlane.xlu1 %8896 }
 0xee9   : > { %v9073_v14 = vsub.f32 %v19504_v50, %v8897_v21 }
 0xeea   : > { %v19666_v27 = vpop.eup %15459 }
 0xeeb   : > { %v19672_v25 = vpop.eup %15461  ;;  %v9264_v43 = vsel %vm2953_vm2, %v19666_v27, 0.0 }
 0xeec   : > { %v9267_v41 = vsel %vm2953_vm2, %v19672_v25, 0.0 }
 0xef0   : > { %v19662_v57 = vpop.f32.mrb[236].mxu0 }
 0xef1   : > { %v14176_v6 = vpop.f32.mrb[237].mxu0  ;;  %v8958_v47 = vsel %vm2953_vm2, %v19662_v57, -inf }
 0xef2   : > { %v19668_v35 = vpop.f32.mrb[238].mxu0  ;;  %8959 = vmax.xlane.f32.xlu0 %v8958_v47  ;;  %v9072_v6 = vsub.f32 %v19499_v29, %v8894_v45  ;;  %v19692_v45 = vpop.eup %15463 }
 0xef3   : > { %v14177_v4 = vpop.f32.mrb[239].mxu0  ;;  %v8961_v40 = vsel %vm2953_vm2, %v19668_v35, -inf }
 0xef4   : > { %8962 = vmax.xlane.f32.xlu1 %v8961_v40  ;;  %v9142_v36 = vmul.f32 1.442695, %v9072_v6 }
 0xef6   : > { %9265 = vadd.xlane.f32.xlu0 %v9264_v43  ;;  %v9144_v43 = vmul.f32 1.442695, %v9073_v14  ;;  %15467 = vpow2.f32 %v9142_v36 }
 0xef8   : > { %v19679_v8 = vpop.f32.mrb[252].mxu1  ;;  %9268 = vadd.xlane.f32.xlu1 %v9267_v41  ;;  %15469 = vpow2.f32 %v9144_v43 }
 0xef9   : > { %v14182_v2 = vpop.f32.mrb[253].mxu1  ;;  %v8964_v42 = vsel %vm2953_vm2, %v19679_v8, -inf }
 0xefa   : > { %v19684_v61 = vpop.f32.mrb[254].mxu1  ;;  %8965 = vmax.xlane.f32.xlu0 %v8964_v42  ;;  %v19698_v2 = vpop.eup %15465 }
 0xefb   : > { %v14183_v63 = vpop.f32.mrb[255].mxu1  ;;  %v8967_v47 = vsel %vm2953_vm2, %v19684_v61, -inf  ;;  %v8900_v42 = vpop.xlane.xlu0 %8899 }
 0xefc   : > { %v19688_v4 = vpop.f32.mrb[240].mxu0  ;;  %8968 = vmax.xlane.f32.xlu1 %v8967_v47  ;;  %v9270_v47 = vsel %vm2953_vm2, %v19692_v45, 0.0  ;;  %v9074_v33 = vsub.f32 %v19517_v30, %v8900_v42 }
 0xefd   : > { %v14188_v29 = vpop.f32.mrb[241].mxu0  ;;  %v8970_v40 = vsel %vm2953_vm2, %v19688_v4, -inf }
 0xefe   : > { %v19694_v41 = vpop.f32.mrb[242].mxu0  ;;  %8971 = vmax.xlane.f32.xlu0 %v8970_v40  ;;  %v8903_v29 = vpop.xlane.xlu1 %8902  ;;  %v9146_v20 = vmul.f32 1.442695, %v9074_v33 }
 0xeff   : > { %v14189_v50 = vpop.f32.mrb[243].mxu0  ;;  %v8973_v21 = vsel %vm2953_vm2, %v19694_v41, -inf  ;;  %v9075_v22 = vsub.f32 %v19522_v7, %v8903_v29 }
 0xf00   : > { %v19700_v6 = vpop.f32.mrb[0].mxu1  ;;  %8974 = vmax.xlane.f32.xlu1 %v8973_v21  ;;  %v9273_v50 = vsel %vm2953_vm2, %v19698_v2, 0.0  ;;  %15471 = vpow2.f32 %v9146_v20 }
 0xf01   : > { %v14194_v63 = vpop.f32.mrb[1].mxu1 }
 0xf02   : > { %v19704_v14 = vpop.f32.mrb[2].mxu1  ;;  %9271 = vadd.xlane.f32.xlu0 %v9270_v47  ;;  %v8976_v63 = vsel %vm2953_vm2, %v19700_v6, -inf }
 0xf03   : > { %v14195_v40 = vpop.f32.mrb[3].mxu1 }
 0xf04   : > { %v19709_v36 = vpop.f32.mrb[244].mxu0  ;;  %9274 = vadd.xlane.f32.xlu1 %v9273_v50  ;;  %v8979_v40 = vsel %vm2953_vm2, %v19704_v14, -inf  ;;  %v19722_v50 = vpop.eup %15467 }
 0xf05   : > { %v14200_v21 = vpop.f32.mrb[245].mxu0  ;;  %v8982_v42 = vsel %vm2953_vm2, %v19709_v36, -inf }
 0xf06   : > { %v19714_v43 = vpop.f32.mrb[246].mxu0  ;;  %8977 = vmax.xlane.f32.xlu0 %v8976_v63  ;;  %v9148_v21 = vmul.f32 1.442695, %v9075_v22  ;;  %v19728_v63 = vpop.eup %15469 }
 0xf07   : > { %v14201_v47 = vpop.f32.mrb[247].mxu0  ;;  %v8985_v29 = vsel %vm2953_vm2, %v19714_v43, -inf  ;;  %v9279_v5 = vsel %vm2953_vm2, %v19728_v63, 0.0 }
 0xf08   : > { %v19718_v19 = vpop.f32.mrb[4].mxu1  ;;  %8980 = vmax.xlane.f32.xlu1 %v8979_v40  ;;  %v8906_v47 = vpop.xlane.xlu0 %8905  ;;  %15473 = vpow2.f32 %v9148_v21 }
 0xf09   : > { %v14206_v30 = vpop.f32.mrb[5].mxu1  ;;  %v9076_v53 = vsub.f32 %v19535_v16, %v8906_v47 }
 0xf0a   : > { %v19724_v51 = vpop.f32.mrb[6].mxu1  ;;  %8983 = vmax.xlane.f32.xlu0 %v8982_v42  ;;  %v9276_v30 = vsel %vm2953_vm2, %v19722_v50, 0.0  ;;  %v8909_v42 = vpop.xlane.xlu1 %8908 }
 0xf0b   : > { %v14207_v7 = vpop.f32.mrb[7].mxu1  ;;  %v9077_v46 = vsub.f32 %v19540_v23, %v8909_v42  ;;  %v9150_v38 = vmul.f32 1.442695, %v9076_v53  ;;  %v19752_v47 = vpop.eup %15471 }
 0xf0c   : > { %v19730_v33 = vpop.f32.mrb[248].mxu0  ;;  %8986 = vmax.xlane.f32.xlu1 %v8985_v29  ;;  %21644 = vst [vmem:[#allocation24_spill] sm:$0xff] %v19752_v47 }
 0xf0d   : > { %v14212_v40 = vpop.f32.mrb[249].mxu0  ;;  %15475 = vpow2.f32 %v9150_v38 }
 0xf0e   : > { %v19734_v22 = vpop.f32.mrb[250].mxu0  ;;  %9277 = vadd.xlane.f32.xlu0 %v9276_v30  ;;  %v8988_v40 = vsel %vm2953_vm2, %v19718_v19, -inf }
 0xf0f   : > { %v14213_v7 = vpop.f32.mrb[251].mxu0  ;;  %v8997_v42 = vsel %vm2953_vm2, %v19734_v22, -inf }
 0xf10   : > { %v19739_v20 = vpop.f32.mrb[8].mxu1  ;;  %9280 = vadd.xlane.f32.xlu1 %v9279_v5  ;;  %v8991_v7 = vsel %vm2953_vm2, %v19724_v51, -inf  ;;  %v8994_v5 = vsel %vm2953_vm2, %v19730_v33, -inf }
 0xf11   : > { %v14218_v29 = vpop.f32.mrb[9].mxu1 }
 0xf12   : > { %v19744_v21 = vpop.f32.mrb[10].mxu1  ;;  %8989 = vmax.xlane.f32.xlu0 %v8988_v40  ;;  %v9152_v29 = vmul.f32 1.442695, %v9077_v46  ;;  %v19758_v40 = vpop.eup %15473 }
 0xf13   : > { %v14219_v30 = vpop.f32.mrb[11].mxu1  ;;  %21646 = vst [vmem:[#allocation26_spill] sm:$0xff] %v19758_v40  ;;  %v9285_v17 = vsel %vm2953_vm2, %v19758_v40, 0.0 }
 0xf14   : > { %v19748_v37 = vpop.f32.mrb[252].mxu0  ;;  %8992 = vmax.xlane.f32.xlu1 %v8991_v7  ;;  %v8912_v30 = vpop.xlane.xlu0 %8911  ;;  %15477 = vpow2.f32 %v9152_v29 }
 0xf15   : > { %21643 = vst [vmem:[#allocation23_spill] sm:$0xff] %v19748_v37  ;;  %v14224_v16 = vpop.f32.mrb[253].mxu0  ;;  %v9078_v58 = vsub.f32 %v19544_v49, %v8912_v30 }
 0xf16   : > { %v19754_v26 = vpop.f32.mrb[254].mxu0  ;;  %8995 = vmax.xlane.f32.xlu0 %v8994_v5  ;;  %v9282_v16 = vsel %vm2953_vm2, %v19752_v47, 0.0  ;;  %v8915_v5 = vpop.xlane.xlu1 %8914 }
 0xf17   : > { %21645 = vst [vmem:[#allocation25_spill] sm:$0xff] %v19754_v26  ;;  %v14225_v23 = vpop.f32.mrb[255].mxu0  ;;  %v9079_v39 = vsub.f32 %v19548_v11, %v8915_v5  ;;  %v9154_v56 = vmul.f32 1.442695, %v9078_v58  ;;  %v19782_v30 = vpop.eup %15475  ;;  %v9009_v5 = vsel %vm2953_vm2, %v19754_v26, -inf }
 0xf18   : > { %v19760_v53 = vpop.f32.mrb[12].mxu1  ;;  %8998 = vmax.xlane.f32.xlu1 %v8997_v42  ;;  %21650 = vst [vmem:[#allocation30_spill] sm:$0xff] %v19782_v30 }
 0xf19   : > { %21647 = vst [vmem:[#allocation27_spill] sm:$0xff] %v19760_v53  ;;  %v14230_v7 = vpop.f32.mrb[13].mxu1  ;;  %15479 = vpow2.f32 %v9154_v56 }
 0xf1a   : > { %v19764_v46 = vpop.f32.mrb[14].mxu1  ;;  %9283 = vadd.xlane.f32.xlu0 %v9282_v16  ;;  %v9000_v7 = vsel %vm2953_vm2, %v19739_v20, -inf }
 0xf1b   : > { %v14231_v23 = vpop.f32.mrb[15].mxu1 }
 0xf1c   : > { %v19769_v38 = vpop.f32.mrb[0].mxu0  ;;  %9286 = vadd.xlane.f32.xlu1 %v9285_v17  ;;  %v9003_v23 = vsel %vm2953_vm2, %v19744_v21, -inf  ;;  %v9006_v17 = vsel %vm2953_vm2, %v19748_v37, -inf }
 0xf1d   : > { %v14236_v42 = vpop.f32.mrb[1].mxu0 }
 0xf1e   : > { %v19774_v29 = vpop.f32.mrb[2].mxu0  ;;  %9001 = vmax.xlane.f32.xlu0 %v9000_v7  ;;  %v9156_v42 = vmul.f32 1.442695, %v9079_v39  ;;  %v19788_v7 = vpop.eup %15477 }
 0xf1f   : > { %21648 = vst [vmem:[#allocation28_spill] sm:$0xff] %v19774_v29  ;;  %v14237_v16 = vpop.f32.mrb[3].mxu0  ;;  %21652 = vst [vmem:[#allocation32_spill] sm:$0xff] %v19788_v7  ;;  %v9291_v47 = vsel %vm2953_vm2, %v19788_v7, 0.0 }
 0xf20   : > { %v19778_v54 = vpop.f32.mrb[16].mxu1  ;;  %9004 = vmax.xlane.f32.xlu1 %v9003_v23  ;;  %v8918_v16 = vpop.xlane.xlu0 %8917  ;;  %15481 = vpow2.f32 %v9156_v42 }
 0xf21   : > { %21649 = vst [vmem:[#allocation29_spill] sm:$0xff] %v19778_v54  ;;  %v14242_v49 = vpop.f32.mrb[17].mxu1  ;;  %v9080_v26 = vsub.f32 %v19552_v1, %v8918_v16 }
 0xf22   : > { %v19784_v40 = vpop.f32.mrb[18].mxu1  ;;  %9007 = vmax.xlane.f32.xlu0 %v9006_v17  ;;  %v9288_v49 = vsel %vm2953_vm2, %v19782_v30, 0.0  ;;  %v8921_v17 = vpop.xlane.xlu1 %8920 }
 0xf23   : > { %21651 = vst [vmem:[#allocation31_spill] sm:$0xff] %v19784_v40  ;;  %v14243_v11 = vpop.f32.mrb[19].mxu1  ;;  %v9081_v30 = vsub.f32 %v19556_v9, %v8921_v17  ;;  %v9158_v37 = vmul.f32 1.442695, %v9080_v26  ;;  %v19812_v16 = vpop.eup %15479  ;;  %v9021_v17 = vsel %vm2953_vm2, %v19774_v29, -inf }
 0xf24   : > { %v19790_v58 = vpop.f32.mrb[4].mxu0  ;;  %9010 = vmax.xlane.f32.xlu1 %v9009_v5  ;;  %21655 = vst [vmem:[#allocation35_spill] sm:$0xff] %v19812_v16 }
 0xf25   : > { %21653 = vst [vmem:[#allocation33_spill] sm:$0xff] %v19790_v58  ;;  %v14248_v23 = vpop.f32.mrb[5].mxu0  ;;  %15483 = vpow2.f32 %v9158_v37  ;;  %v9024_v37 = vsel %vm2953_vm2, %v19778_v54, -inf }
 0xf26   : > { %v19794_v39 = vpop.f32.mrb[6].mxu0  ;;  %9289 = vadd.xlane.f32.xlu0 %v9288_v49  ;;  %v9012_v23 = vsel %vm2953_vm2, %v19760_v53, -inf }
 0xf27   : > { %21654 = vst [vmem:[#allocation34_spill] sm:$0xff] %v19794_v39  ;;  %v14249_v11 = vpop.f32.mrb[7].mxu0 }
 0xf28   : > { %v19799_v56 = vpop.f32.mrb[20].mxu1  ;;  %9292 = vadd.xlane.f32.xlu1 %v9291_v47  ;;  %v9015_v11 = vsel %vm2953_vm2, %v19764_v46, -inf  ;;  %v9018_v47 = vsel %vm2953_vm2, %v19769_v38, -inf }
 0xf29   : > { %v14254_v5 = vpop.f32.mrb[21].mxu1 }
 0xf2a   : > { %v19804_v42 = vpop.f32.mrb[22].mxu1  ;;  %9013 = vmax.xlane.f32.xlu0 %v9012_v23  ;;  %v9160_v5 = vmul.f32 1.442695, %v9081_v30  ;;  %v19818_v23 = vpop.eup %15481 }
 0xf2b   : > { %v14255_v49 = vpop.f32.mrb[23].mxu1  ;;  %21656 = vst [vmem:[#allocation36_spill] sm:$0xff] %v19818_v23 }
 0xf2c   : > { %v19808_v7 = vpop.f32.mrb[8].mxu0  ;;  %9016 = vmax.xlane.f32.xlu1 %v9015_v11  ;;  %v9294_v11 = vsel %vm2953_vm2, %v19812_v16, 0.0  ;;  %15485 = vpow2.f32 %v9160_v5  ;;  %v9027_v5 = vsel %vm2953_vm2, %v19784_v40, -inf }
 0xf2d   : > { %v14260_v1 = vpop.f32.mrb[9].mxu0 }
 0xf2e   : > { %v19814_v53 = vpop.f32.mrb[10].mxu0  ;;  %9019 = vmax.xlane.f32.xlu0 %v9018_v47  ;;  %v9297_v47 = vsel %vm2953_vm2, %v19818_v23, 0.0 }
 0xf2f   : > { %v14261_v9 = vpop.f32.mrb[11].mxu0  ;;  %v19840_v23 = vpop.eup %15483 }
 0xf30   : > { %v19820_v26 = vpop.f32.mrb[24].mxu1  ;;  %9022 = vmax.xlane.f32.xlu1 %v9021_v17  ;;  %21657 = vst [vmem:[#allocation62_spill] sm:$0xff] %v19840_v23 }
 0xf31   : > { %v14266_v49 = vpop.f32.mrb[25].mxu1 }
 0xf32   : > { %v19824_v1 = vpop.f32.mrb[26].mxu1  ;;  %9295 = vadd.xlane.f32.xlu0 %v9294_v11 }
 0xf33   : > { %v14267_v30 = vpop.f32.mrb[27].mxu1 }
 0xf34   : > { %v19828_v9 = vpop.f32.mrb[12].mxu0  ;;  %9298 = vadd.xlane.f32.xlu1 %v9297_v47  ;;  %v9030_v30 = vsel %vm2953_vm2, %v19790_v58, -inf }
 0xf35   : > { %v14272_v29 = vpop.f32.mrb[13].mxu0 }
 0xf36   : > { %v19832_v17 = vpop.f32.mrb[14].mxu0  ;;  %9025 = vmax.xlane.f32.xlu0 %v9024_v37  ;;  %v9033_v37 = vsel %vm2953_vm2, %v19794_v39, -inf }
 0xf37   : > { %v14273_v49 = vpop.f32.mrb[15].mxu0 }
 0xf38   : > { %v19836_v16 = vpop.f32.mrb[28].mxu1  ;;  %9028 = vmax.xlane.f32.xlu1 %v9027_v5  ;;  %v19846_v49 = vpop.eup %15485  ;;  %v9300_v5 = vsel %vm2953_vm2, %v19840_v23, 0.0 }
 0xf39   : > { %v14278_v11 = vpop.f32.mrb[29].mxu1  ;;  %v9303_v58 = vsel %vm2953_vm2, %v19846_v49, 0.0 }
 0xf3a   : > { %v19842_v29 = vpop.f32.mrb[30].mxu1  ;;  %9031 = vmax.xlane.f32.xlu0 %v9030_v30  ;;  %v9036_v30 = vsel %vm2953_vm2, %v19799_v56, -inf }
 0xf3b   : > { %v14279_v47 = vpop.f32.mrb[31].mxu1 }
 0xf3c   : > { %9034 = vmax.xlane.f32.xlu1 %v9033_v37  ;;  %v9039_v37 = vsel %vm2953_vm2, %v19804_v42, -inf }
 0xf3e   : > { %v8924_v40 = vpop.xlane.xlu0 %8923  ;;  %9301 = vadd.xlane.f32.xlu0 %v9300_v5  ;;  %v9042_v5 = vsel %vm2953_vm2, %v19808_v7, -inf }
 0xf3f   : > { %v9082_v54 = vsub.f32 %v19582_v28, %v8924_v40  ;;  %v9045_v28 = vsel %vm2953_vm2, %v19814_v53, -inf }
 0xf40   : > { %v8927_v11 = vpop.xlane.xlu1 %8926  ;;  %9304 = vadd.xlane.f32.xlu1 %v9303_v58 }
 0xf41   : > { %v9083_v47 = vsub.f32 %v19586_v59, %v8927_v11  ;;  %v9162_v39 = vmul.f32 1.442695, %v9082_v54  ;;  %v9048_v59 = vsel %vm2953_vm2, %v19820_v26, -inf  ;;  %v9051_v11 = vsel %vm2953_vm2, %v19824_v1, -inf }
 0xf42   : > { %9037 = vmax.xlane.f32.xlu0 %v9036_v30 }
 0xf43   : > { %v9164_v23 = vmul.f32 1.442695, %v9083_v47  ;;  %15487 = vpow2.f32 %v9162_v39  ;;  %v9054_v39 = vsel %vm2953_vm2, %v19828_v9, -inf }
 0xf44   : > { %9040 = vmax.xlane.f32.xlu1 %v9039_v37 }
 0xf45   : > { %15489 = vpow2.f32 %v9164_v23  ;;  %v9057_v23 = vsel %vm2953_vm2, %v19832_v17, -inf }
 0xf46   : > { %9043 = vmax.xlane.f32.xlu0 %v9042_v5  ;;  %v9060_v5 = vsel %vm2953_vm2, %v19836_v16, -inf }
 0xf48   : > { %9046 = vmax.xlane.f32.xlu1 %v9045_v28 }
 0xf49   : > { %v8930_v40 = vpop.xlane.xlu0 %8929 }
 0xf4a   : > { %v9084_v58 = vsub.f32 %v19598_v18, %v8930_v40  ;;  %9049 = vmax.xlane.f32.xlu0 %v9048_v59  ;;  %v9063_v59 = vsel %vm2953_vm2, %v19842_v29, -inf }
 0xf4b   : > { %v8933_v54 = vpop.xlane.xlu1 %8932 }
 0xf4c   : > { %v9166_v30 = vmul.f32 1.442695, %v9084_v58  ;;  %v9085_v47 = vsub.f32 %v19602_v12, %v8933_v54  ;;  %9052 = vmax.xlane.f32.xlu1 %v9051_v11 }
 0xf4d   : > { %v19874_v28 = vpop.eup %15487 }
 0xf4e   : > { %15491 = vpow2.f32 %v9166_v30  ;;  %v9168_v37 = vmul.f32 1.442695, %v9085_v47  ;;  %9055 = vmax.xlane.f32.xlu0 %v9054_v39  ;;  %v9306_v30 = vsel %vm2953_vm2, %v19874_v28, 0.0 }
 0xf4f   : > { %v19879_v58 = vpop.eup %15489 }
 0xf50   : > { %15493 = vpow2.f32 %v9168_v37  ;;  %9058 = vmax.xlane.f32.xlu1 %v9057_v23 }
 0xf51   : > { %v8936_v18 = vpop.xlane.xlu0 %8935 }
 0xf52   : > { %v9086_v12 = vsub.f32 %v19610_v48, %v8936_v18  ;;  %9061 = vmax.xlane.f32.xlu0 %v9060_v5  ;;  %v9309_v48 = vsel %vm2953_vm2, %v19879_v58, 0.0 }
 0xf53   : > { %v8939_v40 = vpop.xlane.xlu1 %8938 }
 0xf54   : > { %v9170_v54 = vmul.f32 1.442695, %v9086_v12  ;;  %v9087_v11 = vsub.f32 %v19616_v52, %v8939_v40  ;;  %9064 = vmax.xlane.f32.xlu1 %v9063_v59 }
 0xf56   : > { %15495 = vpow2.f32 %v9170_v54  ;;  %v9172_v47 = vmul.f32 1.442695, %v9087_v11  ;;  %9307 = vadd.xlane.f32.xlu0 %v9306_v30 }
 0xf58   : > { %v19886_v39 = vpop.eup %15491  ;;  %15497 = vpow2.f32 %v9172_v47  ;;  %9310 = vadd.xlane.f32.xlu1 %v9309_v48 }
 0xf59   : > { %v8942_v37 = vpop.xlane.xlu0 %8941  ;;  %v9312_v23 = vsel %vm2953_vm2, %v19886_v39, 0.0 }
 0xf5a   : > { %v19890_v18 = vpop.eup %15493  ;;  %v9088_v52 = vsub.f32 %v19622_v13, %v8942_v37  ;;  %9313 = vadd.xlane.f32.xlu0 %v9312_v23 }
 0xf5b   : > { %v8945_v5 = vpop.xlane.xlu1 %8944  ;;  %v9315_v12 = vsel %vm2953_vm2, %v19890_v18, 0.0 }
 0xf5c   : > { %v9174_v40 = vmul.f32 1.442695, %v9088_v52  ;;  %v9089_v59 = vsub.f32 %v19629_v24, %v8945_v5  ;;  %9316 = vadd.xlane.f32.xlu1 %v9315_v12 }
 0xf5e   : > { %15499 = vpow2.f32 %v9174_v40  ;;  %v9176_v54 = vmul.f32 1.442695, %v9089_v59 }
 0xf60   : > { %v19896_v11 = vpop.eup %15495  ;;  %15501 = vpow2.f32 %v9176_v54 }
 0xf61   : > { %v8948_v30 = vpop.xlane.xlu0 %8947  ;;  %v9318_v47 = vsel %vm2953_vm2, %v19896_v11, 0.0 }
 0xf62   : > { %v19900_v48 = vpop.eup %15497  ;;  %v9090_v13 = vsub.f32 %v19634_v55, %v8948_v30  ;;  %9319 = vadd.xlane.f32.xlu0 %v9318_v47 }
 0xf63   : > { %v8951_v37 = vpop.xlane.xlu1 %8950  ;;  %v9321_v23 = vsel %vm2953_vm2, %v19900_v48, 0.0 }
 0xf64   : > { %v9178_v24 = vmul.f32 1.442695, %v9090_v13  ;;  %v9091_v52 = vsub.f32 %v19638_v34, %v8951_v37  ;;  %9322 = vadd.xlane.f32.xlu1 %v9321_v23 }
 0xf66   : > { %15503 = vpow2.f32 %v9178_v24  ;;  %v9180_v5 = vmul.f32 1.442695, %v9091_v52 }
 0xf68   : > { %v19906_v12 = vpop.eup %15499  ;;  %15505 = vpow2.f32 %v9180_v5 }
 0xf69   : > { %v8954_v40 = vpop.xlane.xlu0 %8953  ;;  %v9324_v59 = vsel %vm2953_vm2, %v19906_v12, 0.0 }
 0xf6a   : > { %v19910_v54 = vpop.eup %15501  ;;  %v9092_v55 = vsub.f32 %v19644_v15, %v8954_v40  ;;  %9325 = vadd.xlane.f32.xlu0 %v9324_v59 }
 0xf6b   : > { %v8957_v30 = vpop.xlane.xlu1 %8956  ;;  %v9327_v47 = vsel %vm2953_vm2, %v19910_v54, 0.0 }
 0xf6c   : > { %v9182_v34 = vmul.f32 1.442695, %v9092_v55  ;;  %v9093_v13 = vsub.f32 %v19648_v44, %v8957_v30  ;;  %9328 = vadd.xlane.f32.xlu1 %v9327_v47 }
 0xf6d   : > { %v9260_v37 = vpop.xlane.xlu0 %9259 }
 0xf6e   : > { %15507 = vpow2.f32 %v9182_v34  ;;  %v9184_v23 = vmul.f32 1.442695, %v9093_v13 }
 0xf6f   : > { %15509 = vrcp.f32 %v9260_v37  ;;  %v9263_v24 = vpop.xlane.xlu1 %9262 }
 0xf70   : > { %v19916_v52 = vpop.eup %15503  ;;  %15511 = vpow2.f32 %v9184_v23 }
 0xf71   : > { %v9330_v15 = vsel %vm2953_vm2, %v19916_v52, 0.0  ;;  %15513 = vrcp.f32 %v9263_v24 }
 0xf72   : > { %v19920_v5 = vpop.eup %15505  ;;  %9331 = vadd.xlane.f32.xlu0 %v9330_v15 }
 0xf73   : > { %v9333_v40 = vsel %vm2953_vm2, %v19920_v5, 0.0 }
 0xf74   : > { %9334 = vadd.xlane.f32.xlu1 %v9333_v40 }
 0xf78   : > { %v19924_v44 = vpop.eup %15507 }
 0xf79   : > { %v15510_v59 = vpop.eup %15509  ;;  %v9336_v55 = vsel %vm2953_vm2, %v19924_v44, 0.0 }
 0xf7a   : > { %v19928_v30 = vpop.eup %15511  ;;  %9337 = vadd.xlane.f32.xlu0 %v9336_v55  ;;  %v9514_v13 = vmul.f32 %v15510_v59, %v19642_v10 }
 0xf7b   : > { %21658 = vst [vmem:[#allocation64_spill] sm:$0xff] %v19928_v30  ;;  %v15514_v47 = vpop.eup %15513  ;;  %v9339_v34 = vsel %vm2953_vm2, %v19928_v30, 0.0 }
 0xf7c   : > { %v9515_v37 = vmul.f32 %v15514_v47, %v19654_v3  ;;  %9340 = vadd.xlane.f32.xlu1 %v9339_v34 }
 0xf7e   : > { %v9578_v23 = vpack.c.bf16 %v9515_v37, %v9514_v13 }
 0xf7f   : > { %v8960_v24 = vpop.xlane.xlu0 %8959 }
 0xf80   : > { %14283 = vmatmul.mubr.msk.bf16.vlgmr.msra.gmra.mrb[16].mxu0 %vm2953_vm2, %v9578_v23  ;;  %v9094_v15 = vsub.f32 %v19662_v57, %v8960_v24 }
 0xf81   : > { %14293 = vmatpush3.bf16.msra.mxu0 %v19159_v32  ;;  %v8963_v40 = vpop.xlane.xlu1 %8962  ;;  %14294 = vmatprep.mubr.msk.bf16.mxu0 %vm16134_vm0, %v21597_v31 }
 0xf82   : > { %v9186_v55 = vmul.f32 1.442695, %v9094_v15  ;;  %v9095_v30 = vsub.f32 %v19668_v35, %v8963_v40  ;;  %14304 = vmatprep.subr.bf16.mxu0 %v21597_v31 }
 0xf83   : > { %v9266_v10 = vpop.xlane.xlu0 %9265 }
 0xf84   : > { %15515 = vpow2.f32 %v9186_v55  ;;  %v9188_v3 = vmul.f32 1.442695, %v9095_v30 }
 0xf85   : > { %15517 = vrcp.f32 %v9266_v10  ;;  %v9269_v59 = vpop.xlane.xlu1 %9268 }
 0xf86   : > { %15519 = vpow2.f32 %v9188_v3 }
 0xf87   : > { %15521 = vrcp.f32 %v9269_v59  ;;  %v8966_v47 = vpop.xlane.xlu0 %8965 }
 0xf88   : > { %v9096_v57 = vsub.f32 %v19679_v8, %v8966_v47 }
 0xf89   : > { %v8969_v32 = vpop.xlane.xlu1 %8968 }
 0xf8a   : > { %v9190_v34 = vmul.f32 1.442695, %v9096_v57  ;;  %v9097_v13 = vsub.f32 %v19684_v61, %v8969_v32 }
 0xf8b   : > { %v8972_v37 = vpop.xlane.xlu0 %8971 }
 0xf8c   : > { %15523 = vpow2.f32 %v9190_v34  ;;  %v9192_v23 = vmul.f32 1.442695, %v9097_v13  ;;  %v9098_v35 = vsub.f32 %v19688_v4, %v8972_v37 }
 0xf8d   : > { %v8975_v24 = vpop.xlane.xlu1 %8974 }
 0xf8e   : > { %v19944_v15 = vpop.eup %15515  ;;  %v9194_v30 = vmul.f32 1.442695, %v9098_v35  ;;  %v9099_v40 = vsub.f32 %v19694_v41, %v8975_v24  ;;  %15525 = vpow2.f32 %v9192_v23 }
 0xf8f   : > { %v15518_v55 = vpop.eup %15517  ;;  %v9272_v10 = vpop.xlane.xlu0 %9271  ;;  %v9342_v8 = vsel %vm2953_vm2, %v19944_v15, 0.0 }
 0xf90   : > { %v19949_v3 = vpop.eup %15519  ;;  %15527 = vpow2.f32 %v9194_v30  ;;  %v9196_v61 = vmul.f32 1.442695, %v9099_v40  ;;  %9343 = vadd.xlane.f32.xlu0 %v9342_v8  ;;  %v9516_v57 = vmul.f32 %v15518_v55, %v19666_v27 }
 0xf91   : > { %v15522_v59 = vpop.eup %15521  ;;  %15529 = vrcp.f32 %v9272_v10  ;;  %v9275_v4 = vpop.xlane.xlu1 %9274  ;;  %v9345_v47 = vsel %vm2953_vm2, %v19949_v3, 0.0 }
 0xf92   : > { %v9517_v41 = vmul.f32 %v15522_v59, %v19672_v25  ;;  %15531 = vpow2.f32 %v9196_v61  ;;  %9346 = vadd.xlane.f32.xlu1 %v9345_v47 }
 0xf93   : > { %15533 = vrcp.f32 %v9275_v4  ;;  %v8978_v32 = vpop.xlane.xlu0 %8977 }
 0xf94   : > { %v9579_v34 = vpack.c.bf16 %v9517_v41, %v9516_v57  ;;  %v9100_v13 = vsub.f32 %v19700_v6, %v8978_v32 }
 0xf95   : > { %v8981_v37 = vpop.xlane.xlu1 %8980 }
 0xf96   : > { %v19956_v23 = vpop.eup %15523  ;;  %v9198_v35 = vmul.f32 1.442695, %v9100_v13  ;;  %v9101_v24 = vsub.f32 %v19704_v14, %v8981_v37  ;;  %14289 = vmatmul.mubr.msk.bf16.vlgmr.msra.gmra.mrb[32].mxu1 %vm2953_vm2, %v9579_v34 }
 0xf97   : > { %14299 = vmatpush3.bf16.msra.mxu1 %v19155_v60  ;;  %v8984_v27 = vpop.xlane.xlu0 %8983  ;;  %v9348_v25 = vsel %vm2953_vm2, %v19956_v23, 0.0  ;;  %14300 = vmatprep.mubr.msk.bf16.mxu1 %vm16134_vm0, %v21597_v31 }
 0xf98   : > { %15535 = vpow2.f32 %v9198_v35  ;;  %v9200_v30 = vmul.f32 1.442695, %v9101_v24  ;;  %v9102_v6 = vsub.f32 %v19709_v36, %v8984_v27  ;;  %9349 = vadd.xlane.f32.xlu0 %v9348_v25  ;;  %14310 = vmatprep.subr.bf16.mxu1 %v21597_v31  ;;  %v19967_v40 = vpop.eup %15525 }
 0xf99   : > { %v8987_v14 = vpop.xlane.xlu1 %8986  ;;  %v9351_v13 = vsel %vm2953_vm2, %v19967_v40, 0.0 }
 0xf9a   : > { %v19969_v55 = vpop.eup %15527  ;;  %v9202_v60 = vmul.f32 1.442695, %v9102_v6  ;;  %v9103_v10 = vsub.f32 %v19714_v43, %v8987_v14  ;;  %15537 = vpow2.f32 %v9200_v30 }
 0xf9b   : > { %v15530_v8 = vpop.eup %15529  ;;  %v9278_v61 = vpop.xlane.xlu0 %9277  ;;  %v9354_v59 = vsel %vm2953_vm2, %v19969_v55, 0.0 }
 0xf9c   : > { %v19974_v4 = vpop.eup %15531  ;;  %15539 = vpow2.f32 %v9202_v60  ;;  %v9204_v36 = vmul.f32 1.442695, %v9103_v10  ;;  %9355 = vadd.xlane.f32.xlu1 %v9354_v59  ;;  %v9518_v32 = vmul.f32 %v15530_v8, %v19692_v45 }
 0xf9d   : > { %v15534_v47 = vpop.eup %15533  ;;  %15541 = vrcp.f32 %v9278_v61  ;;  %v9281_v57 = vpop.xlane.xlu1 %9280  ;;  %v9357_v41 = vsel %vm2953_vm2, %v19974_v4, 0.0 }
 0xf9e   : > { %v9519_v43 = vmul.f32 %v15534_v47, %v19698_v2  ;;  %15543 = vpow2.f32 %v9204_v36  ;;  %9358 = vadd.xlane.f32.xlu0 %v9357_v41 }
 0xf9f   : > { %15545 = vrcp.f32 %v9281_v57  ;;  %v8990_v34 = vpop.xlane.xlu0 %8989 }
 0xfa0   : > { %v9580_v37 = vpack.c.bf16 %v9519_v43, %v9518_v32  ;;  %v9104_v35 = vsub.f32 %v19718_v19, %v8990_v34  ;;  %9352 = vadd.xlane.f32.xlu1 %v9351_v13 }
 0xfa1   : > { %v8993_v24 = vpop.xlane.xlu1 %8992 }
 0xfa2   : > { %v19983_v27 = vpop.eup %15535  ;;  %v9206_v25 = vmul.f32 1.442695, %v9104_v35  ;;  %v9105_v30 = vsub.f32 %v19724_v51, %v8993_v24  ;;  %14295 = vmatmul.mubr.msk.bf16.vlgmr.msra.gmra.mrb[20].mxu0 %vm2953_vm2, %v9580_v37 }
 0xfa3   : > { %14305 = vmatpush3.bf16.msra.mxu0 %v19258_v62  ;;  %v8996_v45 = vpop.xlane.xlu0 %8995  ;;  %v9360_v2 = vsel %vm2953_vm2, %v19983_v27, 0.0  ;;  %14306 = vmatprep.mubr.msk.bf16.mxu0 %vm16134_vm0, %v21597_v31 }
 0xfa4   : > { %15547 = vpow2.f32 %v9206_v25  ;;  %v9208_v19 = vmul.f32 1.442695, %v9105_v30  ;;  %v9106_v6 = vsub.f32 %v19730_v33, %v8996_v45  ;;  %9361 = vadd.xlane.f32.xlu0 %v9360_v2  ;;  %14316 = vmatprep.subr.bf16.mxu0 %v21597_v31  ;;  %v19994_v14 = vpop.eup %15537  ;;  %v21659_v2 = vld [vmem:[#allocation23_spill] sm:$0xff] }
 0xfa5   : > { %v8999_v51 = vpop.xlane.xlu1 %8998  ;;  %v9363_v13 = vsel %vm2953_vm2, %v19994_v14, 0.0 }
 0xfa6   : > { %v19996_v60 = vpop.eup %15539  ;;  %v9210_v10 = vmul.f32 1.442695, %v9106_v6  ;;  %v9107_v8 = vsub.f32 %v19734_v22, %v8999_v51  ;;  %15549 = vpow2.f32 %v9208_v19 }
 0xfa7   : > { %v15542_v61 = vpop.eup %15541  ;;  %v9284_v59 = vpop.xlane.xlu0 %9283  ;;  %v9366_v36 = vsel %vm2953_vm2, %v19996_v60, 0.0 }
 0xfa8   : > { %v20001_v47 = vpop.eup %15543  ;;  %15551 = vpow2.f32 %v9210_v10  ;;  %v9212_v33 = vmul.f32 1.442695, %v9107_v8  ;;  %9367 = vadd.xlane.f32.xlu1 %v9366_v36  ;;  %v9520_v43 = vmul.f32 %v15542_v61, %v19722_v50  ;;  %v21660_v8 = vld [vmem:[#allocation25_spill] sm:$0xff] }
 0xfa9   : > { %v15546_v57 = vpop.eup %15545  ;;  %15553 = vrcp.f32 %v9284_v59  ;;  %v9287_v41 = vpop.xlane.xlu1 %9286  ;;  %v9369_v32 = vsel %vm2953_vm2, %v20001_v47, 0.0 }
 0xfaa   : > { %v9521_v22 = vmul.f32 %v15546_v57, %v19728_v63  ;;  %15555 = vpow2.f32 %v9212_v33  ;;  %9370 = vadd.xlane.f32.xlu0 %v9369_v32 }
 0xfab   : > { %15557 = vrcp.f32 %v9287_v41  ;;  %v9002_v34 = vpop.xlane.xlu0 %9001 }
 0xfac   : > { %v9581_v37 = vpack.c.bf16 %v9521_v22, %v9520_v43  ;;  %v9108_v35 = vsub.f32 %v19739_v20, %v9002_v34  ;;  %9364 = vadd.xlane.f32.xlu1 %v9363_v13  ;;  %v21661_v34 = vld [vmem:[#allocation24_spill] sm:$0xff] }
 0xfad   : > { %v9005_v24 = vpop.xlane.xlu1 %9004 }
 0xfae   : > { %v20010_v25 = vpop.eup %15547  ;;  %v9214_v30 = vmul.f32 1.442695, %v9108_v35  ;;  %v9109_v45 = vsub.f32 %v19744_v21, %v9005_v24  ;;  %14301 = vmatmul.mubr.msk.bf16.vlgmr.msra.gmra.mrb[36].mxu1 %vm2953_vm2, %v9581_v37  ;;  %v21662_v37 = vld [vmem:[#allocation26_spill] sm:$0xff] }
 0xfaf   : > { %14311 = vmatpush3.bf16.msra.mxu1 %v19256_v0  ;;  %v9008_v50 = vpop.xlane.xlu0 %9007  ;;  %v9372_v63 = vsel %vm2953_vm2, %v20010_v25, 0.0  ;;  %14312 = vmatprep.mubr.msk.bf16.mxu1 %vm16134_vm0, %v21597_v31 }
 0xfb0   : > { %15559 = vpow2.f32 %v9214_v30  ;;  %v9216_v20 = vmul.f32 1.442695, %v9109_v45  ;;  %v9110_v19 = vsub.f32 %v21659_v2, %v9008_v50  ;;  %9373 = vadd.xlane.f32.xlu0 %v9372_v63  ;;  %14322 = vmatprep.subr.bf16.mxu1 %v21597_v31  ;;  %v20021_v6 = vpop.eup %15549  ;;  %v21663_v50 = vld [vmem:[#allocation27_spill] sm:$0xff] }
 0xfb1   : > { %v9011_v21 = vpop.xlane.xlu1 %9010  ;;  %v9375_v30 = vsel %vm2953_vm2, %v20021_v6, 0.0 }
 0xfb2   : > { %v20023_v51 = vpop.eup %15551  ;;  %v9218_v10 = vmul.f32 1.442695, %v9110_v19  ;;  %v9111_v61 = vsub.f32 %v21660_v8, %v9011_v21  ;;  %15561 = vpow2.f32 %v9216_v20 }
 0xfb3   : > { %v15554_v59 = vpop.eup %15553  ;;  %v9290_v36 = vpop.xlane.xlu0 %9289  ;;  %v9378_v33 = vsel %vm2953_vm2, %v20023_v51, 0.0 }
 0xfb4   : > { %v20028_v57 = vpop.eup %15555  ;;  %15563 = vpow2.f32 %v9218_v10  ;;  %v9220_v41 = vmul.f32 1.442695, %v9111_v61  ;;  %9379 = vadd.xlane.f32.xlu1 %v9378_v33  ;;  %v9522_v13 = vmul.f32 %v15554_v59, %v21661_v34  ;;  %v21664_v10 = vld [vmem:[#allocation43_spill] sm:$0xff] }
 0xfb5   : > { %v15558_v32 = vpop.eup %15557  ;;  %15565 = vrcp.f32 %v9290_v36  ;;  %v9293_v43 = vpop.xlane.xlu1 %9292  ;;  %v9381_v22 = vsel %vm2953_vm2, %v20028_v57, 0.0 }
 0xfb6   : > { %v9523_v35 = vmul.f32 %v15558_v32, %v21662_v37  ;;  %15567 = vpow2.f32 %v9220_v41  ;;  %9382 = vadd.xlane.f32.xlu0 %v9381_v22 }
 0xfb7   : > { %15569 = vrcp.f32 %v9293_v43  ;;  %v9014_v24 = vpop.xlane.xlu0 %9013  ;;  %v21665_v43 = vld [vmem:[#allocation28_spill] sm:$0xff] }
 0xfb8   : > { %v9582_v45 = vpack.c.bf16 %v9523_v35, %v9522_v13  ;;  %v9112_v63 = vsub.f32 %v21663_v50, %v9014_v24  ;;  %9376 = vadd.xlane.f32.xlu1 %v9375_v30  ;;  %v21666_v50 = vld [vmem:[#allocation30_spill] sm:$0xff] }
 0xfb9   : > { %v9017_v20 = vpop.xlane.xlu1 %9016 }
 0xfba   : > { %v20037_v2 = vpop.eup %15559  ;;  %v9222_v19 = vmul.f32 1.442695, %v9112_v63  ;;  %v9113_v21 = vsub.f32 %v19764_v46, %v9017_v20  ;;  %14307 = vmatmul.mubr.msk.bf16.vlgmr.msra.gmra.mrb[24].mxu0 %vm2953_vm2, %v9582_v45  ;;  %v21667_v20 = vld [vmem:[#allocation32_spill] sm:$0xff] }
 0xfbb   : > { %14317 = vmatpush3.bf16.msra.mxu0 %v21664_v10  ;;  %v9020_v8 = vpop.xlane.xlu0 %9019  ;;  %v9384_v61 = vsel %vm2953_vm2, %v20037_v2, 0.0  ;;  %14318 = vmatprep.mubr.msk.bf16.mxu0 %vm16134_vm0, %v21597_v31 }
 0xfbc   : > { %15571 = vpow2.f32 %v9222_v19  ;;  %v9224_v59 = vmul.f32 1.442695, %v9113_v21  ;;  %v9114_v36 = vsub.f32 %v19769_v38, %v9020_v8  ;;  %9385 = vadd.xlane.f32.xlu0 %v9384_v61  ;;  %14328 = vmatprep.subr.bf16.mxu0 %v21597_v31  ;;  %v20048_v33 = vpop.eup %15561 }
 0xfbd   : > { %v9023_v46 = vpop.xlane.xlu1 %9022  ;;  %v9387_v8 = vsel %vm2953_vm2, %v20048_v33, 0.0 }
 0xfbe   : > { %v20050_v41 = vpop.eup %15563  ;;  %v9226_v32 = vmul.f32 1.442695, %v9114_v36  ;;  %v9115_v22 = vsub.f32 %v21665_v43, %v9023_v46  ;;  %15573 = vpow2.f32 %v9224_v59  ;;  %v21668_v59 = vld [vmem:[#allocation29_spill] sm:$0xff] }
 0xfbf   : > { %v15566_v34 = vpop.eup %15565  ;;  %v9296_v13 = vpop.xlane.xlu0 %9295  ;;  %v9390_v37 = vsel %vm2953_vm2, %v20050_v41, 0.0 }
 0xfc0   : > { %v20055_v35 = vpop.eup %15567  ;;  %15575 = vpow2.f32 %v9226_v32  ;;  %v9228_v38 = vmul.f32 1.442695, %v9115_v22  ;;  %9391 = vadd.xlane.f32.xlu1 %v9390_v37  ;;  %v9524_v63 = vmul.f32 %v15566_v34, %v21666_v50  ;;  %v21670_v22 = vld [vmem:[#allocation31_spill] sm:$0xff]  ;;  %v21671_v34 = vld [vmem:[#allocation48_spill] sm:$0xff] }
 0xfc1   : > { %v15570_v24 = vpop.eup %15569  ;;  %15577 = vrcp.f32 %v9296_v13  ;;  %v9299_v30 = vpop.xlane.xlu1 %9298  ;;  %v9393_v45 = vsel %vm2953_vm2, %v20055_v35, 0.0 }
 0xfc2   : > { %v9525_v19 = vmul.f32 %v15570_v24, %v21667_v20  ;;  %15579 = vpow2.f32 %v9228_v38  ;;  %9394 = vadd.xlane.f32.xlu0 %v9393_v45 }
 0xfc3   : > { %15581 = vrcp.f32 %v9299_v30  ;;  %v9026_v21 = vpop.xlane.xlu0 %9025  ;;  %v21672_v30 = vld [vmem:[#allocation33_spill] sm:$0xff] }
 0xfc4   : > { %v9583_v61 = vpack.c.bf16 %v9525_v19, %v9524_v63  ;;  %v9116_v36 = vsub.f32 %v21668_v59, %v9026_v21  ;;  %9388 = vadd.xlane.f32.xlu1 %v9387_v8  ;;  %v21673_v21 = vld [vmem:[#allocation34_spill] sm:$0xff] }
 0xfc5   : > { %v9029_v46 = vpop.xlane.xlu1 %9028 }
 0xfc6   : > { %v20064_v32 = vpop.eup %15571  ;;  %v9230_v43 = vmul.f32 1.442695, %v9116_v36  ;;  %v9117_v13 = vsub.f32 %v21670_v22, %v9029_v46  ;;  %14313 = vmatmul.mubr.msk.bf16.vlgmr.msra.gmra.mrb[40].mxu1 %vm2953_vm2, %v9583_v61 }
 0xfc7   : > { %21669 = vst [vmem:[#allocation65_spill] sm:$0xff] %v20064_v32  ;;  %14323 = vmatpush3.bf16.msra.mxu1 %v21671_v34  ;;  %v9032_v37 = vpop.xlane.xlu0 %9031  ;;  %v9396_v38 = vsel %vm2953_vm2, %v20064_v32, 0.0  ;;  %14324 = vmatprep.mubr.msk.bf16.mxu1 %vm16134_vm0, %v21597_v31 }
 0xfc8   : > { %15583 = vpow2.f32 %v9230_v43  ;;  %v9232_v24 = vmul.f32 1.442695, %v9117_v13  ;;  %v9118_v45 = vsub.f32 %v21672_v30, %v9032_v37  ;;  %9397 = vadd.xlane.f32.xlu0 %v9396_v38  ;;  %14334 = vmatprep.subr.bf16.mxu1 %v21597_v31  ;;  %v20075_v50 = vpop.eup %15573  ;;  %v21675_v38 = vld [vmem:[#allocation35_spill] sm:$0xff]  ;;  %v21676_v30 = vld [vmem:[#allocation36_spill] sm:$0xff] }
 0xfc9   : > { %v9035_v63 = vpop.xlane.xlu1 %9034 }
 0xfca   : > { %v20077_v20 = vpop.eup %15575  ;;  %15585 = vpow2.f32 %v9232_v24  ;;  %v9234_v19 = vmul.f32 1.442695, %v9118_v45  ;;  %v9119_v8 = vsub.f32 %v21673_v21, %v9035_v63  ;;  %v9399_v21 = vsel %vm2953_vm2, %v20075_v50, 0.0 }
 0xfcb   : > { %v15578_v61 = vpop.eup %15577  ;;  %v9302_v59 = vpop.xlane.xlu0 %9301  ;;  %v9402_v36 = vsel %vm2953_vm2, %v20077_v20, 0.0 }
 0xfcc   : > { %v20082_v46 = vpop.eup %15579  ;;  %15587 = vpow2.f32 %v9234_v19  ;;  %v9236_v43 = vmul.f32 1.442695, %v9119_v8  ;;  %9403 = vadd.xlane.f32.xlu1 %v9402_v36  ;;  %v9526_v24 = vmul.f32 %v15578_v61, %v21675_v38  ;;  %v21677_v61 = vld [vmem:[#allocation78_spill] sm:$0xff] }
 0xfcd   : > { %21674 = vst [vmem:[#allocation37_spill] sm:$0xff] %v20082_v46  ;;  %v15582_v22 = vpop.eup %15581  ;;  %15589 = vrcp.f32 %v9302_v59  ;;  %v9305_v13 = vpop.xlane.xlu1 %9304  ;;  %v9405_v37 = vsel %vm2953_vm2, %v20082_v46, 0.0 }
 0xfce   : > { %v9527_v45 = vmul.f32 %v15582_v22, %v21676_v30  ;;  %15591 = vpow2.f32 %v9236_v43  ;;  %9406 = vadd.xlane.f32.xlu0 %v9405_v37 }
 0xfcf   : > { %15593 = vrcp.f32 %v9305_v13  ;;  %v9038_v63 = vpop.xlane.xlu0 %9037 }
 0xfd0   : > { %v9584_v19 = vpack.c.bf16 %v9527_v45, %v9526_v24  ;;  %v9120_v8 = vsub.f32 %v19799_v56, %v9038_v63  ;;  %9400 = vadd.xlane.f32.xlu1 %v9399_v21 }
 0xfd1   : > { %v9041_v59 = vpop.xlane.xlu1 %9040 }
 0xfd2   : > { %v20091_v36 = vpop.eup %15583  ;;  %v9238_v32 = vmul.f32 1.442695, %v9120_v8  ;;  %v9121_v46 = vsub.f32 %v19804_v42, %v9041_v59  ;;  %14319 = vmatmul.mubr.msk.bf16.vlgmr.msra.gmra.mrb[28].mxu0 %vm2953_vm2, %v9584_v19  ;;  %v21678_v59 = vld [vmem:[#allocation62_spill] sm:$0xff] }
 0xfd3   : > { %14329 = vmatpush3.bf16.msra.mxu0 %v21677_v61  ;;  %v9044_v43 = vpop.xlane.xlu0 %9043  ;;  %v9408_v22 = vsel %vm2953_vm2, %v20091_v36, 0.0  ;;  %14330 = vmatprep.mubr.msk.bf16.mxu0 %vm16134_vm0, %v21597_v31 }
 0xfd4   : > { %v20100_v13 = vpop.eup %15585  ;;  %15595 = vpow2.f32 %v9238_v32  ;;  %v9122_v56 = vsub.f32 %v19808_v7, %v9044_v43  ;;  %9409 = vadd.xlane.f32.xlu0 %v9408_v22  ;;  %14340 = vmatprep.subr.bf16.mxu0 %v21597_v31  ;;  %v9240_v42 = vmul.f32 1.442695, %v9121_v46 }
 0xfd5   : > { %v9047_v37 = vpop.xlane.xlu1 %9046  ;;  %v9411_v38 = vsel %vm2953_vm2, %v20100_v13, 0.0 }
 0xfd6   : > { %v20106_v24 = vpop.eup %15587  ;;  %v9242_v30 = vmul.f32 1.442695, %v9122_v56  ;;  %v9123_v45 = vsub.f32 %v19814_v53, %v9047_v37  ;;  %9412 = vadd.xlane.f32.xlu1 %v9411_v38 }
 0xfd7   : > { %v15590_v63 = vpop.eup %15589  ;;  %v9050_v21 = vpop.xlane.xlu0 %9049  ;;  %v9414_v32 = vsel %vm2953_vm2, %v20106_v24, 0.0 }
 0xfd8   : > { %v20111_v7 = vpop.eup %15591  ;;  %15597 = vpow2.f32 %v9242_v30  ;;  %v9244_v19 = vmul.f32 1.442695, %v9123_v45  ;;  %v9124_v46 = vsub.f32 %v19820_v26, %v9050_v21  ;;  %9415 = vadd.xlane.f32.xlu0 %v9414_v32  ;;  %v9528_v61 = vmul.f32 %v15590_v63, %v21678_v59 }
 0xfd9   : > { %v15594_v8 = vpop.eup %15593  ;;  %15599 = vpow2.f32 %v9240_v42  ;;  %v9053_v43 = vpop.xlane.xlu1 %9052  ;;  %v9417_v53 = vsel %vm2953_vm2, %v20111_v7, 0.0 }
 0xfda   : > { %v9529_v22 = vmul.f32 %v15594_v8, %v19846_v49  ;;  %15601 = vpow2.f32 %v9244_v19  ;;  %v9246_v56 = vmul.f32 1.442695, %v9124_v46  ;;  %v9125_v37 = vsub.f32 %v19824_v1, %v9053_v43  ;;  %9418 = vadd.xlane.f32.xlu1 %v9417_v53  ;;  %v21679_v49 = vld [vmem:[#allocation50_spill] sm:$0xff] }
 0xfdb   : > { %v9056_v38 = vpop.xlane.xlu0 %9055 }
 0xfdc   : > { %v9585_v30 = vpack.c.bf16 %v9529_v22, %v9528_v61  ;;  %v9126_v26 = vsub.f32 %v19828_v9, %v9056_v38  ;;  %15603 = vpow2.f32 %v9246_v56  ;;  %v9248_v42 = vmul.f32 1.442695, %v9125_v37 }
 0xfdd   : > { %v9059_v45 = vpop.xlane.xlu1 %9058 }
 0xfde   : > { %v20120_v21 = vpop.eup %15595  ;;  %v9250_v63 = vmul.f32 1.442695, %v9126_v26  ;;  %v9127_v32 = vsub.f32 %v19832_v17, %v9059_v45  ;;  %14325 = vmatmul.mubr.msk.bf16.vlgmr.msra.gmra.mrb[44].mxu1 %vm2953_vm2, %v9585_v30 }
 0xfdf   : > { %14335 = vmatpush3.bf16.msra.mxu1 %v21679_v49  ;;  %v9062_v19 = vpop.xlane.xlu0 %9061  ;;  %v9420_v1 = vsel %vm2953_vm2, %v20120_v21, 0.0  ;;  %14336 = vmatprep.mubr.msk.bf16.mxu1 %vm16134_vm0, %v21597_v31 }
 0xfe0   : > { %15605 = vpow2.f32 %v9250_v63  ;;  %9421 = vadd.xlane.f32.xlu0 %v9420_v1  ;;  %14346 = vmatprep.subr.bf16.mxu1 %v21597_v31  ;;  %v9128_v9 = vsub.f32 %v19836_v16, %v9062_v19  ;;  %v9252_v8 = vmul.f32 1.442695, %v9127_v32 }
 0xfe1   : > { %v20131_v46 = vpop.xlane.xlu1 %9064  ;;  %15607 = vpow2.f32 %v9248_v42 }
 0xfe2   : > { %v20133_v17 = vpop.eup %15597  ;;  %v9254_v22 = vmul.f32 1.442695, %v9128_v9 }
 0xfe3   : > { %v20135_v59 = vpop.eup %15599  ;;  %v9308_v61 = vpop.xlane.xlu0 %9307  ;;  %v9426_v43 = vsel %vm2953_vm2, %v20133_v17, 0.0 }
 0xfe4   : > { %v20139_v53 = vpop.eup %15601  ;;  %9427 = vadd.xlane.f32.xlu0 %v9426_v43  ;;  %15609 = vrcp.f32 %v9308_v61  ;;  %v9423_v38 = vsel %vm2953_vm2, %v20135_v59, 0.0 }
 0xfe5   : > { %v9311_v56 = vpop.xlane.xlu1 %9310  ;;  %v9429_v16 = vsel %vm2953_vm2, %v20139_v53, 0.0  ;;  %15611 = vpow2.f32 %v9252_v8 }
 0xfe6   : > { %9430 = vadd.xlane.f32.xlu1 %v9429_v16  ;;  %15613 = vrcp.f32 %v9311_v56  ;;  %v20145_v30 = vpop.eup %15603 }
 0xfe7   : > { %v9314_v37 = vpop.xlane.xlu0 %9313  ;;  %v9432_v42 = vsel %vm2953_vm2, %v20145_v30, 0.0 }
 0xfe8   : > { %15615 = vrcp.f32 %v9314_v37  ;;  %9424 = vadd.xlane.f32.xlu0 %v9423_v38 }
 0xfe9   : > { %15617 = vpow2.f32 %v9254_v22  ;;  %v9317_v26 = vpop.xlane.xlu1 %9316 }
 0xfea   : > { %v20147_v45 = vpop.eup %15605  ;;  %15619 = vrcp.f32 %v9317_v26 }
 0xfeb   : > { %v9438_v63 = vsel %vm2953_vm2, %v20147_v45, 0.0  ;;  %v20153_v32 = vpop.eup %15607 }
 0xfec   : > { %9433 = vadd.xlane.f32.xlu0 %v9432_v42  ;;  %9439 = vadd.xlane.f32.xlu1 %v9438_v63  ;;  %v9435_v1 = vsel %vm2953_vm2, %v20153_v32, 0.0 }
 0xfee   : > { %v15610_v49 = vpop.eup %15609 }
 0xfef   : > { %v9320_v19 = vpop.xlane.xlu0 %9319  ;;  %v20157_v9 = vpop.eup %15611  ;;  %v9530_v22 = vmul.f32 %v15610_v49, %v19874_v28  ;;  %v21680_v28 = vld [vmem:[#allocation54_spill] sm:$0xff] }
 0xff0   : > { %15621 = vrcp.f32 %v9320_v19  ;;  %9436 = vadd.xlane.f32.xlu0 %v9435_v1  ;;  %v15614_v8 = vpop.eup %15613  ;;  %v9441_v37 = vsel %vm2953_vm2, %v20157_v9, 0.0 }
 0xff1   : > { %v9323_v61 = vpop.xlane.xlu1 %9322  ;;  %v9531_v56 = vmul.f32 %v15614_v8, %v19879_v58 }
 0xff2   : > { %v15616_v43 = vpop.eup %15615  ;;  %15623 = vrcp.f32 %v9323_v61 }
 0xff3   : > { %v20161_v16 = vpop.eup %15617  ;;  %v9586_v26 = vpack.c.bf16 %v9531_v56, %v9530_v22  ;;  %v9532_v42 = vmul.f32 %v15616_v43, %v19886_v39 }
 0xff4   : > { %v15620_v38 = vpop.eup %15619  ;;  %9442 = vadd.xlane.f32.xlu0 %v9441_v37  ;;  %v9444_v58 = vsel %vm2953_vm2, %v20161_v16, 0.0 }
 0xff5   : > { %v9533_v63 = vmul.f32 %v15620_v38, %v19890_v18  ;;  %14331 = vmatmul.mubr.msk.bf16.vlgmr.msra.gmra.mrb[32].mxu0 %vm2953_vm2, %v9586_v26  ;;  %v21681_v18 = vld [vmem:[#allocation44_spill] sm:$0xff]  ;;  %v21682_v26 = vld [vmem:[#allocation55_spill] sm:$0xff] }
 0xff6   : > { %14341 = vmatpush3.bf16.msra.mxu0 %v21680_v28  ;;  %14342 = vmatprep.mubr.msk.bf16.mxu0 %vm16134_vm0, %v21597_v31 }
 0xff7   : > { %v9587_v19 = vpack.c.bf16 %v9533_v63, %v9532_v42  ;;  %v9326_v1 = vpop.xlane.xlu0 %9325  ;;  %14352 = vmatprep.subr.bf16.mxu0 %v21597_v31 }
 0xff8   : > { %15625 = vrcp.f32 %v9326_v1  ;;  %9445 = vadd.xlane.f32.xlu0 %v9444_v58  ;;  %v21683_v1 = vld [vmem:[#allocation57_spill] sm:$0xff]  ;;  %v9129_v58 = vsub.f32 %v19842_v29, %v20131_v46 }
 0xff9   : > { %v9329_v49 = vpop.xlane.xlu1 %9328  ;;  %14337 = vmatmul.mubr.msk.bf16.vlgmr.msra.gmra.mrb[48].mxu1 %vm2953_vm2, %v9587_v19  ;;  %v21686_v29 = vld [vmem:[#allocation21_spill] sm:$0xff] }
 0xffa   : > { %v15622_v39 = vpop.eup %15621  ;;  %15627 = vrcp.f32 %v9329_v49  ;;  %14347 = vmatpush3.bf16.msra.mxu1 %v21681_v18  ;;  %14348 = vmatprep.mubr.msk.bf16.mxu1 %vm16134_vm0, %v21597_v31  ;;  %v21684_v18 = vld [vmem:[#allocation59_spill] sm:$0xff] }
 0xffb   : > { %14358 = vmatprep.subr.bf16.mxu1 %v21597_v31  ;;  %v9534_v61 = vmul.f32 %v15622_v39, %v19896_v11 }
 0xffc   : > { %v15624_v8 = vpop.eup %15623 }
 0xffd   : > { %v9535_v43 = vmul.f32 %v15624_v8, %v19900_v48  ;;  %7356 = vrot.lane.b32.xlu1 %v19256_v0, %s16137_s12  ;;  %v9256_v8 = vmul.f32 1.442695, %v9129_v58 }
 0xfff   : > { %v9588_v22 = vpack.c.bf16 %v9535_v43, %v9534_v61  ;;  %v9332_v56 = vpop.xlane.xlu0 %9331  ;;  %v21685_v61 = vld [vmem:[#allocation64_spill] sm:$0xff] }
0x1000   : > { %15629 = vrcp.f32 %v9332_v56 }
0x1001   : > { %v9335_v37 = vpop.xlane.xlu1 %9334  ;;  %14343 = vmatmul.mubr.msk.bf16.vlgmr.msra.gmra.mrb[36].mxu0 %vm2953_vm2, %v9588_v22  ;;  %7358 = vrot.lane.b32.xlu1 %v21664_v10, %s16137_s12 }
0x1002   : > { %v15626_v38 = vpop.eup %15625  ;;  %15631 = vrcp.f32 %v9335_v37  ;;  %14353 = vmatpush3.bf16.msra.mxu0 %v21682_v26  ;;  %14354 = vmatprep.mubr.msk.bf16.mxu0 %vm16134_vm0, %v21597_v31 }
0x1003   : > { %14364 = vmatprep.subr.bf16.mxu0 %v21597_v31  ;;  %v9536_v0 = vmul.f32 %v15626_v38, %v19906_v12 }
0x1004   : > { %v15628_v11 = vpop.eup %15627 }
0x1005   : > { %v9537_v48 = vmul.f32 %v15628_v11, %v19910_v54 }
0x1007   : > { %v9589_v42 = vpack.c.bf16 %v9537_v48, %v9536_v0  ;;  %v9338_v63 = vpop.xlane.xlu0 %9337 }
0x1008   : > { %15633 = vrcp.f32 %v9338_v63 }
0x1009   : > { %v9341_v19 = vpop.xlane.xlu1 %9340  ;;  %14349 = vmatmul.mubr.msk.bf16.vlgmr.msra.gmra.mrb[52].mxu1 %vm2953_vm2, %v9589_v42 }
0x100a   : > { %v15630_v10 = vpop.eup %15629  ;;  %15635 = vrcp.f32 %v9341_v19  ;;  %14359 = vmatpush3.bf16.msra.mxu1 %v21683_v1  ;;  %14360 = vmatprep.mubr.msk.bf16.mxu1 %vm16134_vm0, %v21597_v31 }
0x100b   : > { %14370 = vmatprep.subr.bf16.mxu1 %v21597_v31  ;;  %v9538_v12 = vmul.f32 %v15630_v10, %v19916_v52  ;;  %15637 = vpow2.f32 %v9256_v8  ;;  %v21687_v10 = vld [vmem:[#allocation47_spill] sm:$0xff] }
0x100c   : > { %v15632_v28 = vpop.eup %15631 }
0x100d   : > { %v9539_v54 = vmul.f32 %v15632_v28, %v19920_v5 }
0x100e   : > { %7354 = vrot.lane.b32.xlu0 %v19258_v62, %s16137_s12 }
0x100f   : > { %v9590_v49 = vpack.c.bf16 %v9539_v54, %v9538_v12 }
0x1011   : > { %14355 = vmatmul.mubr.msk.bf16.vlgmr.msra.gmra.mrb[40].mxu0 %vm2953_vm2, %v9590_v49 }
0x1012   : > { %v15634_v39 = vpop.eup %15633  ;;  %14365 = vmatpush3.bf16.msra.mxu0 %v21684_v18  ;;  %14366 = vmatprep.mubr.msk.bf16.mxu0 %vm16134_vm0, %v21597_v31 }
0x1013   : > { %14376 = vmatprep.subr.bf16.mxu0 %v21597_v31  ;;  %v9540_v5 = vmul.f32 %v15634_v39, %v19924_v44 }
0x1014   : > { %v15636_v52 = vpop.eup %15635 }
0x1015   : > { %v9541_v62 = vmul.f32 %v15636_v52, %v21685_v61  ;;  %v20215_v56 = vpop.eup %15637 }
0x1016   : > { %v9447_v44 = vsel %vm2953_vm2, %v20215_v56, 0.0 }
0x1017   : > { %v9591_v43 = vpack.c.bf16 %v9541_v62, %v9540_v5  ;;  %v21688_v62 = vld [vmem:[#allocation49_spill] sm:$0xff] }
0x1019   : > { %14361 = vmatmul.mubr.msk.bf16.vlgmr.msra.gmra.mrb[56].mxu1 %vm2953_vm2, %v9591_v43 }
0x101a   : > { %14371 = vmatpush3.bf16.msra.mxu1 %v21686_v29  ;;  %14372 = vmatprep.mubr.msk.bf16.mxu1 %vm16134_vm0, %v21597_v31 }
0x101b   : > { %14382 = vmatprep.subr.bf16.mxu1 %v21597_v31 }
0x101d   : > { %v9344_v46 = vpop.xlane.xlu0 %9343 }
0x101e   : > { %15639 = vrcp.f32 %v9344_v46 }
0x101f   : > { %v9347_v22 = vpop.xlane.xlu1 %9346 }
0x1020   : > { %15641 = vrcp.f32 %v9347_v22 }
0x1025   : > { %9448 = vadd.xlane.f32.xlu1 %v9447_v44  ;;  %v9350_v37 = vpop.xlane.xlu0 %9349 }
0x1028   : > { %v15640_v38 = vpop.eup %15639 }
0x1029   : > { %v9356_v26 = vpop.xlane.xlu1 %9355  ;;  %v9542_v0 = vmul.f32 %v15640_v38, %v19944_v15 }
0x102a   : > { %v15642_v11 = vpop.eup %15641  ;;  %15643 = vrcp.f32 %v9356_v26 }
0x102b   : > { %v9543_v48 = vmul.f32 %v15642_v11, %v19949_v3  ;;  %15645 = vrcp.f32 %v9350_v37  ;;  %v9359_v42 = vpop.xlane.xlu0 %9358 }
0x102c   : > { %15647 = vrcp.f32 %v9359_v42 }
0x102d   : > { %v9592_v63 = vpack.c.bf16 %v9543_v48, %v9542_v0  ;;  %v9353_v19 = vpop.xlane.xlu1 %9352  ;;  %v21690_v48 = vld [vmem:[#allocation63_spill] sm:$0xff] }
0x102e   : > { %15649 = vrcp.f32 %v9353_v19 }
0x102f   : > { %14367 = vmatmul.mubr.msk.bf16.vlgmr.msra.gmra.mrb[44].mxu0 %vm2953_vm2, %v9592_v63 }
0x1030   : > { %14377 = vmatpush3.bf16.msra.mxu0 %v21687_v10  ;;  %14378 = vmatprep.mubr.msk.bf16.mxu0 %vm16134_vm0, %v21597_v31 }
0x1031   : > { %14388 = vmatprep.subr.bf16.mxu0 %v21597_v31  ;;  %v9362_v1 = vpop.xlane.xlu0 %9361 }
0x1034   : > { %v15644_v28 = vpop.eup %15643 }
0x1035   : > { %v15646_v15 = vpop.eup %15645  ;;  %v9368_v12 = vpop.xlane.xlu1 %9367  ;;  %v9546_v54 = vmul.f32 %v15644_v28, %v19969_v55  ;;  %v21689_v55 = vld [vmem:[#allocation52_spill] sm:$0xff] }
0x1036   : > { %v15648_v3 = vpop.eup %15647  ;;  %15651 = vrcp.f32 %v9368_v12  ;;  %7360 = vrot.lane.b32.xlu1 %v21671_v34, %s16137_s12  ;;  %v9544_v18 = vmul.f32 %v15646_v15, %v19956_v23 }
0x1037   : > { %v9547_v58 = vmul.f32 %v15648_v3, %v19974_v4  ;;  %15653 = vrcp.f32 %v9362_v1  ;;  %v9371_v49 = vpop.xlane.xlu0 %9370 }
0x1038   : > { %v15650_v39 = vpop.eup %15649  ;;  %15655 = vrcp.f32 %v9371_v49 }
0x1039   : > { %v9594_v8 = vpack.c.bf16 %v9547_v58, %v9546_v54  ;;  %v9545_v52 = vmul.f32 %v15650_v39, %v19967_v40  ;;  %v9365_v5 = vpop.xlane.xlu1 %9364 }
0x103a   : > { %15657 = vrcp.f32 %v9365_v5 }
0x103b   : > { %v9593_v61 = vpack.c.bf16 %v9545_v52, %v9544_v18  ;;  %14379 = vmatmul.mubr.msk.bf16.vlgmr.msra.gmra.mrb[48].mxu0 %vm2953_vm2, %v9594_v8 }
0x103c   : > { %14389 = vmatpush3.bf16.msra.mxu0 %v21688_v62  ;;  %14390 = vmatprep.mubr.msk.bf16.mxu0 %vm16134_vm0, %v21597_v31 }
0x103d   : > { %14373 = vmatmul.mubr.msk.bf16.vlgmr.msra.gmra.mrb[60].mxu1 %vm2953_vm2, %v9593_v61  ;;  %14400 = vmatprep.subr.bf16.mxu0 %v21597_v31  ;;  %v9374_v23 = vpop.xlane.xlu0 %9373 }
0x103e   : > { %14383 = vmatpush3.bf16.msra.mxu1 %v21689_v55  ;;  %14384 = vmatprep.mubr.msk.bf16.mxu1 %vm16134_vm0, %v21597_v31 }
0x103f   : > { %14394 = vmatprep.subr.bf16.mxu1 %v21597_v31 }
0x1040   : > { %v15652_v40 = vpop.eup %15651 }
0x1041   : > { %v15654_v4 = vpop.eup %15653  ;;  %v9380_v34 = vpop.xlane.xlu1 %9379  ;;  %v9550_v29 = vmul.f32 %v15652_v40, %v19996_v60  ;;  %v21691_v60 = vld [vmem:[#allocation45_spill] sm:$0xff] }
0x1042   : > { %v15656_v43 = vpop.eup %15655  ;;  %15659 = vrcp.f32 %v9380_v34  ;;  %v9548_v37 = vmul.f32 %v15654_v4, %v19983_v27 }
0x1043   : > { %v9551_v46 = vmul.f32 %v15656_v43, %v20001_v47  ;;  %15661 = vrcp.f32 %v9374_v23  ;;  %v9383_v22 = vpop.xlane.xlu0 %9382 }
0x1044   : > { %v15658_v44 = vpop.eup %15657  ;;  %15663 = vrcp.f32 %v9383_v22  ;;  %v21694_v22 = vld [vmem:[#allocation56_spill] sm:$0xff] }
0x1045   : > { %v9596_v38 = vpack.c.bf16 %v9551_v46, %v9550_v29  ;;  %v9549_v26 = vmul.f32 %v15658_v44, %v19994_v14  ;;  %v9377_v11 = vpop.xlane.xlu1 %9376 }
0x1046   : > { %15665 = vrcp.f32 %v9377_v11  ;;  %v21696_v11 = vld [vmem:[#allocation37_spill] sm:$0xff] }
0x1047   : > { %v9595_v0 = vpack.c.bf16 %v9549_v26, %v9548_v37  ;;  %14391 = vmatmul.mubr.msk.bf16.vlgmr.msra.gmra.mrb[52].mxu0 %vm2953_vm2, %v9596_v38 }
0x1048   : > { %14401 = vmatpush3.bf16.msra.mxu0 %v21690_v48  ;;  %14402 = vmatprep.mubr.msk.bf16.mxu0 %vm16134_vm0, %v21597_v31 }
0x1049   : > { %14385 = vmatmul.mubr.msk.bf16.vlgmr.msra.gmra.mrb[64].mxu1 %vm2953_vm2, %v9595_v0  ;;  %14412 = vmatprep.subr.bf16.mxu0 %v21597_v31  ;;  %v9386_v27 = vpop.xlane.xlu0 %9385 }
0x104a   : > { %14395 = vmatpush3.bf16.msra.mxu1 %v21691_v60  ;;  %14396 = vmatprep.mubr.msk.bf16.mxu1 %vm16134_vm0, %v21597_v31 }
0x104b   : > { %14406 = vmatprep.subr.bf16.mxu1 %v21597_v31 }
0x104c   : > { %v15660_v14 = vpop.eup %15659 }
0x104d   : > { %v15662_v47 = vpop.eup %15661  ;;  %v9392_v42 = vpop.xlane.xlu1 %9391  ;;  %v9554_v19 = vmul.f32 %v15660_v14, %v20023_v51  ;;  %v21692_v51 = vld [vmem:[#allocation61_spill] sm:$0xff] }
0x104e   : > { %v15664_v63 = vpop.eup %15663  ;;  %15667 = vrcp.f32 %v9392_v42  ;;  %v9552_v15 = vmul.f32 %v15662_v47, %v20010_v25 }
0x104f   : > { %v9555_v10 = vmul.f32 %v15664_v63, %v20028_v57  ;;  %15669 = vrcp.f32 %v9386_v27  ;;  %v9395_v1 = vpop.xlane.xlu0 %9394  ;;  %v21697_v27 = vld [vmem:[#allocation65_spill] sm:$0xff] }
0x1050   : > { %v15666_v28 = vpop.eup %15665  ;;  %15671 = vrcp.f32 %v9395_v1 }
0x1051   : > { %v9598_v12 = vpack.c.bf16 %v9555_v10, %v9554_v19  ;;  %v9553_v3 = vmul.f32 %v15666_v28, %v20021_v6  ;;  %v9389_v54 = vpop.xlane.xlu1 %9388  ;;  %v21693_v6 = vld [vmem:[#allocation60_spill] sm:$0xff] }
0x1052   : > { %15673 = vrcp.f32 %v9389_v54 }
0x1053   : > { %v9597_v58 = vpack.c.bf16 %v9553_v3, %v9552_v15  ;;  %v20260_v49 = vpop.f32.mrb[16].mxu0  ;;  %14403 = vmatmul.mubr.msk.bf16.vlgmr.msra.gmra.mrb[56].mxu0 %vm2953_vm2, %v9598_v12  ;;  %v21699_v3 = vld [vmem:[#allocation51_spill] sm:$0xff] }
0x1054   : > { %v14284_v39 = vpop.f32.mrb[17].mxu0  ;;  %14413 = vmatpush3.bf16.msra.mxu0 %v21692_v51  ;;  %14414 = vmatprep.mubr.msk.bf16.mxu0 %vm16134_vm0, %v21597_v31 }
0x1055   : > { %v20266_v57 = vpop.f32.mrb[18].mxu0  ;;  %14397 = vmatmul.mubr.msk.bf16.vlgmr.msra.gmra.mrb[68].mxu1 %vm2953_vm2, %v9597_v58  ;;  %14424 = vmatprep.subr.bf16.mxu0 %v21597_v31  ;;  %v9398_v18 = vpop.xlane.xlu0 %9397 }
0x1056   : > { %v14285_v25 = vpop.f32.mrb[19].mxu0  ;;  %14407 = vmatpush3.bf16.msra.mxu1 %v21693_v6  ;;  %14408 = vmatprep.mubr.msk.bf16.mxu1 %vm16134_vm0, %v21597_v31 }
0x1057   : > { %14418 = vmatprep.subr.bf16.mxu1 %v21597_v31 }
0x1058   : > { %v15668_v8 = vpop.eup %15667 }
0x1059   : > { %v15670_v52 = vpop.eup %15669  ;;  %v9404_v5 = vpop.xlane.xlu1 %9403  ;;  %v9558_v62 = vmul.f32 %v15668_v8, %v20050_v41 }
0x105a   : > { %v15672_v61 = vpop.eup %15671  ;;  %15675 = vrcp.f32 %v9404_v5  ;;  %v9556_v4 = vmul.f32 %v15670_v52, %v20037_v2 }
0x105b   : > { %v9559_v55 = vmul.f32 %v15672_v61, %v20055_v35  ;;  %15677 = vrcp.f32 %v9398_v18  ;;  %v9407_v23 = vpop.xlane.xlu0 %9406  ;;  %v21695_v35 = vld [vmem:[#allocation22_spill] sm:$0xff] }
0x105c   : > { %v15674_v40 = vpop.eup %15673  ;;  %15679 = vrcp.f32 %v9407_v23 }
0x105d   : > { %v9600_v34 = vpack.c.bf16 %v9559_v55, %v9558_v62  ;;  %v9557_v43 = vmul.f32 %v15674_v40, %v20048_v33  ;;  %v9401_v29 = vpop.xlane.xlu1 %9400  ;;  %v21700_v62 = vld [vmem:[#allocation58_spill] sm:$0xff] }
0x105e   : > { %15681 = vrcp.f32 %v9401_v29 }
0x105f   : > { %v9599_v46 = vpack.c.bf16 %v9557_v43, %v9556_v4  ;;  %14415 = vmatmul.mubr.msk.bf16.vlgmr.msra.gmra.mrb[60].mxu0 %vm2953_vm2, %v9600_v34 }
0x1060   : > { %14425 = vmatpush3.bf16.msra.mxu0 %v21694_v22  ;;  %14426 = vmatprep.mubr.msk.bf16.mxu0 %vm16134_vm0, %v21597_v31 }
0x1061   : > { %14409 = vmatmul.mubr.msk.bf16.vlgmr.msra.gmra.mrb[72].mxu1 %vm2953_vm2, %v9599_v46  ;;  %v9410_v41 = vpop.xlane.xlu0 %9409  ;;  %14436 = vmatprep.subr.bf16.mxu0 %v21597_v31 }
0x1062   : > { %14419 = vmatpush3.bf16.msra.mxu1 %v21695_v35  ;;  %14420 = vmatprep.mubr.msk.bf16.mxu1 %vm16134_vm0, %v21597_v31  ;;  %15683 = vrcp.f32 %v9410_v41 }
0x1063   : > { %v9413_v2 = vpop.xlane.xlu1 %9412  ;;  %14430 = vmatprep.subr.bf16.mxu1 %v21597_v31 }
0x1064   : > { %v15676_v33 = vpop.eup %15675  ;;  %15685 = vrcp.f32 %v9413_v2 }
0x1065   : > { %v15678_v44 = vpop.eup %15677  ;;  %v9416_v37 = vpop.xlane.xlu0 %9415  ;;  %v9562_v26 = vmul.f32 %v15676_v33, %v20077_v20  ;;  %v21698_v20 = vld [vmem:[#allocation53_spill] sm:$0xff] }
0x1066   : > { %v15680_v38 = vpop.eup %15679  ;;  %15687 = vrcp.f32 %v9416_v37  ;;  %v9560_v14 = vmul.f32 %v15678_v44, %v21697_v27 }
0x1067   : > { %v9563_v0 = vmul.f32 %v15680_v38, %v21696_v11  ;;  %v9419_v48 = vpop.xlane.xlu1 %9418 }
0x1068   : > { %v15682_v60 = vpop.eup %15681  ;;  %15689 = vrcp.f32 %v9419_v48 }
0x1069   : > { %v9602_v47 = vpack.c.bf16 %v9563_v0, %v9562_v26  ;;  %v9561_v42 = vmul.f32 %v15682_v60, %v20075_v50  ;;  %v20292_v63 = vpop.f32.mrb[32].mxu1 }
0x106a   : > { %v14290_v19 = vpop.f32.mrb[33].mxu1 }
0x106b   : > { %v9601_v10 = vpack.c.bf16 %v9561_v42, %v9560_v14  ;;  %v20294_v1 = vpop.f32.mrb[34].mxu1  ;;  %14427 = vmatmul.mubr.msk.bf16.vlgmr.msra.gmra.mrb[64].mxu0 %vm2953_vm2, %v9602_v47 }
0x106c   : > { %v14291_v28 = vpop.f32.mrb[35].mxu1  ;;  %14437 = vmatpush3.bf16.msra.mxu0 %v21698_v20  ;;  %14438 = vmatprep.mubr.msk.bf16.mxu0 %vm16134_vm0, %v21597_v31  ;;  %v15684_v15 = vpop.eup %15683 }
0x106d   : > { %14421 = vmatmul.mubr.msk.bf16.vlgmr.msra.gmra.mrb[76].mxu1 %vm2953_vm2, %v9601_v10  ;;  %v9422_v12 = vpop.xlane.xlu0 %9421  ;;  %14448 = vmatprep.subr.bf16.mxu0 %v21597_v31  ;;  %v9564_v39 = vmul.f32 %v15684_v15, %v20091_v36 }
0x106e   : > { %v15686_v50 = vpop.eup %15685  ;;  %14431 = vmatpush3.bf16.msra.mxu1 %v21699_v3  ;;  %14432 = vmatprep.mubr.msk.bf16.mxu1 %vm16134_vm0, %v21597_v31  ;;  %15691 = vrcp.f32 %v9422_v12 }
0x106f   : > { %v9565_v54 = vmul.f32 %v15686_v50, %v20100_v13  ;;  %14442 = vmatprep.subr.bf16.mxu1 %v21597_v31 }
0x1070   : > { %v15688_v58 = vpop.eup %15687 }
0x1071   : > { %v9428_v51 = vpop.xlane.xlu0 %9427  ;;  %v9603_v6 = vpack.c.bf16 %v9565_v54, %v9564_v39  ;;  %v9566_v18 = vmul.f32 %v15688_v58, %v20106_v24 }
0x1072   : > { %v15690_v25 = vpop.eup %15689 }
0x1073   : > { %v9567_v8 = vmul.f32 %v15690_v25, %v20111_v7  ;;  %v9431_v24 = vpop.xlane.xlu1 %9430 }
0x1075   : > { %v9604_v52 = vpack.c.bf16 %v9567_v8, %v9566_v18  ;;  %v20310_v5 = vpop.f32.mrb[20].mxu0  ;;  %14433 = vmatmul.mubr.msk.bf16.vlgmr.msra.gmra.mrb[80].mxu1 %vm2953_vm2, %v9603_v6  ;;  %v9425_v61 = vpop.xlane.xlu0 %9424 }
0x1076   : > { %v14296_v13 = vpop.f32.mrb[21].mxu0  ;;  %14443 = vmatpush3.bf16.msra.mxu1 %v21700_v62  ;;  %15693 = vrcp.f32 %v9425_v61  ;;  %14444 = vmatprep.mubr.msk.bf16.mxu1 %vm16134_vm0, %v21597_v31 }
0x1077   : > { %v20316_v36 = vpop.f32.mrb[22].mxu0  ;;  %14439 = vmatmul.mubr.msk.bf16.vlgmr.msra.gmra.mrb[68].mxu0 %vm2953_vm2, %v9604_v52  ;;  %14454 = vmatprep.subr.bf16.mxu1 %v21597_v31  ;;  %15695 = vrcp.f32 %v9431_v24 }
0x1078   : > { %v14297_v7 = vpop.f32.mrb[23].mxu0  ;;  %14450 = vmatprep.mubr.msk.bf16.mxu0 %vm16134_vm0, %v21597_v31  ;;  %v15692_v40 = vpop.eup %15691 }
0x1079   : > { %v9434_v55 = vpop.xlane.xlu0 %9433  ;;  %v9440_v4 = vpop.xlane.xlu1 %9439  ;;  %v9568_v43 = vmul.f32 %v15692_v40, %v20120_v21  ;;  %v21701_v7 = vmov 0  }
0x107a   : > { %15697 = vrcp.f32 %v9434_v55 }
0x107b   : > { %15699 = vrcp.f32 %v9428_v51 }
0x107d   : > { %v9437_v23 = vpop.xlane.xlu0 %9436  ;;  %v7357_v37 = vpop.permute.xlu1 %7356 }
0x107e   : > { %15701 = vrcp.f32 %v9437_v23 }
0x1080   : > { %v15694_v34 = vpop.eup %15693 }
0x1081   : > { %v9569_v29 = vmul.f32 %v15694_v34, %v20135_v59  ;;  %v20324_v46 = vpop.f32.mrb[36].mxu1  ;;  %v9443_v41 = vpop.xlane.xlu0 %9442 }
0x1082   : > { %v14302_v22 = vpop.f32.mrb[37].mxu1  ;;  %15703 = vrcp.f32 %v9443_v41  ;;  %v15696_v44 = vpop.eup %15695 }
0x1083   : > { %v9605_v35 = vpack.c.bf16 %v9569_v29, %v9568_v43  ;;  %v20326_v2 = vpop.f32.mrb[38].mxu1  ;;  %15705 = vrcp.f32 %v9440_v4  ;;  %v9571_v11 = vmul.f32 %v15696_v44, %v20139_v53  ;;  %v7359_v10 = vpop.permute.xlu1 %7358 }
0x1084   : > { %v14303_v33 = vpop.f32.mrb[39].mxu1  ;;  %v15698_v38 = vpop.eup %15697 }
0x1085   : > { %14445 = vmatmul.mubr.msk.bf16.vlgmr.msra.gmra.mrb[84].mxu1 %vm2953_vm2, %v9605_v35  ;;  %v9446_v26 = vpop.xlane.xlu0 %9445  ;;  %v15700_v21 = vpop.eup %15699  ;;  %v9572_v0 = vmul.f32 %v15698_v38, %v20145_v30 }
0x1086   : > { %14455 = vmatpush3.bf16.msra.mxu1 %v7357_v37  ;;  %14456 = vmatprep.mubr.msk.bf16.mxu1 %vm16134_vm0, %v21597_v31  ;;  %v9570_v60 = vmul.f32 %v15700_v21, %v20133_v17  ;;  %15707 = vrcp.f32 %v9446_v26 }
0x1087   : > { %14466 = vmatprep.subr.bf16.mxu1 %v21597_v31 }
0x1088   : > { %v15702_v59 = vpop.eup %15701  ;;  %v9606_v47 = vpack.c.bf16 %v9571_v11, %v9570_v60 }
0x1089   : > { %v9573_v48 = vmul.f32 %v15702_v59, %v20153_v32  ;;  %v7355_v27 = vpop.permute.xlu0 %7354 }
0x108a   : > { %14449 = vmatpush3.bf16.msra.mxu0 %v7355_v27 }
0x108b   : > { %v9607_v14 = vpack.c.bf16 %v9573_v48, %v9572_v0  ;;  %14460 = vmatprep.subr.bf16.mxu0 %v21597_v31 }
0x108c   : > { %v15704_v42 = vpop.eup %15703 }
0x108d   : > { %v20337_v19 = vpop.f32.mrb[24].mxu0  ;;  %14457 = vmatmul.mubr.msk.bf16.vlgmr.msra.gmra.mrb[88].mxu1 %vm2953_vm2, %v9607_v14  ;;  %14451 = vmatmul.mubr.msk.bf16.vlgmr.msra.gmra.mrb[72].mxu0 %vm2953_vm2, %v9606_v47  ;;  %v15706_v53 = vpop.eup %15705  ;;  %v9575_v30 = vmul.f32 %v15704_v42, %v20157_v9 }
0x108e   : > { %v14308_v28 = vpop.f32.mrb[25].mxu0  ;;  %14468 = vmatprep.mubr.msk.bf16.mxu1 %vm16134_vm0, %v21597_v31  ;;  %14461 = vmatpush3.bf16.msra.mxu0 %v7359_v10  ;;  %v9574_v20 = vmul.f32 %v15706_v53, %v20147_v45 }
0x108f   : > { %v20343_v17 = vpop.f32.mrb[26].mxu0  ;;  %14462 = vmatprep.mubr.msk.bf16.mxu0 %vm16134_vm0, %v21597_v31 }
0x1090   : > { %v14309_v32 = vpop.f32.mrb[27].mxu0  ;;  %v9608_v15 = vpack.c.bf16 %v9575_v30, %v9574_v20  ;;  %v15708_v52 = vpop.eup %15707 }
0x1091   : > { %v9576_v13 = vmul.f32 %v15708_v52, %v20161_v16 }
0x1095   : > { %14463 = vmatmul.mubr.msk.bf16.vlgmr.msra.gmra.mrb[76].mxu0 %vm2953_vm2, %v9608_v15 }
0x1099   : > { %v20350_v12 = vpop.f32.mrb[40].mxu1 }
0x109a   : > { %v14314_v50 = vpop.f32.mrb[41].mxu1 }
0x109b   : > { %v20352_v3 = vpop.f32.mrb[42].mxu1 }
0x109c   : > { %v14315_v54 = vpop.f32.mrb[43].mxu1 }
0x10a5   : > { %v20354_v58 = vpop.f32.mrb[28].mxu0 }
0x10a6   : > { %v14320_v39 = vpop.f32.mrb[29].mxu0 }
0x10a7   : > { %v20356_v51 = vpop.f32.mrb[30].mxu0 }
0x10a8   : > { %v14321_v31 = vpop.f32.mrb[31].mxu0 }
0x10b1   : > { %v20358_v9 = vpop.f32.mrb[44].mxu1 }
0x10b2   : > { %v14326_v25 = vpop.f32.mrb[45].mxu1  ;;  %v9449_v45 = vpop.xlane.xlu1 %9448 }
0x10b3   : > { %v20360_v6 = vpop.f32.mrb[46].mxu1  ;;  %15709 = vrcp.f32 %v9449_v45 }
0x10b4   : > { %v14327_v18 = vpop.f32.mrb[47].mxu1 }
0x10b6   : > { %v7361_v8 = vpop.permute.xlu1 %7360 }
0x10b7   : > { %14467 = vmatpush3.bf16.msra.mxu1 %v7361_v8 }
0x10bd   : > { %v15710_v61 = vpop.eup %15709 }
0x10be   : > { %v9577_v62 = vmul.f32 %v15710_v61, %v20215_v56 }
0x10c0   : > { %v9609_v24 = vpack.c.bf16 %v9577_v62, %v9576_v13 }
0x10c2   : > { %14469 = vmatmul.mubr.msk.bf16.vlgmr.msra.gmra.mrb[92].mxu1 %vm2953_vm2, %v9609_v24  ;;  %v14991_v24 = vld [vmem:[#allocation11 + $0x40] sm:$0xff]  }
0x10c3   : > { %11826 = vmatprep.mubr.bf16.mxu1 %v21701_v7  ;;  %14472 = vmatprep.subr.bf16.mxu0 %v14991_v24 }
0x10c4   : > { %14473 = vmatpush3.bf16.msra.mxu0 %v14991_v24 }
0x10c8   : > { %v9999_v55 = vpop.f32.mrb[32].mxu0 }
0x10c9   : > { %v14332_v23 = vpop.f32.mrb[33].mxu0 }
0x10ca   : > { %v10002_v40 = vpop.f32.mrb[34].mxu0 }
0x10cb   : > { %v14759_v4 = vpack.i.bf16 %v10002_v40, %v9999_v55  ;;  %v14333_v34 = vpop.f32.mrb[35].mxu0  ;;  %v14992_v55 = vld [vmem:[#allocation11 + $0x48] sm:$0xff]  }
0x10cc   : > { %v10043_v43 = vpop.f32.mrb[48].mxu1  ;;  %14474 = vmatprep.subr.bf16.mxu0 %v14992_v55 }
0x10cd   : > { %v14338_v29 = vpop.f32.mrb[49].mxu1  ;;  %14760 = vrot.lane.b32.xlu0 %v14759_v4, %s16137_s12  ;;  %14475 = vmatpush3.bf16.msra.mxu0 %v14992_v55 }
0x10ce   : > { %v10046_v22 = vpop.f32.mrb[50].mxu1 }
0x10cf   : > { %v14764_v41 = vpack.i.bf16 %v10046_v22, %v10043_v43  ;;  %v14339_v35 = vpop.f32.mrb[51].mxu1 }
0x10d1   : > { %14765 = vrot.lane.b32.xlu1 %v14764_v41, %s16137_s12  ;;  %v14993_v41 = vld [vmem:[#allocation11 + $0x50] sm:$0xff]  }
0x10d2   : > { %14476 = vmatprep.subr.bf16.mxu0 %v14993_v41 }
0x10d3   : > { %14477 = vmatpush3.bf16.msra.mxu0 %v14993_v41  ;;  %v14997_v41 = vld [vmem:[#allocation11 + $0x70] sm:$0xff]  }
0x10d4   : > { %v20368_v16 = vpop.f32.mrb[36].mxu0 }
0x10d5   : > { %v14344_v56 = vpop.f32.mrb[37].mxu0 }
0x10d6   : > { %v20370_v33 = vpop.f32.mrb[38].mxu0 }
0x10d7   : > { %v14789_v44 = vpack.i.bf16 %v20370_v33, %v20368_v16  ;;  %v14345_v37 = vpop.f32.mrb[39].mxu0 }
0x10d8   : > { %v14994_v37 = vld [vmem:[#allocation11 + $0x58] sm:$0xff]  }
0x10d9   : > { %14478 = vmatprep.subr.bf16.mxu0 %v14994_v37 }
0x10da   : > { %14479 = vmatpush3.bf16.msra.mxu0 %v14994_v37 }
0x10dc   : > { %v20374_v38 = vpop.f32.mrb[52].mxu1 }
0x10dd   : > { %v14350_v26 = vpop.f32.mrb[53].mxu1 }
0x10de   : > { %v20376_v21 = vpop.f32.mrb[54].mxu1 }
0x10df   : > { %v14794_v59 = vpack.i.bf16 %v20376_v21, %v20374_v38  ;;  %v14351_v11 = vpop.f32.mrb[55].mxu1 }
0x10e0   : > { %v14995_v11 = vld [vmem:[#allocation11 + $0x60] sm:$0xff]  }
0x10e1   : > { %14480 = vmatprep.subr.bf16.mxu0 %v14995_v11 }
0x10e2   : > { %14481 = vmatpush3.bf16.msra.mxu0 %v14995_v11 }
0x10e4   : > { %v20380_v0 = vpop.f32.mrb[40].mxu0 }
0x10e5   : > { %v14356_v48 = vpop.f32.mrb[41].mxu0 }
0x10e6   : > { %v20382_v60 = vpop.f32.mrb[42].mxu0 }
0x10e7   : > { %v14819_v27 = vpack.i.bf16 %v20382_v60, %v20380_v0  ;;  %v14357_v14 = vpop.f32.mrb[43].mxu0 }
0x10ec   : > { %v20386_v47 = vpop.f32.mrb[56].mxu1 }
0x10ed   : > { %v14362_v42 = vpop.f32.mrb[57].mxu1 }
0x10ee   : > { %v20388_v10 = vpop.f32.mrb[58].mxu1 }
0x10ef   : > { %v14824_v28 = vpack.i.bf16 %v20388_v10, %v20386_v47  ;;  %v14363_v53 = vpop.f32.mrb[59].mxu1 }
0x1102   : > { %v20392_v30 = vpop.f32.mrb[44].mxu0 }
0x1103   : > { %v14368_v32 = vpop.f32.mrb[45].mxu0 }
0x1104   : > { %v20394_v20 = vpop.f32.mrb[46].mxu0 }
0x1105   : > { %v14849_v15 = vpack.i.bf16 %v20394_v20, %v20392_v30  ;;  %v14369_v50 = vpop.f32.mrb[47].mxu0 }
0x110e   : > { %v10351_v54 = vpop.f32.mrb[48].mxu0 }
0x110f   : > { %v14380_v39 = vpop.f32.mrb[49].mxu0 }
0x1110   : > { %v20398_v31 = vpop.f32.mrb[60].mxu1  ;;  %v10354_v25 = vpop.f32.mrb[50].mxu0 }
0x1111   : > { %v14769_v45 = vpack.i.bf16 %v10354_v25, %v10351_v54  ;;  %v14374_v18 = vpop.f32.mrb[61].mxu1  ;;  %v14381_v8 = vpop.f32.mrb[51].mxu0 }
0x1112   : > { %v20400_v52 = vpop.f32.mrb[62].mxu1 }
0x1113   : > { %v14854_v61 = vpack.i.bf16 %v20400_v52, %v20398_v31  ;;  %v14375_v13 = vpop.f32.mrb[63].mxu1  ;;  %14770 = vrot.lane.b32.xlu0 %v14769_v45, %s16136_s17 }
0x111a   : > { %v20405_v62 = vpop.f32.mrb[52].mxu0 }
0x111b   : > { %v14392_v23 = vpop.f32.mrb[53].mxu0 }
0x111c   : > { %v10395_v40 = vpop.f32.mrb[64].mxu1  ;;  %v20407_v4 = vpop.f32.mrb[54].mxu0 }
0x111d   : > { %v14799_v34 = vpack.i.bf16 %v20407_v4, %v20405_v62  ;;  %v14386_v43 = vpop.f32.mrb[65].mxu1  ;;  %v14393_v29 = vpop.f32.mrb[55].mxu0 }
0x111e   : > { %v10398_v22 = vpop.f32.mrb[66].mxu1 }
0x111f   : > { %v14774_v35 = vpack.i.bf16 %v10398_v22, %v10395_v40  ;;  %v14387_v56 = vpop.f32.mrb[67].mxu1  ;;  %v14996_v22 = vld [vmem:[#allocation11 + $0x68] sm:$0xff]  }
0x1120   : > { %14482 = vmatprep.subr.bf16.mxu0 %v14996_v22 }
0x1121   : > { %14775 = vrot.lane.b32.xlu1 %v14774_v35, %s16136_s17  ;;  %14483 = vmatpush3.bf16.msra.mxu0 %v14996_v22 }
0x1122   : > { %14484 = vmatprep.subr.bf16.mxu0 %v14997_v41 }
0x1125   : > { %14485 = vmatpush3.bf16.msra.mxu0 %v14997_v41 }
0x1126   : > { %v10527_v26 = vpop.f32.mrb[56].mxu0 }
0x1127   : > { %v14404_v48 = vpop.f32.mrb[57].mxu0 }
0x1128   : > { %v10483_v14 = vpop.f32.mrb[68].mxu1  ;;  %v10530_v42 = vpop.f32.mrb[58].mxu0 }
0x1129   : > { %v14829_v53 = vpack.i.bf16 %v10530_v42, %v10527_v26  ;;  %v14398_v32 = vpop.f32.mrb[69].mxu1  ;;  %v14405_v50 = vpop.f32.mrb[59].mxu0 }
0x112a   : > { %v10486_v54 = vpop.f32.mrb[70].mxu1 }
0x112b   : > { %v14804_v39 = vpack.i.bf16 %v10486_v54, %v10483_v14  ;;  %v14399_v25 = vpop.f32.mrb[71].mxu1  ;;  %v14998_v54 = vld [vmem:[#allocation11 + $0x78] sm:$0xff]  }
0x112c   : > { %14486 = vmatprep.subr.bf16.mxu0 %v14998_v54 }
0x112d   : > { %14487 = vmatpush3.bf16.msra.mxu0 %v14998_v54 }
0x1132   : > { %v20412_v45 = vpop.f32.mrb[60].mxu0 }
0x1133   : > { %v14416_v18 = vpop.f32.mrb[61].mxu0 }
0x1134   : > { %v20414_v8 = vpop.f32.mrb[72].mxu1  ;;  %v20416_v13 = vpop.f32.mrb[62].mxu0 }
0x1135   : > { %v14859_v24 = vpack.i.bf16 %v20416_v13, %v20412_v45  ;;  %v14410_v55 = vpop.f32.mrb[73].mxu1  ;;  %v14417_v23 = vpop.f32.mrb[63].mxu0 }
0x1136   : > { %v10574_v40 = vpop.f32.mrb[74].mxu1 }
0x1137   : > { %v14834_v43 = vpack.i.bf16 %v10574_v40, %v20414_v8  ;;  %v14411_v29 = vpop.f32.mrb[75].mxu1 }
0x113e   : > { %v10703_v35 = vpop.f32.mrb[64].mxu0 }
0x113f   : > { %v14428_v56 = vpop.f32.mrb[65].mxu0 }
0x1140   : > { %v10659_v37 = vpop.f32.mrb[76].mxu1  ;;  %v10706_v26 = vpop.f32.mrb[66].mxu0 }
0x1141   : > { %v14422_v11 = vpop.f32.mrb[77].mxu1  ;;  %v14779_v48 = vpack.i.bf16 %v10706_v26, %v10703_v35  ;;  %v14429_v14 = vpop.f32.mrb[67].mxu0 }
0x1142   : > { %v10662_v42 = vpop.f32.mrb[78].mxu1 }
0x1143   : > { %v14864_v32 = vpack.i.bf16 %v10662_v42, %v10659_v37  ;;  %v14423_v50 = vpop.f32.mrb[79].mxu1  ;;  %14780 = vrot.lane.b32.xlu0 %v14779_v48, %s16135_s1  ;;  %v14761_v48 = vpop.permute.xlu0 %14760 }
0x1144   : > { %v14763_v31 = vunpack.i.h.bf16 %v14761_v48  ;;  %v14762_v52 = vunpack.i.l.bf16 %v14761_v48  ;;  %v14766_v50 = vpop.permute.xlu1 %14765 }
0x1146   : > { %v11211_v13 = vsel %vm1448_vm1, %v20266_v57, %v14763_v31 }
0x1147   : > { %14790 = vrot.lane.b32.xlu0 %v14789_v44, %s16137_s12 }
0x1148   : > { %v10747_v25 = vpop.f32.mrb[80].mxu1 }
0x1149   : > { %v14434_v18 = vpop.f32.mrb[81].mxu1 }
0x114a   : > { %v10750_v8 = vpop.f32.mrb[82].mxu1  ;;  %v10791_v55 = vpop.f32.mrb[68].mxu0 }
0x114b   : > { %v14784_v23 = vpack.i.bf16 %v10750_v8, %v10747_v25  ;;  %v14435_v40 = vpop.f32.mrb[83].mxu1  ;;  %v14440_v29 = vpop.f32.mrb[69].mxu0  ;;  %14800 = vrot.lane.b32.xlu0 %v14799_v34, %s16136_s17 }
0x114c   : > { %v10794_v22 = vpop.f32.mrb[70].mxu0 }
0x114d   : > { %v14809_v41 = vpack.i.bf16 %v10794_v22, %v10791_v55  ;;  %14785 = vrot.lane.b32.xlu1 %v14784_v23, %s16135_s1  ;;  %v14441_v35 = vpop.f32.mrb[71].mxu0  ;;  %v14768_v22 = vunpack.i.h.bf16 %v14766_v50 }
0x114f   : > { %14810 = vrot.lane.b32.xlu0 %v14809_v41, %s16135_s1  ;;  %v14767_v41 = vunpack.i.l.bf16 %v14766_v50 }
0x1151   : > { %14795 = vrot.lane.b32.xlu1 %v14794_v59, %s16137_s12 }
0x1153   : > { %14820 = vrot.lane.b32.xlu0 %v14819_v27, %s16137_s12 }
0x1155   : > { %14805 = vrot.lane.b32.xlu1 %v14804_v39, %s16136_s17 }
0x1157   : > { %14830 = vrot.lane.b32.xlu0 %v14829_v53, %s16136_s17 }
0x1158   : > { %v10835_v16 = vpop.f32.mrb[84].mxu1 }
0x1159   : > { %v14446_v33 = vpop.f32.mrb[85].mxu1 }
0x115a   : > { %v10838_v44 = vpop.f32.mrb[86].mxu1  ;;  %v11213_v33 = vsel %vm1448_vm1, %v20294_v1, %v14768_v22 }
0x115b   : > { %v14814_v62 = vpack.i.bf16 %v10838_v44, %v10835_v16  ;;  %v14447_v4 = vpop.f32.mrb[87].mxu1  ;;  %v11212_v44 = vsel %vm1448_vm1, %v20292_v63, %v14767_v41 }
0x115d   : > { %14815 = vrot.lane.b32.xlu1 %v14814_v62, %s16135_s1 }
0x1160   : > { %v10923_v34 = vpop.f32.mrb[88].mxu1  ;;  %v10879_v56 = vpop.f32.mrb[72].mxu0 }
0x1161   : > { %14825 = vrot.lane.b32.xlu1 %v14824_v28, %s16137_s12  ;;  %v14458_v38 = vpop.f32.mrb[89].mxu1  ;;  %v14452_v21 = vpop.f32.mrb[73].mxu0 }
0x1162   : > { %v10926_v59 = vpop.f32.mrb[90].mxu1  ;;  %v10882_v0 = vpop.f32.mrb[74].mxu0 }
0x1163   : > { %v14844_v60 = vpack.i.bf16 %v10926_v59, %v10923_v34  ;;  %v14459_v27 = vpop.f32.mrb[91].mxu1  ;;  %v14839_v53 = vpack.i.bf16 %v10882_v0, %v10879_v56  ;;  %v14453_v39 = vpop.f32.mrb[75].mxu0 }
0x1165   : > { %14835 = vrot.lane.b32.xlu1 %v14834_v43, %s16136_s17  ;;  %14840 = vrot.lane.b32.xlu0 %v14839_v53, %s16135_s1 }
0x1168   : > { %v10967_v37 = vpop.f32.mrb[76].mxu0 }
0x1169   : > { %14845 = vrot.lane.b32.xlu1 %v14844_v60, %s16135_s1  ;;  %14850 = vrot.lane.b32.xlu0 %v14849_v15, %s16137_s12  ;;  %v14464_v47 = vpop.f32.mrb[77].mxu0 }
0x116a   : > { %v10970_v10 = vpop.f32.mrb[78].mxu0 }
0x116b   : > { %v14869_v28 = vpack.i.bf16 %v10970_v10, %v10967_v37  ;;  %v14465_v26 = vpop.f32.mrb[79].mxu0 }
0x116d   : > { %14855 = vrot.lane.b32.xlu1 %v14854_v61, %s16137_s12  ;;  %14860 = vrot.lane.b32.xlu0 %v14859_v24, %s16136_s17  ;;  %v11210_v24 = vsel %vm1448_vm1, %v20260_v49, %v14762_v52 }
0x1171   : > { %14865 = vrot.lane.b32.xlu1 %v14864_v32, %s16136_s17  ;;  %14870 = vrot.lane.b32.xlu0 %v14869_v28, %s16135_s1 }
0x1185   : > { %v14771_v14 = vpop.permute.xlu0 %14770 }
0x1186   : > { %v14773_v61 = vunpack.i.h.bf16 %v14771_v14  ;;  %v14772_v42 = vunpack.i.l.bf16 %v14771_v14 }
0x1188   : > { %v11226_v25 = vsel %vm5306_vm3, %v11210_v24, %v14772_v42  ;;  %v11227_v18 = vsel %vm5306_vm3, %v11211_v13, %v14773_v61 }
0x1193   : > { %v14776_v23 = vpop.permute.xlu1 %14775 }
0x1194   : > { %v14778_v57 = vunpack.i.h.bf16 %v14776_v23  ;;  %v14777_v35 = vunpack.i.l.bf16 %v14776_v23 }
0x1195   : > { %v11011_v30 = vpop.f32.mrb[92].mxu1 }
0x1196   : > { %v14470_v20 = vpop.f32.mrb[93].mxu1  ;;  %v11229_v59 = vsel %vm5306_vm3, %v11213_v33, %v14778_v57  ;;  %v11228_v0 = vsel %vm5306_vm3, %v11212_v44, %v14777_v35 }
0x1197   : > { %v11014_v15 = vpop.f32.mrb[94].mxu1 }
0x1198   : > { %v14874_v43 = vpack.i.bf16 %v11014_v15, %v11011_v30  ;;  %v14471_v11 = vpop.f32.mrb[95].mxu1 }
0x119a   : > { %14875 = vrot.lane.b32.xlu1 %v14874_v43, %s16135_s1  ;;  %s595_s1 = scalar_lea.vmem [#allocation15], %s12876_s13  ;;  %s16043_s13 = sshll.u32 %s16138_s24, 4  ;;  %s16044_s13 = int_to_ptr.vmem [resolvable:$false] %s16043_s13 }
0x119b   : > { %s12729_s17 = sshll.u32 %s595_s1, 4  ;;  %s21273_s17 = int_to_ptr.vmem [resolvable:$true] %s12729_s17 }
0x119c   : > { %s16039_s2 = scalar_lea.vmem %s21273_s17, 128  ;;  %p16046_p1 = scmp.lt.s32.totalorder %s21273_s17, %s16044_s13 }
0x119d   : > { %p16040_p6 = scmp.ne.s32.totalorder %s21273_s17, %s16039_s2 }
0x119f   : > { %p16041_p4 = pnand %p16040_p6, %p21727_p9 }
0x11a1   : > { %p16042_p13 = pneg %p16041_p4 }
0x11b5   : > { %v14781_v45 = vpop.permute.xlu0 %14780 }
0x11b6   : > { %v14783_v32 = vunpack.i.h.bf16 %v14781_v45  ;;  %v14782_v54 = vunpack.i.l.bf16 %v14781_v45 }
0x11b8   : > { %v11242_v8 = vsel %vm5323_vm4, %v11226_v25, %v14782_v54  ;;  %v11243_v55 = vsel %vm5323_vm4, %v11227_v18, %v14783_v32 }
0x11b9   : > { %v14791_v40 = vpop.permute.xlu0 %14790  ;;  %v11258_v29 = vpack.c.bf16 %v11243_v55, %v11242_v8 }
0x11ba   : > { %v14793_v16 = vunpack.i.h.bf16 %v14791_v40  ;;  %v14792_v62 = vunpack.i.l.bf16 %v14791_v40 }
0x11bb   : > { %14488 = vmatprep.mubr.bf16.mxu0 %v11258_v29 }
0x11bc   : > { %v11215_v60 = vsel %vm1448_vm1, %v20316_v36, %v14793_v16  ;;  %v11214_v63 = vsel %vm1448_vm1, %v20310_v5, %v14792_v62 }
0x11bd   : > { %v14801_v49 = vpop.permute.xlu0 %14800 }
0x11be   : > { %v14803_v34 = vunpack.i.h.bf16 %v14801_v49  ;;  %v14802_v56 = vunpack.i.l.bf16 %v14801_v49 }
0x11bf   : > { %v14786_v4 = vpop.permute.xlu1 %14785 }
0x11c0   : > { %v14788_v38 = vunpack.i.h.bf16 %v14786_v4  ;;  %v14787_v21 = vunpack.i.l.bf16 %v14786_v4  ;;  %v11230_v10 = vsel %vm5306_vm3, %v11214_v63, %v14802_v56  ;;  %v11231_v28 = vsel %vm5306_vm3, %v11215_v60, %v14803_v34 }
0x11c1   : > { %v14811_v53 = vpop.permute.xlu0 %14810 }
0x11c2   : > { %v11245_v27 = vsel %vm5323_vm4, %v11229_v59, %v14788_v38  ;;  %v11244_v1 = vsel %vm5323_vm4, %v11228_v0, %v14787_v21  ;;  %v14813_v37 = vunpack.i.h.bf16 %v14811_v53  ;;  %v14812_v47 = vunpack.i.l.bf16 %v14811_v53 }
0x11c3   : > { %v11259_v39 = vpack.c.bf16 %v11245_v27, %v11244_v1  ;;  %v14796_v26 = vpop.permute.xlu1 %14795 }
0x11c4   : > { %v11246_v30 = vsel %vm5323_vm4, %v11230_v10, %v14812_v47  ;;  %v11247_v36 = vsel %vm5323_vm4, %v11231_v28, %v14813_v37  ;;  %v14798_v43 = vunpack.i.h.bf16 %v14796_v26  ;;  %v14797_v11 = vunpack.i.l.bf16 %v14796_v26 }
0x11c5   : > { %14489 = vmatmul.mubr.bf16.vlgmr.msra.gmra.mrb[80].mxu0 %v11259_v39  ;;  %v11260_v20 = vpack.c.bf16 %v11247_v36, %v11246_v30  ;;  %v14821_v48 = vpop.permute.xlu0 %14820 }
0x11c6   : > { %v11217_v52 = vsel %vm1448_vm1, %v20326_v2, %v14798_v43  ;;  %v11216_v61 = vsel %vm1448_vm1, %v20324_v46, %v14797_v11  ;;  %v14823_v8 = vunpack.i.h.bf16 %v14821_v48  ;;  %v14822_v55 = vunpack.i.l.bf16 %v14821_v48 }
0x11c7   : > { %14492 = vmatprep.mubr.bf16.mxu0 %v11260_v20  ;;  %v14806_v15 = vpop.permute.xlu1 %14805 }
0x11c8   : > { %v14808_v5 = vunpack.i.h.bf16 %v14806_v15  ;;  %v14807_v14 = vunpack.i.l.bf16 %v14806_v15  ;;  %v11219_v29 = vsel %vm1448_vm1, %v20343_v17, %v14823_v8  ;;  %v11218_v22 = vsel %vm1448_vm1, %v20337_v19, %v14822_v55  ;;  %v13103_v8 = vld [vmem:[%s21321_s6 + $0x1] ss:$0 sm:$0xff] }
0x11c9   : > { %v14831_v54 = vpop.permute.xlu0 %14830 }
0x11ca   : > { %v11232_v45 = vsel %vm5306_vm3, %v11216_v61, %v14807_v14  ;;  %v11233_v13 = vsel %vm5306_vm3, %v11217_v52, %v14808_v5  ;;  %v14833_v2 = vunpack.i.h.bf16 %v14831_v54  ;;  %v14832_v23 = vunpack.i.l.bf16 %v14831_v54 }
0x11cc   : > { %v11234_v44 = vsel %vm5306_vm3, %v11218_v22, %v14832_v23  ;;  %v11235_v62 = vsel %vm5306_vm3, %v11219_v29, %v14833_v2 }
0x11cf   : > { %v14816_v31 = vpop.permute.xlu1 %14815 }
0x11d0   : > { %v14818_v42 = vunpack.i.h.bf16 %v14816_v31  ;;  %v14817_v50 = vunpack.i.l.bf16 %v14816_v31 }
0x11d2   : > { %v11249_v24 = vsel %vm5323_vm4, %v11233_v13, %v14818_v42  ;;  %v11248_v32 = vsel %vm5323_vm4, %v11232_v45, %v14817_v50 }
0x11d3   : > { %v11261_v25 = vpack.c.bf16 %v11249_v24, %v11248_v32  ;;  %v14826_v18 = vpop.permute.xlu1 %14825 }
0x11d4   : > { %v14828_v40 = vunpack.i.h.bf16 %v14826_v18  ;;  %v14827_v41 = vunpack.i.l.bf16 %v14826_v18 }
0x11d5   : > { %14493 = vmatmul.mubr.bf16.gmra.mrb[84].mxu0 %v11261_v25 }
0x11d6   : > { %v11221_v4 = vsel %vm1448_vm1, %v20352_v3, %v14828_v40  ;;  %v11220_v19 = vsel %vm1448_vm1, %v20350_v12, %v14827_v41  ;;  %v21703_v41 = vld [vmem:[#allocation66_spill] sm:$0xff] }
0x11d7   : > { %v14836_v46 = vpop.permute.xlu1 %14835  ;;  %v14841_v57 = vpop.permute.xlu0 %14840 }
0x11d8   : > { %v14838_v35 = vunpack.i.h.bf16 %v14836_v46  ;;  %v14837_v16 = vunpack.i.l.bf16 %v14836_v46  ;;  %v14843_v49 = vunpack.i.h.bf16 %v14841_v57  ;;  %v14842_v33 = vunpack.i.l.bf16 %v14841_v57  ;;  %v21702_v46 = vld [vmem:[#allocation41_spill] sm:$0xff] }
0x11da   : > { %v11250_v56 = vsel %vm5323_vm4, %v11234_v44, %v14842_v33  ;;  %v11251_v17 = vsel %vm5323_vm4, %v11235_v62, %v14843_v49  ;;  %v11236_v60 = vsel %vm5306_vm3, %v11220_v19, %v14837_v16  ;;  %v11237_v27 = vsel %vm5306_vm3, %v11221_v4, %v14838_v35  ;;  %v21704_v35 = vld [vmem:[#allocation67_spill] sm:$0xff]  ;;  %v21705_v33 = vld [vmem:[#allocation69_spill] sm:$0xff] }
0x11db   : > { %v14846_v34 = vpop.permute.xlu1 %14845  ;;  %v14851_v59 = vpop.permute.xlu0 %14850  ;;  %v11262_v0 = vpack.c.bf16 %v11251_v17, %v11250_v56 }
0x11dc   : > { %v14848_v38 = vunpack.i.h.bf16 %v14846_v34  ;;  %v14847_v21 = vunpack.i.l.bf16 %v14846_v34  ;;  %v14853_v39 = vunpack.i.h.bf16 %v14851_v59  ;;  %v14852_v37 = vunpack.i.l.bf16 %v14851_v59 }
0x11dd   : > { %14496 = vmatprep.mubr.bf16.mxu0 %v11262_v0 }
0x11de   : > { %v11253_v1 = vsel %vm5323_vm4, %v11237_v27, %v14848_v38  ;;  %v11252_v3 = vsel %vm5323_vm4, %v11236_v60, %v14847_v21  ;;  %v11223_v28 = vsel %vm1448_vm1, %v20356_v51, %v14853_v39  ;;  %v11222_v26 = vsel %vm1448_vm1, %v20354_v58, %v14852_v37  ;;  %v21706_v38 = vld [vmem:[#allocation68_spill] sm:$0xff] }
0x11df   : > { %v11263_v53 = vpack.c.bf16 %v11253_v1, %v11252_v3  ;;  %v14861_v63 = vpop.permute.xlu0 %14860  ;;  %v14856_v5 = vpop.permute.xlu1 %14855  ;;  %v21707_v60 = vld [vmem:[#allocation40_spill] sm:$0xff]  ;;  %v21708_v1 = vld [vmem:[#allocation70_spill] sm:$0xff] }
0x11e0   : > { %v14863_v47 = vunpack.i.h.bf16 %v14861_v63  ;;  %v14862_v12 = vunpack.i.l.bf16 %v14861_v63  ;;  %v14858_v31 = vunpack.i.h.bf16 %v14856_v5  ;;  %v14857_v52 = vunpack.i.l.bf16 %v14856_v5  ;;  %v21713_v5 = vld [vmem:[#allocation77_spill] sm:$0xff] }
0x11e1   : > { %14497 = vmatmul.mubr.bf16.gmra.mrb[88].mxu0 %v11263_v53  ;;  %v21709_v53 = vld [vmem:[#allocation72_spill] sm:$0xff] }
0x11e2   : > { %v11238_v20 = vsel %vm5306_vm3, %v11222_v26, %v14862_v12  ;;  %v11239_v15 = vsel %vm5306_vm3, %v11223_v28, %v14863_v47  ;;  %v11225_v58 = vsel %vm1448_vm1, %v20360_v6, %v14858_v31  ;;  %v11224_v50 = vsel %vm1448_vm1, %v20358_v9, %v14857_v52  ;;  %v21710_v26 = vld [vmem:[#allocation46_spill] sm:$0xff] }
0x11e3   : > { %v14871_v10 = vpop.permute.xlu0 %14870  ;;  %v14866_v14 = vpop.permute.xlu1 %14865 }
0x11e4   : > { %v14873_v30 = vunpack.i.h.bf16 %v14871_v10  ;;  %v14872_v36 = vunpack.i.l.bf16 %v14871_v10  ;;  %v14868_v51 = vunpack.i.h.bf16 %v14866_v14  ;;  %v14867_v61 = vunpack.i.l.bf16 %v14866_v14 }
0x11e6   : > { %v11254_v43 = vsel %vm5323_vm4, %v11238_v20, %v14872_v36  ;;  %v11255_v11 = vsel %vm5323_vm4, %v11239_v15, %v14873_v30  ;;  %v11240_v24 = vsel %vm5306_vm3, %v11224_v50, %v14867_v61  ;;  %v11241_v32 = vsel %vm5306_vm3, %v11225_v58, %v14868_v51  ;;  %v21711_v15 = vld [vmem:[#allocation71_spill] sm:$0xff]  ;;  %v21714_v50 = vld [vmem:[#allocation73_spill] sm:$0xff] }
0x11e7   : > { %v11264_v48 = vpack.c.bf16 %v11255_v11, %v11254_v43  ;;  %v21712_v11 = vld [vmem:[#allocation76_spill] sm:$0xff] }
0x11e9   : > { %14500 = vmatprep.mubr.bf16.mxu0 %v11264_v48 }
0x120c   : > { %v14876_v42 = vpop.permute.xlu1 %14875 }
0x120d   : > { %v14878_v45 = vunpack.i.h.bf16 %v14876_v42  ;;  %v14877_v13 = vunpack.i.l.bf16 %v14876_v42 }
0x120f   : > { %v11257_v54 = vsel %vm5323_vm4, %v11241_v32, %v14878_v45  ;;  %v11256_v25 = vsel %vm5323_vm4, %v11240_v24, %v14877_v13  ;;  %v21715_v32 = vld [vmem:[#allocation74_spill] sm:$0xff] }
0x1210   : > { %v11265_v18 = vpack.c.bf16 %v11257_v54, %v11256_v25  ;;  %v21716_v25 = vld [vmem:[#allocation42_spill] sm:$0xff] }
0x1212   : > { %14501 = vmatmul.mubr.bf16.gmra.mrb[92].mxu0 %v11265_v18 }
0x1298   : > { %v14490_v6 = vpop.f32.mrb[80].mxu0 }
0x1299   : > { %v11373_v55 = vpop.f32.mrb[81].mxu0  ;;  %v11382_v40 = vadd.f32 %v14490_v6, %v13103_v8  ;;  %v21717_v6 = vld [vmem:[#allocation75_spill] sm:$0xff] }
0x129a   : > { %v11374_v2 = vadd.f32 %v13103_v8, %v11373_v55  ;;  %v14491_v9 = vpop.f32.mrb[82].mxu0 }
0x129b   : > { %v11376_v23 = vpop.f32.mrb[83].mxu0  ;;  %v20540_v16 = vadd.f32 %v11382_v40, %v21704_v35  ;;  %v11385_v49 = vadd.f32 %v14491_v9, %v13103_v8  ;;  %v15001_v9 = vld [vmem:[#allocation12 + $0x84] ss:$8 sps:$4 sm:$0xff]  }
0x129c   : > { %v20533_v29 = vadd.f32 %v11374_v2, %v21702_v46  ;;  %v11377_v22 = vadd.f32 %v13103_v8, %v11376_v23  ;;  %v14999_v2 = vld [vmem:[#allocation12 + $0x80] ss:$8 sps:$4 sm:$0xff]   ;;  %11794 = vmatprep.subr.bf16.mxu1 %v15001_v9  ;;  %v15002_v23 = vld [vmem:[#allocation12 + $0x90] ss:$8 sps:$4 sm:$0xff]   ;;  %v15019_v9 = vld [vmem:[#allocation12 + $0xe4] ss:$8 sps:$4 sm:$0xff]  }
0x129d   : > { %v20545_v44 = vadd.f32 %v11385_v49, %v21705_v33  ;;  %11795 = vmatpush1.bf16.msra.mxu1 %v14999_v2  ;;  %v15016_v2 = vld [vmem:[#allocation12 + $0xd4] ss:$8 sps:$4 sm:$0xff]  }
0x129e   : > { %v20536_v57 = vadd.f32 %v11377_v22, %v21703_v41  ;;  %11456 = vadd.xlane.f32.xlu0 %v20533_v29 }
0x12a0   : > { %11458 = vadd.xlane.f32.xlu1 %v20536_v57 }
0x12a2   : > { %11460 = vadd.xlane.f32.xlu0 %v20540_v16 }
0x12a6   : > { %11462 = vadd.xlane.f32.xlu0 %v20545_v44 }
0x12a8   : > { %v14494_v62 = vpop.f32.mrb[84].mxu0 }
0x12a9   : > { %v11389_v4 = vpop.f32.mrb[85].mxu0  ;;  %v11398_v19 = vadd.f32 %v14494_v62, %v13103_v8 }
0x12aa   : > { %v11390_v34 = vadd.f32 %v13103_v8, %v11389_v4  ;;  %v14495_v56 = vpop.f32.mrb[86].mxu0 }
0x12ab   : > { %v11392_v17 = vpop.f32.mrb[87].mxu0  ;;  %v11401_v0 = vadd.f32 %v14495_v56, %v13103_v8  ;;  %v20556_v3 = vadd.f32 %v11398_v19, %v21708_v1 }
0x12ac   : > { %v20549_v21 = vadd.f32 %v11390_v34, %v21706_v38  ;;  %v11393_v59 = vadd.f32 %v13103_v8, %v11392_v17 }
0x12ad   : > { %v20560_v63 = vadd.f32 %v11401_v0, %v21709_v53 }
0x12ae   : > { %v20552_v27 = vadd.f32 %v11393_v59, %v21707_v60  ;;  %11464 = vadd.xlane.f32.xlu0 %v20549_v21 }
0x12b0   : > { %11466 = vadd.xlane.f32.xlu1 %v20552_v27 }
0x12b2   : > { %11468 = vadd.xlane.f32.xlu0 %v20556_v3 }
0x12b4   : > { %v14498_v39 = vpop.f32.mrb[88].mxu0  ;;  %11470 = vadd.xlane.f32.xlu1 %v20560_v63 }
0x12b5   : > { %v11405_v37 = vpop.f32.mrb[89].mxu0  ;;  %v11414_v28 = vadd.f32 %v14498_v39, %v13103_v8 }
0x12b6   : > { %v11406_v47 = vadd.f32 %v13103_v8, %v11405_v37  ;;  %v14499_v12 = vpop.f32.mrb[90].mxu0 }
0x12b7   : > { %v11408_v10 = vpop.f32.mrb[91].mxu0  ;;  %v11417_v20 = vadd.f32 %v14499_v12, %v13103_v8  ;;  %v20572_v48 = vadd.f32 %v11414_v28, %v21712_v11 }
0x12b8   : > { %v20565_v30 = vadd.f32 %v11406_v47, %v21710_v26  ;;  %v11409_v36 = vadd.f32 %v13103_v8, %v11408_v10 }
0x12b9   : > { %v20576_v14 = vadd.f32 %v11417_v20, %v21713_v5 }
0x12ba   : > { %v20568_v43 = vadd.f32 %v11409_v36, %v21711_v15  ;;  %11472 = vadd.xlane.f32.xlu0 %v20565_v30 }
0x12bc   : > { %11474 = vadd.xlane.f32.xlu1 %v20568_v43 }
0x12be   : > { %11476 = vadd.xlane.f32.xlu0 %v20572_v48 }
0x12c0   : > { %11478 = vadd.xlane.f32.xlu1 %v20576_v14 }
0x12e5   : > { %v14502_v31 = vpop.f32.mrb[92].mxu0 }
0x12e6   : > { %v11421_v52 = vpop.f32.mrb[93].mxu0  ;;  %v11430_v58 = vadd.f32 %v14502_v31, %v13103_v8 }
0x12e7   : > { %v11422_v51 = vadd.f32 %v13103_v8, %v11421_v52  ;;  %v14503_v61 = vpop.f32.mrb[94].mxu0 }
0x12e8   : > { %v11424_v42 = vpop.f32.mrb[95].mxu0  ;;  %v11433_v24 = vadd.f32 %v14503_v61, %v13103_v8  ;;  %v20588_v18 = vadd.f32 %v11430_v58, %v21716_v25  ;;  %v15013_v25 = vld [vmem:[#allocation12 + $0xc4] ss:$8 sps:$4 sm:$0xff]  }
0x12e9   : > { %v20581_v45 = vadd.f32 %v11422_v51, %v21714_v50  ;;  %v11425_v13 = vadd.f32 %v13103_v8, %v11424_v42  ;;  %v15004_v8 = vld [vmem:[#allocation12 + $0x94] ss:$8 sps:$4 sm:$0xff]   ;;  %v15007_v50 = vld [vmem:[#allocation12 + $0xa4] ss:$8 sps:$4 sm:$0xff]  }
0x12ea   : > { %v20592_v55 = vadd.f32 %v11433_v24, %v21717_v6  ;;  %11796 = vmatprep.subr.bf16.mxu1 %v15004_v8  ;;  %v15005_v24 = vld [vmem:[#allocation12 + $0xa0] ss:$8 sps:$4 sm:$0xff]   ;;  %v15014_v6 = vld [vmem:[#allocation12 + $0xd0] ss:$8 sps:$4 sm:$0xff]  }
0x12eb   : > { %v20584_v54 = vadd.f32 %v11425_v13, %v21715_v32  ;;  %11480 = vadd.xlane.f32.xlu0 %v20581_v45  ;;  %11797 = vmatpush1.bf16.msra.mxu1 %v15002_v23  ;;  %v15008_v32 = vld [vmem:[#allocation12 + $0xb0] ss:$8 sps:$4 sm:$0xff]   ;;  %v15017_v8 = vld [vmem:[#allocation12 + $0xe0] ss:$8 sps:$4 sm:$0xff]   ;;  %v15022_v23 = vld [vmem:[#allocation12 + $0xf4] ss:$8 sps:$4 sm:$0xff]  }
0x12ec   : > { %11798 = vmatprep.subr.bf16.mxu1 %v15007_v50  ;;  %v20687_v50 = vld [vmem:[%s21585_s3 + $0x1] ss:$0 sm:$0xff]  ;;  %s16045_s3 = scalar_lea.vmem %s16044_s13, 256 }
0x12ed   : > { %11482 = vadd.xlane.f32.xlu1 %v20584_v54  ;;  %p16047_p3 = scmp.lt.s32.totalorder %s16045_s3, %s16039_s2 }
0x12ef   : > { %11484 = vadd.xlane.f32.xlu0 %v20588_v18  ;;  %11799 = vmatpush1.bf16.msra.mxu1 %v15005_v24  ;;  %p16048_p2 = por %p16047_p3, %p16046_p1 }
0x12f1   : > { %11486 = vadd.xlane.f32.xlu1 %v20592_v55  ;;  %p16049_p8 = pnand %p16048_p2, %p16042_p13 }
0x132b   : > { %v11457_v40 = vpop.xlane.xlu0 %11456 }
0x132c   : > { %v11488_v46 = vmul.f32 0.0078125, %v11457_v40  ;;  %v15020_v40 = vld [vmem:[#allocation12 + $0xf0] ss:$8 sps:$4 sm:$0xff]  }
0x132d   : > { %v11459_v22 = vpop.xlane.xlu1 %11458 }
0x132e   : > { %v20597_v41 = vsub.f32 %v20533_v29, %v11488_v46  ;;  %v11489_v35 = vmul.f32 0.0078125, %v11459_v22 }
0x132f   : > { %v11461_v49 = vpop.xlane.xlu0 %11460 }
0x1330   : > { %v20600_v33 = vsub.f32 %v20536_v57, %v11489_v35  ;;  %v11490_v62 = vmul.f32 0.0078125, %v11461_v49  ;;  %v11520_v4 = vmul.f32 %v20597_v41, %v20597_v41 }
0x1332   : > { %v20605_v34 = vsub.f32 %v20540_v16, %v11490_v62  ;;  %11536 = vadd.xlane.f32.xlu0 %v11520_v4  ;;  %v11521_v56 = vmul.f32 %v20600_v33, %v20600_v33 }
0x1333   : > { %v11463_v17 = vpop.xlane.xlu0 %11462 }
0x1334   : > { %v11491_v19 = vmul.f32 0.0078125, %v11463_v17  ;;  %11538 = vadd.xlane.f32.xlu1 %v11521_v56  ;;  %v11522_v29 = vmul.f32 %v20605_v34, %v20605_v34 }
0x1336   : > { %v20612_v57 = vsub.f32 %v20545_v44, %v11491_v19  ;;  %11540 = vadd.xlane.f32.xlu0 %v11522_v29 }
0x1338   : > { %v11523_v38 = vmul.f32 %v20612_v57, %v20612_v57 }
0x133a   : > { %11542 = vadd.xlane.f32.xlu1 %v11523_v38 }
0x133b   : > { %v11465_v16 = vpop.xlane.xlu0 %11464 }
0x133c   : > { %v11492_v59 = vmul.f32 0.0078125, %v11465_v16 }
0x133d   : > { %v11467_v0 = vpop.xlane.xlu1 %11466 }
0x133e   : > { %v20617_v60 = vsub.f32 %v20549_v21, %v11492_v59  ;;  %v11493_v1 = vmul.f32 0.0078125, %v11467_v0 }
0x133f   : > { %v11469_v53 = vpop.xlane.xlu0 %11468 }
0x1340   : > { %v20620_v39 = vsub.f32 %v20552_v27, %v11493_v1  ;;  %v11494_v37 = vmul.f32 0.0078125, %v11469_v53  ;;  %v11524_v44 = vmul.f32 %v20617_v60, %v20617_v60 }
0x1341   : > { %v11471_v47 = vpop.xlane.xlu1 %11470 }
0x1342   : > { %v20625_v12 = vsub.f32 %v20556_v3, %v11494_v37  ;;  %v11495_v10 = vmul.f32 0.0078125, %v11471_v47  ;;  %11544 = vadd.xlane.f32.xlu0 %v11524_v44  ;;  %v11525_v28 = vmul.f32 %v20620_v39, %v20620_v39 }
0x1344   : > { %v20630_v21 = vsub.f32 %v20560_v63, %v11495_v10  ;;  %11546 = vadd.xlane.f32.xlu1 %v11525_v28  ;;  %v11526_v27 = vmul.f32 %v20625_v12, %v20625_v12 }
0x1346   : > { %11548 = vadd.xlane.f32.xlu0 %v11526_v27  ;;  %v11527_v26 = vmul.f32 %v20630_v21, %v20630_v21 }
0x1347   : > { %v11473_v36 = vpop.xlane.xlu0 %11472 }
0x1348   : > { %v11496_v20 = vmul.f32 0.0078125, %v11473_v36  ;;  %11550 = vadd.xlane.f32.xlu1 %v11527_v26 }
0x1349   : > { %v11475_v3 = vpop.xlane.xlu1 %11474 }
0x134a   : > { %v20637_v15 = vsub.f32 %v20565_v30, %v11496_v20  ;;  %v11497_v11 = vmul.f32 0.0078125, %v11475_v3  ;;  %v20679_v3 = vld [vmem:[%s21584_s23 + $0x1] ss:$0 sm:$0xff] }
0x134b   : > { %v11477_v5 = vpop.xlane.xlu0 %11476 }
0x134c   : > { %v20640_v63 = vsub.f32 %v20568_v43, %v11497_v11  ;;  %v11498_v31 = vmul.f32 0.0078125, %v11477_v5  ;;  %v11528_v52 = vmul.f32 %v20637_v15, %v20637_v15 }
0x134d   : > { %v11479_v51 = vpop.xlane.xlu1 %11478 }
0x134e   : > { %v20645_v61 = vsub.f32 %v20572_v48, %v11498_v31  ;;  %v11499_v42 = vmul.f32 0.0078125, %v11479_v51  ;;  %11552 = vadd.xlane.f32.xlu0 %v11528_v52  ;;  %v11529_v58 = vmul.f32 %v20640_v63, %v20640_v63  ;;  %v15010_v48 = vld [vmem:[#allocation12 + $0xb4] ss:$8 sps:$4 sm:$0xff]  }
0x134f   : > { %11800 = vmatprep.subr.bf16.mxu1 %v15010_v48 }
0x1350   : > { %v20650_v30 = vsub.f32 %v20576_v14, %v11499_v42  ;;  %11554 = vadd.xlane.f32.xlu1 %v11529_v58  ;;  %v11530_v43 = vmul.f32 %v20645_v61, %v20645_v61  ;;  %11801 = vmatpush1.bf16.msra.mxu1 %v15008_v32  ;;  %v15011_v14 = vld [vmem:[#allocation12 + $0xc0] ss:$8 sps:$4 sm:$0xff]  }
0x1351   : > { %11802 = vmatprep.subr.bf16.mxu1 %v15013_v25 }
0x1352   : > { %11556 = vadd.xlane.f32.xlu0 %v11530_v43  ;;  %v11531_v13 = vmul.f32 %v20650_v30, %v20650_v30 }
0x1354   : > { %11558 = vadd.xlane.f32.xlu1 %v11531_v13  ;;  %11803 = vmatpush1.bf16.msra.mxu1 %v15011_v14 }
0x1355   : > { %11804 = vmatprep.subr.bf16.mxu1 %v15016_v2 }
0x1358   : > { %11805 = vmatpush1.bf16.msra.mxu1 %v15014_v6 }
0x1359   : > { %11806 = vmatprep.subr.bf16.mxu1 %v15019_v9 }
0x135c   : > { %11807 = vmatpush1.bf16.msra.mxu1 %v15017_v8 }
0x135d   : > { %11808 = vmatprep.subr.bf16.mxu1 %v15022_v23 }
0x1360   : > { %11809 = vmatpush1.bf16.msra.mxu1 %v15020_v40 }
0x1378   : > { %v11481_v46 = vpop.xlane.xlu0 %11480 }
0x1379   : > { %v11500_v22 = vmul.f32 0.0078125, %v11481_v46 }
0x137a   : > { %v11483_v35 = vpop.xlane.xlu1 %11482 }
0x137b   : > { %v20657_v49 = vsub.f32 %v20581_v45, %v11500_v22  ;;  %v11501_v62 = vmul.f32 0.0078125, %v11483_v35 }
0x137c   : > { %v11485_v4 = vpop.xlane.xlu0 %11484 }
0x137d   : > { %v20660_v56 = vsub.f32 %v20584_v54, %v11501_v62  ;;  %v11502_v17 = vmul.f32 0.0078125, %v11485_v4  ;;  %v11532_v19 = vmul.f32 %v20657_v49, %v20657_v49 }
0x137e   : > { %v11487_v29 = vpop.xlane.xlu1 %11486 }
0x137f   : > { %v20665_v38 = vsub.f32 %v20588_v18, %v11502_v17  ;;  %v11503_v16 = vmul.f32 0.0078125, %v11487_v29  ;;  %11560 = vadd.xlane.f32.xlu0 %v11532_v19  ;;  %v11533_v59 = vmul.f32 %v20660_v56, %v20660_v56 }
0x1381   : > { %v20670_v45 = vsub.f32 %v20592_v55, %v11503_v16  ;;  %11562 = vadd.xlane.f32.xlu1 %v11533_v59  ;;  %v11534_v54 = vmul.f32 %v20665_v38, %v20665_v38 }
0x1383   : > { %11564 = vadd.xlane.f32.xlu0 %v11534_v54  ;;  %v11535_v0 = vmul.f32 %v20670_v45, %v20670_v45 }
0x1385   : > { %11566 = vadd.xlane.f32.xlu1 %v11535_v0 }
0x13bf   : > { %v11537_v1 = vpop.xlane.xlu0 %11536 }
0x13c0   : > { %v11568_v18 = vmul.f32 0.0078125, %v11537_v1 }
0x13c1   : > { %v11539_v53 = vpop.xlane.xlu1 %11538 }
0x13c2   : > { %v11584_v37 = vadd.f32 1e-05, %v11568_v18  ;;  %v11569_v44 = vmul.f32 0.0078125, %v11539_v53 }
0x13c3   : > { %v11541_v47 = vpop.xlane.xlu0 %11540 }
0x13c4   : > { %15711 = vrsqrt.f32 %v11584_v37  ;;  %v11585_v10 = vadd.f32 1e-05, %v11569_v44  ;;  %v11570_v28 = vmul.f32 0.0078125, %v11541_v47 }
0x13c6   : > { %15713 = vrsqrt.f32 %v11585_v10  ;;  %v11586_v55 = vadd.f32 1e-05, %v11570_v28 }
0x13c7   : > { %v11543_v27 = vpop.xlane.xlu1 %11542 }
0x13c8   : > { %15715 = vrsqrt.f32 %v11586_v55  ;;  %v11571_v26 = vmul.f32 0.0078125, %v11543_v27 }
0x13ca   : > { %v11587_v36 = vadd.f32 1e-05, %v11571_v26 }
0x13cc   : > { %15717 = vrsqrt.f32 %v11587_v36 }
0x13ce   : > { %v15712_v20 = vpop.eup %15711 }
0x13cf   : > { %v11616_v11 = vmul.f32 %v15712_v20, %v20597_v41  ;;  %v11545_v5 = vpop.xlane.xlu0 %11544 }
0x13d0   : > { %v15714_v31 = vpop.eup %15713  ;;  %v11572_v52 = vmul.f32 0.0078125, %v11545_v5 }
0x13d1   : > { %v11638_v51 = vmul.f32 %v20679_v3, %v11616_v11  ;;  %v11617_v42 = vmul.f32 %v15714_v31, %v20600_v33  ;;  %v11547_v58 = vpop.xlane.xlu1 %11546 }
0x13d2   : > { %v15716_v43 = vpop.eup %15715  ;;  %v11588_v13 = vadd.f32 1e-05, %v11572_v52  ;;  %v11573_v24 = vmul.f32 0.0078125, %v11547_v58 }
0x13d3   : > { %v11639_v48 = vmul.f32 %v20679_v3, %v11617_v42  ;;  %v11549_v32 = vpop.xlane.xlu0 %11548  ;;  %v20691_v14 = vadd.f32 %v20687_v50, %v11638_v51  ;;  %v11618_v6 = vmul.f32 %v15716_v43, %v20605_v34 }
0x13d4   : > { %15719 = vrsqrt.f32 %v11588_v13  ;;  %v11589_v41 = vadd.f32 1e-05, %v11573_v24  ;;  %v11574_v25 = vmul.f32 0.0078125, %v11549_v32 }
0x13d5   : > { %v20694_v33 = vadd.f32 %v20687_v50, %v11639_v48  ;;  %v11551_v2 = vpop.xlane.xlu1 %11550  ;;  %v11640_v35 = vmul.f32 %v20679_v3, %v11618_v6 }
0x13d6   : > { %v15718_v9 = vpop.eup %15717  ;;  %15721 = vrsqrt.f32 %v11589_v41  ;;  %v11590_v8 = vadd.f32 1e-05, %v11574_v25  ;;  %v11575_v23 = vmul.f32 0.0078125, %v11551_v2 }
0x13d7   : > { %v11676_v40 = vpack.c.bf16 %v20694_v33, %v20691_v14  ;;  %v11619_v46 = vmul.f32 %v15718_v9, %v20612_v57  ;;  %v20707_v19 = vadd.f32 %v20687_v50, %v11640_v35 }
0x13d8   : > { %15723 = vrsqrt.f32 %v11590_v8  ;;  %v11591_v22 = vadd.f32 1e-05, %v11575_v23 }
0x13d9   : > { %v11641_v62 = vmul.f32 %v20679_v3, %v11619_v46  ;;  %11827 = vmatmul.mubr.bf16.vlgmr.msra.gmra.mrb[96].mxu1 %v11676_v40 }
0x13da   : > { %15725 = vrsqrt.f32 %v11591_v22  ;;  %11836 = vmatprep.mubr.bf16.mxu1 %v21701_v7 }
0x13db   : > { %v20704_v34 = vadd.f32 %v20687_v50, %v11641_v62  ;;  %v11553_v4 = vpop.xlane.xlu0 %11552 }
0x13dc   : > { %v11576_v17 = vmul.f32 0.0078125, %v11553_v4 }
0x13dd   : > { %v11555_v29 = vpop.xlane.xlu1 %11554  ;;  %v11677_v54 = vpack.c.bf16 %v20704_v34, %v20707_v19 }
0x13de   : > { %v15720_v57 = vpop.eup %15719  ;;  %v11592_v16 = vadd.f32 1e-05, %v11576_v17  ;;  %v11577_v59 = vmul.f32 0.0078125, %v11555_v29 }
0x13df   : > { %v11620_v0 = vmul.f32 %v15720_v57, %v20617_v60  ;;  %v11557_v1 = vpop.xlane.xlu0 %11556 }
0x13e0   : > { %v15722_v18 = vpop.eup %15721  ;;  %15727 = vrsqrt.f32 %v11592_v16  ;;  %v11593_v53 = vadd.f32 1e-05, %v11577_v59  ;;  %v11578_v37 = vmul.f32 0.0078125, %v11557_v1 }
0x13e1   : > { %v11642_v44 = vmul.f32 %v20679_v3, %v11620_v0  ;;  %v11621_v47 = vmul.f32 %v15722_v18, %v20620_v39  ;;  %v11559_v10 = vpop.xlane.xlu1 %11558  ;;  %11837 = vmatmul.mubr.bf16.gmra.mrb[100].mxu1 %v11677_v54 }
0x13e2   : > { %v15724_v28 = vpop.eup %15723  ;;  %15729 = vrsqrt.f32 %v11593_v53  ;;  %v11579_v55 = vmul.f32 0.0078125, %v11559_v10  ;;  %11846 = vmatprep.mubr.bf16.mxu1 %v21701_v7  ;;  %v11594_v60 = vadd.f32 1e-05, %v11578_v37 }
0x13e3   : > { %v11643_v27 = vmul.f32 %v20679_v3, %v11621_v47  ;;  %v20717_v20 = vadd.f32 %v20687_v50, %v11642_v44  ;;  %v11622_v39 = vmul.f32 %v15724_v28, %v20625_v12 }
0x13e4   : > { %v15726_v26 = vpop.eup %15725  ;;  %v11595_v36 = vadd.f32 1e-05, %v11579_v55 }
0x13e5   : > { %v20720_v11 = vadd.f32 %v20687_v50, %v11643_v27  ;;  %v11623_v5 = vmul.f32 %v15726_v26, %v20630_v21  ;;  %v11644_v51 = vmul.f32 %v20679_v3, %v11622_v39 }
0x13e6   : > { %15731 = vrsqrt.f32 %v11595_v36 }
0x13e7   : > { %v11678_v31 = vpack.c.bf16 %v20720_v11, %v20717_v20  ;;  %v11645_v52 = vmul.f32 %v20679_v3, %v11623_v5  ;;  %15733 = vrsqrt.f32 %v11594_v60  ;;  %v20733_v12 = vadd.f32 %v20687_v50, %v11644_v51  ;;  %v15026_v51 = vld [vmem:[#allocation14 + $0x88] sm:$0xff]  }
0x13e9   : > { %11847 = vmatmul.mubr.bf16.gmra.mrb[104].mxu1 %v11678_v31  ;;  %v20730_v58 = vadd.f32 %v20687_v50, %v11645_v52  ;;  %v15024_v31 = vld [vmem:[#allocation14 + $0x80] sm:$0xff]   ;;  %v15025_v52 = vld [vmem:[#allocation14 + $0xc8] sm:$0xff]  }
0x13ea   : > { %v15728_v42 = vpop.eup %15727  ;;  %11856 = vmatprep.mubr.bf16.mxu1 %v21701_v7 }
0x13eb   : > { %v11624_v21 = vmul.f32 %v15728_v42, %v20637_v15  ;;  %v11679_v24 = vpack.c.bf16 %v20730_v58, %v20733_v12  ;;  %v15029_v42 = vld [vmem:[#allocation14 + $0xd8] sm:$0xff]  }
0x13ec   : > { %v15730_v43 = vpop.eup %15729 }
0x13ed   : > { %v11625_v13 = vmul.f32 %v15730_v43, %v20640_v63  ;;  %v11646_v41 = vmul.f32 %v20679_v3, %v11624_v21  ;;  %v15030_v43 = vld [vmem:[#allocation14 + $0x98] sm:$0xff]   ;;  %v15032_v21 = vld [vmem:[#allocation14 + $0xa0] sm:$0xff]  }
0x13ef   : > { %v11647_v48 = vmul.f32 %v20679_v3, %v11625_v13  ;;  %v20747_v15 = vadd.f32 %v20687_v50, %v11646_v41  ;;  %v15033_v13 = vld [vmem:[#allocation14 + $0xe8] sm:$0xff]   ;;  %v15037_v41 = vld [vmem:[#allocation14 + $0xf8] sm:$0xff]  }
0x13f0   : > { %v15732_v32 = vpop.eup %15731 }
0x13f1   : > { %11857 = vmatmul.mubr.bf16.gmra.mrb[108].mxu1 %v11679_v24  ;;  %v15734_v25 = vpop.eup %15733  ;;  %v20743_v6 = vadd.f32 %v20687_v50, %v11647_v48  ;;  %v11627_v2 = vmul.f32 %v15732_v32, %v20650_v30  ;;  %v15034_v24 = vld [vmem:[#allocation14 + $0xa8] sm:$0xff]   ;;  %v15035_v48 = vld [vmem:[#allocation14 + $0xf0] sm:$0xff]  }
0x13f2   : > { %11866 = vmatprep.mubr.bf16.mxu1 %v21701_v7  ;;  %v11626_v63 = vmul.f32 %v15734_v25, %v20645_v61  ;;  %v15036_v32 = vld [vmem:[#allocation14 + $0xb0] sm:$0xff]   ;;  %v15038_v25 = vld [vmem:[#allocation14 + $0xb8] sm:$0xff]  }
0x13f3   : > { %v11680_v9 = vpack.c.bf16 %v20743_v6, %v20747_v15  ;;  %v11649_v8 = vmul.f32 %v20679_v3, %v11627_v2  ;;  %v13116_v2 = vld [vmem:[%s21589_s10 + $0x2] sm:$0x3] }
0x13f4   : > { %v11648_v23 = vmul.f32 %v20679_v3, %v11626_v63  ;;  %v21720_v63 = vld [vmem:[#allocation38_spill] sm:$0xff] }
0x13f5   : > { %v20756_v40 = vadd.f32 %v20687_v50, %v11649_v8  ;;  %v21721_v8 = vld [vmem:[#allocation39_spill] sm:$0xff] }
0x13f6   : > { %v20759_v30 = vadd.f32 %v20687_v50, %v11648_v23  ;;  %v20796_v23 = vrot.slane %v13116_v2, %v21721_v8 }
0x13f7   : > { %21718 = vst [vmem:[#allocation23_spill] sm:$0xff] %v20756_v40 }
0x13f8   : > { %v11681_v46 = vpack.c.bf16 %v20756_v40, %v20759_v30 }
0x13f9   : > { %11867 = vmatmul.mubr.bf16.gmra.mrb[112].mxu1 %v11680_v9  ;;  %v20793_v9 = vrot.slane %v13116_v2, %v21720_v63 }
0x13fa   : > { %11876 = vmatprep.mubr.bf16.mxu1 %v21701_v7 }
0x1401   : > { %11877 = vmatmul.mubr.bf16.gmra.mrb[116].mxu1 %v11681_v46 }
0x1402   : > { %11886 = vmatprep.mubr.bf16.mxu1 %v21701_v7 }
0x140c   : > { %v11561_v61 = vpop.xlane.xlu0 %11560 }
0x140d   : > { %v11580_v22 = vmul.f32 0.0078125, %v11561_v61 }
0x140e   : > { %v11563_v35 = vpop.xlane.xlu1 %11562 }
0x140f   : > { %v11596_v62 = vadd.f32 1e-05, %v11580_v22  ;;  %v11581_v4 = vmul.f32 0.0078125, %v11563_v35 }
0x1410   : > { %v11565_v17 = vpop.xlane.xlu0 %11564 }
0x1411   : > { %15735 = vrsqrt.f32 %v11596_v62  ;;  %v11597_v29 = vadd.f32 1e-05, %v11581_v4  ;;  %v11582_v57 = vmul.f32 0.0078125, %v11565_v17 }
0x1412   : > { %v11567_v16 = vpop.xlane.xlu1 %11566 }
0x1413   : > { %15737 = vrsqrt.f32 %v11597_v29  ;;  %v11598_v59 = vadd.f32 1e-05, %v11582_v57  ;;  %v11583_v54 = vmul.f32 0.0078125, %v11567_v16 }
0x1415   : > { %15739 = vrsqrt.f32 %v11598_v59  ;;  %v11599_v0 = vadd.f32 1e-05, %v11583_v54 }
0x1417   : > { %15741 = vrsqrt.f32 %v11599_v0 }
0x141b   : > { %v15736_v1 = vpop.eup %15735 }
0x141c   : > { %v11628_v18 = vmul.f32 %v15736_v1, %v20657_v49 }
0x141d   : > { %v15738_v53 = vpop.eup %15737 }
0x141e   : > { %v11650_v37 = vmul.f32 %v20679_v3, %v11628_v18  ;;  %v11629_v44 = vmul.f32 %v15738_v53, %v20660_v56 }
0x141f   : > { %v15740_v47 = vpop.eup %15739 }
0x1420   : > { %v11651_v10 = vmul.f32 %v20679_v3, %v11629_v44  ;;  %v20769_v55 = vadd.f32 %v20687_v50, %v11650_v37  ;;  %v11630_v26 = vmul.f32 %v15740_v47, %v20665_v38 }
0x1421   : > { %v15742_v28 = vpop.eup %15741 }
0x1422   : > { %v20772_v27 = vadd.f32 %v20687_v50, %v11651_v10  ;;  %v11631_v60 = vmul.f32 %v15742_v28, %v20670_v45  ;;  %v11652_v56 = vmul.f32 %v20679_v3, %v11630_v26  ;;  %v15023_v45 = vld [vmem:[#allocation14 + $0xc0] sm:$0xff]  }
0x1423   : > { %13544 = vmatprep.subr.bf16.mxu0 %v15023_v45 }
0x1424   : > { %v11682_v49 = vpack.c.bf16 %v20772_v27, %v20769_v55  ;;  %v11653_v36 = vmul.f32 %v20679_v3, %v11631_v60  ;;  %v20785_v5 = vadd.f32 %v20687_v50, %v11652_v56  ;;  %13545 = vmatpush3.bf16.msra.mxu0 %v15024_v31  ;;  %v15027_v3 = vld [vmem:[#allocation14 + $0xd0] sm:$0xff]  }
0x1425   : > { %13546 = vmatprep.subr.bf16.mxu0 %v15025_v52 }
0x1426   : > { %11887 = vmatmul.mubr.bf16.gmra.mrb[120].mxu1 %v11682_v49  ;;  %v20782_v39 = vadd.f32 %v20687_v50, %v11653_v36  ;;  %v15031_v50 = vld [vmem:[#allocation14 + $0xe0] sm:$0xff]  }
0x1427   : > { %11896 = vmatprep.mubr.bf16.mxu1 %v21701_v7  ;;  %v15028_v7 = vld [vmem:[#allocation14 + $0x90] sm:$0xff]  }
0x1428   : > { %21719 = vst [vmem:[#allocation25_spill] sm:$0xff] %v20782_v39  ;;  %v11683_v38 = vpack.c.bf16 %v20782_v39, %v20785_v5  ;;  %13547 = vmatpush3.bf16.msra.mxu0 %v15026_v51 }
0x1429   : > { %13548 = vmatprep.subr.bf16.mxu0 %v15027_v3 }
0x142c   : > { %13549 = vmatpush3.bf16.msra.mxu0 %v15028_v7 }
0x142d   : > { %13550 = vmatprep.subr.bf16.mxu0 %v15029_v42 }
0x142e   : > { %11897 = vmatmul.mubr.bf16.gmra.mrb[124].mxu1 %v11683_v38 }
0x1430   : > { %13551 = vmatpush3.bf16.msra.mxu0 %v15030_v43 }
0x1431   : > { %13552 = vmatprep.subr.bf16.mxu0 %v15031_v50 }
0x1434   : > { %13553 = vmatpush3.bf16.msra.mxu0 %v15032_v21 }
0x1435   : > { %13554 = vmatprep.subr.bf16.mxu0 %v15033_v13 }
0x1438   : > { %13555 = vmatpush3.bf16.msra.mxu0 %v15034_v24 }
0x1439   : > { %13556 = vmatprep.subr.bf16.mxu0 %v15035_v48 }
0x143c   : > { %13557 = vmatpush3.bf16.msra.mxu0 %v15036_v32 }
0x143d   : > { %13558 = vmatprep.subr.bf16.mxu0 %v15037_v41 }
0x1440   : > { %13559 = vmatpush3.bf16.msra.mxu0 %v15038_v25 }
0x14ac   : > { %v11828_v46 = vpop.f32.mrb[96].mxu1 }
0x14ad   : > { %v20799_v61 = vadd.f32 %v11828_v46, %v20793_v9  ;;  %v11830_v22 = vpop.f32.mrb[97].mxu1 }
0x14ae   : > { %v20802_v35 = vadd.f32 %v11830_v22, %v20796_v23  ;;  %v11832_v62 = vpop.f32.mrb[98].mxu1 }
0x14af   : > { %v11907_v4 = vmul.f32 %v20799_v61, %v20799_v61  ;;  %v20807_v17 = vadd.f32 %v11832_v62, %v20793_v9  ;;  %v11834_v29 = vpop.f32.mrb[99].mxu1 }
0x14b0   : > { %v11908_v57 = vmul.f32 %v20802_v35, %v20802_v35  ;;  %v20812_v16 = vadd.f32 %v11834_v29, %v20796_v23 }
0x14b1   : > { %v11939_v59 = vmul.f32 %v11907_v4, %v20799_v61  ;;  %v11909_v54 = vmul.f32 %v20807_v17, %v20807_v17 }
0x14b2   : > { %v11940_v0 = vmul.f32 %v11908_v57, %v20802_v35  ;;  %v11910_v1 = vmul.f32 %v20812_v16, %v20812_v16 }
0x14b3   : > { %v11971_v18 = vmul.f32 0.044715, %v11939_v59  ;;  %v11941_v53 = vmul.f32 %v11909_v54, %v20807_v17 }
0x14b4   : > { %v11972_v37 = vmul.f32 0.044715, %v11940_v0  ;;  %v11942_v44 = vmul.f32 %v11910_v1, %v20812_v16  ;;  %v11838_v47 = vpop.f32.mrb[100].mxu1 }
0x14b5   : > { %v12003_v10 = vadd.f32 %v11971_v18, %v20799_v61  ;;  %v11973_v28 = vmul.f32 0.044715, %v11941_v53  ;;  %v20824_v26 = vadd.f32 %v11838_v47, %v20793_v9  ;;  %v11840_v60 = vpop.f32.mrb[101].mxu1 }
0x14b6   : > { %v12004_v49 = vadd.f32 %v11972_v37, %v20802_v35  ;;  %v11974_v36 = vmul.f32 0.044715, %v11942_v44  ;;  %v20828_v56 = vadd.f32 %v11840_v60, %v20796_v23  ;;  %v11842_v38 = vpop.f32.mrb[102].mxu1 }
0x14b7   : > { %v12035_v45 = vmul.f32 0.7978846, %v12003_v10  ;;  %v12005_v31 = vadd.f32 %v11973_v28, %v20807_v17  ;;  %v11911_v52 = vmul.f32 %v20824_v26, %v20824_v26  ;;  %v20834_v51 = vadd.f32 %v11842_v38, %v20793_v9  ;;  %v11844_v3 = vpop.f32.mrb[103].mxu1 }
0x14b8   : > { %v12036_v7 = vmul.f32 0.7978846, %v12004_v49  ;;  %v12006_v42 = vadd.f32 %v11974_v36, %v20812_v16  ;;  %v11912_v43 = vmul.f32 %v20828_v56, %v20828_v56  ;;  %v20840_v50 = vadd.f32 %v11844_v3, %v20796_v23 }
0x14b9   : > { %15743 = vtanh.f32 %v12035_v45  ;;  %v12037_v21 = vmul.f32 0.7978846, %v12005_v31  ;;  %v11943_v13 = vmul.f32 %v11911_v52, %v20824_v26  ;;  %v11913_v24 = vmul.f32 %v20834_v51, %v20834_v51 }
0x14ba   : > { %15745 = vtanh.f32 %v12036_v7  ;;  %v12038_v48 = vmul.f32 0.7978846, %v12006_v42  ;;  %v11944_v32 = vmul.f32 %v11912_v43, %v20828_v56  ;;  %v11914_v41 = vmul.f32 %v20840_v50, %v20840_v50 }
0x14bb   : > { %15747 = vtanh.f32 %v12037_v21  ;;  %v11975_v25 = vmul.f32 0.044715, %v11943_v13  ;;  %v11945_v2 = vmul.f32 %v11913_v24, %v20834_v51 }
0x14bc   : > { %v11976_v63 = vmul.f32 0.044715, %v11944_v32  ;;  %v11946_v8 = vmul.f32 %v11914_v41, %v20840_v50  ;;  %v11848_v46 = vpop.f32.mrb[104].mxu1  ;;  %15749 = vtanh.f32 %v12038_v48 }
0x14bd   : > { %v12007_v22 = vadd.f32 %v11975_v25, %v20824_v26  ;;  %v11977_v62 = vmul.f32 0.044715, %v11945_v2  ;;  %v20852_v4 = vadd.f32 %v11848_v46, %v20793_v9  ;;  %v11850_v29 = vpop.f32.mrb[105].mxu1 }
0x14be   : > { %v12008_v57 = vadd.f32 %v11976_v63, %v20828_v56  ;;  %v11978_v59 = vmul.f32 0.044715, %v11946_v8  ;;  %v20856_v54 = vadd.f32 %v11850_v29, %v20796_v23  ;;  %v11852_v0 = vpop.f32.mrb[106].mxu1 }
0x14bf   : > { %v12039_v1 = vmul.f32 0.7978846, %v12007_v22  ;;  %v12009_v18 = vadd.f32 %v11977_v62, %v20834_v51  ;;  %v11915_v53 = vmul.f32 %v20852_v4, %v20852_v4  ;;  %v20862_v37 = vadd.f32 %v11852_v0, %v20793_v9  ;;  %v11854_v44 = vpop.f32.mrb[107].mxu1 }
0x14c0   : > { %v12040_v47 = vmul.f32 0.7978846, %v12008_v57  ;;  %v12010_v10 = vadd.f32 %v11978_v59, %v20840_v50  ;;  %v11916_v28 = vmul.f32 %v20856_v54, %v20856_v54  ;;  %v20868_v60 = vadd.f32 %v11854_v44, %v20796_v23 }
0x14c1   : > { %15751 = vtanh.f32 %v12039_v1  ;;  %v12041_v49 = vmul.f32 0.7978846, %v12009_v18  ;;  %v11947_v36 = vmul.f32 %v11915_v53, %v20852_v4  ;;  %v11917_v38 = vmul.f32 %v20862_v37, %v20862_v37 }
0x14c2   : > { %15753 = vtanh.f32 %v12040_v47  ;;  %v12042_v45 = vmul.f32 0.7978846, %v12010_v10  ;;  %v11948_v31 = vmul.f32 %v11916_v28, %v20856_v54  ;;  %v11918_v52 = vmul.f32 %v20868_v60, %v20868_v60 }
0x14c3   : > { %v15744_v3 = vpop.eup %15743  ;;  %15755 = vtanh.f32 %v12041_v49  ;;  %v11979_v7 = vmul.f32 0.044715, %v11947_v36  ;;  %v11949_v42 = vmul.f32 %v11917_v38, %v20862_v37 }
0x14c4   : > { %v15746_v43 = vpop.eup %15745  ;;  %v12099_v21 = vadd.f32 1.0, %v15744_v3  ;;  %15757 = vtanh.f32 %v12042_v45  ;;  %v11980_v13 = vmul.f32 0.044715, %v11948_v31  ;;  %v11950_v24 = vmul.f32 %v11918_v52, %v20868_v60  ;;  %v11858_v48 = vpop.f32.mrb[108].mxu1 }
0x14c5   : > { %v15748_v32 = vpop.eup %15747  ;;  %v12011_v41 = vadd.f32 %v11979_v7, %v20852_v4  ;;  %v11981_v25 = vmul.f32 0.044715, %v11949_v42  ;;  %v20880_v2 = vadd.f32 %v11858_v48, %v20793_v9  ;;  %v11860_v63 = vpop.f32.mrb[109].mxu1  ;;  %v20882_v8 = vadd.f32 1.0, %v15746_v43 }
0x14c6   : > { %v12131_v46 = vmul.f32 0.5, %v12099_v21  ;;  %v12101_v22 = vadd.f32 1.0, %v15748_v32  ;;  %v12012_v62 = vadd.f32 %v11980_v13, %v20856_v54  ;;  %v11982_v29 = vmul.f32 0.044715, %v11950_v24  ;;  %v11862_v57 = vpop.f32.mrb[110].mxu1  ;;  %v20891_v44 = vpop.eup %15749 }
0x14c7   : > { %v12043_v59 = vmul.f32 0.7978846, %v12011_v41  ;;  %v12013_v0 = vadd.f32 %v11981_v25, %v20862_v37  ;;  %v11919_v1 = vmul.f32 %v20880_v2, %v20880_v2  ;;  %v20889_v18 = vadd.f32 %v11860_v63, %v20796_v23  ;;  %v11864_v53 = vpop.f32.mrb[111].mxu1 }
0x14c8   : > { %v20894_v47 = vmul.f32 %v12131_v46, %v20799_v61  ;;  %v12133_v10 = vmul.f32 0.5, %v12101_v22  ;;  %v12044_v28 = vmul.f32 0.7978846, %v12012_v62  ;;  %v12014_v49 = vadd.f32 %v11982_v29, %v20868_v60 }
0x14c9   : > { %15759 = vtanh.f32 %v12043_v59  ;;  %v12045_v36 = vmul.f32 0.7978846, %v12013_v0  ;;  %v11951_v38 = vmul.f32 %v11919_v1, %v20880_v2  ;;  %v11920_v45 = vmul.f32 %v20889_v18, %v20889_v18 }
0x14ca   : > { %v20901_v31 = vmul.f32 %v12133_v10, %v20807_v17  ;;  %15761 = vtanh.f32 %v12044_v28  ;;  %v12046_v52 = vmul.f32 0.7978846, %v12014_v49  ;;  %v20904_v3 = vadd.f32 %v11862_v57, %v20793_v9 }
0x14cb   : > { %v15752_v61 = vpop.eup %15751  ;;  %15763 = vtanh.f32 %v12045_v36  ;;  %v11983_v7 = vmul.f32 0.044715, %v11951_v38  ;;  %v11952_v42 = vmul.f32 %v11920_v45, %v20889_v18  ;;  %v20908_v43 = vadd.f32 %v11864_v53, %v20796_v23 }
0x14cc   : > { %v20910_v21 = vpop.eup %15753  ;;  %v12103_v17 = vadd.f32 1.0, %v15752_v61  ;;  %15765 = vtanh.f32 %v12046_v52  ;;  %v11921_v24 = vmul.f32 %v20904_v3, %v20904_v3  ;;  %v11868_v48 = vpop.f32.mrb[112].mxu1  ;;  %v12102_v40 = vadd.f32 1.0, %v20891_v44 }
0x14cd   : > { %v15756_v32 = vpop.eup %15755  ;;  %v12015_v41 = vadd.f32 %v11983_v7, %v20880_v2  ;;  %v11984_v25 = vmul.f32 0.044715, %v11952_v42  ;;  %v11922_v63 = vmul.f32 %v20908_v43, %v20908_v43  ;;  %v20920_v46 = vadd.f32 %v11868_v48, %v20793_v9  ;;  %v11870_v22 = vpop.f32.mrb[113].mxu1 }
0x14ce   : > { %v20922_v62 = vpop.eup %15757  ;;  %v12135_v29 = vmul.f32 0.5, %v12103_v17  ;;  %v12105_v57 = vadd.f32 1.0, %v15756_v32  ;;  %v11953_v59 = vmul.f32 %v11921_v24, %v20904_v3  ;;  %v20926_v0 = vadd.f32 %v11870_v22, %v20796_v23  ;;  %v11872_v1 = vpop.f32.mrb[114].mxu1 }
0x14cf   : > { %v12047_v53 = vmul.f32 0.7978846, %v12015_v41  ;;  %v12016_v10 = vadd.f32 %v11984_v25, %v20889_v18  ;;  %v11954_v28 = vmul.f32 %v11922_v63, %v20908_v43  ;;  %v11923_v49 = vmul.f32 %v20920_v46, %v20920_v46  ;;  %v11874_v36 = vpop.f32.mrb[115].mxu1 }
0x14d0   : > { %v20933_v38 = vmul.f32 %v12135_v29, %v20824_v26  ;;  %v12137_v45 = vmul.f32 0.5, %v12105_v57  ;;  %v11985_v52 = vmul.f32 0.044715, %v11953_v59  ;;  %v11924_v61 = vmul.f32 %v20926_v0, %v20926_v0 }
0x14d1   : > { %15767 = vtanh.f32 %v12047_v53  ;;  %v12048_v7 = vmul.f32 0.7978846, %v12016_v10  ;;  %v11986_v42 = vmul.f32 0.044715, %v11954_v28  ;;  %v11955_v17 = vmul.f32 %v11923_v49, %v20920_v46 }
0x14d2   : > { %v20939_v24 = vmul.f32 %v12137_v45, %v20834_v51  ;;  %v12017_v48 = vadd.f32 %v11985_v52, %v20904_v3  ;;  %v11956_v32 = vmul.f32 %v11924_v61, %v20926_v0  ;;  %v20944_v26 = vadd.f32 %v11872_v1, %v20793_v9 }
0x14d3   : > { %v15760_v41 = vpop.eup %15759  ;;  %15769 = vtanh.f32 %v12048_v7  ;;  %v12018_v25 = vadd.f32 %v11986_v42, %v20908_v43  ;;  %v11987_v63 = vmul.f32 0.044715, %v11955_v17  ;;  %v20948_v22 = vadd.f32 %v11874_v36, %v20796_v23 }
0x14d4   : > { %v20950_v29 = vpop.eup %15761  ;;  %v12107_v57 = vadd.f32 1.0, %v15760_v41  ;;  %v12049_v59 = vmul.f32 0.7978846, %v12017_v48  ;;  %v11988_v53 = vmul.f32 0.044715, %v11956_v32  ;;  %v11878_v10 = vpop.f32.mrb[116].mxu1  ;;  %v11925_v45 = vmul.f32 %v20944_v26, %v20944_v26 }
0x14d5   : > { %v15764_v28 = vpop.eup %15763  ;;  %v12050_v1 = vmul.f32 0.7978846, %v12018_v25  ;;  %v12019_v49 = vadd.f32 %v11987_v63, %v20920_v46  ;;  %v11926_v36 = vmul.f32 %v20948_v22, %v20948_v22  ;;  %v11880_v52 = vpop.f32.mrb[117].mxu1 }
0x14d6   : > { %v20959_v61 = vpop.eup %15765  ;;  %v12139_v7 = vmul.f32 0.5, %v12107_v57  ;;  %v12109_v42 = vadd.f32 1.0, %v15764_v28  ;;  %15771 = vtanh.f32 %v12049_v59  ;;  %v12020_v17 = vadd.f32 %v11988_v53, %v20926_v0  ;;  %v11882_v48 = vpop.f32.mrb[118].mxu1 }
0x14d7   : > { %15773 = vtanh.f32 %v12050_v1  ;;  %v12051_v32 = vmul.f32 0.7978846, %v12019_v49  ;;  %v11957_v41 = vmul.f32 %v11925_v45, %v20944_v26  ;;  %v11958_v25 = vmul.f32 %v11926_v36, %v20948_v22  ;;  %v11884_v63 = vpop.f32.mrb[119].mxu1 }
0x14d8   : > { %v20965_v51 = vmul.f32 %v12139_v7, %v20852_v4  ;;  %v12141_v13 = vmul.f32 0.5, %v12109_v42  ;;  %v12052_v39 = vmul.f32 0.7978846, %v12020_v17  ;;  %v12132_v53 = vmul.f32 0.5, %v20882_v8 }
0x14d9   : > { %15775 = vtanh.f32 %v12051_v32  ;;  %v11989_v57 = vmul.f32 0.044715, %v11957_v41  ;;  %v11990_v59 = vmul.f32 0.044715, %v11958_v25  ;;  %v12134_v1 = vmul.f32 0.5, %v12102_v40 }
0x14da   : > { %v20970_v28 = vmul.f32 %v12141_v13, %v20862_v37  ;;  %15777 = vtanh.f32 %v12052_v39  ;;  %v20973_v49 = vadd.f32 %v11878_v10, %v20793_v9  ;;  %v12164_v44 = vmul.f32 %v12132_v53, %v20802_v35 }
0x14db   : > { %v15768_v45 = vpop.eup %15767  ;;  %v12021_v4 = vadd.f32 %v11989_v57, %v20944_v26  ;;  %v12022_v36 = vadd.f32 %v11990_v59, %v20948_v22  ;;  %v20979_v7 = vadd.f32 %v11880_v52, %v20796_v23  ;;  %v12166_v39 = vmul.f32 %v12134_v1, %v20812_v16 }
0x14dc   : > { %v12199_v8 = vpack.c.bf16 %v20970_v28, %v20965_v51  ;;  %v12111_v37 = vadd.f32 1.0, %v15768_v45  ;;  %v11927_v40 = vmul.f32 %v20973_v49, %v20973_v49  ;;  %v20989_v35 = vadd.f32 %v11882_v48, %v20793_v9 }
0x14dd   : > { %v15770_v13 = vpop.eup %15769  ;;  %v12053_v10 = vmul.f32 0.7978846, %v12021_v4  ;;  %v12054_v42 = vmul.f32 0.7978846, %v12022_v36  ;;  %v11928_v17 = vmul.f32 %v20979_v7, %v20979_v7  ;;  %v12196_v32 = vpack.c.bf16 %v12166_v39, %v12164_v44 }
0x14de   : > { %v12143_v52 = vmul.f32 0.5, %v12111_v37  ;;  %v11959_v41 = vmul.f32 %v11927_v40, %v20973_v49  ;;  %v20993_v25 = vadd.f32 %v11884_v63, %v20796_v23  ;;  %v11929_v57 = vmul.f32 %v20989_v35, %v20989_v35 }
0x14df   : > { %15779 = vtanh.f32 %v12053_v10  ;;  %v11960_v16 = vmul.f32 %v11928_v17, %v20979_v7  ;;  %v12104_v59 = vadd.f32 1.0, %v20910_v21  ;;  %12380 = vmatprep.mubr.bf16.mxu0 %v12196_v32  ;;  %v21722_v36 = vpack.c.bf16 %v20901_v31, %v20894_v47 }
0x14e0   : > { %v15772_v53 = vpop.eup %15771  ;;  %v21000_v1 = vmul.f32 %v12143_v52, %v20880_v2  ;;  %15781 = vtanh.f32 %v12054_v42  ;;  %v11991_v48 = vmul.f32 0.044715, %v11959_v41  ;;  %v11930_v45 = vmul.f32 %v20993_v25, %v20993_v25 }
0x14e1   : > { %v15774_v63 = vpop.eup %15773  ;;  %v12113_v4 = vadd.f32 1.0, %v15772_v53  ;;  %12381 = vmatmul.mubr.bf16.vlgmr.msra.gmra.mrb[96].mxu0 %v21722_v36  ;;  %v11992_v44 = vmul.f32 0.044715, %v11960_v16  ;;  %v11961_v37 = vmul.f32 %v11929_v57, %v20989_v35  ;;  %v12106_v21 = vadd.f32 1.0, %v20922_v62 }
0x14e2   : > { %v12023_v2 = vadd.f32 %v11991_v48, %v20973_v49  ;;  %v11962_v39 = vmul.f32 %v11930_v45, %v20993_v25  ;;  %v12136_v40 = vmul.f32 0.5, %v12104_v59  ;;  %v12108_v10 = vadd.f32 1.0, %v20950_v29 }
0x14e3   : > { %v15776_v42 = vpop.eup %15775  ;;  %v12145_v17 = vmul.f32 0.5, %v12113_v4  ;;  %v12024_v52 = vadd.f32 %v11992_v44, %v20979_v7  ;;  %v11993_v32 = vmul.f32 0.044715, %v11961_v37  ;;  %v12138_v41 = vmul.f32 0.5, %v12106_v21 }
0x14e4   : > { %v15778_v47 = vpop.eup %15777  ;;  %v12115_v31 = vadd.f32 1.0, %v15776_v42  ;;  %v12055_v16 = vmul.f32 0.7978846, %v12023_v2  ;;  %v11994_v53 = vmul.f32 0.044715, %v11962_v39  ;;  %v12168_v57 = vmul.f32 %v12136_v40, %v20828_v56 }
0x14e5   : > { %v21015_v62 = vmul.f32 %v12145_v17, %v20904_v3  ;;  %v12056_v48 = vmul.f32 0.7978846, %v12024_v52  ;;  %v12025_v59 = vadd.f32 %v11993_v32, %v20989_v35  ;;  %v12170_v29 = vmul.f32 %v12138_v41, %v20840_v50 }
0x14e6   : > { %15783 = vtanh.f32 %v12055_v16  ;;  %v12026_v45 = vadd.f32 %v11994_v53, %v20993_v25  ;;  %v12110_v4 = vadd.f32 1.0, %v20959_v61  ;;  %v12147_v56 = vmul.f32 0.5, %v12115_v31 }
0x14e7   : > { %v12201_v36 = vpack.c.bf16 %v21015_v62, %v21000_v1  ;;  %15785 = vtanh.f32 %v12056_v48  ;;  %v12057_v44 = vmul.f32 0.7978846, %v12025_v59  ;;  %v12198_v37 = vpack.c.bf16 %v12170_v29, %v12168_v57 }
0x14e8   : > { %v12058_v21 = vmul.f32 0.7978846, %v12026_v45  ;;  %v12140_v3 = vmul.f32 0.5, %v12108_v10  ;;  %v12142_v2 = vmul.f32 0.5, %v12110_v4  ;;  %v12112_v40 = vadd.f32 1.0, %v15770_v13 }
0x14e9   : > { %v15780_v39 = vpop.eup %15779  ;;  %15787 = vtanh.f32 %v12057_v44  ;;  %12388 = vmatprep.mubr.bf16.mxu0 %v12198_v37  ;;  %v12114_v50 = vadd.f32 1.0, %v15774_v63  ;;  %v12116_v42 = vadd.f32 1.0, %v15778_v47  ;;  %v21723_v61 = vpack.c.bf16 %v20939_v24, %v20933_v38 }
0x14ea   : > { %v15782_v17 = vpop.eup %15781  ;;  %v12117_v52 = vadd.f32 1.0, %v15780_v39  ;;  %15789 = vtanh.f32 %v12058_v21  ;;  %v12172_v1 = vmul.f32 %v12140_v3, %v20856_v54  ;;  %v12174_v32 = vmul.f32 %v12142_v2, %v20868_v60 }
0x14eb   : > { %12389 = vmatmul.mubr.bf16.gmra.mrb[100].mxu0 %v21723_v61  ;;  %v12144_v41 = vmul.f32 0.5, %v12112_v40  ;;  %v12146_v10 = vmul.f32 0.5, %v12114_v50  ;;  %v12118_v31 = vadd.f32 1.0, %v15782_v17  ;;  %v12148_v16 = vmul.f32 0.5, %v12116_v42 }
0x14ec   : > { %v12149_v53 = vmul.f32 0.5, %v12117_v52  ;;  %v12200_v57 = vpack.c.bf16 %v12174_v32, %v12172_v1  ;;  %v12179_v62 = vmul.f32 %v12147_v56, %v20920_v46 }
0x14ed   : > { %v12176_v13 = vmul.f32 %v12144_v41, %v20889_v18  ;;  %v12178_v63 = vmul.f32 %v12146_v10, %v20908_v43  ;;  %v12150_v47 = vmul.f32 0.5, %v12118_v31  ;;  %v12180_v54 = vmul.f32 %v12148_v16, %v20926_v0 }
0x14ee   : > { %v12181_v38 = vmul.f32 %v12149_v53, %v20944_v26  ;;  %12396 = vmatprep.mubr.bf16.mxu0 %v12200_v57 }
0x14ef   : > { %v12202_v24 = vpack.c.bf16 %v12178_v63, %v12176_v13  ;;  %v12182_v60 = vmul.f32 %v12150_v47, %v20948_v22 }
0x14f0   : > { %v15784_v48 = vpop.eup %15783  ;;  %v12203_v59 = vpack.c.bf16 %v12181_v38, %v12179_v62 }
0x14f1   : > { %v15786_v29 = vpop.eup %15785  ;;  %v12119_v45 = vadd.f32 1.0, %v15784_v48  ;;  %v12204_v4 = vpack.c.bf16 %v12182_v60, %v12180_v54 }
0x14f2   : > { %v12120_v18 = vadd.f32 1.0, %v15786_v29 }
0x14f3   : > { %12397 = vmatmul.mubr.bf16.gmra.mrb[104].mxu0 %v12199_v8  ;;  %v15788_v43 = vpop.eup %15787  ;;  %v12151_v26 = vmul.f32 0.5, %v12119_v45 }
0x14f4   : > { %12404 = vmatprep.mubr.bf16.mxu0 %v12202_v24  ;;  %v15790_v46 = vpop.eup %15789  ;;  %v12121_v44 = vadd.f32 1.0, %v15788_v43  ;;  %v12152_v56 = vmul.f32 0.5, %v12120_v18 }
0x14f5   : > { %v12122_v37 = vadd.f32 1.0, %v15790_v46  ;;  %v12183_v22 = vmul.f32 %v12151_v26, %v20973_v49 }
0x14f6   : > { %v12153_v0 = vmul.f32 0.5, %v12121_v44  ;;  %v12184_v2 = vmul.f32 %v12152_v56, %v20979_v7 }
0x14f7   : > { %v12154_v21 = vmul.f32 0.5, %v12122_v37 }
0x14f8   : > { %v12185_v3 = vmul.f32 %v12153_v0, %v20989_v35 }
0x14f9   : > { %v12186_v39 = vmul.f32 %v12154_v21, %v20993_v25  ;;  %v11888_v51 = vpop.f32.mrb[120].mxu1 }
0x14fa   : > { %v12205_v28 = vpack.c.bf16 %v12185_v3, %v12183_v22  ;;  %v21042_v8 = vadd.f32 %v11888_v51, %v20793_v9  ;;  %v11890_v40 = vpop.f32.mrb[121].mxu1 }
0x14fb   : > { %12405 = vmatmul.mubr.bf16.gmra.mrb[108].mxu0 %v12201_v36  ;;  %v12206_v50 = vpack.c.bf16 %v12186_v39, %v12184_v2  ;;  %v21045_v42 = vadd.f32 %v11890_v40, %v20796_v23  ;;  %v11892_v17 = vpop.f32.mrb[122].mxu1 }
0x14fc   : > { %12412 = vmatprep.mubr.bf16.mxu0 %v12204_v4  ;;  %v11931_v49 = vmul.f32 %v21042_v8, %v21042_v8  ;;  %v21050_v7 = vadd.f32 %v11892_v17, %v20793_v9  ;;  %v11894_v35 = vpop.f32.mrb[123].mxu1 }
0x14fd   : > { %v11932_v25 = vmul.f32 %v21045_v42, %v21045_v42  ;;  %v21055_v36 = vadd.f32 %v11894_v35, %v20796_v23 }
0x14fe   : > { %v11963_v52 = vmul.f32 %v11931_v49, %v21042_v8  ;;  %v11933_v61 = vmul.f32 %v21050_v7, %v21050_v7 }
0x14ff   : > { %v11964_v1 = vmul.f32 %v11932_v25, %v21045_v42  ;;  %v11934_v32 = vmul.f32 %v21055_v36, %v21055_v36 }
0x1500   : > { %v11995_v41 = vmul.f32 0.044715, %v11963_v52  ;;  %v11965_v10 = vmul.f32 %v11933_v61, %v21050_v7 }
0x1501   : > { %v11996_v31 = vmul.f32 0.044715, %v11964_v1  ;;  %v11966_v16 = vmul.f32 %v11934_v32, %v21055_v36  ;;  %v11898_v53 = vpop.f32.mrb[124].mxu1 }
0x1502   : > { %v12027_v57 = vadd.f32 %v11995_v41, %v21042_v8  ;;  %v11997_v13 = vmul.f32 0.044715, %v11965_v10  ;;  %v21067_v63 = vadd.f32 %v11898_v53, %v20793_v9  ;;  %v11900_v47 = vpop.f32.mrb[125].mxu1 }
0x1503   : > { %12413 = vmatmul.mubr.bf16.gmra.mrb[112].mxu0 %v12203_v59  ;;  %v12028_v62 = vadd.f32 %v11996_v31, %v21045_v42  ;;  %v11998_v38 = vmul.f32 0.044715, %v11966_v16  ;;  %v21071_v24 = vadd.f32 %v11900_v47, %v20796_v23  ;;  %v11902_v54 = vpop.f32.mrb[126].mxu1 }
0x1504   : > { %12420 = vmatprep.mubr.bf16.mxu0 %v12206_v50  ;;  %v12059_v60 = vmul.f32 0.7978846, %v12027_v57  ;;  %v12029_v48 = vadd.f32 %v11997_v13, %v21050_v7  ;;  %v11935_v59 = vmul.f32 %v21067_v63, %v21067_v63  ;;  %v21077_v29 = vadd.f32 %v11902_v54, %v20793_v9  ;;  %v11904_v45 = vpop.f32.mrb[127].mxu1 }
0x1505   : > { %v12060_v4 = vmul.f32 0.7978846, %v12028_v62  ;;  %v12030_v18 = vadd.f32 %v11998_v38, %v21055_v36  ;;  %v11936_v43 = vmul.f32 %v21071_v24, %v21071_v24  ;;  %v21083_v46 = vadd.f32 %v11904_v45, %v20796_v23 }
0x1506   : > { %15791 = vtanh.f32 %v12059_v60  ;;  %v12061_v26 = vmul.f32 0.7978846, %v12029_v48  ;;  %v11967_v44 = vmul.f32 %v11935_v59, %v21067_v63  ;;  %v11937_v37 = vmul.f32 %v21077_v29, %v21077_v29 }
0x1507   : > { %15793 = vtanh.f32 %v12060_v4  ;;  %v12062_v9 = vmul.f32 0.7978846, %v12030_v18  ;;  %v11968_v56 = vmul.f32 %v11936_v43, %v21071_v24  ;;  %v11938_v0 = vmul.f32 %v21083_v46, %v21083_v46 }
0x1508   : > { %15795 = vtanh.f32 %v12061_v26  ;;  %v11999_v21 = vmul.f32 0.044715, %v11967_v44  ;;  %v11969_v22 = vmul.f32 %v11937_v37, %v21077_v29 }
0x1509   : > { %15797 = vtanh.f32 %v12062_v9  ;;  %v12000_v23 = vmul.f32 0.044715, %v11968_v56  ;;  %v11970_v3 = vmul.f32 %v11938_v0, %v21083_v46 }
0x150a   : > { %v12031_v2 = vadd.f32 %v11999_v21, %v21067_v63  ;;  %v12001_v39 = vmul.f32 0.044715, %v11969_v22 }
0x150b   : > { %12421 = vmatmul.mubr.bf16.gmra.mrb[116].mxu0 %v12205_v28  ;;  %v12032_v51 = vadd.f32 %v12000_v23, %v21071_v24  ;;  %v12002_v40 = vmul.f32 0.044715, %v11970_v3 }
0x150c   : > { %v12063_v50 = vmul.f32 0.7978846, %v12031_v2  ;;  %v12033_v17 = vadd.f32 %v12001_v39, %v21077_v29  ;;  %v21108_v39 = vld [vmem:[%s21593_s8 + $0x1] ss:$0 sm:$0xff] }
0x150d   : > { %v12064_v49 = vmul.f32 0.7978846, %v12032_v51  ;;  %v12034_v35 = vadd.f32 %v12002_v40, %v21083_v46 }
0x150e   : > { %15799 = vtanh.f32 %v12063_v50  ;;  %v12065_v25 = vmul.f32 0.7978846, %v12033_v17 }
0x150f   : > { %15801 = vtanh.f32 %v12064_v49  ;;  %v12066_v52 = vmul.f32 0.7978846, %v12034_v35 }
0x1510   : > { %v15792_v61 = vpop.eup %15791  ;;  %15803 = vtanh.f32 %v12065_v25 }
0x1511   : > { %v15794_v1 = vpop.eup %15793  ;;  %v12123_v28 = vadd.f32 1.0, %v15792_v61  ;;  %15805 = vtanh.f32 %v12066_v52 }
0x1512   : > { %v15796_v32 = vpop.eup %15795  ;;  %v12124_v41 = vadd.f32 1.0, %v15794_v1 }
0x1513   : > { %v15798_v10 = vpop.eup %15797  ;;  %v12155_v31 = vmul.f32 0.5, %v12123_v28  ;;  %v12125_v16 = vadd.f32 1.0, %v15796_v32 }
0x1514   : > { %v12126_v53 = vadd.f32 1.0, %v15798_v10  ;;  %v12156_v57 = vmul.f32 0.5, %v12124_v41 }
0x1515   : > { %v12157_v13 = vmul.f32 0.5, %v12125_v16  ;;  %v12187_v62 = vmul.f32 %v12155_v31, %v21042_v8 }
0x1516   : > { %v12158_v47 = vmul.f32 0.5, %v12126_v53  ;;  %v12188_v60 = vmul.f32 %v12156_v57, %v21045_v42 }
0x1517   : > { %v12189_v38 = vmul.f32 %v12157_v13, %v21050_v7 }
0x1518   : > { %v15800_v54 = vpop.eup %15799  ;;  %v12190_v48 = vmul.f32 %v12158_v47, %v21055_v36 }
0x1519   : > { %v15802_v59 = vpop.eup %15801  ;;  %v12207_v45 = vpack.c.bf16 %v12189_v38, %v12187_v62  ;;  %v12127_v4 = vadd.f32 1.0, %v15800_v54 }
0x151a   : > { %v15804_v18 = vpop.eup %15803  ;;  %v12208_v43 = vpack.c.bf16 %v12190_v48, %v12188_v60  ;;  %v12128_v26 = vadd.f32 1.0, %v15802_v59 }
0x151b   : > { %v15806_v44 = vpop.eup %15805  ;;  %v12159_v37 = vmul.f32 0.5, %v12127_v4  ;;  %v12129_v9 = vadd.f32 1.0, %v15804_v18 }
0x151c   : > { %12428 = vmatprep.mubr.bf16.mxu0 %v12208_v43  ;;  %v12130_v56 = vadd.f32 1.0, %v15806_v44  ;;  %v12160_v0 = vmul.f32 0.5, %v12128_v26 }
0x151d   : > { %v12161_v8 = vmul.f32 0.5, %v12129_v9  ;;  %12429 = vmatmul.mubr.bf16.gmra.mrb[120].mxu0 %v12207_v45  ;;  %v12191_v21 = vmul.f32 %v12159_v37, %v21067_v63 }
0x151e   : > { %v12162_v7 = vmul.f32 0.5, %v12130_v56  ;;  %v12192_v36 = vmul.f32 %v12160_v0, %v21071_v24 }
0x151f   : > { %v12193_v42 = vmul.f32 %v12161_v8, %v21077_v29 }
0x1520   : > { %v12194_v22 = vmul.f32 %v12162_v7, %v21083_v46 }
0x1521   : > { %v12209_v23 = vpack.c.bf16 %v12193_v42, %v12191_v21 }
0x1522   : > { %v12210_v3 = vpack.c.bf16 %v12194_v22, %v12192_v36 }
0x1524   : > { %12436 = vmatprep.mubr.bf16.mxu0 %v12210_v3 }
0x1525   : > { %12437 = vmatmul.mubr.bf16.gmra.mrb[124].mxu0 %v12209_v23 }
0x15b4   : > { %v13560_v2 = vpop.f32.mrb[96].mxu0 }
0x15b5   : > { %v13561_v51 = vpop.f32.mrb[97].mxu0 }
0x15b6   : > { %v13562_v40 = vadd.f32 %v13561_v51, %v13560_v2  ;;  %v13563_v50 = vpop.f32.mrb[98].mxu0 }
0x15b7   : > { %v13564_v63 = vpop.f32.mrb[99].mxu0 }
0x15b8   : > { %v12383_v29 = vadd.f32 %v13562_v40, %v21108_v39  ;;  %v21111_v17 = vadd.f32 %v13564_v63, %v13563_v50 }
0x15ba   : > { %v21114_v24 = vadd.f32 %v12383_v29, %v20691_v14 }
0x15bc   : > { %12465 = vadd.xlane.f32.xlu0 %v21114_v24 }
0x15be   : > { %v13566_v46 = vpop.f32.mrb[100].mxu0 }
0x15bf   : > { %v13567_v49 = vpop.f32.mrb[101].mxu0 }
0x15c0   : > { %v13568_v35 = vadd.f32 %v13567_v49, %v13566_v46  ;;  %v13569_v25 = vpop.f32.mrb[102].mxu0 }
0x15c1   : > { %v13570_v52 = vpop.f32.mrb[103].mxu0 }
0x15c2   : > { %v12391_v61 = vadd.f32 %v13568_v35, %v21108_v39  ;;  %v21118_v1 = vadd.f32 %v13570_v52, %v13569_v25 }
0x15c4   : > { %v21121_v28 = vadd.f32 %v12391_v61, %v20707_v19 }
0x15c6   : > { %12469 = vadd.xlane.f32.xlu1 %v21121_v28  ;;  %v13572_v32 = vpop.f32.mrb[104].mxu0 }
0x15c7   : > { %v13573_v41 = vpop.f32.mrb[105].mxu0 }
0x15c8   : > { %v13574_v14 = vadd.f32 %v13573_v41, %v13572_v32  ;;  %v13575_v10 = vpop.f32.mrb[106].mxu0 }
0x15c9   : > { %v13576_v31 = vpop.f32.mrb[107].mxu0 }
0x15ca   : > { %v12399_v16 = vadd.f32 %v13574_v14, %v21108_v39  ;;  %v21125_v53 = vadd.f32 %v13576_v31, %v13575_v10 }
0x15cc   : > { %v12449_v57 = vadd.f32 %v12399_v16, %v20717_v20 }
0x15ce   : > { %12473 = vadd.xlane.f32.xlu0 %v12449_v57  ;;  %v13578_v13 = vpop.f32.mrb[108].mxu0 }
0x15cf   : > { %v13579_v47 = vpop.f32.mrb[109].mxu0 }
0x15d0   : > { %v13580_v62 = vadd.f32 %v13579_v47, %v13578_v13  ;;  %v13581_v38 = vpop.f32.mrb[110].mxu0 }
0x15d1   : > { %v13582_v19 = vpop.f32.mrb[111].mxu0 }
0x15d2   : > { %v12407_v54 = vadd.f32 %v13580_v62, %v21108_v39  ;;  %v21129_v60 = vadd.f32 %v13582_v19, %v13581_v38 }
0x15d4   : > { %v12451_v48 = vadd.f32 %v12407_v54, %v20733_v12 }
0x15d6   : > { %12477 = vadd.xlane.f32.xlu1 %v12451_v48  ;;  %v13584_v59 = vpop.f32.mrb[112].mxu0 }
0x15d7   : > { %v13585_v45 = vpop.f32.mrb[113].mxu0 }
0x15d8   : > { %v13586_v4 = vadd.f32 %v13585_v45, %v13584_v59  ;;  %v13587_v18 = vpop.f32.mrb[114].mxu0 }
0x15d9   : > { %v13588_v43 = vpop.f32.mrb[115].mxu0 }
0x15da   : > { %v12415_v20 = vadd.f32 %v13586_v4, %v21108_v39  ;;  %v21133_v26 = vadd.f32 %v13588_v43, %v13587_v18 }
0x15dc   : > { %v12453_v44 = vadd.f32 %v12415_v20, %v20747_v15 }
0x15de   : > { %12481 = vadd.xlane.f32.xlu0 %v12453_v44  ;;  %v13590_v37 = vpop.f32.mrb[116].mxu0 }
0x15df   : > { %v13591_v9 = vpop.f32.mrb[117].mxu0 }
0x15e0   : > { %v13592_v56 = vadd.f32 %v13591_v9, %v13590_v37  ;;  %v13593_v0 = vpop.f32.mrb[118].mxu0 }
0x15e1   : > { %v13594_v8 = vpop.f32.mrb[119].mxu0 }
0x15e2   : > { %v12423_v12 = vadd.f32 %v13592_v56, %v21108_v39  ;;  %v21137_v7 = vadd.f32 %v13594_v8, %v13593_v0  ;;  %v12402_v56 = vadd.f32 %v21125_v53, %v21108_v39 }
0x15e4   : > { %v12455_v21 = vadd.f32 %v12423_v12, %v20759_v30 }
0x15e6   : > { %12485 = vadd.xlane.f32.xlu1 %v12455_v21 }
0x15f0   : > { %v13596_v42 = vpop.f32.mrb[120].mxu0 }
0x15f1   : > { %v13597_v36 = vpop.f32.mrb[121].mxu0 }
0x15f2   : > { %v13598_v22 = vadd.f32 %v13597_v36, %v13596_v42  ;;  %v13599_v23 = vpop.f32.mrb[122].mxu0  ;;  %v21191_v36 = vadd.f32 %v12402_v56, %v20720_v11  ;;  %v12426_v11 = vadd.f32 %v21137_v7, %v21108_v39 }
0x15f3   : > { %v13600_v3 = vpop.f32.mrb[123].mxu0 }
0x15f4   : > { %v12431_v15 = vadd.f32 %v13598_v22, %v21108_v39  ;;  %v13601_v2 = vadd.f32 %v13600_v3, %v13599_v23  ;;  %v21725_v3 = vld [vmem:[#allocation25_spill] sm:$0xff] }
0x15f6   : > { %v12457_v51 = vadd.f32 %v12431_v15, %v20769_v55  ;;  %v12434_v53 = vadd.f32 %v13601_v2, %v21108_v39 }
0x15f8   : > { %12489 = vadd.xlane.f32.xlu0 %v12457_v51  ;;  %v13602_v40 = vpop.f32.mrb[124].mxu0 }
0x15f9   : > { %v13603_v50 = vpop.f32.mrb[125].mxu0 }
0x15fa   : > { %v13604_v63 = vadd.f32 %v13603_v50, %v13602_v40  ;;  %v13605_v29 = vpop.f32.mrb[126].mxu0 }
0x15fb   : > { %v13606_v46 = vpop.f32.mrb[127].mxu0 }
0x15fc   : > { %v12439_v49 = vadd.f32 %v13604_v63, %v21108_v39  ;;  %v13607_v30 = vadd.f32 %v13606_v46, %v13605_v29  ;;  %v21233_v29 = vld [vmem:[%s21599_s26 + $0x1] ss:$0 sm:$0xff] }
0x15fe   : > { %v12459_v35 = vadd.f32 %v12439_v49, %v20785_v5 }
0x1600   : > { %12493 = vadd.xlane.f32.xlu1 %v12459_v35 }
0x1649   : > { %v12466_v25 = vpop.xlane.xlu0 %12465 }
0x164a   : > { %v12497_v52 = vmul.f32 0.0078125, %v12466_v25 }
0x164c   : > { %v21145_v61 = vsub.f32 %v21114_v24, %v12497_v52 }
0x164e   : > { %v12529_v55 = vmul.f32 %v21145_v61, %v21145_v61 }
0x1650   : > { %12545 = vadd.xlane.f32.xlu0 %v12529_v55 }
0x1653   : > { %v12470_v32 = vpop.xlane.xlu1 %12469 }
0x1654   : > { %v12499_v41 = vmul.f32 0.0078125, %v12470_v32 }
0x1656   : > { %v21150_v14 = vsub.f32 %v21121_v28, %v12499_v41 }
0x1658   : > { %v12531_v10 = vmul.f32 %v21150_v14, %v21150_v14 }
0x165a   : > { %12549 = vadd.xlane.f32.xlu1 %v12531_v10 }
0x165b   : > { %v12474_v5 = vpop.xlane.xlu0 %12473 }
0x165c   : > { %v12501_v31 = vmul.f32 0.0078125, %v12474_v5 }
0x165e   : > { %v21154_v16 = vsub.f32 %v12449_v57, %v12501_v31 }
0x1660   : > { %v12533_v24 = vmul.f32 %v21154_v16, %v21154_v16 }
0x1662   : > { %12553 = vadd.xlane.f32.xlu0 %v12533_v24 }
0x1663   : > { %v12478_v13 = vpop.xlane.xlu1 %12477 }
0x1664   : > { %v12503_v47 = vmul.f32 0.0078125, %v12478_v13 }
0x1666   : > { %v21158_v62 = vsub.f32 %v12451_v48, %v12503_v47 }
0x1668   : > { %v12535_v28 = vmul.f32 %v21158_v62, %v21158_v62 }
0x166a   : > { %12557 = vadd.xlane.f32.xlu1 %v12535_v28 }
0x166b   : > { %v12482_v38 = vpop.xlane.xlu0 %12481 }
0x166c   : > { %v12505_v19 = vmul.f32 0.0078125, %v12482_v38 }
0x166e   : > { %v21162_v54 = vsub.f32 %v12453_v44, %v12505_v19  ;;  %v12386_v44 = vadd.f32 %v21111_v17, %v21108_v39  ;;  %v12418_v17 = vadd.f32 %v21133_v26, %v21108_v39 }
0x1670   : > { %v12537_v57 = vmul.f32 %v21162_v54, %v21162_v54  ;;  %v21179_v8 = vadd.f32 %v12386_v44, %v20694_v33  ;;  %v12410_v33 = vadd.f32 %v21129_v60, %v21108_v39  ;;  %v21211_v60 = vadd.f32 %v12434_v53, %v20772_v27 }
0x1672   : > { %12561 = vadd.xlane.f32.xlu0 %v12537_v57  ;;  %v21208_v26 = vadd.f32 %v12410_v33, %v20730_v58 }
0x1673   : > { %v12486_v59 = vpop.xlane.xlu1 %12485 }
0x1674   : > { %v12507_v45 = vmul.f32 0.0078125, %v12486_v59 }
0x1676   : > { %v21166_v4 = vsub.f32 %v12455_v21, %v12507_v45  ;;  %v12394_v21 = vadd.f32 %v21118_v1, %v21108_v39  ;;  %v21201_v1 = vadd.f32 %v12418_v17, %v20743_v6  ;;  %v21724_v6 = vld [vmem:[#allocation23_spill] sm:$0xff] }
0x1677   : > { %v21217_v23 = vadd.f32 %v12426_v11, %v21724_v6 }
0x1678   : > { %v12539_v48 = vmul.f32 %v21166_v4, %v21166_v4  ;;  %v21198_v22 = vadd.f32 %v12394_v21, %v20704_v34  ;;  %v12442_v34 = vadd.f32 %v13607_v30, %v21108_v39  ;;  %v21227_v39 = vld [vmem:[%s21598_s22 + $0x1] ss:$0 sm:$0xff] }
0x167a   : > { %12565 = vadd.xlane.f32.xlu1 %v12539_v48  ;;  %v21221_v15 = vadd.f32 %v12442_v34, %v21725_v3 }
0x1685   : > { %v12490_v18 = vpop.xlane.xlu0 %12489 }
0x1686   : > { %v12509_v43 = vmul.f32 0.0078125, %v12490_v18 }
0x1688   : > { %v21170_v20 = vsub.f32 %v12457_v51, %v12509_v43 }
0x168a   : > { %v12541_v37 = vmul.f32 %v21170_v20, %v21170_v20 }
0x168c   : > { %12569 = vadd.xlane.f32.xlu0 %v12541_v37 }
0x168d   : > { %v12494_v9 = vpop.xlane.xlu1 %12493 }
0x168e   : > { %v12511_v0 = vmul.f32 0.0078125, %v12494_v9 }
0x1690   : > { %v21181_v12 = vsub.f32 %v12459_v35, %v12511_v0  ;;  %12467 = vadd.xlane.f32.xlu0 %v21179_v8 }
0x1692   : > { %v12543_v42 = vmul.f32 %v21181_v12, %v21181_v12 }
0x1694   : > { %12573 = vadd.xlane.f32.xlu1 %v12543_v42  ;;  %12475 = vadd.xlane.f32.xlu0 %v21191_v36 }
0x1698   : > { %12471 = vadd.xlane.f32.xlu1 %v21198_v22  ;;  %12483 = vadd.xlane.f32.xlu0 %v21201_v1 }
0x169c   : > { %12479 = vadd.xlane.f32.xlu1 %v21208_v26  ;;  %12491 = vadd.xlane.f32.xlu0 %v21211_v60 }
0x16a0   : > { %12487 = vadd.xlane.f32.xlu1 %v21217_v23 }
0x16a4   : > { %12495 = vadd.xlane.f32.xlu1 %v21221_v15 }
0x16dd   : > { %v12546_v58 = vpop.xlane.xlu0 %12545 }
0x16de   : > { %v12577_v7 = vmul.f32 0.0078125, %v12546_v58 }
0x16e0   : > { %v12593_v27 = vadd.f32 1e-05, %v12577_v7 }
0x16e2   : > { %15807 = vrsqrt.f32 %v12593_v27 }
0x16e7   : > { %v12550_v2 = vpop.xlane.xlu1 %12549 }
0x16e8   : > { %v12579_v51 = vmul.f32 0.0078125, %v12550_v2 }
0x16ea   : > { %v12595_v40 = vadd.f32 1e-05, %v12579_v51 }
0x16ec   : > { %15809 = vrsqrt.f32 %v12595_v40  ;;  %v15808_v50 = vpop.eup %15807 }
0x16ed   : > { %v12625_v63 = vmul.f32 %v15808_v50, %v21145_v61 }
0x16ef   : > { %v12554_v46 = vpop.xlane.xlu0 %12553  ;;  %v12647_v49 = vmul.f32 %v21227_v39, %v12625_v63 }
0x16f0   : > { %v12581_v30 = vmul.f32 0.0078125, %v12554_v46 }
0x16f1   : > { %v12669_v35 = vadd.f32 %v21233_v29, %v12647_v49 }
0x16f2   : > { %v12597_v25 = vadd.f32 1e-05, %v12581_v30 }
0x16f3   : > { %12685 = vst [vmem:[#allocation2] sm:$0xff] %v12669_v35 }
0x16f4   : > { %15811 = vrsqrt.f32 %v12597_v25 }
0x16f6   : > { %v15810_v52 = vpop.eup %15809 }
0x16f7   : > { %v12627_v55 = vmul.f32 %v15810_v52, %v21150_v14  ;;  %v12558_v32 = vpop.xlane.xlu1 %12557 }
0x16f8   : > { %v12583_v41 = vmul.f32 0.0078125, %v12558_v32 }
0x16f9   : > { %v12649_v61 = vmul.f32 %v21227_v39, %v12627_v55 }
0x16fa   : > { %v12599_v10 = vadd.f32 1e-05, %v12583_v41 }
0x16fb   : > { %v12671_v5 = vadd.f32 %v21233_v29, %v12649_v61 }
0x16fc   : > { %15813 = vrsqrt.f32 %v12599_v10 }
0x16fd   : > { %12687 = vst [vmem:[#allocation2 + $0x10] sm:$0xff] %v12671_v5 }
0x16fe   : > { %v15812_v31 = vpop.eup %15811 }
0x16ff   : > { %v12629_v24 = vmul.f32 %v15812_v31, %v21154_v16  ;;  %v12562_v13 = vpop.xlane.xlu0 %12561 }
0x1700   : > { %v12585_v47 = vmul.f32 0.0078125, %v12562_v13 }
0x1701   : > { %v12651_v28 = vmul.f32 %v21227_v39, %v12629_v24 }
0x1702   : > { %v12601_v38 = vadd.f32 1e-05, %v12585_v47 }
0x1703   : > { %v12673_v19 = vadd.f32 %v21233_v29, %v12651_v28 }
0x1704   : > { %15815 = vrsqrt.f32 %v12601_v38 }
0x1705   : > { %12689 = vst [vmem:[#allocation2 + $0x20] sm:$0xff] %v12673_v19 }
0x1706   : > { %v15814_v14 = vpop.eup %15813 }
0x1707   : > { %v12631_v57 = vmul.f32 %v15814_v14, %v21158_v62  ;;  %v12566_v59 = vpop.xlane.xlu1 %12565 }
0x1708   : > { %v12587_v45 = vmul.f32 0.0078125, %v12566_v59 }
0x1709   : > { %v12653_v48 = vmul.f32 %v21227_v39, %v12631_v57 }
0x170a   : > { %v12603_v18 = vadd.f32 1e-05, %v12587_v45  ;;  %v12701_v45 = vld [vmem:[#allocation2] ss:$16 sm:$0x3] }
0x170b   : > { %v12675_v43 = vadd.f32 %v21233_v29, %v12653_v48 }
0x170c   : > { %15817 = vrsqrt.f32 %v12603_v18 }
0x170d   : > { %12691 = vst [vmem:[#allocation2 + $0x30] sm:$0xff] %v12675_v43 }
0x170e   : > { %v15816_v16 = vpop.eup %15815 }
0x170f   : > { %v12633_v44 = vmul.f32 %v15816_v16, %v21162_v54 }
0x1711   : > { %v12655_v37 = vmul.f32 %v21227_v39, %v12633_v44 }
0x1713   : > { %v12677_v9 = vadd.f32 %v21233_v29, %v12655_v37 }
0x1714   : > { %v12702_v59 = vld [vmem:[#allocation2] ss:$16 sm:$0xc] }
0x1715   : > { %12693 = vst [vmem:[#allocation2 + $0x40] sm:$0xff] %v12677_v9  ;;  %v12703_v48 = vor.u32 %v12702_v59, %v12701_v45 }
0x1716   : > { %v15818_v56 = vpop.eup %15817 }
0x1717   : > { %v12635_v62 = vmul.f32 %v15818_v56, %v21166_v4 }
0x1719   : > { %v12657_v0 = vmul.f32 %v21227_v39, %v12635_v62  ;;  %v12570_v21 = vpop.xlane.xlu0 %12569 }
0x171a   : > { %v12589_v42 = vmul.f32 0.0078125, %v12570_v21 }
0x171b   : > { %v12679_v17 = vadd.f32 %v21233_v29, %v12657_v0 }
0x171c   : > { %v12605_v33 = vadd.f32 1e-05, %v12589_v42 }
0x171d   : > { %12695 = vst [vmem:[#allocation2 + $0x50] sm:$0xff] %v12679_v17  ;;  %v12468_v53 = vpop.xlane.xlu0 %12467 }
0x171e   : > { %15819 = vrsqrt.f32 %v12605_v33  ;;  %v12498_v11 = vmul.f32 0.0078125, %v12468_v53 }
0x1720   : > { %v12514_v54 = vsub.f32 %v21179_v8, %v12498_v11 }
0x1721   : > { %v12574_v34 = vpop.xlane.xlu1 %12573  ;;  %v12476_v6 = vpop.xlane.xlu0 %12475 }
0x1722   : > { %v12591_v3 = vmul.f32 0.0078125, %v12574_v34  ;;  %v12502_v58 = vmul.f32 0.0078125, %v12476_v6  ;;  %v12530_v7 = vmul.f32 %v12514_v54, %v12514_v54 }
0x1724   : > { %v12607_v27 = vadd.f32 1e-05, %v12591_v3  ;;  %v12518_v4 = vsub.f32 %v21191_v36, %v12502_v58  ;;  %12547 = vadd.xlane.f32.xlu0 %v12530_v7 }
0x1725   : > { %v12472_v2 = vpop.xlane.xlu1 %12471  ;;  %v12484_v51 = vpop.xlane.xlu0 %12483 }
0x1726   : > { %15821 = vrsqrt.f32 %v12607_v27  ;;  %v12500_v40 = vmul.f32 0.0078125, %v12472_v2  ;;  %v12506_v50 = vmul.f32 0.0078125, %v12484_v51  ;;  %v12534_v63 = vmul.f32 %v12518_v4, %v12518_v4 }
0x1728   : > { %v15820_v46 = vpop.eup %15819  ;;  %v12516_v49 = vsub.f32 %v21198_v22, %v12500_v40  ;;  %v12522_v8 = vsub.f32 %v21201_v1, %v12506_v50  ;;  %12555 = vadd.xlane.f32.xlu0 %v12534_v63 }
0x1729   : > { %v12637_v30 = vmul.f32 %v15820_v46, %v21170_v20  ;;  %v12480_v35 = vpop.xlane.xlu1 %12479  ;;  %v12492_v25 = vpop.xlane.xlu0 %12491 }
0x172a   : > { %v12504_v52 = vmul.f32 0.0078125, %v12480_v35  ;;  %v12510_v55 = vmul.f32 0.0078125, %v12492_v25  ;;  %v12532_v36 = vmul.f32 %v12516_v49, %v12516_v49  ;;  %v12538_v32 = vmul.f32 %v12522_v8, %v12522_v8 }
0x172b   : > { %v12659_v41 = vmul.f32 %v21227_v39, %v12637_v30 }
0x172c   : > { %v12520_v61 = vsub.f32 %v21208_v26, %v12504_v52  ;;  %v12526_v10 = vsub.f32 %v21211_v60, %v12510_v55  ;;  %12551 = vadd.xlane.f32.xlu1 %v12532_v36  ;;  %12563 = vadd.xlane.f32.xlu0 %v12538_v32 }
0x172d   : > { %v12681_v22 = vadd.f32 %v21233_v29, %v12659_v41  ;;  %v12488_v1 = vpop.xlane.xlu1 %12487 }
0x172e   : > { %v12508_v5 = vmul.f32 0.0078125, %v12488_v1  ;;  %v12536_v31 = vmul.f32 %v12520_v61, %v12520_v61  ;;  %v12542_v20 = vmul.f32 %v12526_v10, %v12526_v10 }
0x172f   : > { %12697 = vst [vmem:[#allocation2 + $0x60] sm:$0xff] %v12681_v22 }
0x1730   : > { %v15822_v24 = vpop.eup %15821  ;;  %v12524_v13 = vsub.f32 %v21217_v23, %v12508_v5  ;;  %12559 = vadd.xlane.f32.xlu1 %v12536_v31  ;;  %12571 = vadd.xlane.f32.xlu0 %v12542_v20  ;;  %v12704_v23 = vld [vmem:[#allocation2] ss:$16 sm:$0x30] }
0x1731   : > { %v12639_v47 = vmul.f32 %v15822_v24, %v21181_v12  ;;  %v12496_v28 = vpop.xlane.xlu1 %12495  ;;  %v12705_v18 = vor.u32 %v12704_v23, %v12703_v48 }
0x1732   : > { %v12512_v26 = vmul.f32 0.0078125, %v12496_v28  ;;  %v12540_v38 = vmul.f32 %v12524_v13, %v12524_v13 }
0x1733   : > { %v12661_v60 = vmul.f32 %v21227_v39, %v12639_v47 }
0x1734   : > { %v12528_v19 = vsub.f32 %v21221_v15, %v12512_v26  ;;  %12567 = vadd.xlane.f32.xlu1 %v12540_v38 }
0x1735   : > { %v12683_v14 = vadd.f32 %v21233_v29, %v12661_v60 }
0x1736   : > { %v12544_v57 = vmul.f32 %v12528_v19, %v12528_v19 }
0x1737   : > { %12699 = vst [vmem:[#allocation2 + $0x70] sm:$0xff] %v12683_v14 }
0x1738   : > { %12575 = vadd.xlane.f32.xlu1 %v12544_v57 }
0x173e   : > { %v12706_v43 = vld [vmem:[#allocation2] ss:$16 sm:$0xc0] }
0x173f   : > { %v12707_v12 = vor.u32 %v12706_v43, %v12705_v18 }
0x1741   : > { %v12708_v16 = vmul.f32 %v12707_v12, %v12707_v12 }
0x1743   : > { %12709 = vadd.xlane.f32.xlu0 %v12708_v16 }
0x17b1   : > { %v12548_v44 = vpop.xlane.xlu0 %12547 }
0x17b2   : > { %v12578_v37 = vmul.f32 0.0078125, %v12548_v44 }
0x17b4   : > { %v12594_v39 = vadd.f32 1e-05, %v12578_v37 }
0x17b5   : > { %v12556_v9 = vpop.xlane.xlu0 %12555 }
0x17b6   : > { %15823 = vrsqrt.f32 %v12594_v39  ;;  %v12582_v15 = vmul.f32 0.0078125, %v12556_v9 }
0x17b8   : > { %v12598_v56 = vadd.f32 1e-05, %v12582_v15 }
0x17b9   : > { %v12552_v29 = vpop.xlane.xlu1 %12551  ;;  %v12564_v62 = vpop.xlane.xlu0 %12563 }
0x17ba   : > { %15825 = vrsqrt.f32 %v12598_v56  ;;  %v12580_v0 = vmul.f32 0.0078125, %v12552_v29  ;;  %v12586_v21 = vmul.f32 0.0078125, %v12564_v62 }
0x17bc   : > { %v12596_v17 = vadd.f32 1e-05, %v12580_v0  ;;  %v12602_v42 = vadd.f32 1e-05, %v12586_v21 }
0x17bd   : > { %v12560_v33 = vpop.xlane.xlu1 %12559  ;;  %v12572_v53 = vpop.xlane.xlu0 %12571 }
0x17be   : > { %15827 = vrsqrt.f32 %v12596_v17  ;;  %v12584_v11 = vmul.f32 0.0078125, %v12560_v33  ;;  %v12590_v54 = vmul.f32 0.0078125, %v12572_v53 }
0x17bf   : > { %15829 = vrsqrt.f32 %v12602_v42 }
0x17c0   : > { %v15824_v34 = vpop.eup %15823  ;;  %v12600_v6 = vadd.f32 1e-05, %v12584_v11  ;;  %v12606_v3 = vadd.f32 1e-05, %v12590_v54 }
0x17c1   : > { %v12568_v58 = vpop.xlane.xlu1 %12567 }
0x17c2   : > { %15831 = vrsqrt.f32 %v12600_v6  ;;  %v12588_v7 = vmul.f32 0.0078125, %v12568_v58 }
0x17c3   : > { %15833 = vrsqrt.f32 %v12606_v3 }
0x17c4   : > { %v15826_v27 = vpop.eup %15825  ;;  %v12604_v4 = vadd.f32 1e-05, %v12588_v7 }
0x17c5   : > { %v12576_v2 = vpop.xlane.xlu1 %12575 }
0x17c6   : > { %15835 = vrsqrt.f32 %v12604_v4  ;;  %v12592_v51 = vmul.f32 0.0078125, %v12576_v2 }
0x17c8   : > { %v15828_v40 = vpop.eup %15827  ;;  %v12608_v50 = vadd.f32 1e-05, %v12592_v51 }
0x17c9   : > { %v15830_v63 = vpop.eup %15829 }
0x17ca   : > { %15837 = vrsqrt.f32 %v12608_v50 }
0x17cc   : > { %v15832_v46 = vpop.eup %15831 }
0x17cd   : > { %v15834_v49 = vpop.eup %15833 }
0x17d0   : > { %v15836_v8 = vpop.eup %15835  ;;  %v12710_v30 = vpop.xlane.xlu0 %12709 }
0x17d1   : > { %v12711_v35 = vadd.f32 1e-12, %v12710_v30 }
0x17d3   : > { %15839 = vrsqrt.f32 %v12711_v35 }
0x17d4   : > { %v15838_v25 = vpop.eup %15837 }
0x17dd   : > { %v15840_v52 = vpop.eup %15839 }
0x17de   : > { %v12713_v55 = vmul.f32 %v15840_v52, %v12707_v12 }
0x17e0   : > { %12714 = vst [vmem:[%s595_s1] sm:$0xff] %v12713_v55 }
0x17e1   : > { %16052 = shalt.err (!%p16049_p8)
}
0x17e2   : > { %s16053_s27 = scalar_lea.hbm %s21271_s25, 128  ;;  %s16057_s12 = scalar_lea.hbm %s21726_s30, 256 }
0x17e3   : > { %p16054_p10 = scmp.ne.s32.totalorder %s21271_s25, %s16053_s27  ;;  %p16058_p0 = scmp.lt.u32.totalorder %s21271_s25, %s21726_s30 }
0x17e4   : > { %p16059_p5 = scmp.lt.u32.totalorder %s16057_s12, %s16053_s27  ;;  %p16061_p6 = scmp.lt.u32.totalorder %s16053_s27, %s21271_s25 }
0x17e5   : > { %p16055_p11 = pnand %p16054_p10, %p21727_p9 }
0x17e6   : > { %p16060_p7 = por %p16059_p5, %p16058_p0 }
0x17e7   : > { %p16056_p12 = pneg %p16055_p11 }
0x17e8   : > { %p16062_p4 = por %p16061_p6, %p16060_p7 }
0x17ea   : > { %p16063_p13 = pnand %p16062_p4, %p16056_p12 }
0x17ec   : > { %16066 = shalt.err (!%p16063_p13)
}
0x17ed   : > { %14546 = dma.vmem_to_hbm [thread:$0]  (%p21727_p9), %s21273_s17, 128, %s21271_s25, %s12716_s0  }
0x17ee PF: > { %s12741_s2 = sand.u32 1, %s16105_s18   ;;  %p21728_p1 = scmp.ne.s32.totalorder %s21457_s14, 0 }
0x17ef   : > { %p21729_p3 = scmp.ge.s32.totalorder %s16117_s21, 2  ;;  %s12742_s3 = scalar_lea.sflag [#allocation5], %s12741_s2 }
0x17f1   : > { %p14572_p2 = pnand %p21729_p3, %p21728_p1 }
0x17f3   : > { %16100 = dma.done.wait (!%p14572_p2), %s12742_s3, 128  }
0x17f4   : > { %16102 = vsyncadd (!%p14572_p2), %s12742_s3, 4294967168  ;;  %p31_p8 = scmp.ge.s32.totalorder %s16399_s28, 4   ;;  %s21730_s18 = smov %s16109_s19 }
0x17f5   : > { %s21731_s19 = smov %s16113_s20  ;;  %s21732_s20 = smov %s16410_s16 }
0x17f6   : > { %s21733_s21 = smov %s16399_s28  ;;  %33 = sbr.rel (!%p31_p8) target bundleno = 20 (0x14), region = 161 }
0x17fd   :  { %12747 = vsyncpa [#allocation4], 1 }
0x17fe   :  { %12749 = vsyncpa [#allocation4 + $0x1], 1 }
0x17ff   :  { %12750 = vsyncpa [#allocation7], 1 }
0x1800   :  { %12751 = vsyncpa [#allocation10], 1 }
0x1801   :  { %12752 = vsyncpa [#allocation13], 1 }
0x1802   :  { %12753 = vsyncpa [#allocation5], 1 }
0x1803   :  { %12755 = vsyncpa [#allocation5 + $0x1], 1 }

</bundles_post_ra>
